<compile_context>
chip_gen: v5e
topology: v5e:2x2
jax: 0.10.0
libtpu: 0.0.40
codegen_flags: <defaults>
</compile_context>

<pallas_src>
import functools
import math

import jax
import jax.numpy as jnp
from jax.experimental import pallas as pl
from jax.experimental.pallas import tpu as pltpu


# ----------------------------------------------------------------------------
# Fused branch kernel: input conv (+lrelu) then `nb` ResidualBlockNoBN blocks.
# grid = (N, nb + 1):
#   k == 0     : zero scratches, run input conv (Cin0 = cf + 3 -> cf) + lrelu
#   k in 1..nb : residual block k-1:  x + conv2(relu(conv1(x)))
#   k == nb    : additionally write the final activation to HBM
# ----------------------------------------------------------------------------
def _conv3x3_taps(src_ref, w, b, H, W, cf):
    """3x3 conv over zero-haloed src_ref ((H+2, W+2, C) ref).

    w: (9, C, cf) bf16 value, b: (1, cf) f32 value.  Returns (H, W, cf) f32.
    9 small bf16 MXU taps accumulated in f32.
    """
    C = src_ref.shape[-1]
    acc = jnp.zeros((H * W, cf), jnp.float32)
    for t in range(9):
        dy, dx = divmod(t, 3)
        patch = src_ref[dy:dy + H, dx:dx + W, :].reshape(H * W, C)
        acc = acc + jnp.dot(patch.astype(jnp.bfloat16), w[t],
                            preferred_element_type=jnp.float32)
    return (acc + b).reshape(H, W, cf)


def _branch_kernel(xin_ref, w_in_ref, b_in_ref, w1_ref, b1_ref, w2_ref, b2_ref,
                   o_ref, act_ref, tmp_ref, *, H, W, cf, nb):
    k = pl.program_id(1)

    @pl.when(k == 0)
    def _():
        # Zero both scratches once per image: their 1-pixel halo then stays
        # zero forever, implementing "padding=1" for every later conv.
        act_ref[...] = jnp.zeros(act_ref.shape, act_ref.dtype)
        tmp_ref[...] = jnp.zeros(tmp_ref.shape, tmp_ref.dtype)
        y = _conv3x3_taps(xin_ref, w_in_ref[...], b_in_ref[...], H, W, cf)
        y = jnp.where(y > 0, y, 0.1 * y)                       # LeakyReLU(0.1)
        act_ref[1:H + 1, 1:W + 1, :] = y

    @pl.when(k > 0)
    def _():
        bi = k - 1                                             # residual block id
        y1 = _conv3x3_taps(act_ref, w1_ref[bi], b1_ref[bi], H, W, cf)
        tmp_ref[1:H + 1, 1:W + 1, :] = jnp.maximum(y1, 0.0)    # ReLU
        y2 = _conv3x3_taps(tmp_ref, w2_ref[bi], b2_ref[bi], H, W, cf)
        act_ref[1:H + 1, 1:W + 1, :] = act_ref[1:H + 1, 1:W + 1, :] + y2

    @pl.when(k == nb)
    def _():
        o_ref[...] = act_ref[1:H + 1, 1:W + 1, :].astype(o_ref.dtype)


def branch_resblocks(x, p):
    """ResidualBlocksWithInputConv (3x3 conv + lrelu, then nb ResidualBlockNoBN).

    x: (N, H, W, cf+3) f32 NHWC.  Returns (N, H, W, cf) bf16.
    """
    N, H, W, Cin0 = x.shape
    cf = p["in_w"].shape[-1]
    nb = p["c1w"].shape[0]

    xpad = jnp.pad(x, ((0, 0), (1, 1), (1, 1), (0, 0)))         # once per branch
    w_in = p["in_w"].reshape(9, Cin0, cf).astype(jnp.bfloat16)
    b_in = p["in_b"].reshape(1, cf).astype(jnp.float32)
    w1 = p["c1w"].reshape(nb, 9, cf, cf).astype(jnp.bfloat16)   # full stack ~35 KiB
    w2 = p["c2w"].reshape(nb, 9, cf, cf).astype(jnp.bfloat16)
    b1 = p["c1b"].reshape(nb, 1, cf).astype(jnp.float32)
    b2 = p["c2b"].reshape(nb, 1, cf).astype(jnp.float32)

    kernel = functools.partial(_branch_kernel, H=H, W=W, cf=cf, nb=nb)

    return pl.pallas_call(
        kernel,
        out_shape=jax.ShapeDtypeStruct((N, H, W, cf), jnp.bfloat16),
        grid=(N, nb + 1),
        in_specs=[
            # per-image padded input, constant over the block axis (one DMA / image)
            pl.BlockSpec((None, H + 2, W + 2, Cin0), lambda n, k: (n, 0, 0, 0)),
            # weights / biases: full arrays, VMEM-resident for the whole grid
            pl.BlockSpec((9, Cin0, cf), lambda n, k: (0, 0, 0)),
            pl.BlockSpec((1, cf), lambda n, k: (0, 0)),
            pl.BlockSpec((nb, 9, cf, cf), lambda n, k: (0, 0, 0, 0)),
            pl.BlockSpec((nb, 1, cf), lambda n, k: (0, 0, 0)),
            pl.BlockSpec((nb, 9, cf, cf), lambda n, k: (0, 0, 0, 0)),
            pl.BlockSpec((nb, 1, cf), lambda n, k: (0, 0, 0)),
        ],
        out_specs=pl.BlockSpec((None, H, W, cf), lambda n, k: (n, 0, 0, 0)),
        scratch_shapes=[pltpu.VMEM((H + 2, W + 2, cf), jnp.float32),   # activation
                        pltpu.VMEM((H + 2, W + 2, cf), jnp.float32)],  # conv1 output
        compiler_params=pltpu.CompilerParams(
            dimension_semantics=("parallel", "arbitrary"),
            vmem_limit_bytes=32 * 1024 * 1024),
    )(xpad, w_in, b_in, w1, b1, w2, b2)


# ----------------------------------------------------------------------------
# 1x1 fusion conv + LeakyReLU, row-tiled.
# ----------------------------------------------------------------------------
def _fusion_kernel(x_ref, w_ref, b_ref, o_ref):
    y = jnp.dot(x_ref[...], w_ref[...], preferred_element_type=jnp.float32)
    y = y + b_ref[...]
    o_ref[...] = jnp.where(y > 0, y, 0.1 * y).astype(o_ref.dtype)


def fusion_conv1x1_lrelu(x, w, b, row_tile=512):
    """x: (N,H,W,Cin) bf16, w: (Cin,Cout), b: (Cout,).  Returns (N,H,W,Cout) f32."""
    N, H, W, Cin = x.shape
    Cout = w.shape[-1]
    M = N * H * W
    tr = min(row_tile, M)
    m_pad = pl.cdiv(M, tr) * tr
    xf = x.reshape(M, Cin)
    if m_pad != M:
        xf = jnp.pad(xf, ((0, m_pad - M), (0, 0)))
    out = pl.pallas_call(
        _fusion_kernel,
        out_shape=jax.ShapeDtypeStruct((m_pad, Cout), jnp.float32),
        grid=(m_pad // tr,),
        in_specs=[
            pl.BlockSpec((tr, Cin), lambda i: (i, 0)),
            pl.BlockSpec((Cin, Cout), lambda i: (0, 0)),
            pl.BlockSpec((1, Cout), lambda i: (0, 0)),
        ],
        out_specs=pl.BlockSpec((tr, Cout), lambda i: (i, 0)),
        compiler_params=pltpu.CompilerParams(
            dimension_semantics=("parallel",),
            vmem_limit_bytes=32 * 1024 * 1024),
    )(xf.astype(jnp.bfloat16), w.astype(jnp.bfloat16),
      b.reshape(1, Cout).astype(jnp.float32))
    if m_pad != M:
        out = out[:M]
    return out.reshape(N, H, W, Cout)


# ----------------------------------------------------------------------------
# Plain-JAX glue: flow warp (bilinear, zeros padding, align_corners=True style
# pixel offsets) and the full FeedForward forward pass.
# ----------------------------------------------------------------------------
def flow_warp(x, flow):
    """x: (N,H,W,C) NHWC, flow: (N,H,W,2) with [...,0]=dx, [...,1]=dy."""
    N, H, W, C = x.shape
    gy, gx = jnp.meshgrid(jnp.arange(H, dtype=jnp.float32),
                          jnp.arange(W, dtype=jnp.float32), indexing="ij")
    ix = gx[None] + flow[..., 0]
    iy = gy[None] + flow[..., 1]

    x0 = jnp.floor(ix)
    y0 = jnp.floor(iy)
    x1 = x0 + 1.0
    y1 = y0 + 1.0
    wx1 = ix - x0
    wx0 = 1.0 - wx1
    wy1 = iy - y0
    wy0 = 1.0 - wy1

    flat = x.reshape(N, H * W, C)

    def gather(yc, xc):
        valid = ((xc >= 0) & (xc <= W - 1) & (yc >= 0) & (yc <= H - 1))
        xcc = jnp.clip(xc, 0, W - 1).astype(jnp.int32)
        ycc = jnp.clip(yc, 0, H - 1).astype(jnp.int32)
        idx = (ycc * W + xcc).reshape(N, H * W, 1)
        g = jnp.take_along_axis(flat, idx, axis=1).reshape(N, H, W, C)
        return g * valid[..., None].astype(x.dtype)

    out = (gather(y0, x0) * (wy0 * wx0)[..., None]
           + gather(y0, x1) * (wy0 * wx1)[..., None]
           + gather(y1, x0) * (wy1 * wx0)[..., None]
           + gather(y1, x1) * (wy1 * wx1)[..., None])
    return out


def feed_forward(x, lrs, flows, params):
    """x: (b,t,c,h,w), lrs: (b,t,3,h,w), flows: (flow0, flow1) each (b,t,2,h,w)."""
    b, t, c, h, w = x.shape
    lrs_flat = lrs.reshape(b * t, -1, h, w).transpose(0, 2, 3, 1)       # NHWC

    # backward branch: frames shifted forward (t+1), warped with flows[1]
    x1 = jnp.concatenate([x[:, 1:], x[:, -1:]], axis=1)
    x1 = x1.reshape(b * t, c, h, w).transpose(0, 2, 3, 1)
    flow1 = flows[1].reshape(b * t, 2, h, w).transpose(0, 2, 3, 1)
    x1 = flow_warp(x1, flow1)
    x1 = jnp.concatenate([lrs_flat, x1], axis=-1)                       # (bt,h,w,c+3)
    x1 = branch_resblocks(x1, params["backward"])

    # forward branch: frames shifted backward (t-1), warped with flows[0]
    x2 = jnp.concatenate([x[:, :1], x[:, :-1]], axis=1)
    x2 = x2.reshape(b * t, c, h, w).transpose(0, 2, 3, 1)
    flow0 = flows[0].reshape(b * t, 2, h, w).transpose(0, 2, 3, 1)
    x2 = flow_warp(x2, flow0)
    x2 = jnp.concatenate([lrs_flat, x2], axis=-1)
    x2 = branch_resblocks(x2, params["forward"])

    out = jnp.concatenate([x1, x2], axis=-1)                            # (bt,h,w,2c) bf16
    out = fusion_conv1x1_lrelu(out, params["fusion_w"], params["fusion_b"])
    out = out.transpose(0, 3, 1, 2).reshape(b, t, c, h, w)
    return out


# ----------------------------------------------------------------------------
# Deterministic parameter init (shapes per the PyTorch module; synthetic values)
# ----------------------------------------------------------------------------
def _init_conv(key, kh, kw, cin, cout, scale):
    kw_, kb_ = jax.random.split(key)
    fan_in = kh * kw * cin
    w = jax.random.normal(kw_, (kh, kw, cin, cout), jnp.float32) * (scale / math.sqrt(fan_in))
    b = jax.random.normal(kb_, (cout,), jnp.float32) * 0.01
    return w, b


def _init_branch(key, cin, cf, nb):
    k = jax.random.split(key, 5)
    in_w, in_b = _init_conv(k[0], 3, 3, cin, cf, 1.0)
    res_scale = 0.1 / math.sqrt(9 * cf)   # mimics default_init_weights(scale=0.1)
    c1w = jax.random.normal(k[1], (nb, 3, 3, cf, cf), jnp.float32) * res_scale
    c2w = jax.random.normal(k[2], (nb, 3, 3, cf, cf), jnp.float32) * res_scale
    c1b = jax.random.normal(k[3], (nb, cf), jnp.float32) * 0.01
    c2b = jax.random.normal(k[4], (nb, cf), jnp.float32) * 0.01
    return dict(in_w=in_w, in_b=in_b, c1w=c1w, c1b=c1b, c2w=c2w, c2b=c2b)


def init_params(key, num_feat, num_blocks=30):
    k = jax.random.split(key, 3)
    fw, fb = _init_conv(k[2], 1, 1, 2 * num_feat, num_feat, 1.0)
    return dict(
        backward=_init_branch(k[0], num_feat + 3, num_feat, num_blocks),
        forward=_init_branch(k[1], num_feat + 3, num_feat, num_blocks),
        fusion_w=fw.reshape(2 * num_feat, num_feat),
        fusion_b=fb,
    )


# ----------------------------------------------------------------------------
if __name__ == "__main__":
    b, t, num_feat, h, w = 2, 3, 8, 16, 16
    c = num_feat

    key = jax.random.PRNGKey(0)
    ks = jax.random.split(key, 5)
    x = jax.random.normal(ks[0], (b, t, c, h, w), jnp.float32)
    lrs = jax.random.normal(ks[1], (b, t, 3, h, w), jnp.float32)
    flow0 = jax.random.normal(ks[2], (b, t, 2, h, w), jnp.float32) * 2.0
    flow1 = jax.random.normal(ks[3], (b, t, 2, h, w), jnp.float32) * 2.0
    params = init_params(ks[4], num_feat, num_blocks=30)

    out = jax.jit(feed_forward)(x, lrs, (flow0, flow1), params)
    out = jax.block_until_ready(out)

    assert out.shape == x.shape, (out.shape, x.shape)
    assert out.dtype == jnp.float32
    assert bool(jnp.all(jnp.isfinite(out)))
    print("KERNEL_OK")
</pallas_src>

<mosaic_0001>
module attributes {stable_mosaic.version = 11 : i64} {
  func.func @_branch_kernel(%arg0: i32, %arg1: i32, %arg2: memref<1x18x18x11xf32, #tpu.memory_space<vmem>>, %arg3: memref<9x11x8xbf16, #tpu.memory_space<vmem>>, %arg4: memref<1x8xf32, #tpu.memory_space<vmem>>, %arg5: memref<30x9x8x8xbf16, #tpu.memory_space<vmem>>, %arg6: memref<30x1x8xf32, #tpu.memory_space<vmem>>, %arg7: memref<30x9x8x8xbf16, #tpu.memory_space<vmem>>, %arg8: memref<30x1x8xf32, #tpu.memory_space<vmem>>, %arg9: memref<1x16x16x8xbf16, #tpu.memory_space<vmem>>, %arg10: memref<18x18x8xf32, #tpu.memory_space<vmem>>, %arg11: memref<18x18x8xf32, #tpu.memory_space<vmem>>) attributes {dimension_semantics = [#tpu.dimension_semantics<parallel>, #tpu.dimension_semantics<arbitrary>], iteration_bounds = array<i64: 6, 31>, scalar_prefetch = 0 : i64, scratch_operands = 2 : i64, tpu.core_type = #tpu.core_type<tc>, window_params = [{transform_indices = @transform_0, window_bounds = array<i64: 1, 18, 18, 11>}, {pipeline_mode = #tpu.pipeline_mode<synchronous>, transform_indices = @transform_1, window_bounds = array<i64: 9, 11, 8>}, {pipeline_mode = #tpu.pipeline_mode<synchronous>, transform_indices = @transform_2, window_bounds = array<i64: 1, 8>}, {pipeline_mode = #tpu.pipeline_mode<synchronous>, transform_indices = @transform_3, window_bounds = array<i64: 30, 9, 8, 8>}, {pipeline_mode = #tpu.pipeline_mode<synchronous>, transform_indices = @transform_4, window_bounds = array<i64: 30, 1, 8>}, {pipeline_mode = #tpu.pipeline_mode<synchronous>, transform_indices = @transform_5, window_bounds = array<i64: 30, 9, 8, 8>}, {pipeline_mode = #tpu.pipeline_mode<synchronous>, transform_indices = @transform_6, window_bounds = array<i64: 30, 1, 8>}, {transform_indices = @transform_7, window_bounds = array<i64: 1, 16, 16, 8>}]} {
    %c0_i32 = arith.constant 0 : i32
    %0 = arith.cmpi eq, %arg1, %c0_i32 : i32
    %1 = arith.extui %0 : i1 to i32
    %c0_i32_0 = arith.constant 0 : i32
    %2 = arith.cmpi ne, %1, %c0_i32_0 : i32
    scf.if %2 {
      %cst = arith.constant 0.000000e+00 : f32
      %9 = vector.broadcast %cst : f32 to vector<18x18x8xf32>
      %c0 = arith.constant 0 : index
      %c0_4 = arith.constant 0 : index
      %c0_5 = arith.constant 0 : index
      %10 = vector.load %arg10[%c0, %c0_4, %c0_5] : memref<18x18x8xf32, #tpu.memory_space<vmem>>, vector<18x18x8xf32>
      tpu.vector_store %arg10[%c0, %c0_4, %c0_5], %9 {strides = array<i32>} : memref<18x18x8xf32, #tpu.memory_space<vmem>>, vector<18x18x8xf32>,
      %cst_6 = arith.constant 0.000000e+00 : f32
      %11 = vector.broadcast %cst_6 : f32 to vector<18x18x8xf32>
      %c0_7 = arith.constant 0 : index
      %c0_8 = arith.constant 0 : index
      %c0_9 = arith.constant 0 : index
      %12 = vector.load %arg11[%c0_7, %c0_8, %c0_9] : memref<18x18x8xf32, #tpu.memory_space<vmem>>, vector<18x18x8xf32>
      tpu.vector_store %arg11[%c0_7, %c0_8, %c0_9], %11 {strides = array<i32>} : memref<18x18x8xf32, #tpu.memory_space<vmem>>, vector<18x18x8xf32>,
      %c0_10 = arith.constant 0 : index
      %c0_11 = arith.constant 0 : index
      %c0_12 = arith.constant 0 : index
      %13 = vector.load %arg3[%c0_10, %c0_11, %c0_12] : memref<9x11x8xbf16, #tpu.memory_space<vmem>>, vector<9x11x8xbf16>
      %c0_13 = arith.constant 0 : index
      %c0_14 = arith.constant 0 : index
      %14 = vector.load %arg4[%c0_13, %c0_14] : memref<1x8xf32, #tpu.memory_space<vmem>>, vector<1x8xf32>
      %cst_15 = arith.constant 0.000000e+00 : f32
      %15 = vector.broadcast %cst_15 : f32 to vector<256x8xf32>
      %c0_16 = arith.constant 0 : index
      %c0_17 = arith.constant 0 : index
      %c0_18 = arith.constant 0 : index
      %c0_19 = arith.constant 0 : index
      %16 = vector.load %arg2[%c0_16, %c0_17, %c0_18, %c0_19] : memref<1x18x18x11xf32, #tpu.memory_space<vmem>>, vector<1x16x16x11xf32>
      %17 = vector.shape_cast %16 : vector<1x16x16x11xf32> to vector<16x16x11xf32>
      %18 = vector.shape_cast %17 : vector<16x16x11xf32> to vector<256x11xf32>
      %19 = arith.truncf %18 : vector<256x11xf32> to vector<256x11xbf16>
      %20 = vector.extract_strided_slice %13 {offsets = [0, 0, 0], sizes = [1, 11, 8], strides = [1, 1, 1]} : vector<9x11x8xbf16> to vector<1x11x8xbf16>
      %21 = vector.shape_cast %20 : vector<1x11x8xbf16> to vector<11x8xbf16>
      %cst_20 = arith.constant dense<0.000000e+00> : vector<256x8xf32>
      %22 = tpu.matmul %19, %21, %cst_20 {dimension_numbers = #tpu.dot_dimension_numbers<[1], [0], [0], [1], [0, 0, 1, 1], [], []>} : vector<256x11xbf16>, vector<11x8xbf16>, vector<256x8xf32> -> vector<256x8xf32>
      %23 = arith.addf %15, %22 : vector<256x8xf32>
      %c0_21 = arith.constant 0 : index
      %c0_22 = arith.constant 0 : index
      %c1 = arith.constant 1 : index
      %c0_23 = arith.constant 0 : index
      %24 = vector.load %arg2[%c0_21, %c0_22, %c1, %c0_23] : memref<1x18x18x11xf32, #tpu.memory_space<vmem>>, vector<1x16x16x11xf32>
      %25 = vector.shape_cast %24 : vector<1x16x16x11xf32> to vector<16x16x11xf32>
      %26 = vector.shape_cast %25 : vector<16x16x11xf32> to vector<256x11xf32>
      %27 = arith.truncf %26 : vector<256x11xf32> to vector<256x11xbf16>
      %28 = vector.extract_strided_slice %13 {offsets = [1, 0, 0], sizes = [1, 11, 8], strides = [1, 1, 1]} : vector<9x11x8xbf16> to vector<1x11x8xbf16>
      %29 = vector.shape_cast %28 : vector<1x11x8xbf16> to vector<11x8xbf16>
      %cst_24 = arith.constant dense<0.000000e+00> : vector<256x8xf32>
      %30 = tpu.matmul %27, %29, %cst_24 {dimension_numbers = #tpu.dot_dimension_numbers<[1], [0], [0], [1], [0, 0, 1, 1], [], []>} : vector<256x11xbf16>, vector<11x8xbf16>, vector<256x8xf32> -> vector<256x8xf32>
      %31 = arith.addf %23, %30 : vector<256x8xf32>
      %c0_25 = arith.constant 0 : index
      %c0_26 = arith.constant 0 : index
      %c2 = arith.constant 2 : index
      %c0_27 = arith.constant 0 : index
      %32 = vector.load %arg2[%c0_25, %c0_26, %c2, %c0_27] : memref<1x18x18x11xf32, #tpu.memory_space<vmem>>, vector<1x16x16x11xf32>
      %33 = vector.shape_cast %32 : vector<1x16x16x11xf32> to vector<16x16x11xf32>
      %34 = vector.shape_cast %33 : vector<16x16x11xf32> to vector<256x11xf32>
      %35 = arith.truncf %34 : vector<256x11xf32> to vector<256x11xbf16>
      %36 = vector.extract_strided_slice %13 {offsets = [2, 0, 0], sizes = [1, 11, 8], strides = [1, 1, 1]} : vector<9x11x8xbf16> to vector<1x11x8xbf16>
      %37 = vector.shape_cast %36 : vector<1x11x8xbf16> to vector<11x8xbf16>
      %cst_28 = arith.constant dense<0.000000e+00> : vector<256x8xf32>
      %38 = tpu.matmul %35, %37, %cst_28 {dimension_numbers = #tpu.dot_dimension_numbers<[1], [0], [0], [1], [0, 0, 1, 1], [], []>} : vector<256x11xbf16>, vector<11x8xbf16>, vector<256x8xf32> -> vector<256x8xf32>
      %39 = arith.addf %31, %38 : vector<256x8xf32>
      %c0_29 = arith.constant 0 : index
      %c1_30 = arith.constant 1 : index
      %c0_31 = arith.constant 0 : index
      %c0_32 = arith.constant 0 : index
      %40 = vector.load %arg2[%c0_29, %c1_30, %c0_31, %c0_32] : memref<1x18x18x11xf32, #tpu.memory_space<vmem>>, vector<1x16x16x11xf32>
      %41 = vector.shape_cast %40 : vector<1x16x16x11xf32> to vector<16x16x11xf32>
      %42 = vector.shape_cast %41 : vector<16x16x11xf32> to vector<256x11xf32>
      %43 = arith.truncf %42 : vector<256x11xf32> to vector<256x11xbf16>
      %44 = vector.extract_strided_slice %13 {offsets = [3, 0, 0], sizes = [1, 11, 8], strides = [1, 1, 1]} : vector<9x11x8xbf16> to vector<1x11x8xbf16>
      %45 = vector.shape_cast %44 : vector<1x11x8xbf16> to vector<11x8xbf16>
      %cst_33 = arith.constant dense<0.000000e+00> : vector<256x8xf32>
      %46 = tpu.matmul %43, %45, %cst_33 {dimension_numbers = #tpu.dot_dimension_numbers<[1], [0], [0], [1], [0, 0, 1, 1], [], []>} : vector<256x11xbf16>, vector<11x8xbf16>, vector<256x8xf32> -> vector<256x8xf32>
      %47 = arith.addf %39, %46 : vector<256x8xf32>
      %c0_34 = arith.constant 0 : index
      %c1_35 = arith.constant 1 : index
      %c1_36 = arith.constant 1 : index
      %c0_37 = arith.constant 0 : index
      %48 = vector.load %arg2[%c0_34, %c1_35, %c1_36, %c0_37] : memref<1x18x18x11xf32, #tpu.memory_space<vmem>>, vector<1x16x16x11xf32>
      %49 = vector.shape_cast %48 : vector<1x16x16x11xf32> to vector<16x16x11xf32>
      %50 = vector.shape_cast %49 : vector<16x16x11xf32> to vector<256x11xf32>
      %51 = arith.truncf %50 : vector<256x11xf32> to vector<256x11xbf16>
      %52 = vector.extract_strided_slice %13 {offsets = [4, 0, 0], sizes = [1, 11, 8], strides = [1, 1, 1]} : vector<9x11x8xbf16> to vector<1x11x8xbf16>
      %53 = vector.shape_cast %52 : vector<1x11x8xbf16> to vector<11x8xbf16>
      %cst_38 = arith.constant dense<0.000000e+00> : vector<256x8xf32>
      %54 = tpu.matmul %51, %53, %cst_38 {dimension_numbers = #tpu.dot_dimension_numbers<[1], [0], [0], [1], [0, 0, 1, 1], [], []>} : vector<256x11xbf16>, vector<11x8xbf16>, vector<256x8xf32> -> vector<256x8xf32>
      %55 = arith.addf %47, %54 : vector<256x8xf32>
      %c0_39 = arith.constant 0 : index
      %c1_40 = arith.constant 1 : index
      %c2_41 = arith.constant 2 : index
      %c0_42 = arith.constant 0 : index
      %56 = vector.load %arg2[%c0_39, %c1_40, %c2_41, %c0_42] : memref<1x18x18x11xf32, #tpu.memory_space<vmem>>, vector<1x16x16x11xf32>
      %57 = vector.shape_cast %56 : vector<1x16x16x11xf32> to vector<16x16x11xf32>
      %58 = vector.shape_cast %57 : vector<16x16x11xf32> to vector<256x11xf32>
      %59 = arith.truncf %58 : vector<256x11xf32> to vector<256x11xbf16>
      %60 = vector.extract_strided_slice %13 {offsets = [5, 0, 0], sizes = [1, 11, 8], strides = [1, 1, 1]} : vector<9x11x8xbf16> to vector<1x11x8xbf16>
      %61 = vector.shape_cast %60 : vector<1x11x8xbf16> to vector<11x8xbf16>
      %cst_43 = arith.constant dense<0.000000e+00> : vector<256x8xf32>
      %62 = tpu.matmul %59, %61, %cst_43 {dimension_numbers = #tpu.dot_dimension_numbers<[1], [0], [0], [1], [0, 0, 1, 1], [], []>} : vector<256x11xbf16>, vector<11x8xbf16>, vector<256x8xf32> -> vector<256x8xf32>
      %63 = arith.addf %55, %62 : vector<256x8xf32>
      %c0_44 = arith.constant 0 : index
      %c2_45 = arith.constant 2 : index
      %c0_46 = arith.constant 0 : index
      %c0_47 = arith.constant 0 : index
      %64 = vector.load %arg2[%c0_44, %c2_45, %c0_46, %c0_47] : memref<1x18x18x11xf32, #tpu.memory_space<vmem>>, vector<1x16x16x11xf32>
      %65 = vector.shape_cast %64 : vector<1x16x16x11xf32> to vector<16x16x11xf32>
      %66 = vector.shape_cast %65 : vector<16x16x11xf32> to vector<256x11xf32>
      %67 = arith.truncf %66 : vector<256x11xf32> to vector<256x11xbf16>
      %68 = vector.extract_strided_slice %13 {offsets = [6, 0, 0], sizes = [1, 11, 8], strides = [1, 1, 1]} : vector<9x11x8xbf16> to vector<1x11x8xbf16>
      %69 = vector.shape_cast %68 : vector<1x11x8xbf16> to vector<11x8xbf16>
      %cst_48 = arith.constant dense<0.000000e+00> : vector<256x8xf32>
      %70 = tpu.matmul %67, %69, %cst_48 {dimension_numbers = #tpu.dot_dimension_numbers<[1], [0], [0], [1], [0, 0, 1, 1], [], []>} : vector<256x11xbf16>, vector<11x8xbf16>, vector<256x8xf32> -> vector<256x8xf32>
      %71 = arith.addf %63, %70 : vector<256x8xf32>
      %c0_49 = arith.constant 0 : index
      %c2_50 = arith.constant 2 : index
      %c1_51 = arith.constant 1 : index
      %c0_52 = arith.constant 0 : index
      %72 = vector.load %arg2[%c0_49, %c2_50, %c1_51, %c0_52] : memref<1x18x18x11xf32, #tpu.memory_space<vmem>>, vector<1x16x16x11xf32>
      %73 = vector.shape_cast %72 : vector<1x16x16x11xf32> to vector<16x16x11xf32>
      %74 = vector.shape_cast %73 : vector<16x16x11xf32> to vector<256x11xf32>
      %75 = arith.truncf %74 : vector<256x11xf32> to vector<256x11xbf16>
      %76 = vector.extract_strided_slice %13 {offsets = [7, 0, 0], sizes = [1, 11, 8], strides = [1, 1, 1]} : vector<9x11x8xbf16> to vector<1x11x8xbf16>
      %77 = vector.shape_cast %76 : vector<1x11x8xbf16> to vector<11x8xbf16>
      %cst_53 = arith.constant dense<0.000000e+00> : vector<256x8xf32>
      %78 = tpu.matmul %75, %77, %cst_53 {dimension_numbers = #tpu.dot_dimension_numbers<[1], [0], [0], [1], [0, 0, 1, 1], [], []>} : vector<256x11xbf16>, vector<11x8xbf16>, vector<256x8xf32> -> vector<256x8xf32>
      %79 = arith.addf %71, %78 : vector<256x8xf32>
      %c0_54 = arith.constant 0 : index
      %c2_55 = arith.constant 2 : index
      %c2_56 = arith.constant 2 : index
      %c0_57 = arith.constant 0 : index
      %80 = vector.load %arg2[%c0_54, %c2_55, %c2_56, %c0_57] : memref<1x18x18x11xf32, #tpu.memory_space<vmem>>, vector<1x16x16x11xf32>
      %81 = vector.shape_cast %80 : vector<1x16x16x11xf32> to vector<16x16x11xf32>
      %82 = vector.shape_cast %81 : vector<16x16x11xf32> to vector<256x11xf32>
      %83 = arith.truncf %82 : vector<256x11xf32> to vector<256x11xbf16>
      %84 = vector.extract_strided_slice %13 {offsets = [8, 0, 0], sizes = [1, 11, 8], strides = [1, 1, 1]} : vector<9x11x8xbf16> to vector<1x11x8xbf16>
      %85 = vector.shape_cast %84 : vector<1x11x8xbf16> to vector<11x8xbf16>
      %cst_58 = arith.constant dense<0.000000e+00> : vector<256x8xf32>
      %86 = tpu.matmul %83, %85, %cst_58 {dimension_numbers = #tpu.dot_dimension_numbers<[1], [0], [0], [1], [0, 0, 1, 1], [], []>} : vector<256x11xbf16>, vector<11x8xbf16>, vector<256x8xf32> -> vector<256x8xf32>
      %87 = arith.addf %79, %86 : vector<256x8xf32>
      %88 = vector.broadcast %14 : vector<1x8xf32> to vector<256x8xf32>
      %89 = arith.addf %87, %88 : vector<256x8xf32>
      %90 = vector.shape_cast %89 : vector<256x8xf32> to vector<16x16x8xf32>
      %cst_59 = arith.constant 0.000000e+00 : f32
      %91 = vector.broadcast %cst_59 : f32 to vector<16x16x8xf32>
      %92 = arith.cmpf ogt, %90, %91 : vector<16x16x8xf32>
      %cst_60 = arith.constant 1.000000e-01 : f32
      %93 = vector.broadcast %cst_60 : f32 to vector<16x16x8xf32>
      %94 = arith.mulf %93, %90 : vector<16x16x8xf32>
      %95 = arith.select %92, %90, %94 : vector<16x16x8xi1>, vector<16x16x8xf32>
      %c1_61 = arith.constant 1 : index
      %c1_62 = arith.constant 1 : index
      %c0_63 = arith.constant 0 : index
      %96 = vector.load %arg10[%c1_61, %c1_62, %c0_63] : memref<18x18x8xf32, #tpu.memory_space<vmem>>, vector<16x16x8xf32>
      tpu.vector_store %arg10[%c1_61, %c1_62, %c0_63], %95 {strides = array<i32>} : memref<18x18x8xf32, #tpu.memory_space<vmem>>, vector<16x16x8xf32>,
    } else {
    }
    %c0_i32_1 = arith.constant 0 : i32
    %3 = arith.cmpi sgt, %arg1, %c0_i32_1 : i32
    %4 = arith.extui %3 : i1 to i32
    %c0_i32_2 = arith.constant 0 : i32
    %5 = arith.cmpi ne, %4, %c0_i32_2 : i32
    scf.if %5 {
      %c1_i32 = arith.constant 1 : i32
      %9 = arith.subi %arg1, %c1_i32 : i32
      %10 = arith.index_cast %9 : i32 to index
      %c0 = arith.constant 0 : index
      %c0_4 = arith.constant 0 : index
      %c0_5 = arith.constant 0 : index
      %11 = vector.load %arg5[%10, %c0, %c0_4, %c0_5] : memref<30x9x8x8xbf16, #tpu.memory_space<vmem>>, vector<1x9x8x8xbf16>
      %12 = vector.shape_cast %11 : vector<1x9x8x8xbf16> to vector<9x8x8xbf16>
      %13 = arith.index_cast %9 : i32 to index
      %c0_6 = arith.constant 0 : index
      %c0_7 = arith.constant 0 : index
      %14 = vector.load %arg6[%13, %c0_6, %c0_7] : memref<30x1x8xf32, #tpu.memory_space<vmem>>, vector<1x1x8xf32>
      %15 = vector.shape_cast %14 : vector<1x1x8xf32> to vector<1x8xf32>
      %cst = arith.constant 0.000000e+00 : f32
      %16 = vector.broadcast %cst : f32 to vector<256x8xf32>
      %c0_8 = arith.constant 0 : index
      %c0_9 = arith.constant 0 : index
      %c0_10 = arith.constant 0 : index
      %17 = vector.load %arg10[%c0_8, %c0_9, %c0_10] : memref<18x18x8xf32, #tpu.memory_space<vmem>>, vector<16x16x8xf32>
      %18 = vector.shape_cast %17 : vector<16x16x8xf32> to vector<256x8xf32>
      %19 = arith.truncf %18 : vector<256x8xf32> to vector<256x8xbf16>
      %20 = vector.extract_strided_slice %12 {offsets = [0, 0, 0], sizes = [1, 8, 8], strides = [1, 1, 1]} : vector<9x8x8xbf16> to vector<1x8x8xbf16>
      %21 = vector.shape_cast %20 : vector<1x8x8xbf16> to vector<8x8xbf16>
      %cst_11 = arith.constant dense<0.000000e+00> : vector<256x8xf32>
      %22 = tpu.matmul %19, %21, %cst_11 {dimension_numbers = #tpu.dot_dimension_numbers<[1], [0], [0], [1], [0, 0, 1, 1], [], []>} : vector<256x8xbf16>, vector<8x8xbf16>, vector<256x8xf32> -> vector<256x8xf32>
      %23 = arith.addf %16, %22 : vector<256x8xf32>
      %c0_12 = arith.constant 0 : index
      %c1 = arith.constant 1 : index
      %c0_13 = arith.constant 0 : index
      %24 = vector.load %arg10[%c0_12, %c1, %c0_13] : memref<18x18x8xf32, #tpu.memory_space<vmem>>, vector<16x16x8xf32>
      %25 = vector.shape_cast %24 : vector<16x16x8xf32> to vector<256x8xf32>
      %26 = arith.truncf %25 : vector<256x8xf32> to vector<256x8xbf16>
      %27 = vector.extract_strided_slice %12 {offsets = [1, 0, 0], sizes = [1, 8, 8], strides = [1, 1, 1]} : vector<9x8x8xbf16> to vector<1x8x8xbf16>
      %28 = vector.shape_cast %27 : vector<1x8x8xbf16> to vector<8x8xbf16>
      %cst_14 = arith.constant dense<0.000000e+00> : vector<256x8xf32>
      %29 = tpu.matmul %26, %28, %cst_14 {dimension_numbers = #tpu.dot_dimension_numbers<[1], [0], [0], [1], [0, 0, 1, 1], [], []>} : vector<256x8xbf16>, vector<8x8xbf16>, vector<256x8xf32> -> vector<256x8xf32>
      %30 = arith.addf %23, %29 : vector<256x8xf32>
      %c0_15 = arith.constant 0 : index
      %c2 = arith.constant 2 : index
      %c0_16 = arith.constant 0 : index
      %31 = vector.load %arg10[%c0_15, %c2, %c0_16] : memref<18x18x8xf32, #tpu.memory_space<vmem>>, vector<16x16x8xf32>
      %32 = vector.shape_cast %31 : vector<16x16x8xf32> to vector<256x8xf32>
      %33 = arith.truncf %32 : vector<256x8xf32> to vector<256x8xbf16>
      %34 = vector.extract_strided_slice %12 {offsets = [2, 0, 0], sizes = [1, 8, 8], strides = [1, 1, 1]} : vector<9x8x8xbf16> to vector<1x8x8xbf16>
      %35 = vector.shape_cast %34 : vector<1x8x8xbf16> to vector<8x8xbf16>
      %cst_17 = arith.constant dense<0.000000e+00> : vector<256x8xf32>
      %36 = tpu.matmul %33, %35, %cst_17 {dimension_numbers = #tpu.dot_dimension_numbers<[1], [0], [0], [1], [0, 0, 1, 1], [], []>} : vector<256x8xbf16>, vector<8x8xbf16>, vector<256x8xf32> -> vector<256x8xf32>
      %37 = arith.addf %30, %36 : vector<256x8xf32>
      %c1_18 = arith.constant 1 : index
      %c0_19 = arith.constant 0 : index
      %c0_20 = arith.constant 0 : index
      %38 = vector.load %arg10[%c1_18, %c0_19, %c0_20] : memref<18x18x8xf32, #tpu.memory_space<vmem>>, vector<16x16x8xf32>
      %39 = vector.shape_cast %38 : vector<16x16x8xf32> to vector<256x8xf32>
      %40 = arith.truncf %39 : vector<256x8xf32> to vector<256x8xbf16>
      %41 = vector.extract_strided_slice %12 {offsets = [3, 0, 0], sizes = [1, 8, 8], strides = [1, 1, 1]} : vector<9x8x8xbf16> to vector<1x8x8xbf16>
      %42 = vector.shape_cast %41 : vector<1x8x8xbf16> to vector<8x8xbf16>
      %cst_21 = arith.constant dense<0.000000e+00> : vector<256x8xf32>
      %43 = tpu.matmul %40, %42, %cst_21 {dimension_numbers = #tpu.dot_dimension_numbers<[1], [0], [0], [1], [0, 0, 1, 1], [], []>} : vector<256x8xbf16>, vector<8x8xbf16>, vector<256x8xf32> -> vector<256x8xf32>
      %44 = arith.addf %37, %43 : vector<256x8xf32>
      %c1_22 = arith.constant 1 : index
      %c1_23 = arith.constant 1 : index
      %c0_24 = arith.constant 0 : index
      %45 = vector.load %arg10[%c1_22, %c1_23, %c0_24] : memref<18x18x8xf32, #tpu.memory_space<vmem>>, vector<16x16x8xf32>
      %46 = vector.shape_cast %45 : vector<16x16x8xf32> to vector<256x8xf32>
      %47 = arith.truncf %46 : vector<256x8xf32> to vector<256x8xbf16>
      %48 = vector.extract_strided_slice %12 {offsets = [4, 0, 0], sizes = [1, 8, 8], strides = [1, 1, 1]} : vector<9x8x8xbf16> to vector<1x8x8xbf16>
      %49 = vector.shape_cast %48 : vector<1x8x8xbf16> to vector<8x8xbf16>
      %cst_25 = arith.constant dense<0.000000e+00> : vector<256x8xf32>
      %50 = tpu.matmul %47, %49, %cst_25 {dimension_numbers = #tpu.dot_dimension_numbers<[1], [0], [0], [1], [0, 0, 1, 1], [], []>} : vector<256x8xbf16>, vector<8x8xbf16>, vector<256x8xf32> -> vector<256x8xf32>
      %51 = arith.addf %44, %50 : vector<256x8xf32>
      %c1_26 = arith.constant 1 : index
      %c2_27 = arith.constant 2 : index
      %c0_28 = arith.constant 0 : index
      %52 = vector.load %arg10[%c1_26, %c2_27, %c0_28] : memref<18x18x8xf32, #tpu.memory_space<vmem>>, vector<16x16x8xf32>
      %53 = vector.shape_cast %52 : vector<16x16x8xf32> to vector<256x8xf32>
      %54 = arith.truncf %53 : vector<256x8xf32> to vector<256x8xbf16>
      %55 = vector.extract_strided_slice %12 {offsets = [5, 0, 0], sizes = [1, 8, 8], strides = [1, 1, 1]} : vector<9x8x8xbf16> to vector<1x8x8xbf16>
      %56 = vector.shape_cast %55 : vector<1x8x8xbf16> to vector<8x8xbf16>
      %cst_29 = arith.constant dense<0.000000e+00> : vector<256x8xf32>
      %57 = tpu.matmul %54, %56, %cst_29 {dimension_numbers = #tpu.dot_dimension_numbers<[1], [0], [0], [1], [0, 0, 1, 1], [], []>} : vector<256x8xbf16>, vector<8x8xbf16>, vector<256x8xf32> -> vector<256x8xf32>
      %58 = arith.addf %51, %57 : vector<256x8xf32>
      %c2_30 = arith.constant 2 : index
      %c0_31 = arith.constant 0 : index
      %c0_32 = arith.constant 0 : index
      %59 = vector.load %arg10[%c2_30, %c0_31, %c0_32] : memref<18x18x8xf32, #tpu.memory_space<vmem>>, vector<16x16x8xf32>
      %60 = vector.shape_cast %59 : vector<16x16x8xf32> to vector<256x8xf32>
      %61 = arith.truncf %60 : vector<256x8xf32> to vector<256x8xbf16>
      %62 = vector.extract_strided_slice %12 {offsets = [6, 0, 0], sizes = [1, 8, 8], strides = [1, 1, 1]} : vector<9x8x8xbf16> to vector<1x8x8xbf16>
      %63 = vector.shape_cast %62 : vector<1x8x8xbf16> to vector<8x8xbf16>
      %cst_33 = arith.constant dense<0.000000e+00> : vector<256x8xf32>
      %64 = tpu.matmul %61, %63, %cst_33 {dimension_numbers = #tpu.dot_dimension_numbers<[1], [0], [0], [1], [0, 0, 1, 1], [], []>} : vector<256x8xbf16>, vector<8x8xbf16>, vector<256x8xf32> -> vector<256x8xf32>
      %65 = arith.addf %58, %64 : vector<256x8xf32>
      %c2_34 = arith.constant 2 : index
      %c1_35 = arith.constant 1 : index
      %c0_36 = arith.constant 0 : index
      %66 = vector.load %arg10[%c2_34, %c1_35, %c0_36] : memref<18x18x8xf32, #tpu.memory_space<vmem>>, vector<16x16x8xf32>
      %67 = vector.shape_cast %66 : vector<16x16x8xf32> to vector<256x8xf32>
      %68 = arith.truncf %67 : vector<256x8xf32> to vector<256x8xbf16>
      %69 = vector.extract_strided_slice %12 {offsets = [7, 0, 0], sizes = [1, 8, 8], strides = [1, 1, 1]} : vector<9x8x8xbf16> to vector<1x8x8xbf16>
      %70 = vector.shape_cast %69 : vector<1x8x8xbf16> to vector<8x8xbf16>
      %cst_37 = arith.constant dense<0.000000e+00> : vector<256x8xf32>
      %71 = tpu.matmul %68, %70, %cst_37 {dimension_numbers = #tpu.dot_dimension_numbers<[1], [0], [0], [1], [0, 0, 1, 1], [], []>} : vector<256x8xbf16>, vector<8x8xbf16>, vector<256x8xf32> -> vector<256x8xf32>
      %72 = arith.addf %65, %71 : vector<256x8xf32>
      %c2_38 = arith.constant 2 : index
      %c2_39 = arith.constant 2 : index
      %c0_40 = arith.constant 0 : index
      %73 = vector.load %arg10[%c2_38, %c2_39, %c0_40] : memref<18x18x8xf32, #tpu.memory_space<vmem>>, vector<16x16x8xf32>
      %74 = vector.shape_cast %73 : vector<16x16x8xf32> to vector<256x8xf32>
      %75 = arith.truncf %74 : vector<256x8xf32> to vector<256x8xbf16>
      %76 = vector.extract_strided_slice %12 {offsets = [8, 0, 0], sizes = [1, 8, 8], strides = [1, 1, 1]} : vector<9x8x8xbf16> to vector<1x8x8xbf16>
      %77 = vector.shape_cast %76 : vector<1x8x8xbf16> to vector<8x8xbf16>
      %cst_41 = arith.constant dense<0.000000e+00> : vector<256x8xf32>
      %78 = tpu.matmul %75, %77, %cst_41 {dimension_numbers = #tpu.dot_dimension_numbers<[1], [0], [0], [1], [0, 0, 1, 1], [], []>} : vector<256x8xbf16>, vector<8x8xbf16>, vector<256x8xf32> -> vector<256x8xf32>
      %79 = arith.addf %72, %78 : vector<256x8xf32>
      %80 = vector.broadcast %15 : vector<1x8xf32> to vector<256x8xf32>
      %81 = arith.addf %79, %80 : vector<256x8xf32>
      %82 = vector.shape_cast %81 : vector<256x8xf32> to vector<16x16x8xf32>
      %cst_42 = arith.constant 0.000000e+00 : f32
      %83 = vector.broadcast %cst_42 : f32 to vector<16x16x8xf32>
      %84 = arith.maximumf %82, %83 : vector<16x16x8xf32>
      %c1_43 = arith.constant 1 : index
      %c1_44 = arith.constant 1 : index
      %c0_45 = arith.constant 0 : index
      %85 = vector.load %arg11[%c1_43, %c1_44, %c0_45] : memref<18x18x8xf32, #tpu.memory_space<vmem>>, vector<16x16x8xf32>
      tpu.vector_store %arg11[%c1_43, %c1_44, %c0_45], %84 {strides = array<i32>} : memref<18x18x8xf32, #tpu.memory_space<vmem>>, vector<16x16x8xf32>,
      %86 = arith.index_cast %9 : i32 to index
      %c0_46 = arith.constant 0 : index
      %c0_47 = arith.constant 0 : index
      %c0_48 = arith.constant 0 : index
      %87 = vector.load %arg7[%86, %c0_46, %c0_47, %c0_48] : memref<30x9x8x8xbf16, #tpu.memory_space<vmem>>, vector<1x9x8x8xbf16>
      %88 = vector.shape_cast %87 : vector<1x9x8x8xbf16> to vector<9x8x8xbf16>
      %89 = arith.index_cast %9 : i32 to index
      %c0_49 = arith.constant 0 : index
      %c0_50 = arith.constant 0 : index
      %90 = vector.load %arg8[%89, %c0_49, %c0_50] : memref<30x1x8xf32, #tpu.memory_space<vmem>>, vector<1x1x8xf32>
      %91 = vector.shape_cast %90 : vector<1x1x8xf32> to vector<1x8xf32>
      %cst_51 = arith.constant 0.000000e+00 : f32
      %92 = vector.broadcast %cst_51 : f32 to vector<256x8xf32>
      %c0_52 = arith.constant 0 : index
      %c0_53 = arith.constant 0 : index
      %c0_54 = arith.constant 0 : index
      %93 = vector.load %arg11[%c0_52, %c0_53, %c0_54] : memref<18x18x8xf32, #tpu.memory_space<vmem>>, vector<16x16x8xf32>
      %94 = vector.shape_cast %93 : vector<16x16x8xf32> to vector<256x8xf32>
      %95 = arith.truncf %94 : vector<256x8xf32> to vector<256x8xbf16>
      %96 = vector.extract_strided_slice %88 {offsets = [0, 0, 0], sizes = [1, 8, 8], strides = [1, 1, 1]} : vector<9x8x8xbf16> to vector<1x8x8xbf16>
      %97 = vector.shape_cast %96 : vector<1x8x8xbf16> to vector<8x8xbf16>
      %cst_55 = arith.constant dense<0.000000e+00> : vector<256x8xf32>
      %98 = tpu.matmul %95, %97, %cst_55 {dimension_numbers = #tpu.dot_dimension_numbers<[1], [0], [0], [1], [0, 0, 1, 1], [], []>} : vector<256x8xbf16>, vector<8x8xbf16>, vector<256x8xf32> -> vector<256x8xf32>
      %99 = arith.addf %92, %98 : vector<256x8xf32>
      %c0_56 = arith.constant 0 : index
      %c1_57 = arith.constant 1 : index
      %c0_58 = arith.constant 0 : index
      %100 = vector.load %arg11[%c0_56, %c1_57, %c0_58] : memref<18x18x8xf32, #tpu.memory_space<vmem>>, vector<16x16x8xf32>
      %101 = vector.shape_cast %100 : vector<16x16x8xf32> to vector<256x8xf32>
      %102 = arith.truncf %101 : vector<256x8xf32> to vector<256x8xbf16>
      %103 = vector.extract_strided_slice %88 {offsets = [1, 0, 0], sizes = [1, 8, 8], strides = [1, 1, 1]} : vector<9x8x8xbf16> to vector<1x8x8xbf16>
      %104 = vector.shape_cast %103 : vector<1x8x8xbf16> to vector<8x8xbf16>
      %cst_59 = arith.constant dense<0.000000e+00> : vector<256x8xf32>
      %105 = tpu.matmul %102, %104, %cst_59 {dimension_numbers = #tpu.dot_dimension_numbers<[1], [0], [0], [1], [0, 0, 1, 1], [], []>} : vector<256x8xbf16>, vector<8x8xbf16>, vector<256x8xf32> -> vector<256x8xf32>
      %106 = arith.addf %99, %105 : vector<256x8xf32>
      %c0_60 = arith.constant 0 : index
      %c2_61 = arith.constant 2 : index
      %c0_62 = arith.constant 0 : index
      %107 = vector.load %arg11[%c0_60, %c2_61, %c0_62] : memref<18x18x8xf32, #tpu.memory_space<vmem>>, vector<16x16x8xf32>
      %108 = vector.shape_cast %107 : vector<16x16x8xf32> to vector<256x8xf32>
      %109 = arith.truncf %108 : vector<256x8xf32> to vector<256x8xbf16>
      %110 = vector.extract_strided_slice %88 {offsets = [2, 0, 0], sizes = [1, 8, 8], strides = [1, 1, 1]} : vector<9x8x8xbf16> to vector<1x8x8xbf16>
      %111 = vector.shape_cast %110 : vector<1x8x8xbf16> to vector<8x8xbf16>
      %cst_63 = arith.constant dense<0.000000e+00> : vector<256x8xf32>
      %112 = tpu.matmul %109, %111, %cst_63 {dimension_numbers = #tpu.dot_dimension_numbers<[1], [0], [0], [1], [0, 0, 1, 1], [], []>} : vector<256x8xbf16>, vector<8x8xbf16>, vector<256x8xf32> -> vector<256x8xf32>
      %113 = arith.addf %106, %112 : vector<256x8xf32>
      %c1_64 = arith.constant 1 : index
      %c0_65 = arith.constant 0 : index
      %c0_66 = arith.constant 0 : index
      %114 = vector.load %arg11[%c1_64, %c0_65, %c0_66] : memref<18x18x8xf32, #tpu.memory_space<vmem>>, vector<16x16x8xf32>
      %115 = vector.shape_cast %114 : vector<16x16x8xf32> to vector<256x8xf32>
      %116 = arith.truncf %115 : vector<256x8xf32> to vector<256x8xbf16>
      %117 = vector.extract_strided_slice %88 {offsets = [3, 0, 0], sizes = [1, 8, 8], strides = [1, 1, 1]} : vector<9x8x8xbf16> to vector<1x8x8xbf16>
      %118 = vector.shape_cast %117 : vector<1x8x8xbf16> to vector<8x8xbf16>
      %cst_67 = arith.constant dense<0.000000e+00> : vector<256x8xf32>
      %119 = tpu.matmul %116, %118, %cst_67 {dimension_numbers = #tpu.dot_dimension_numbers<[1], [0], [0], [1], [0, 0, 1, 1], [], []>} : vector<256x8xbf16>, vector<8x8xbf16>, vector<256x8xf32> -> vector<256x8xf32>
      %120 = arith.addf %113, %119 : vector<256x8xf32>
      %c1_68 = arith.constant 1 : index
      %c1_69 = arith.constant 1 : index
      %c0_70 = arith.constant 0 : index
      %121 = vector.load %arg11[%c1_68, %c1_69, %c0_70] : memref<18x18x8xf32, #tpu.memory_space<vmem>>, vector<16x16x8xf32>
      %122 = vector.shape_cast %121 : vector<16x16x8xf32> to vector<256x8xf32>
      %123 = arith.truncf %122 : vector<256x8xf32> to vector<256x8xbf16>
      %124 = vector.extract_strided_slice %88 {offsets = [4, 0, 0], sizes = [1, 8, 8], strides = [1, 1, 1]} : vector<9x8x8xbf16> to vector<1x8x8xbf16>
      %125 = vector.shape_cast %124 : vector<1x8x8xbf16> to vector<8x8xbf16>
      %cst_71 = arith.constant dense<0.000000e+00> : vector<256x8xf32>
      %126 = tpu.matmul %123, %125, %cst_71 {dimension_numbers = #tpu.dot_dimension_numbers<[1], [0], [0], [1], [0, 0, 1, 1], [], []>} : vector<256x8xbf16>, vector<8x8xbf16>, vector<256x8xf32> -> vector<256x8xf32>
      %127 = arith.addf %120, %126 : vector<256x8xf32>
      %c1_72 = arith.constant 1 : index
      %c2_73 = arith.constant 2 : index
      %c0_74 = arith.constant 0 : index
      %128 = vector.load %arg11[%c1_72, %c2_73, %c0_74] : memref<18x18x8xf32, #tpu.memory_space<vmem>>, vector<16x16x8xf32>
      %129 = vector.shape_cast %128 : vector<16x16x8xf32> to vector<256x8xf32>
      %130 = arith.truncf %129 : vector<256x8xf32> to vector<256x8xbf16>
      %131 = vector.extract_strided_slice %88 {offsets = [5, 0, 0], sizes = [1, 8, 8], strides = [1, 1, 1]} : vector<9x8x8xbf16> to vector<1x8x8xbf16>
      %132 = vector.shape_cast %131 : vector<1x8x8xbf16> to vector<8x8xbf16>
      %cst_75 = arith.constant dense<0.000000e+00> : vector<256x8xf32>
      %133 = tpu.matmul %130, %132, %cst_75 {dimension_numbers = #tpu.dot_dimension_numbers<[1], [0], [0], [1], [0, 0, 1, 1], [], []>} : vector<256x8xbf16>, vector<8x8xbf16>, vector<256x8xf32> -> vector<256x8xf32>
      %134 = arith.addf %127, %133 : vector<256x8xf32>
      %c2_76 = arith.constant 2 : index
      %c0_77 = arith.constant 0 : index
      %c0_78 = arith.constant 0 : index
      %135 = vector.load %arg11[%c2_76, %c0_77, %c0_78] : memref<18x18x8xf32, #tpu.memory_space<vmem>>, vector<16x16x8xf32>
      %136 = vector.shape_cast %135 : vector<16x16x8xf32> to vector<256x8xf32>
      %137 = arith.truncf %136 : vector<256x8xf32> to vector<256x8xbf16>
      %138 = vector.extract_strided_slice %88 {offsets = [6, 0, 0], sizes = [1, 8, 8], strides = [1, 1, 1]} : vector<9x8x8xbf16> to vector<1x8x8xbf16>
      %139 = vector.shape_cast %138 : vector<1x8x8xbf16> to vector<8x8xbf16>
      %cst_79 = arith.constant dense<0.000000e+00> : vector<256x8xf32>
      %140 = tpu.matmul %137, %139, %cst_79 {dimension_numbers = #tpu.dot_dimension_numbers<[1], [0], [0], [1], [0, 0, 1, 1], [], []>} : vector<256x8xbf16>, vector<8x8xbf16>, vector<256x8xf32> -> vector<256x8xf32>
      %141 = arith.addf %134, %140 : vector<256x8xf32>
      %c2_80 = arith.constant 2 : index
      %c1_81 = arith.constant 1 : index
      %c0_82 = arith.constant 0 : index
      %142 = vector.load %arg11[%c2_80, %c1_81, %c0_82] : memref<18x18x8xf32, #tpu.memory_space<vmem>>, vector<16x16x8xf32>
      %143 = vector.shape_cast %142 : vector<16x16x8xf32> to vector<256x8xf32>
      %144 = arith.truncf %143 : vector<256x8xf32> to vector<256x8xbf16>
      %145 = vector.extract_strided_slice %88 {offsets = [7, 0, 0], sizes = [1, 8, 8], strides = [1, 1, 1]} : vector<9x8x8xbf16> to vector<1x8x8xbf16>
      %146 = vector.shape_cast %145 : vector<1x8x8xbf16> to vector<8x8xbf16>
      %cst_83 = arith.constant dense<0.000000e+00> : vector<256x8xf32>
      %147 = tpu.matmul %144, %146, %cst_83 {dimension_numbers = #tpu.dot_dimension_numbers<[1], [0], [0], [1], [0, 0, 1, 1], [], []>} : vector<256x8xbf16>, vector<8x8xbf16>, vector<256x8xf32> -> vector<256x8xf32>
      %148 = arith.addf %141, %147 : vector<256x8xf32>
      %c2_84 = arith.constant 2 : index
      %c2_85 = arith.constant 2 : index
      %c0_86 = arith.constant 0 : index
      %149 = vector.load %arg11[%c2_84, %c2_85, %c0_86] : memref<18x18x8xf32, #tpu.memory_space<vmem>>, vector<16x16x8xf32>
      %150 = vector.shape_cast %149 : vector<16x16x8xf32> to vector<256x8xf32>
      %151 = arith.truncf %150 : vector<256x8xf32> to vector<256x8xbf16>
      %152 = vector.extract_strided_slice %88 {offsets = [8, 0, 0], sizes = [1, 8, 8], strides = [1, 1, 1]} : vector<9x8x8xbf16> to vector<1x8x8xbf16>
      %153 = vector.shape_cast %152 : vector<1x8x8xbf16> to vector<8x8xbf16>
      %cst_87 = arith.constant dense<0.000000e+00> : vector<256x8xf32>
      %154 = tpu.matmul %151, %153, %cst_87 {dimension_numbers = #tpu.dot_dimension_numbers<[1], [0], [0], [1], [0, 0, 1, 1], [], []>} : vector<256x8xbf16>, vector<8x8xbf16>, vector<256x8xf32> -> vector<256x8xf32>
      %155 = arith.addf %148, %154 : vector<256x8xf32>
      %156 = vector.broadcast %91 : vector<1x8xf32> to vector<256x8xf32>
      %157 = arith.addf %155, %156 : vector<256x8xf32>
      %158 = vector.shape_cast %157 : vector<256x8xf32> to vector<16x16x8xf32>
      %c1_88 = arith.constant 1 : index
      %c1_89 = arith.constant 1 : index
      %c0_90 = arith.constant 0 : index
      %159 = vector.load %arg10[%c1_88, %c1_89, %c0_90] : memref<18x18x8xf32, #tpu.memory_space<vmem>>, vector<16x16x8xf32>
      %160 = arith.addf %159, %158 : vector<16x16x8xf32>
      %c1_91 = arith.constant 1 : index
      %c1_92 = arith.constant 1 : index
      %c0_93 = arith.constant 0 : index
      %161 = vector.load %arg10[%c1_91, %c1_92, %c0_93] : memref<18x18x8xf32, #tpu.memory_space<vmem>>, vector<16x16x8xf32>
      tpu.vector_store %arg10[%c1_91, %c1_92, %c0_93], %160 {strides = array<i32>} : memref<18x18x8xf32, #tpu.memory_space<vmem>>, vector<16x16x8xf32>,
    } else {
    }
    %c30_i32 = arith.constant 30 : i32
    %6 = arith.cmpi eq, %arg1, %c30_i32 : i32
    %7 = arith.extui %6 : i1 to i32
    %c0_i32_3 = arith.constant 0 : i32
    %8 = arith.cmpi ne, %7, %c0_i32_3 : i32
    scf.if %8 {
      %c1 = arith.constant 1 : index
      %c1_4 = arith.constant 1 : index
      %c0 = arith.constant 0 : index
      %9 = vector.load %arg10[%c1, %c1_4, %c0] : memref<18x18x8xf32, #tpu.memory_space<vmem>>, vector<16x16x8xf32>
      %10 = arith.truncf %9 : vector<16x16x8xf32> to vector<16x16x8xbf16>
      %c0_5 = arith.constant 0 : index
      %c0_6 = arith.constant 0 : index
      %c0_7 = arith.constant 0 : index
      %c0_8 = arith.constant 0 : index
      %11 = vector.load %arg9[%c0_5, %c0_6, %c0_7, %c0_8] : memref<1x16x16x8xbf16, #tpu.memory_space<vmem>>, vector<1x16x16x8xbf16>
      %12 = vector.shape_cast %11 : vector<1x16x16x8xbf16> to vector<16x16x8xbf16>
      %13 = vector.shape_cast %10 : vector<16x16x8xbf16> to vector<1x16x16x8xbf16>
      tpu.vector_store %arg9[%c0_5, %c0_6, %c0_7, %c0_8], %13 {strides = array<i32>} : memref<1x16x16x8xbf16, #tpu.memory_space<vmem>>, vector<1x16x16x8xbf16>,
    } else {
    }
    return
  }
  func.func @transform_0(%arg0: i32, %arg1: i32) -> (i32, i32, i32, i32) {
    %c0_i32 = arith.constant 0 : i32
    %c0_i32_0 = arith.constant 0 : i32
    %c0_i32_1 = arith.constant 0 : i32
    %c0_i32_2 = arith.constant 0 : i32
    return %arg0, %c0_i32, %c0_i32_0, %c0_i32_1 : i32, i32, i32, i32
  }
  func.func @transform_1(%arg0: i32, %arg1: i32) -> (i32, i32, i32) {
    %c0_i32 = arith.constant 0 : i32
    %c0_i32_0 = arith.constant 0 : i32
    %c0_i32_1 = arith.constant 0 : i32
    %c0_i32_2 = arith.constant 0 : i32
    return %c0_i32, %c0_i32_0, %c0_i32_1 : i32, i32, i32
  }
  func.func @transform_2(%arg0: i32, %arg1: i32) -> (i32, i32) {
    %c0_i32 = arith.constant 0 : i32
    %c0_i32_0 = arith.constant 0 : i32
    %c0_i32_1 = arith.constant 0 : i32
    return %c0_i32, %c0_i32_0 : i32, i32
  }
  func.func @transform_3(%arg0: i32, %arg1: i32) -> (i32, i32, i32, i32) {
    %c0_i32 = arith.constant 0 : i32
    %c0_i32_0 = arith.constant 0 : i32
    %c0_i32_1 = arith.constant 0 : i32
    %c0_i32_2 = arith.constant 0 : i32
    %c0_i32_3 = arith.constant 0 : i32
    return %c0_i32, %c0_i32_0, %c0_i32_1, %c0_i32_2 : i32, i32, i32, i32
  }
  func.func @transform_4(%arg0: i32, %arg1: i32) -> (i32, i32, i32) {
    %c0_i32 = arith.constant 0 : i32
    %c0_i32_0 = arith.constant 0 : i32
    %c0_i32_1 = arith.constant 0 : i32
    %c0_i32_2 = arith.constant 0 : i32
    return %c0_i32, %c0_i32_0, %c0_i32_1 : i32, i32, i32
  }
  func.func @transform_5(%arg0: i32, %arg1: i32) -> (i32, i32, i32, i32) {
    %c0_i32 = arith.constant 0 : i32
    %c0_i32_0 = arith.constant 0 : i32
    %c0_i32_1 = arith.constant 0 : i32
    %c0_i32_2 = arith.constant 0 : i32
    %c0_i32_3 = arith.constant 0 : i32
    return %c0_i32, %c0_i32_0, %c0_i32_1, %c0_i32_2 : i32, i32, i32, i32
  }
  func.func @transform_6(%arg0: i32, %arg1: i32) -> (i32, i32, i32) {
    %c0_i32 = arith.constant 0 : i32
    %c0_i32_0 = arith.constant 0 : i32
    %c0_i32_1 = arith.constant 0 : i32
    %c0_i32_2 = arith.constant 0 : i32
    return %c0_i32, %c0_i32_0, %c0_i32_1 : i32, i32, i32
  }
  func.func @transform_7(%arg0: i32, %arg1: i32) -> (i32, i32, i32, i32) {
    %c0_i32 = arith.constant 0 : i32
    %c0_i32_0 = arith.constant 0 : i32
    %c0_i32_1 = arith.constant 0 : i32
    %c0_i32_2 = arith.constant 0 : i32
    return %arg0, %c0_i32, %c0_i32_0, %c0_i32_1 : i32, i32, i32, i32
  }
}

module attributes {stable_mosaic.version = 11 : i64} {
  func.func @_fusion_kernel(%arg0: i32, %arg1: memref<512x16xbf16, #tpu.memory_space<vmem>>, %arg2: memref<16x8xbf16, #tpu.memory_space<vmem>>, %arg3: memref<1x8xf32, #tpu.memory_space<vmem>>, %arg4: memref<512x8xf32, #tpu.memory_space<vmem>>) attributes {dimension_semantics = [#tpu.dimension_semantics<parallel>], iteration_bounds = array<i64: 3>, scalar_prefetch = 0 : i64, scratch_operands = 0 : i64, tpu.core_type = #tpu.core_type<tc>, window_params = [{transform_indices = @transform_0, window_bounds = array<i64: 512, 16>}, {pipeline_mode = #tpu.pipeline_mode<synchronous>, transform_indices = @transform_1, window_bounds = array<i64: 16, 8>}, {pipeline_mode = #tpu.pipeline_mode<synchronous>, transform_indices = @transform_2, window_bounds = array<i64: 1, 8>}, {transform_indices = @transform_3, window_bounds = array<i64: 512, 8>}]} {
    %c0 = arith.constant 0 : index
    %c0_0 = arith.constant 0 : index
    %0 = vector.load %arg1[%c0, %c0_0] : memref<512x16xbf16, #tpu.memory_space<vmem>>, vector<512x16xbf16>
    %c0_1 = arith.constant 0 : index
    %c0_2 = arith.constant 0 : index
    %1 = vector.load %arg2[%c0_1, %c0_2] : memref<16x8xbf16, #tpu.memory_space<vmem>>, vector<16x8xbf16>
    %cst = arith.constant dense<0.000000e+00> : vector<512x8xf32>
    %2 = tpu.matmul %0, %1, %cst {dimension_numbers = #tpu.dot_dimension_numbers<[1], [0], [0], [1], [0, 0, 1, 1], [], []>} : vector<512x16xbf16>, vector<16x8xbf16>, vector<512x8xf32> -> vector<512x8xf32>
    %c0_3 = arith.constant 0 : index
    %c0_4 = arith.constant 0 : index
    %3 = vector.load %arg3[%c0_3, %c0_4] : memref<1x8xf32, #tpu.memory_space<vmem>>, vector<1x8xf32>
    %4 = vector.broadcast %3 : vector<1x8xf32> to vector<512x8xf32>
    %5 = arith.addf %2, %4 : vector<512x8xf32>
    %cst_5 = arith.constant 0.000000e+00 : f32
    %6 = vector.broadcast %cst_5 : f32 to vector<512x8xf32>
    %7 = arith.cmpf ogt, %5, %6 : vector<512x8xf32>
    %cst_6 = arith.constant 1.000000e-01 : f32
    %8 = vector.broadcast %cst_6 : f32 to vector<512x8xf32>
    %9 = arith.mulf %8, %5 : vector<512x8xf32>
    %10 = arith.select %7, %5, %9 : vector<512x8xi1>, vector<512x8xf32>
    %c0_7 = arith.constant 0 : index
    %c0_8 = arith.constant 0 : index
    %11 = vector.load %arg4[%c0_7, %c0_8] : memref<512x8xf32, #tpu.memory_space<vmem>>, vector<512x8xf32>
    tpu.vector_store %arg4[%c0_7, %c0_8], %10 {strides = array<i32>} : memref<512x8xf32, #tpu.memory_space<vmem>>, vector<512x8xf32>,
    return
  }
  func.func @transform_0(%arg0: i32) -> (i32, i32) {
    %c0_i32 = arith.constant 0 : i32
    %c0_i32_0 = arith.constant 0 : i32
    return %arg0, %c0_i32 : i32, i32
  }
  func.func @transform_1(%arg0: i32) -> (i32, i32) {
    %c0_i32 = arith.constant 0 : i32
    %c0_i32_0 = arith.constant 0 : i32
    %c0_i32_1 = arith.constant 0 : i32
    return %c0_i32, %c0_i32_0 : i32, i32
  }
  func.func @transform_2(%arg0: i32) -> (i32, i32) {
    %c0_i32 = arith.constant 0 : i32
    %c0_i32_0 = arith.constant 0 : i32
    %c0_i32_1 = arith.constant 0 : i32
    return %c0_i32, %c0_i32_0 : i32, i32
  }
  func.func @transform_3(%arg0: i32) -> (i32, i32) {
    %c0_i32 = arith.constant 0 : i32
    %c0_i32_0 = arith.constant 0 : i32
    return %arg0, %c0_i32 : i32, i32
  }
}

</mosaic_0001>

<bundles_post_ra>
// kernel: feed_forward.5
= control target key start
LH: loop header
LB: loop body
LE: loop exit
PB: predicated region body
PF: predicated region fallthrough
CT: control target
= control target key end

     0   :  { %s1238_s12 = smov 0   ;;  %s1527_s0 = inlined_call_operand.vmem [shape: bf16[1536,16], index: 0, kind: input, shape index: {}]   ;;  %s1528_s1 = inlined_call_operand.vmem [shape: bf16[16,8], index: 1, kind: input, shape index: {}]   ;;  %s1529_s2 = inlined_call_operand.vmem [shape: f32[1,8], index: 2, kind: input, shape index: {}]   ;;  %s1530_s3 = inlined_call_operand.vmem [shape: f32[1536,8], index: 3, kind: output, shape index: {}]  }
   0x1 LB: > { %s990_s13 = sadd.s32 4294967295, %s1216_s12   ;;  %p994_p0 = scmp.ge.s32.totalorder %s1216_s12, 1  ;;  %s1216_s12 = sphi %s1238_s12, %s13_s12  }
   0x2   : > { %p138_p1 = scmp.lt.s32.totalorder %s1216_s12, 4 }
   0x4   : > { %p139_p2 = pnand %p994_p0, %p138_p1 }
   0x5   : > { %s995_s16 = sshll.u32 (!%p139_p2), %s990_s13, 6 }
   0x6   : > { %142 = sbr.rel (%p139_p2) target bundleno = 276 (0x114), region = 32  ;;  %p163_p3 = scmp.lt.s32.totalorder (!%p139_p2), %s995_s16, 191 }
   0xb   : > { %v1197_v0 = vld [vmem:[%s1528_s1] sm:$0xff]  ;;  %s1532_s16 = smov (!%p163_p3, %s995_s16), 191  ;;  %vm411_vm0 = vcmask 130048   ;;  %vm869_vm1 = vcmask 64512  }
   0xc   : > { %515 = vmatpush.bf16.msra.mxu0 %v1197_v0  ;;  %1198 = vmatpush.bf16.msra.mxu1 %v1197_v0  ;;  %s996_s17 = sshll.u32 %s1532_s16, 2  ;;  %v1324_v33 = vld [vmem:[%s1529_s2] ss:$0 sm:$0xff]  ;;  %s998_s23 = sshll.u32 %s1532_s16, 3 }
   0xd   : > { %1199 = vmatpush.bf16.msra.mxu2 %v1197_v0  ;;  %1200 = vmatpush.bf16.msra.mxu3 %v1197_v0  ;;  %s1255_s20 = scalar_lea.vmem %s1527_s0, %s996_s17  ;;  %s1332_s26 = scalar_lea.vmem %s1530_s3, %s998_s23 }
   0xe   : > { %v1165_v1 = vld [vmem:[%s1255_s20] sm:$0xff]  ;;  %v1166_v5 = vld [vmem:[%s1255_s20 + $0x8] sm:$0xff]  ;;  %v1167_v9 = vld [vmem:[%s1255_s20 + $0x10] sm:$0xff] }
   0xf   : > { %v1173_v2 = vld [vmem:[%s1255_s20 + $0x40] sm:$0xff]  ;;  %1131 = vmatmul.msk.bf16.vlgmr.msra.gmra.mxu0 %vm411_vm0, %v1165_v1  ;;  %v1174_v6 = vld [vmem:[%s1255_s20 + $0x48] sm:$0xff]  ;;  %v1175_v10 = vld [vmem:[%s1255_s20 + $0x50] sm:$0xff] }
  0x10   : > { %v1181_v3 = vld [vmem:[%s1255_s20 + $0x80] sm:$0xff]  ;;  %1139 = vmatmul.msk.bf16.vlgmr.msra.gmra.mxu1 %vm411_vm0, %v1173_v2  ;;  %v1182_v7 = vld [vmem:[%s1255_s20 + $0x88] sm:$0xff]  ;;  %v1183_v11 = vld [vmem:[%s1255_s20 + $0x90] sm:$0xff] }
  0x11   : > { %v1189_v4 = vld [vmem:[%s1255_s20 + $0xc0] sm:$0xff]  ;;  %1147 = vmatmul.msk.bf16.vlgmr.msra.gmra.mxu2 %vm411_vm0, %v1181_v3  ;;  %v1190_v8 = vld [vmem:[%s1255_s20 + $0xc8] sm:$0xff]  ;;  %v1191_v12 = vld [vmem:[%s1255_s20 + $0xd0] sm:$0xff] }
  0x12   : > { %1155 = vmatmul.msk.bf16.vlgmr.msra.gmra.mxu3 %vm411_vm0, %v1189_v4  ;;  %v1168_v13 = vld [vmem:[%s1255_s20 + $0x18] sm:$0xff]  ;;  %v1169_v17 = vld [vmem:[%s1255_s20 + $0x20] sm:$0xff]  ;;  %v1170_v21 = vld [vmem:[%s1255_s20 + $0x28] sm:$0xff] }
  0x13   : > { %v1176_v14 = vld [vmem:[%s1255_s20 + $0x58] sm:$0xff]  ;;  %v1177_v18 = vld [vmem:[%s1255_s20 + $0x60] sm:$0xff]  ;;  %v1178_v22 = vld [vmem:[%s1255_s20 + $0x68] sm:$0xff] }
  0x14   : > { %v1184_v15 = vld [vmem:[%s1255_s20 + $0x98] sm:$0xff]  ;;  %v1185_v19 = vld [vmem:[%s1255_s20 + $0xa0] sm:$0xff]  ;;  %v1186_v23 = vld [vmem:[%s1255_s20 + $0xa8] sm:$0xff] }
  0x15   : > { %v1192_v16 = vld [vmem:[%s1255_s20 + $0xd8] sm:$0xff]  ;;  %v1193_v20 = vld [vmem:[%s1255_s20 + $0xe0] sm:$0xff]  ;;  %v1194_v24 = vld [vmem:[%s1255_s20 + $0xe8] sm:$0xff] }
  0x16   : > { %v1171_v25 = vld [vmem:[%s1255_s20 + $0x30] sm:$0xff]  ;;  %v1172_v29 = vld [vmem:[%s1255_s20 + $0x38] sm:$0xff] }
  0x17   : > { %v1179_v26 = vld [vmem:[%s1255_s20 + $0x70] sm:$0xff]  ;;  %v1180_v30 = vld [vmem:[%s1255_s20 + $0x78] sm:$0xff] }
  0x18   : > { %v1187_v27 = vld [vmem:[%s1255_s20 + $0xb0] sm:$0xff]  ;;  %v1188_v31 = vld [vmem:[%s1255_s20 + $0xb8] sm:$0xff] }
  0x19   : > { %v1195_v28 = vld [vmem:[%s1255_s20 + $0xf0] sm:$0xff]  ;;  %v1196_v32 = vld [vmem:[%s1255_s20 + $0xf8] sm:$0xff] }
  0x1f   : > { %1132 = vmatmul.msk.bf16.gmra.mxu0 %vm411_vm0, %v1166_v5 }
  0x20   : > { %1140 = vmatmul.msk.bf16.gmra.mxu1 %vm411_vm0, %v1174_v6 }
  0x21   : > { %1148 = vmatmul.msk.bf16.gmra.mxu2 %vm411_vm0, %v1182_v7 }
  0x22   : > { %1156 = vmatmul.msk.bf16.gmra.mxu3 %vm411_vm0, %v1190_v8 }
  0x2f   : > { %1133 = vmatmul.msk.bf16.gmra.mxu0 %vm411_vm0, %v1167_v9 }
  0x30   : > { %1141 = vmatmul.msk.bf16.gmra.mxu1 %vm411_vm0, %v1175_v10 }
  0x31   : > { %1149 = vmatmul.msk.bf16.gmra.mxu2 %vm411_vm0, %v1183_v11 }
  0x32   : > { %1157 = vmatmul.msk.bf16.gmra.mxu3 %vm411_vm0, %v1191_v12 }
  0x3f   : > { %1134 = vmatmul.msk.bf16.gmra.mxu0 %vm411_vm0, %v1168_v13 }
  0x40   : > { %1142 = vmatmul.msk.bf16.gmra.mxu1 %vm411_vm0, %v1176_v14 }
  0x41   : > { %1150 = vmatmul.msk.bf16.gmra.mxu2 %vm411_vm0, %v1184_v15 }
  0x42   : > { %1158 = vmatmul.msk.bf16.gmra.mxu3 %vm411_vm0, %v1192_v16 }
  0x4f   : > { %1135 = vmatmul.msk.bf16.gmra.mxu0 %vm411_vm0, %v1169_v17 }
  0x50   : > { %1143 = vmatmul.msk.bf16.gmra.mxu1 %vm411_vm0, %v1177_v18 }
  0x51   : > { %1151 = vmatmul.msk.bf16.gmra.mxu2 %vm411_vm0, %v1185_v19 }
  0x52   : > { %1159 = vmatmul.msk.bf16.gmra.mxu3 %vm411_vm0, %v1193_v20 }
  0x5f   : > { %1136 = vmatmul.msk.bf16.gmra.mxu0 %vm411_vm0, %v1170_v21 }
  0x60   : > { %1144 = vmatmul.msk.bf16.gmra.mxu1 %vm411_vm0, %v1178_v22 }
  0x61   : > { %1152 = vmatmul.msk.bf16.gmra.mxu2 %vm411_vm0, %v1186_v23 }
  0x62   : > { %1160 = vmatmul.msk.bf16.gmra.mxu3 %vm411_vm0, %v1194_v24 }
  0x6f   : > { %1137 = vmatmul.msk.bf16.gmra.mxu0 %vm411_vm0, %v1171_v25 }
  0x70   : > { %1145 = vmatmul.msk.bf16.gmra.mxu1 %vm411_vm0, %v1179_v26 }
  0x71   : > { %1153 = vmatmul.msk.bf16.gmra.mxu2 %vm411_vm0, %v1187_v27 }
  0x72   : > { %1161 = vmatmul.msk.bf16.gmra.mxu3 %vm411_vm0, %v1195_v28 }
  0x7f   : > { %1138 = vmatmul.msk.bf16.gmra.mxu0 %vm411_vm0, %v1172_v29 }
  0x80   : > { %1146 = vmatmul.msk.bf16.gmra.mxu1 %vm411_vm0, %v1180_v30 }
  0x81   : > { %1154 = vmatmul.msk.bf16.gmra.mxu2 %vm411_vm0, %v1188_v31 }
  0x82   : > { %1162 = vmatmul.msk.bf16.gmra.mxu3 %vm411_vm0, %v1196_v32 }
  0x8c   : > { %v517_v34 = vpop.f32.mrf.mxu0 }
  0x8d   : > { %v557_v35 = vpop.f32.mrf.mxu1  ;;  %v518_v36 = vadd.f32 %v1324_v33, %v517_v34 }
  0x8e   : > { %v558_v37 = vadd.f32 %v1324_v33, %v557_v35 }
  0x8f   : > { %vm677_vm2 = vcmp.gt.f32.partialorder %v518_v36, 0.0  ;;  %v741_v38 = vmul.f32 0.1, %v518_v36 }
  0x90   : > { %vm693_vm3 = vcmp.gt.f32.partialorder %v558_v37, 0.0  ;;  %v757_v39 = vmul.f32 0.1, %v558_v37 }
  0x91   : > { %v805_v40 = vsel %vm677_vm2, %v518_v36, %v741_v38 }
  0x92   : > { %v821_v41 = vsel %vm693_vm3, %v558_v37, %v757_v39  ;;  %870 = vst.msk [vmem:[%s1332_s26] sm:$0xff] %vm869_vm1, %v805_v40 }
  0x93   : > { %886 = vst.msk [vmem:[%s1332_s26 + $0x80] sm:$0xff] %vm869_vm1, %v821_v41 }
  0x94   : > { %v597_v42 = vpop.f32.mrf.mxu2  ;;  %v519_v46 = vpop.f32.mrf.mxu0 }
  0x95   : > { %v637_v43 = vpop.f32.mrf.mxu3  ;;  %v598_v44 = vadd.f32 %v1324_v33, %v597_v42  ;;  %v559_v47 = vpop.f32.mrf.mxu1  ;;  %v520_v48 = vadd.f32 %v1324_v33, %v519_v46 }
  0x96   : > { %v638_v45 = vadd.f32 %v1324_v33, %v637_v43  ;;  %v560_v49 = vadd.f32 %v1324_v33, %v559_v47 }
  0x97   : > { %vm709_vm4 = vcmp.gt.f32.partialorder %v598_v44, 0.0  ;;  %v773_v50 = vmul.f32 0.1, %v598_v44  ;;  %vm678_vm6 = vcmp.gt.f32.partialorder %v520_v48, 0.0  ;;  %v742_v52 = vmul.f32 0.1, %v520_v48 }
  0x98   : > { %vm725_vm5 = vcmp.gt.f32.partialorder %v638_v45, 0.0  ;;  %v789_v51 = vmul.f32 0.1, %v638_v45  ;;  %vm694_vm7 = vcmp.gt.f32.partialorder %v560_v49, 0.0  ;;  %v758_v53 = vmul.f32 0.1, %v560_v49 }
  0x99   : > { %v837_v54 = vsel %vm709_vm4, %v598_v44, %v773_v50  ;;  %v806_v56 = vsel %vm678_vm6, %v520_v48, %v742_v52 }
  0x9a   : > { %v853_v55 = vsel %vm725_vm5, %v638_v45, %v789_v51  ;;  %902 = vst.msk [vmem:[%s1332_s26 + $0x100] sm:$0xff] %vm869_vm1, %v837_v54  ;;  %v822_v57 = vsel %vm694_vm7, %v560_v49, %v758_v53 }
  0x9b   : > { %918 = vst.msk [vmem:[%s1332_s26 + $0x180] sm:$0xff] %vm869_vm1, %v853_v55 }
  0x9c   : > { %871 = vst.msk [vmem:[%s1332_s26 + $0x8] sm:$0xff] %vm869_vm1, %v806_v56  ;;  %v599_v58 = vpop.f32.mrf.mxu2  ;;  %v522_v62 = vpop.f32.mrf.mxu0 }
  0x9d   : > { %v639_v59 = vpop.f32.mrf.mxu3  ;;  %887 = vst.msk [vmem:[%s1332_s26 + $0x88] sm:$0xff] %vm869_vm1, %v822_v57  ;;  %v600_v60 = vadd.f32 %v1324_v33, %v599_v58  ;;  %v562_v63 = vpop.f32.mrf.mxu1  ;;  %v523_v0 = vadd.f32 %v1324_v33, %v522_v62 }
  0x9e   : > { %v640_v61 = vadd.f32 %v1324_v33, %v639_v59  ;;  %v563_v1 = vadd.f32 %v1324_v33, %v562_v63 }
  0x9f   : > { %vm710_vm8 = vcmp.gt.f32.partialorder %v600_v60, 0.0  ;;  %v774_v2 = vmul.f32 0.1, %v600_v60  ;;  %vm679_vm10 = vcmp.gt.f32.partialorder %v523_v0, 0.0  ;;  %v743_v4 = vmul.f32 0.1, %v523_v0 }
  0xa0   : > { %vm726_vm9 = vcmp.gt.f32.partialorder %v640_v61, 0.0  ;;  %v790_v3 = vmul.f32 0.1, %v640_v61  ;;  %vm695_vm11 = vcmp.gt.f32.partialorder %v563_v1, 0.0  ;;  %v759_v5 = vmul.f32 0.1, %v563_v1 }
  0xa1   : > { %v838_v6 = vsel %vm710_vm8, %v600_v60, %v774_v2  ;;  %v807_v8 = vsel %vm679_vm10, %v523_v0, %v743_v4 }
  0xa2   : > { %v854_v7 = vsel %vm726_vm9, %v640_v61, %v790_v3  ;;  %903 = vst.msk [vmem:[%s1332_s26 + $0x108] sm:$0xff] %vm869_vm1, %v838_v6  ;;  %v823_v9 = vsel %vm695_vm11, %v563_v1, %v759_v5 }
  0xa3   : > { %919 = vst.msk [vmem:[%s1332_s26 + $0x188] sm:$0xff] %vm869_vm1, %v854_v7 }
  0xa4   : > { %872 = vst.msk [vmem:[%s1332_s26 + $0x10] sm:$0xff] %vm869_vm1, %v807_v8  ;;  %v602_v10 = vpop.f32.mrf.mxu2  ;;  %v524_v14 = vpop.f32.mrf.mxu0 }
  0xa5   : > { %v642_v11 = vpop.f32.mrf.mxu3  ;;  %888 = vst.msk [vmem:[%s1332_s26 + $0x90] sm:$0xff] %vm869_vm1, %v823_v9  ;;  %v603_v12 = vadd.f32 %v1324_v33, %v602_v10  ;;  %v564_v15 = vpop.f32.mrf.mxu1  ;;  %v525_v16 = vadd.f32 %v1324_v33, %v524_v14 }
  0xa6   : > { %v643_v13 = vadd.f32 %v1324_v33, %v642_v11  ;;  %v565_v17 = vadd.f32 %v1324_v33, %v564_v15 }
  0xa7   : > { %vm711_vm12 = vcmp.gt.f32.partialorder %v603_v12, 0.0  ;;  %v775_v18 = vmul.f32 0.1, %v603_v12  ;;  %vm680_vm14 = vcmp.gt.f32.partialorder %v525_v16, 0.0  ;;  %v744_v20 = vmul.f32 0.1, %v525_v16 }
  0xa8   : > { %vm727_vm13 = vcmp.gt.f32.partialorder %v643_v13, 0.0  ;;  %v791_v19 = vmul.f32 0.1, %v643_v13  ;;  %vm696_vm15 = vcmp.gt.f32.partialorder %v565_v17, 0.0  ;;  %v760_v21 = vmul.f32 0.1, %v565_v17 }
  0xa9   : > { %v839_v22 = vsel %vm711_vm12, %v603_v12, %v775_v18  ;;  %v808_v24 = vsel %vm680_vm14, %v525_v16, %v744_v20 }
  0xaa   : > { %v855_v23 = vsel %vm727_vm13, %v643_v13, %v791_v19  ;;  %904 = vst.msk [vmem:[%s1332_s26 + $0x110] sm:$0xff] %vm869_vm1, %v839_v22  ;;  %v824_v25 = vsel %vm696_vm15, %v565_v17, %v760_v21 }
  0xab   : > { %920 = vst.msk [vmem:[%s1332_s26 + $0x190] sm:$0xff] %vm869_vm1, %v855_v23 }
  0xac   : > { %873 = vst.msk [vmem:[%s1332_s26 + $0x18] sm:$0xff] %vm869_vm1, %v808_v24  ;;  %v604_v26 = vpop.f32.mrf.mxu2  ;;  %v527_v30 = vpop.f32.mrf.mxu0 }
  0xad   : > { %v644_v27 = vpop.f32.mrf.mxu3  ;;  %889 = vst.msk [vmem:[%s1332_s26 + $0x98] sm:$0xff] %vm869_vm1, %v824_v25  ;;  %v605_v28 = vadd.f32 %v1324_v33, %v604_v26  ;;  %v567_v31 = vpop.f32.mrf.mxu1  ;;  %v528_v32 = vadd.f32 %v1324_v33, %v527_v30 }
  0xae   : > { %v645_v29 = vadd.f32 %v1324_v33, %v644_v27  ;;  %v568_v34 = vadd.f32 %v1324_v33, %v567_v31 }
  0xaf   : > { %vm712_vm0 = vcmp.gt.f32.partialorder %v605_v28, 0.0  ;;  %v776_v35 = vmul.f32 0.1, %v605_v28  ;;  %vm681_vm3 = vcmp.gt.f32.partialorder %v528_v32, 0.0  ;;  %v745_v37 = vmul.f32 0.1, %v528_v32 }
  0xb0   : > { %vm728_vm2 = vcmp.gt.f32.partialorder %v645_v29, 0.0  ;;  %v792_v36 = vmul.f32 0.1, %v645_v29  ;;  %vm697_vm4 = vcmp.gt.f32.partialorder %v568_v34, 0.0  ;;  %v761_v38 = vmul.f32 0.1, %v568_v34 }
  0xb1   : > { %v840_v39 = vsel %vm712_vm0, %v605_v28, %v776_v35  ;;  %v809_v41 = vsel %vm681_vm3, %v528_v32, %v745_v37 }
  0xb2   : > { %v856_v40 = vsel %vm728_vm2, %v645_v29, %v792_v36  ;;  %905 = vst.msk [vmem:[%s1332_s26 + $0x118] sm:$0xff] %vm869_vm1, %v840_v39  ;;  %v825_v42 = vsel %vm697_vm4, %v568_v34, %v761_v38 }
  0xb3   : > { %921 = vst.msk [vmem:[%s1332_s26 + $0x198] sm:$0xff] %vm869_vm1, %v856_v40 }
  0xb4   : > { %874 = vst.msk [vmem:[%s1332_s26 + $0x20] sm:$0xff] %vm869_vm1, %v809_v41  ;;  %v607_v43 = vpop.f32.mrf.mxu2  ;;  %v529_v47 = vpop.f32.mrf.mxu0 }
  0xb5   : > { %v647_v44 = vpop.f32.mrf.mxu3  ;;  %890 = vst.msk [vmem:[%s1332_s26 + $0xa0] sm:$0xff] %vm869_vm1, %v825_v42  ;;  %v608_v45 = vadd.f32 %v1324_v33, %v607_v43  ;;  %v569_v48 = vpop.f32.mrf.mxu1  ;;  %v530_v49 = vadd.f32 %v1324_v33, %v529_v47 }
  0xb6   : > { %v648_v46 = vadd.f32 %v1324_v33, %v647_v44  ;;  %v570_v50 = vadd.f32 %v1324_v33, %v569_v48 }
  0xb7   : > { %vm713_vm5 = vcmp.gt.f32.partialorder %v608_v45, 0.0  ;;  %v777_v51 = vmul.f32 0.1, %v608_v45  ;;  %vm682_vm7 = vcmp.gt.f32.partialorder %v530_v49, 0.0  ;;  %v746_v53 = vmul.f32 0.1, %v530_v49 }
  0xb8   : > { %vm729_vm6 = vcmp.gt.f32.partialorder %v648_v46, 0.0  ;;  %v793_v52 = vmul.f32 0.1, %v648_v46  ;;  %vm698_vm8 = vcmp.gt.f32.partialorder %v570_v50, 0.0  ;;  %v762_v54 = vmul.f32 0.1, %v570_v50 }
  0xb9   : > { %v841_v55 = vsel %vm713_vm5, %v608_v45, %v777_v51  ;;  %v810_v57 = vsel %vm682_vm7, %v530_v49, %v746_v53 }
  0xba   : > { %v857_v56 = vsel %vm729_vm6, %v648_v46, %v793_v52  ;;  %906 = vst.msk [vmem:[%s1332_s26 + $0x120] sm:$0xff] %vm869_vm1, %v841_v55  ;;  %v826_v58 = vsel %vm698_vm8, %v570_v50, %v762_v54 }
  0xbb   : > { %922 = vst.msk [vmem:[%s1332_s26 + $0x1a0] sm:$0xff] %vm869_vm1, %v857_v56 }
  0xbc   : > { %875 = vst.msk [vmem:[%s1332_s26 + $0x28] sm:$0xff] %vm869_vm1, %v810_v57  ;;  %v609_v59 = vpop.f32.mrf.mxu2  ;;  %v532_v63 = vpop.f32.mrf.mxu0 }
  0xbd   : > { %v649_v60 = vpop.f32.mrf.mxu3  ;;  %891 = vst.msk [vmem:[%s1332_s26 + $0xa8] sm:$0xff] %vm869_vm1, %v826_v58  ;;  %v610_v61 = vadd.f32 %v1324_v33, %v609_v59  ;;  %v572_v0 = vpop.f32.mrf.mxu1  ;;  %v533_v1 = vadd.f32 %v1324_v33, %v532_v63 }
  0xbe   : > { %v650_v62 = vadd.f32 %v1324_v33, %v649_v60  ;;  %v573_v2 = vadd.f32 %v1324_v33, %v572_v0 }
  0xbf   : > { %vm714_vm9 = vcmp.gt.f32.partialorder %v610_v61, 0.0  ;;  %v778_v3 = vmul.f32 0.1, %v610_v61  ;;  %vm683_vm11 = vcmp.gt.f32.partialorder %v533_v1, 0.0  ;;  %v747_v5 = vmul.f32 0.1, %v533_v1 }
  0xc0   : > { %vm730_vm10 = vcmp.gt.f32.partialorder %v650_v62, 0.0  ;;  %v794_v4 = vmul.f32 0.1, %v650_v62  ;;  %vm699_vm12 = vcmp.gt.f32.partialorder %v573_v2, 0.0  ;;  %v763_v6 = vmul.f32 0.1, %v573_v2 }
  0xc1   : > { %v842_v7 = vsel %vm714_vm9, %v610_v61, %v778_v3  ;;  %v811_v9 = vsel %vm683_vm11, %v533_v1, %v747_v5 }
  0xc2   : > { %v858_v8 = vsel %vm730_vm10, %v650_v62, %v794_v4  ;;  %907 = vst.msk [vmem:[%s1332_s26 + $0x128] sm:$0xff] %vm869_vm1, %v842_v7  ;;  %v827_v10 = vsel %vm699_vm12, %v573_v2, %v763_v6 }
  0xc3   : > { %923 = vst.msk [vmem:[%s1332_s26 + $0x1a8] sm:$0xff] %vm869_vm1, %v858_v8 }
  0xc4   : > { %876 = vst.msk [vmem:[%s1332_s26 + $0x30] sm:$0xff] %vm869_vm1, %v811_v9  ;;  %v612_v11 = vpop.f32.mrf.mxu2  ;;  %v534_v15 = vpop.f32.mrf.mxu0 }
  0xc5   : > { %v652_v12 = vpop.f32.mrf.mxu3  ;;  %892 = vst.msk [vmem:[%s1332_s26 + $0xb0] sm:$0xff] %vm869_vm1, %v827_v10  ;;  %v613_v13 = vadd.f32 %v1324_v33, %v612_v11  ;;  %v574_v16 = vpop.f32.mrf.mxu1  ;;  %v535_v17 = vadd.f32 %v1324_v33, %v534_v15 }
  0xc6   : > { %v653_v14 = vadd.f32 %v1324_v33, %v652_v12  ;;  %v575_v18 = vadd.f32 %v1324_v33, %v574_v16 }
  0xc7   : > { %vm715_vm13 = vcmp.gt.f32.partialorder %v613_v13, 0.0  ;;  %v779_v19 = vmul.f32 0.1, %v613_v13  ;;  %vm684_vm15 = vcmp.gt.f32.partialorder %v535_v17, 0.0  ;;  %v748_v21 = vmul.f32 0.1, %v535_v17 }
  0xc8   : > { %vm731_vm14 = vcmp.gt.f32.partialorder %v653_v14, 0.0  ;;  %v795_v20 = vmul.f32 0.1, %v653_v14  ;;  %vm700_vm0 = vcmp.gt.f32.partialorder %v575_v18, 0.0  ;;  %v764_v22 = vmul.f32 0.1, %v575_v18 }
  0xc9   : > { %v843_v23 = vsel %vm715_vm13, %v613_v13, %v779_v19  ;;  %v812_v25 = vsel %vm684_vm15, %v535_v17, %v748_v21 }
  0xca   : > { %v859_v24 = vsel %vm731_vm14, %v653_v14, %v795_v20  ;;  %908 = vst.msk [vmem:[%s1332_s26 + $0x130] sm:$0xff] %vm869_vm1, %v843_v23  ;;  %v828_v26 = vsel %vm700_vm0, %v575_v18, %v764_v22 }
  0xcb   : > { %924 = vst.msk [vmem:[%s1332_s26 + $0x1b0] sm:$0xff] %vm869_vm1, %v859_v24 }
  0xcc   : > { %877 = vst.msk [vmem:[%s1332_s26 + $0x38] sm:$0xff] %vm869_vm1, %v812_v25  ;;  %v614_v27 = vpop.f32.mrf.mxu2  ;;  %v537_v31 = vpop.f32.mrf.mxu0 }
  0xcd   : > { %v654_v28 = vpop.f32.mrf.mxu3  ;;  %893 = vst.msk [vmem:[%s1332_s26 + $0xb8] sm:$0xff] %vm869_vm1, %v828_v26  ;;  %v615_v29 = vadd.f32 %v1324_v33, %v614_v27  ;;  %v577_v32 = vpop.f32.mrf.mxu1  ;;  %v538_v34 = vadd.f32 %v1324_v33, %v537_v31 }
  0xce   : > { %v655_v30 = vadd.f32 %v1324_v33, %v654_v28  ;;  %v578_v35 = vadd.f32 %v1324_v33, %v577_v32 }
  0xcf   : > { %vm716_vm2 = vcmp.gt.f32.partialorder %v615_v29, 0.0  ;;  %v780_v36 = vmul.f32 0.1, %v615_v29  ;;  %vm685_vm4 = vcmp.gt.f32.partialorder %v538_v34, 0.0  ;;  %v749_v38 = vmul.f32 0.1, %v538_v34 }
  0xd0   : > { %vm732_vm3 = vcmp.gt.f32.partialorder %v655_v30, 0.0  ;;  %v796_v37 = vmul.f32 0.1, %v655_v30  ;;  %vm701_vm5 = vcmp.gt.f32.partialorder %v578_v35, 0.0  ;;  %v765_v39 = vmul.f32 0.1, %v578_v35 }
  0xd1   : > { %v844_v40 = vsel %vm716_vm2, %v615_v29, %v780_v36  ;;  %v813_v42 = vsel %vm685_vm4, %v538_v34, %v749_v38 }
  0xd2   : > { %v860_v41 = vsel %vm732_vm3, %v655_v30, %v796_v37  ;;  %909 = vst.msk [vmem:[%s1332_s26 + $0x138] sm:$0xff] %vm869_vm1, %v844_v40  ;;  %v829_v43 = vsel %vm701_vm5, %v578_v35, %v765_v39 }
  0xd3   : > { %925 = vst.msk [vmem:[%s1332_s26 + $0x1b8] sm:$0xff] %vm869_vm1, %v860_v41 }
  0xd4   : > { %878 = vst.msk [vmem:[%s1332_s26 + $0x40] sm:$0xff] %vm869_vm1, %v813_v42  ;;  %v617_v44 = vpop.f32.mrf.mxu2  ;;  %v539_v48 = vpop.f32.mrf.mxu0 }
  0xd5   : > { %v657_v45 = vpop.f32.mrf.mxu3  ;;  %894 = vst.msk [vmem:[%s1332_s26 + $0xc0] sm:$0xff] %vm869_vm1, %v829_v43  ;;  %v618_v46 = vadd.f32 %v1324_v33, %v617_v44  ;;  %v579_v49 = vpop.f32.mrf.mxu1  ;;  %v540_v50 = vadd.f32 %v1324_v33, %v539_v48 }
  0xd6   : > { %v658_v47 = vadd.f32 %v1324_v33, %v657_v45  ;;  %v580_v51 = vadd.f32 %v1324_v33, %v579_v49 }
  0xd7   : > { %vm717_vm6 = vcmp.gt.f32.partialorder %v618_v46, 0.0  ;;  %v781_v52 = vmul.f32 0.1, %v618_v46  ;;  %vm686_vm8 = vcmp.gt.f32.partialorder %v540_v50, 0.0  ;;  %v750_v54 = vmul.f32 0.1, %v540_v50 }
  0xd8   : > { %vm733_vm7 = vcmp.gt.f32.partialorder %v658_v47, 0.0  ;;  %v797_v53 = vmul.f32 0.1, %v658_v47  ;;  %vm702_vm9 = vcmp.gt.f32.partialorder %v580_v51, 0.0  ;;  %v766_v55 = vmul.f32 0.1, %v580_v51 }
  0xd9   : > { %v845_v56 = vsel %vm717_vm6, %v618_v46, %v781_v52  ;;  %v814_v58 = vsel %vm686_vm8, %v540_v50, %v750_v54 }
  0xda   : > { %v861_v57 = vsel %vm733_vm7, %v658_v47, %v797_v53  ;;  %910 = vst.msk [vmem:[%s1332_s26 + $0x140] sm:$0xff] %vm869_vm1, %v845_v56  ;;  %v830_v59 = vsel %vm702_vm9, %v580_v51, %v766_v55 }
  0xdb   : > { %926 = vst.msk [vmem:[%s1332_s26 + $0x1c0] sm:$0xff] %vm869_vm1, %v861_v57 }
  0xdc   : > { %879 = vst.msk [vmem:[%s1332_s26 + $0x48] sm:$0xff] %vm869_vm1, %v814_v58  ;;  %v619_v60 = vpop.f32.mrf.mxu2  ;;  %v542_v0 = vpop.f32.mrf.mxu0 }
  0xdd   : > { %v659_v61 = vpop.f32.mrf.mxu3  ;;  %895 = vst.msk [vmem:[%s1332_s26 + $0xc8] sm:$0xff] %vm869_vm1, %v830_v59  ;;  %v620_v62 = vadd.f32 %v1324_v33, %v619_v60  ;;  %v582_v1 = vpop.f32.mrf.mxu1  ;;  %v543_v2 = vadd.f32 %v1324_v33, %v542_v0 }
  0xde   : > { %v660_v63 = vadd.f32 %v1324_v33, %v659_v61  ;;  %v583_v3 = vadd.f32 %v1324_v33, %v582_v1 }
  0xdf   : > { %vm718_vm10 = vcmp.gt.f32.partialorder %v620_v62, 0.0  ;;  %v782_v4 = vmul.f32 0.1, %v620_v62  ;;  %vm687_vm12 = vcmp.gt.f32.partialorder %v543_v2, 0.0  ;;  %v751_v6 = vmul.f32 0.1, %v543_v2 }
  0xe0   : > { %vm734_vm11 = vcmp.gt.f32.partialorder %v660_v63, 0.0  ;;  %v798_v5 = vmul.f32 0.1, %v660_v63  ;;  %vm703_vm13 = vcmp.gt.f32.partialorder %v583_v3, 0.0  ;;  %v767_v7 = vmul.f32 0.1, %v583_v3 }
  0xe1   : > { %v846_v8 = vsel %vm718_vm10, %v620_v62, %v782_v4  ;;  %v815_v10 = vsel %vm687_vm12, %v543_v2, %v751_v6 }
  0xe2   : > { %v862_v9 = vsel %vm734_vm11, %v660_v63, %v798_v5  ;;  %911 = vst.msk [vmem:[%s1332_s26 + $0x148] sm:$0xff] %vm869_vm1, %v846_v8  ;;  %v831_v11 = vsel %vm703_vm13, %v583_v3, %v767_v7 }
  0xe3   : > { %927 = vst.msk [vmem:[%s1332_s26 + $0x1c8] sm:$0xff] %vm869_vm1, %v862_v9 }
  0xe4   : > { %880 = vst.msk [vmem:[%s1332_s26 + $0x50] sm:$0xff] %vm869_vm1, %v815_v10  ;;  %v622_v12 = vpop.f32.mrf.mxu2  ;;  %v544_v16 = vpop.f32.mrf.mxu0 }
  0xe5   : > { %v662_v13 = vpop.f32.mrf.mxu3  ;;  %896 = vst.msk [vmem:[%s1332_s26 + $0xd0] sm:$0xff] %vm869_vm1, %v831_v11  ;;  %v623_v14 = vadd.f32 %v1324_v33, %v622_v12  ;;  %v584_v17 = vpop.f32.mrf.mxu1  ;;  %v545_v18 = vadd.f32 %v1324_v33, %v544_v16 }
  0xe6   : > { %v663_v15 = vadd.f32 %v1324_v33, %v662_v13  ;;  %v585_v19 = vadd.f32 %v1324_v33, %v584_v17 }
  0xe7   : > { %vm719_vm14 = vcmp.gt.f32.partialorder %v623_v14, 0.0  ;;  %v783_v20 = vmul.f32 0.1, %v623_v14  ;;  %vm688_vm0 = vcmp.gt.f32.partialorder %v545_v18, 0.0  ;;  %v752_v22 = vmul.f32 0.1, %v545_v18 }
  0xe8   : > { %vm735_vm15 = vcmp.gt.f32.partialorder %v663_v15, 0.0  ;;  %v799_v21 = vmul.f32 0.1, %v663_v15  ;;  %vm704_vm2 = vcmp.gt.f32.partialorder %v585_v19, 0.0  ;;  %v768_v23 = vmul.f32 0.1, %v585_v19 }
  0xe9   : > { %v847_v24 = vsel %vm719_vm14, %v623_v14, %v783_v20  ;;  %v816_v26 = vsel %vm688_vm0, %v545_v18, %v752_v22 }
  0xea   : > { %v863_v25 = vsel %vm735_vm15, %v663_v15, %v799_v21  ;;  %912 = vst.msk [vmem:[%s1332_s26 + $0x150] sm:$0xff] %vm869_vm1, %v847_v24  ;;  %v832_v27 = vsel %vm704_vm2, %v585_v19, %v768_v23 }
  0xeb   : > { %928 = vst.msk [vmem:[%s1332_s26 + $0x1d0] sm:$0xff] %vm869_vm1, %v863_v25 }
  0xec   : > { %881 = vst.msk [vmem:[%s1332_s26 + $0x58] sm:$0xff] %vm869_vm1, %v816_v26  ;;  %v624_v28 = vpop.f32.mrf.mxu2  ;;  %v547_v32 = vpop.f32.mrf.mxu0 }
  0xed   : > { %v664_v29 = vpop.f32.mrf.mxu3  ;;  %897 = vst.msk [vmem:[%s1332_s26 + $0xd8] sm:$0xff] %vm869_vm1, %v832_v27  ;;  %v625_v30 = vadd.f32 %v1324_v33, %v624_v28  ;;  %v587_v34 = vpop.f32.mrf.mxu1  ;;  %v548_v35 = vadd.f32 %v1324_v33, %v547_v32 }
  0xee   : > { %v665_v31 = vadd.f32 %v1324_v33, %v664_v29  ;;  %v588_v36 = vadd.f32 %v1324_v33, %v587_v34 }
  0xef   : > { %vm720_vm3 = vcmp.gt.f32.partialorder %v625_v30, 0.0  ;;  %v784_v37 = vmul.f32 0.1, %v625_v30  ;;  %vm689_vm5 = vcmp.gt.f32.partialorder %v548_v35, 0.0  ;;  %v753_v39 = vmul.f32 0.1, %v548_v35 }
  0xf0   : > { %vm736_vm4 = vcmp.gt.f32.partialorder %v665_v31, 0.0  ;;  %v800_v38 = vmul.f32 0.1, %v665_v31  ;;  %vm705_vm6 = vcmp.gt.f32.partialorder %v588_v36, 0.0  ;;  %v769_v40 = vmul.f32 0.1, %v588_v36 }
  0xf1   : > { %v848_v41 = vsel %vm720_vm3, %v625_v30, %v784_v37  ;;  %v817_v43 = vsel %vm689_vm5, %v548_v35, %v753_v39 }
  0xf2   : > { %v864_v42 = vsel %vm736_vm4, %v665_v31, %v800_v38  ;;  %913 = vst.msk [vmem:[%s1332_s26 + $0x158] sm:$0xff] %vm869_vm1, %v848_v41  ;;  %v833_v44 = vsel %vm705_vm6, %v588_v36, %v769_v40 }
  0xf3   : > { %929 = vst.msk [vmem:[%s1332_s26 + $0x1d8] sm:$0xff] %vm869_vm1, %v864_v42 }
  0xf4   : > { %882 = vst.msk [vmem:[%s1332_s26 + $0x60] sm:$0xff] %vm869_vm1, %v817_v43  ;;  %v627_v45 = vpop.f32.mrf.mxu2  ;;  %v549_v49 = vpop.f32.mrf.mxu0 }
  0xf5   : > { %v667_v46 = vpop.f32.mrf.mxu3  ;;  %898 = vst.msk [vmem:[%s1332_s26 + $0xe0] sm:$0xff] %vm869_vm1, %v833_v44  ;;  %v628_v47 = vadd.f32 %v1324_v33, %v627_v45  ;;  %v589_v50 = vpop.f32.mrf.mxu1  ;;  %v550_v51 = vadd.f32 %v1324_v33, %v549_v49 }
  0xf6   : > { %v668_v48 = vadd.f32 %v1324_v33, %v667_v46  ;;  %v590_v52 = vadd.f32 %v1324_v33, %v589_v50 }
  0xf7   : > { %vm721_vm7 = vcmp.gt.f32.partialorder %v628_v47, 0.0  ;;  %v785_v53 = vmul.f32 0.1, %v628_v47  ;;  %vm690_vm9 = vcmp.gt.f32.partialorder %v550_v51, 0.0  ;;  %v754_v55 = vmul.f32 0.1, %v550_v51 }
  0xf8   : > { %vm737_vm8 = vcmp.gt.f32.partialorder %v668_v48, 0.0  ;;  %v801_v54 = vmul.f32 0.1, %v668_v48  ;;  %vm706_vm10 = vcmp.gt.f32.partialorder %v590_v52, 0.0  ;;  %v770_v56 = vmul.f32 0.1, %v590_v52 }
  0xf9   : > { %v849_v57 = vsel %vm721_vm7, %v628_v47, %v785_v53  ;;  %v818_v59 = vsel %vm690_vm9, %v550_v51, %v754_v55 }
  0xfa   : > { %v865_v58 = vsel %vm737_vm8, %v668_v48, %v801_v54  ;;  %914 = vst.msk [vmem:[%s1332_s26 + $0x160] sm:$0xff] %vm869_vm1, %v849_v57  ;;  %v834_v60 = vsel %vm706_vm10, %v590_v52, %v770_v56 }
  0xfb   : > { %930 = vst.msk [vmem:[%s1332_s26 + $0x1e0] sm:$0xff] %vm869_vm1, %v865_v58 }
  0xfc   : > { %883 = vst.msk [vmem:[%s1332_s26 + $0x68] sm:$0xff] %vm869_vm1, %v818_v59  ;;  %v629_v61 = vpop.f32.mrf.mxu2  ;;  %v552_v1 = vpop.f32.mrf.mxu0 }
  0xfd   : > { %v669_v62 = vpop.f32.mrf.mxu3  ;;  %899 = vst.msk [vmem:[%s1332_s26 + $0xe8] sm:$0xff] %vm869_vm1, %v834_v60  ;;  %v630_v63 = vadd.f32 %v1324_v33, %v629_v61  ;;  %v592_v2 = vpop.f32.mrf.mxu1  ;;  %v553_v3 = vadd.f32 %v1324_v33, %v552_v1 }
  0xfe   : > { %v670_v0 = vadd.f32 %v1324_v33, %v669_v62  ;;  %v593_v4 = vadd.f32 %v1324_v33, %v592_v2 }
  0xff   : > { %vm722_vm11 = vcmp.gt.f32.partialorder %v630_v63, 0.0  ;;  %v786_v5 = vmul.f32 0.1, %v630_v63  ;;  %vm691_vm13 = vcmp.gt.f32.partialorder %v553_v3, 0.0  ;;  %v755_v7 = vmul.f32 0.1, %v553_v3 }
 0x100   : > { %vm738_vm12 = vcmp.gt.f32.partialorder %v670_v0, 0.0  ;;  %v802_v6 = vmul.f32 0.1, %v670_v0  ;;  %vm707_vm14 = vcmp.gt.f32.partialorder %v593_v4, 0.0  ;;  %v771_v8 = vmul.f32 0.1, %v593_v4 }
 0x101   : > { %v850_v9 = vsel %vm722_vm11, %v630_v63, %v786_v5  ;;  %v819_v11 = vsel %vm691_vm13, %v553_v3, %v755_v7 }
 0x102   : > { %v866_v10 = vsel %vm738_vm12, %v670_v0, %v802_v6  ;;  %915 = vst.msk [vmem:[%s1332_s26 + $0x168] sm:$0xff] %vm869_vm1, %v850_v9  ;;  %v835_v12 = vsel %vm707_vm14, %v593_v4, %v771_v8 }
 0x103   : > { %931 = vst.msk [vmem:[%s1332_s26 + $0x1e8] sm:$0xff] %vm869_vm1, %v866_v10 }
 0x104   : > { %884 = vst.msk [vmem:[%s1332_s26 + $0x70] sm:$0xff] %vm869_vm1, %v819_v11  ;;  %v632_v13 = vpop.f32.mrf.mxu2  ;;  %v554_v17 = vpop.f32.mrf.mxu0 }
 0x105   : > { %v672_v14 = vpop.f32.mrf.mxu3  ;;  %900 = vst.msk [vmem:[%s1332_s26 + $0xf0] sm:$0xff] %vm869_vm1, %v835_v12  ;;  %v633_v15 = vadd.f32 %v1324_v33, %v632_v13  ;;  %v594_v18 = vpop.f32.mrf.mxu1  ;;  %v555_v19 = vadd.f32 %v1324_v33, %v554_v17 }
 0x106   : > { %v673_v16 = vadd.f32 %v1324_v33, %v672_v14  ;;  %v595_v20 = vadd.f32 %v1324_v33, %v594_v18 }
 0x107   : > { %vm723_vm15 = vcmp.gt.f32.partialorder %v633_v15, 0.0  ;;  %v787_v21 = vmul.f32 0.1, %v633_v15  ;;  %vm692_vm2 = vcmp.gt.f32.partialorder %v555_v19, 0.0  ;;  %v756_v23 = vmul.f32 0.1, %v555_v19 }
 0x108   : > { %vm739_vm0 = vcmp.gt.f32.partialorder %v673_v16, 0.0  ;;  %v803_v22 = vmul.f32 0.1, %v673_v16  ;;  %vm708_vm3 = vcmp.gt.f32.partialorder %v595_v20, 0.0  ;;  %v772_v24 = vmul.f32 0.1, %v595_v20 }
 0x109   : > { %v851_v25 = vsel %vm723_vm15, %v633_v15, %v787_v21  ;;  %v820_v27 = vsel %vm692_vm2, %v555_v19, %v756_v23 }
 0x10a   : > { %v867_v26 = vsel %vm739_vm0, %v673_v16, %v803_v22  ;;  %916 = vst.msk [vmem:[%s1332_s26 + $0x170] sm:$0xff] %vm869_vm1, %v851_v25  ;;  %v836_v28 = vsel %vm708_vm3, %v595_v20, %v772_v24 }
 0x10b   : > { %932 = vst.msk [vmem:[%s1332_s26 + $0x1f0] sm:$0xff] %vm869_vm1, %v867_v26 }
 0x10c   : > { %885 = vst.msk [vmem:[%s1332_s26 + $0x78] sm:$0xff] %vm869_vm1, %v820_v27  ;;  %v634_v29 = vpop.f32.mrf.mxu2 }
 0x10d   : > { %v674_v30 = vpop.f32.mrf.mxu3  ;;  %901 = vst.msk [vmem:[%s1332_s26 + $0xf8] sm:$0xff] %vm869_vm1, %v836_v28  ;;  %v635_v31 = vadd.f32 %v1324_v33, %v634_v29 }
 0x10e   : > { %v675_v32 = vadd.f32 %v1324_v33, %v674_v30 }
 0x10f   : > { %vm724_vm4 = vcmp.gt.f32.partialorder %v635_v31, 0.0  ;;  %v788_v34 = vmul.f32 0.1, %v635_v31 }
 0x110   : > { %vm740_vm5 = vcmp.gt.f32.partialorder %v675_v32, 0.0  ;;  %v804_v35 = vmul.f32 0.1, %v675_v32 }
 0x111   : > { %v852_v36 = vsel %vm724_vm4, %v635_v31, %v788_v34 }
 0x112   : > { %v868_v37 = vsel %vm740_vm5, %v675_v32, %v804_v35  ;;  %917 = vst.msk [vmem:[%s1332_s26 + $0x178] sm:$0xff] %vm869_vm1, %v852_v36 }
 0x113   : > { %933 = vst.msk [vmem:[%s1332_s26 + $0x1f8] sm:$0xff] %vm869_vm1, %v868_v37 }
 0x114 PF: > { %s13_s12 = sadd.s32 1, %s1216_s12  }
 0x115   : > { %p10_p4 = scmp.ge.s32.totalorder %s13_s12, 5  }
 0x117   :  { %12 = sbr.rel (!%p10_p4) target bundleno = 1 (0x1), region = 62 }

// kernel: feed_forward.3
= control target key start
LH: loop header
LB: loop body
LE: loop exit
PB: predicated region body
PF: predicated region fallthrough
CT: control target
= control target key end

     0   :  { %s7654_s24 = smov 0   ;;  %s7656_s25 = smov 0   ;;  %s10287_s0 = inlined_call_operand.vmem [shape: f32[6,18,18,11], index: 0, kind: input, shape index: {}]   ;;  %s10288_s1 = inlined_call_operand.vmem [shape: bf16[9,11,8], index: 1, kind: input, shape index: {}]   ;;  %s10289_s2 = inlined_call_operand.vmem [shape: f32[1,8], index: 2, kind: input, shape index: {}]   ;;  %s10290_s3 = inlined_call_operand.vmem [shape: bf16[30,9,8,8], index: 3, kind: input, shape index: {}]   ;;  %s10291_s4 = inlined_call_operand.vmem [shape: f32[30,1,8], index: 4, kind: input, shape index: {}]   ;;  %s10292_s5 = inlined_call_operand.vmem [shape: bf16[30,9,8,8], index: 5, kind: input, shape index: {}]   ;;  %s10293_s6 = inlined_call_operand.vmem [shape: f32[30,1,8], index: 6, kind: input, shape index: {}]   ;;  %s10294_s7 = inlined_call_operand.vmem [shape: bf16[6,16,16,8], index: 7, kind: output, shape index: {}]  }
   0x1   :  { %s7658_s26 = smov 0   ;;  %s7660_s27 = smov 0  }
   0x2   :  { %s7662_s28 = smov 0  }
   0x3 LB: > { %s26_s29 = sadd.s32 1, %s7602_s26  ;;  %s29_s30 = sadd.s32 1, %s7606_s27  ;;  %s7610_s28 = sphi %s7662_s28, %s17_s28   ;;  %s7606_s27 = sphi %s7660_s27, %s10428_s27   ;;  %s7602_s26 = sphi %s7658_s26, %s10427_s26   ;;  %s7598_s25 = sphi %s7656_s25, %s10426_s25   ;;  %s7594_s24 = sphi %s7654_s24, %s10425_s24  }
   0x4   : > { %p27_p0 = scmp.ge.s32.totalorder %s26_s29, 31  ;;  %p6835_p1 = scmp.ge.s32.totalorder %s7610_s28, 1 }
   0x5   : > { %p249_p2 = scmp.lt.s32.totalorder %s7610_s28, 187 }
   0x6   : > { %s10430_s29 = smov (%p27_p0, %s26_s29), 0  ;;  %s10432_s30 = smov (!%p27_p0, %s29_s30), %s7606_s27 }
   0x7   : > { %p250_p3 = pnand %p6835_p1, %p249_p2  ;;  %p31_p4 = scmp.ge.s32.totalorder %s10432_s30, 6 }
   0x8   : > { %p281_p5 = scmp.lt.s32.totalorder (!%p250_p3), %s7598_s25, 5  ;;  %p6839_p6 = scmp.ne.s32.totalorder (!%p250_p3), %s7594_s24, 0 }
   0x9   : > { %s10434_s30 = smov (%p31_p4, %s10432_s30), 0  ;;  %253 = sbr.rel (%p250_p3) target bundleno = 2220 (0x8ac), region = 48 }
   0xe   : > { %s10436_s25 = smov (!%p281_p5, %s7598_s25), 5  ;;  %295 = sbr.rel (%p6839_p6) target bundleno = 740 (0x2e4), region = 52 }
   0xf   : > { %s7524_s8 = smul.u32 432, %s10436_s25  ;;  %s7507_s9 = sshll.u32 %s10436_s25, 7 }
  0x10   : > { %s7689_s12 = scalar_lea.vmem %s10294_s7, %s7507_s9 }
  0x11   : > { %s7694_s15 = scalar_lea.vmem %s10287_s0, %s7524_s8 }
  0x13   : > { %v6842_v0 = vld [vmem:[%s10288_s1 + $0x8] sm:$0xf]  ;;  %v7509_v1 = vld [vmem:[%s10288_s1 + $0x8] sm:$0x30]  ;;  %vm575_vm0 = vcmask 1044480   ;;  %vm576_vm1 = vcmask 1045504  }
  0x14   : > { %v6843_v2 = vor.u32 %v7509_v1, %v6842_v0  ;;  %v481_v3 = vld [vmem:[%s7694_s15 + $0x61] sm:$0xff]  ;;  %v482_v4 = vld [vmem:[%s7694_s15 + $0x69] sm:$0xff]  ;;  %v7612_v6 = vmov 65535   ;;  %v7510_v13 = vld [vmem:[%s10288_s1 + $0x10] sm:$0x30]  ;;  %vm526_vm2 = vcmask 89088  }
  0x15   : > { %v489_v5 = vld [vmem:[%s7694_s15 + $0xc1] sm:$0xff]  ;;  %v577_v7 = vsel %vm575_vm0, 4294967295, %v7612_v6  ;;  %v490_v8 = vld [vmem:[%s7694_s15 + $0xc9] sm:$0xff]  ;;  %v6934_v18 = vld [vmem:[%s10288_s1 + $0x18] sm:$0xf]  ;;  %v7726_v20 = vpack.c.bf16 %v482_v4, %v481_v3  ;;  %vm296_vm3 = vcmask 64512  }
  0x16   : > { %v497_v9 = vld [vmem:[%s7694_s15 + $0x121] sm:$0xff]  ;;  %v498_v10 = vld [vmem:[%s7694_s15 + $0x129] sm:$0xff]  ;;  %v7709_v11 = vsel %vm576_vm1, %v577_v7, 0  ;;  %v7511_v19 = vld [vmem:[%s10288_s1 + $0x18] sm:$0x30]  ;;  %v7728_v21 = vpack.c.bf16 %v490_v8, %v489_v5  ;;  %vm299_vm5 = vcmask 58368  }
  0x17   : > { %v6882_v12 = vld [vmem:[%s10288_s1 + $0x10] sm:$0xf]  ;;  %v473_v14 = vld [vmem:[%s7694_s15 + $0x1] sm:$0xff]  ;;  %v580_v15 = vand.u32 %v6843_v2, %v7709_v11  ;;  %v7730_v22 = vpack.c.bf16 %v498_v10, %v497_v9  ;;  %v6935_v23 = vor.u32 %v7511_v19, %v6934_v18  ;;  %v483_v35 = vld [vmem:[%s7694_s15 + $0x79] sm:$0xff] }
  0x18   : > { %v6883_v16 = vor.u32 %v7510_v13, %v6882_v12  ;;  %v474_v17 = vld [vmem:[%s7694_s15 + $0x9] sm:$0xff]  ;;  %v6862_v24 = vld [vmem:[%s10288_s1] sm:$0xf]  ;;  %v7508_v25 = vld [vmem:[%s10288_s1] sm:$0x30] }
  0x19   : > { %v6986_v26 = vld [vmem:[%s10288_s1 + $0x20] sm:$0xf]  ;;  %7519 = vmatpush.bf16.msra.mxu1 %v580_v15  ;;  %7520 = vmatpush.bf16.msra.mxu2 %v580_v15  ;;  %v505_v28 = vpack.c.bf16 %v474_v17, %v473_v14  ;;  %v6863_v29 = vor.u32 %v7508_v25, %v6862_v24  ;;  %v7512_v30 = vld [vmem:[%s10288_s1 + $0x20] sm:$0x30]  ;;  %v1144_v31 = vand.u32 %v6935_v23, %v7709_v11  ;;  %v485_v47 = vld [vmem:[%s7694_s15 + $0x91] sm:$0xff] }
  0x1a   : > { %v918_v27 = vand.u32 %v6883_v16, %v7709_v11  ;;  %7521 = vmatpush.bf16.msra.mxu3 %v580_v15  ;;  %589 = vmatpush.bf16.msra.mxu0 %v580_v15  ;;  %v6987_v32 = vor.u32 %v7512_v30, %v6986_v26  ;;  %v484_v36 = vld [vmem:[%s7694_s15 + $0x81] sm:$0xff]  ;;  %v491_v37 = vld [vmem:[%s7694_s15 + $0xd9] sm:$0xff]  ;;  %v493_v49 = vld [vmem:[%s7694_s15 + $0xf1] sm:$0xff] }
  0x1b   : > { %v725_v33 = vand.u32 %v6863_v29, %v7709_v11  ;;  %v492_v38 = vld [vmem:[%s7694_s15 + $0xe1] sm:$0xff]  ;;  %v499_v39 = vld [vmem:[%s7694_s15 + $0x139] sm:$0xff]  ;;  %v7763_v43 = vpack.c.bf16 %v484_v36, %v483_v35  ;;  %v501_v51 = vld [vmem:[%s7694_s15 + $0x151] sm:$0xff] }
  0x1c   : > { %6848 = vmatmul.msk.bf16.vlgmr.msra.gmra.mxu1 %vm526_vm2, %v7726_v20  ;;  %6852 = vmatmul.msk.bf16.vlgmr.msra.gmra.mxu2 %vm526_vm2, %v7728_v21  ;;  %v1369_v34 = vand.u32 %v6987_v32, %v7709_v11  ;;  %v500_v40 = vld [vmem:[%s7694_s15 + $0x141] sm:$0xff]  ;;  %v475_v41 = vld [vmem:[%s7694_s15 + $0x19] sm:$0xff]  ;;  %v7765_v44 = vpack.c.bf16 %v492_v38, %v491_v37  ;;  %v477_v53 = vld [vmem:[%s7694_s15 + $0x31] sm:$0xff] }
  0x1d   : > { %927 = vmatpush.bf16.msrb.mxu2 %v918_v27  ;;  %6856 = vmatmul.msk.bf16.vlgmr.msra.gmra.mxu3 %vm526_vm2, %v7730_v22  ;;  %v476_v42 = vld [vmem:[%s7694_s15 + $0x21] sm:$0xff]  ;;  %v7767_v45 = vpack.c.bf16 %v500_v40, %v499_v39  ;;  %v486_v48 = vld [vmem:[%s7694_s15 + $0x99] sm:$0xff]  ;;  %v7090_v59 = vld [vmem:[%s10288_s1 + $0x30] sm:$0xf] }
  0x1e   : > { %6844 = vmatmul.msk.bf16.vlgmr.msra.gmra.mxu0 %vm526_vm2, %v505_v28  ;;  %1153 = vmatpush.bf16.msrb.mxu3 %v1144_v31  ;;  %v7769_v46 = vpack.c.bf16 %v476_v42, %v475_v41  ;;  %v494_v50 = vld [vmem:[%s7694_s15 + $0xf9] sm:$0xff]  ;;  %v7787_v55 = vpack.c.bf16 %v486_v48, %v485_v47  ;;  %v7514_v60 = vld [vmem:[%s10288_s1 + $0x30] sm:$0x30]  ;;  %v7038_v0 = vld [vmem:[%s10288_s1 + $0x28] sm:$0xf] }
  0x1f   : > { %734 = vmatpush.bf16.msrb.mxu1 %v725_v33  ;;  %1378 = vmatpush.bf16.msrb.mxu0 %v1369_v34  ;;  %v502_v52 = vld [vmem:[%s7694_s15 + $0x159] sm:$0xff]  ;;  %v7789_v56 = vpack.c.bf16 %v494_v50, %v493_v49  ;;  %v7091_v62 = vor.u32 %v7514_v60, %v7090_v59  ;;  %v7513_v1 = vld [vmem:[%s10288_s1 + $0x28] sm:$0x30]  ;;  %v7516_v5 = vld [vmem:[%s10288_s1 + $0x40] sm:$0x30] }
  0x20   : > { %v478_v54 = vld [vmem:[%s7694_s15 + $0x39] sm:$0xff]  ;;  %v7791_v57 = vpack.c.bf16 %v502_v52, %v501_v51  ;;  %v7039_v3 = vor.u32 %v7513_v1, %v7038_v0  ;;  %v487_v12 = vld [vmem:[%s7694_s15 + $0xa9] sm:$0xff]  ;;  %v488_v13 = vld [vmem:[%s7694_s15 + $0xb1] sm:$0xff] }
  0x21   : > { %v7793_v58 = vpack.c.bf16 %v478_v54, %v477_v53  ;;  %v7142_v61 = vld [vmem:[%s10288_s1 + $0x38] sm:$0xf]  ;;  %v7515_v63 = vld [vmem:[%s10288_s1 + $0x38] sm:$0x30]  ;;  %v7194_v4 = vld [vmem:[%s10288_s1 + $0x40] sm:$0xf]  ;;  %v1820_v6 = vand.u32 %v7091_v62, %v7709_v11  ;;  %v7839_v23 = vpack.c.bf16 %v488_v13, %v487_v12 }
  0x22   : > { %v7143_v2 = vor.u32 %v7515_v63, %v7142_v61  ;;  %v7195_v7 = vor.u32 %v7516_v5, %v7194_v4  ;;  %v1594_v9 = vand.u32 %v7039_v3, %v7709_v11  ;;  %v495_v14 = vld [vmem:[%s7694_s15 + $0x109] sm:$0xff]  ;;  %v496_v15 = vld [vmem:[%s7694_s15 + $0x111] sm:$0xff]  ;;  %v425_v26 = vld [vmem:[%s7694_s15] sm:$0xff] }
  0x23   : > { %1829 = vmatpush.bf16.msra.mxu2 %v1820_v6  ;;  %v503_v16 = vld [vmem:[%s7694_s15 + $0x169] sm:$0xff]  ;;  %v504_v17 = vld [vmem:[%s7694_s15 + $0x171] sm:$0xff]  ;;  %v6901_v31 = vld [vmem:[%s7694_s15 + $0x20] sm:$0xff] }
  0x24   : > { %v2045_v8 = vand.u32 %v7143_v2, %v7709_v11  ;;  %v2270_v10 = vand.u32 %v7195_v7, %v7709_v11  ;;  %1603 = vmatpush.bf16.msra.mxu1 %v1594_v9  ;;  %v479_v18 = vld [vmem:[%s7694_s15 + $0x49] sm:$0xff]  ;;  %v480_v19 = vld [vmem:[%s7694_s15 + $0x51] sm:$0xff]  ;;  %v7841_v11 = vpack.c.bf16 %v496_v15, %v495_v14  ;;  %v7843_v24 = vpack.c.bf16 %v504_v17, %v503_v16  ;;  %v818_v35 = vld [vmem:[%s7694_s15 + $0x1a] sm:$0xff] }
  0x25   : > { %v7845_v25 = vpack.c.bf16 %v480_v19, %v479_v18  ;;  %v426_v27 = vld [vmem:[%s7694_s15 + $0x8] sm:$0xff]  ;;  %v6900_v30 = vld [vmem:[%s7694_s15 + $0x18] sm:$0xff]  ;;  %v6902_v37 = vld [vmem:[%s7694_s15 + $0x30] sm:$0xff] }
  0x26   : > { %2054 = vmatpush.bf16.msra.mxu3 %v2045_v8  ;;  %2279 = vmatpush.bf16.msra.mxu0 %v2270_v10  ;;  %v816_v28 = vld [vmem:[%s7694_s15 + $0x2] sm:$0xff]  ;;  %v817_v29 = vld [vmem:[%s7694_s15 + $0xa] sm:$0xff]  ;;  %v457_v32 = vpack.c.bf16 %v426_v27, %v425_v26  ;;  %v1074_v34 = vpack.c.bf16 %v6901_v31, %v6900_v30  ;;  %v6903_v38 = vld [vmem:[%s7694_s15 + $0x38] sm:$0xff] }
  0x27   : > { %v848_v33 = vpack.c.bf16 %v817_v29, %v816_v28  ;;  %v819_v36 = vld [vmem:[%s7694_s15 + $0x22] sm:$0xff]  ;;  %v7872_v40 = vpack.c.bf16 %v6903_v38, %v6902_v37  ;;  %v820_v41 = vld [vmem:[%s7694_s15 + $0x32] sm:$0xff]  ;;  %v821_v42 = vld [vmem:[%s7694_s15 + $0x3a] sm:$0xff] }
  0x28   : > { %v7870_v39 = vpack.c.bf16 %v819_v36, %v818_v35  ;;  %v6905_v47 = vld [vmem:[%s7694_s15 + $0x50] sm:$0xff]  ;;  %v7885_v48 = vpack.c.bf16 %v821_v42, %v820_v41  ;;  %v6906_v52 = vld [vmem:[%s7694_s15 + $0x60] sm:$0xff]  ;;  %v6907_v53 = vld [vmem:[%s7694_s15 + $0x68] sm:$0xff] }
  0x29   : > { %v822_v50 = vld [vmem:[%s7694_s15 + $0x4a] sm:$0xff]  ;;  %v823_v51 = vld [vmem:[%s7694_s15 + $0x52] sm:$0xff]  ;;  %v7903_v59 = vpack.c.bf16 %v6907_v53, %v6906_v52  ;;  %v824_v60 = vld [vmem:[%s7694_s15 + $0x62] sm:$0xff] }
  0x2a   : > { %v7901_v54 = vpack.c.bf16 %v823_v51, %v822_v50  ;;  %v825_v61 = vld [vmem:[%s7694_s15 + $0x6a] sm:$0xff]  ;;  %v6908_v62 = vld [vmem:[%s7694_s15 + $0x78] sm:$0xff]  ;;  %v6909_v63 = vld [vmem:[%s7694_s15 + $0x80] sm:$0xff] }
  0x2b   : > { %v7917_v0 = vpack.c.bf16 %v825_v61, %v824_v60  ;;  %v7921_v2 = vpack.c.bf16 %v6909_v63, %v6908_v62  ;;  %v826_v7 = vld [vmem:[%s7694_s15 + $0x7a] sm:$0xff]  ;;  %v827_v8 = vld [vmem:[%s7694_s15 + $0x82] sm:$0xff]  ;;  %v6910_v9 = vld [vmem:[%s7694_s15 + $0x90] sm:$0xff] }
  0x2c   : > { %6849 = vmatmul.msk.bf16.gmra.mxu1 %vm526_vm2, %v7763_v43  ;;  %6853 = vmatmul.msk.bf16.gmra.mxu2 %vm526_vm2, %v7765_v44  ;;  %v6911_v10 = vld [vmem:[%s7694_s15 + $0x98] sm:$0xff]  ;;  %v6912_v29 = vld [vmem:[%s7694_s15 + $0xa8] sm:$0xff]  ;;  %v6913_v30 = vld [vmem:[%s7694_s15 + $0xb0] sm:$0xff] }
  0x2d   : > { %6857 = vmatmul.msk.bf16.gmra.mxu3 %vm526_vm2, %v7767_v45  ;;  %v7953_v15 = vpack.c.bf16 %v6911_v10, %v6910_v9  ;;  %v828_v27 = vld [vmem:[%s7694_s15 + $0x92] sm:$0xff]  ;;  %v829_v28 = vld [vmem:[%s7694_s15 + $0x9a] sm:$0xff]  ;;  %v830_v42 = vld [vmem:[%s7694_s15 + $0xaa] sm:$0xff] }
  0x2e   : > { %6845 = vmatmul.msk.bf16.gmra.mxu0 %vm526_vm2, %v7769_v46  ;;  %v6915_v50 = vld [vmem:[%s7694_s15 + $0xc8] sm:$0xff] }
  0x2f   : > { %v832_v9 = vld [vmem:[%s7694_s15 + $0xc2] sm:$0xff]  ;;  %v833_v10 = vld [vmem:[%s7694_s15 + $0xca] sm:$0xff] }
  0x3c   : > { %6850 = vmatmul.msk.bf16.gmra.mxu1 %vm526_vm2, %v7787_v55  ;;  %6854 = vmatmul.msk.bf16.gmra.mxu2 %vm526_vm2, %v7789_v56 }
  0x3d   : > { %6858 = vmatmul.msk.bf16.gmra.mxu3 %vm526_vm2, %v7791_v57 }
  0x3e   : > { %6846 = vmatmul.msk.bf16.gmra.mxu0 %vm526_vm2, %v7793_v58 }
  0x4c   : > { %6851 = vmatmul.msk.bf16.gmra.mxu1 %vm526_vm2, %v7839_v23  ;;  %6855 = vmatmul.msk.bf16.gmra.mxu2 %vm526_vm2, %v7841_v11 }
  0x4d   : > { %6859 = vmatmul.msk.bf16.gmra.mxu3 %vm526_vm2, %v7843_v24 }
  0x4e   : > { %6847 = vmatmul.msk.bf16.gmra.mxu0 %vm526_vm2, %v7845_v25 }
  0x5c   : > { %6864 = vmatmul.msk.bf16.vlgmr.msrb.gmra.mxu1 %vm526_vm2, %v457_v32  ;;  %6884 = vmatmul.msk.bf16.vlgmr.msrb.gmra.mxu2 %vm526_vm2, %v848_v33 }
  0x5d   : > { %6936 = vmatmul.msk.bf16.vlgmr.msrb.gmra.mxu3 %vm526_vm2, %v1074_v34 }
  0x5e   : > { %6988 = vmatmul.msk.bf16.vlgmr.msrb.gmra.mxu0 %vm526_vm2, %v7769_v46  ;;  %v6904_v46 = vld [vmem:[%s7694_s15 + $0x48] sm:$0xff] }
  0x5f   : > { %v7887_v49 = vpack.c.bf16 %v6905_v47, %v6904_v46  ;;  %v831_v46 = vld [vmem:[%s7694_s15 + $0xb2] sm:$0xff]  ;;  %v6914_v47 = vld [vmem:[%s7694_s15 + $0xc0] sm:$0xff] }
  0x60   : > { %v8017_v60 = vpack.c.bf16 %v6915_v50, %v6914_v47 }
  0x62   : > { %10330 = vst [vmem:[#allocation11_spill] sm:$0xff] %v8017_v60 }
  0x6c   : > { %6865 = vmatmul.msk.bf16.gmra.mxu1 %vm526_vm2, %v1074_v34  ;;  %6885 = vmatmul.msk.bf16.gmra.mxu2 %vm526_vm2, %v7870_v39  ;;  %v7985_v34 = vpack.c.bf16 %v6913_v30, %v6912_v29 }
  0x6d   : > { %6937 = vmatmul.msk.bf16.gmra.mxu3 %vm526_vm2, %v7872_v40 }
  0x6e   : > { %6989 = vmatmul.msk.bf16.gmra.mxu0 %vm526_vm2, %v7793_v58  ;;  %10326 = vst [vmem:[#allocation7_spill] sm:$0xff] %v7985_v34 }
  0x7c   : > { %6866 = vmatmul.msk.bf16.gmra.mxu1 %vm526_vm2, %v7872_v40  ;;  %6886 = vmatmul.msk.bf16.gmra.mxu2 %vm526_vm2, %v7885_v48 }
  0x7d   : > { %6938 = vmatmul.msk.bf16.gmra.mxu3 %vm526_vm2, %v7887_v49 }
  0x7e   : > { %6990 = vmatmul.msk.bf16.gmra.mxu0 %vm526_vm2, %v7845_v25 }
  0x8c   : > { %6867 = vmatmul.msk.bf16.gmra.mxu1 %vm526_vm2, %v7887_v49  ;;  %6887 = vmatmul.msk.bf16.gmra.mxu2 %vm526_vm2, %v7901_v54 }
  0x8d   : > { %6939 = vmatmul.msk.bf16.gmra.mxu3 %vm526_vm2, %v7903_v59 }
  0x8e   : > { %6991 = vmatmul.msk.bf16.gmra.mxu0 %vm526_vm2, %v7726_v20 }
  0x99   : > { %v7919_v1 = vpop.f32.mrf.mxu1 }
  0x9b   : > { %v7923_v3 = vpop.f32.mrf.mxu0 }
  0x9c   : > { %6868 = vmatmul.msk.bf16.gmra.mxu1 %vm526_vm2, %v7903_v59  ;;  %6888 = vmatmul.msk.bf16.gmra.mxu2 %vm526_vm2, %v7917_v0 }
  0x9d   : > { %6940 = vmatmul.msk.bf16.gmra.mxu3 %vm526_vm2, %v7921_v2 }
  0x9e   : > { %6992 = vmatmul.msk.bf16.gmra.mxu0 %vm526_vm2, %v7763_v43  ;;  %v7949_v43 = vpack.c.bf16 %v827_v8, %v826_v7 }
  0x9f   : > { %v7933_v20 = vpop.f32.mrf.mxu2 }
  0xa0   : > { %v7935_v4 = vpop.f32.mrf.mxu3 }
  0xa1   : > { %v7937_v5 = vpop.f32.mrf.mxu1 }
  0xa3   : > { %v7939_v6 = vpop.f32.mrf.mxu0 }
  0xa7   : > { %v7945_v12 = vpop.f32.mrf.mxu2 }
  0xa8   : > { %v7947_v13 = vpop.f32.mrf.mxu3 }
  0xa9   : > { %10323 = vst [vmem:[#allocation4_spill] sm:$0xff] %v7947_v13  ;;  %v7951_v14 = vpop.f32.mrf.mxu1 }
  0xab   : > { %v7955_v16 = vpop.f32.mrf.mxu0 }
  0xac   : > { %6869 = vmatmul.msk.bf16.gmra.mxu1 %vm526_vm2, %v7921_v2  ;;  %6889 = vmatmul.msk.bf16.gmra.mxu2 %vm526_vm2, %v7949_v43 }
  0xad   : > { %6941 = vmatmul.msk.bf16.gmra.mxu3 %vm526_vm2, %v7953_v15 }
  0xae   : > { %6993 = vmatmul.msk.bf16.gmra.mxu0 %vm526_vm2, %v7787_v55  ;;  %v7981_v55 = vpack.c.bf16 %v829_v28, %v828_v27  ;;  %v6916_v27 = vld [vmem:[%s7694_s15 + $0xd8] sm:$0xff]  ;;  %v6917_v28 = vld [vmem:[%s7694_s15 + $0xe0] sm:$0xff] }
  0xaf   : > { %v7965_v17 = vpop.f32.mrf.mxu2 }
  0xb0   : > { %v7967_v18 = vpop.f32.mrf.mxu3 }
  0xb1   : > { %10324 = vst [vmem:[#allocation5_spill] sm:$0xff] %v7967_v18  ;;  %v7969_v19 = vpop.f32.mrf.mxu1 }
  0xb3   : > { %v7971_v26 = vpop.f32.mrf.mxu0 }
  0xb7   : > { %v7977_v31 = vpop.f32.mrf.mxu2 }
  0xb8   : > { %v7979_v32 = vpop.f32.mrf.mxu3 }
  0xb9   : > { %10325 = vst [vmem:[#allocation6_spill] sm:$0xff] %v7979_v32  ;;  %v7983_v33 = vpop.f32.mrf.mxu1  ;;  %v835_v32 = vld [vmem:[%s7694_s15 + $0xe2] sm:$0xff] }
  0xbb   : > { %v7987_v35 = vpop.f32.mrf.mxu0 }
  0xbc   : > { %6870 = vmatmul.msk.bf16.gmra.mxu1 %vm526_vm2, %v7953_v15  ;;  %6890 = vmatmul.msk.bf16.gmra.mxu2 %vm526_vm2, %v7981_v55 }
  0xbd   : > { %6942 = vmatmul.msk.bf16.gmra.mxu3 %vm526_vm2, %v7985_v34 }
  0xbe   : > { %6994 = vmatmul.msk.bf16.gmra.mxu0 %vm526_vm2, %v7839_v23  ;;  %v8013_v23 = vpack.c.bf16 %v831_v46, %v830_v42  ;;  %v8045_v42 = vpack.c.bf16 %v833_v10, %v832_v9 }
  0xbf   : > { %v7997_v36 = vpop.f32.mrf.mxu2 }
  0xc0   : > { %v7999_v37 = vpop.f32.mrf.mxu3  ;;  %10329 = vst [vmem:[#allocation10_spill] sm:$0xff] %v8013_v23 }
  0xc1   : > { %10327 = vst [vmem:[#allocation8_spill] sm:$0xff] %v7999_v37  ;;  %v8001_v38 = vpop.f32.mrf.mxu1  ;;  %v6918_v37 = vld [vmem:[%s7694_s15 + $0xf0] sm:$0xff] }
  0xc2   : > { %10333 = vst [vmem:[#allocation14_spill] sm:$0xff] %v8045_v42 }
  0xc3   : > { %v8003_v41 = vpop.f32.mrf.mxu0 }
  0xc7   : > { %v8009_v51 = vpop.f32.mrf.mxu2 }
  0xc8   : > { %v8011_v52 = vpop.f32.mrf.mxu3 }
  0xc9   : > { %10328 = vst [vmem:[#allocation9_spill] sm:$0xff] %v8011_v52  ;;  %v8015_v53 = vpop.f32.mrf.mxu1 }
  0xcb   : > { %v8019_v61 = vpop.f32.mrf.mxu0 }
  0xcc   : > { %6871 = vmatmul.msk.bf16.gmra.mxu1 %vm526_vm2, %v7985_v34  ;;  %6891 = vmatmul.msk.bf16.gmra.mxu2 %vm526_vm2, %v8013_v23 }
  0xcd   : > { %6943 = vmatmul.msk.bf16.gmra.mxu3 %vm526_vm2, %v8017_v60 }
  0xce   : > { %6995 = vmatmul.msk.bf16.gmra.mxu0 %vm526_vm2, %v7728_v21  ;;  %v8047_v21 = vpack.c.bf16 %v6917_v28, %v6916_v27 }
  0xcf   : > { %v8029_v62 = vpop.f32.mrf.mxu2 }
  0xd0   : > { %v8031_v63 = vpop.f32.mrf.mxu3 }
  0xd1   : > { %10331 = vst [vmem:[#allocation12_spill] sm:$0xff] %v8031_v63  ;;  %v8033_v7 = vpop.f32.mrf.mxu1  ;;  %v834_v63 = vld [vmem:[%s7694_s15 + $0xda] sm:$0xff] }
  0xd2   : > { %v8065_v34 = vpack.c.bf16 %v835_v32, %v834_v63 }
  0xd3   : > { %v8035_v8 = vpop.f32.mrf.mxu0 }
  0xd7   : > { %v8041_v29 = vpop.f32.mrf.mxu2 }
  0xd8   : > { %v8043_v30 = vpop.f32.mrf.mxu3 }
  0xd9   : > { %10332 = vst [vmem:[#allocation13_spill] sm:$0xff] %v8043_v30  ;;  %v736_v46 = vpop.f32.mrf.mxu1 }
  0xda   : > { %v737_v47 = vadd.f32 %v736_v46, %v7923_v3 }
  0xdb   : > { %v1380_v50 = vpop.f32.mrf.mxu0 }
  0xdc   : > { %6872 = vmatmul.msk.bf16.gmra.mxu1 %vm526_vm2, %v8017_v60  ;;  %6892 = vmatmul.msk.bf16.gmra.mxu2 %vm526_vm2, %v8045_v42  ;;  %v6919_v42 = vld [vmem:[%s7694_s15 + $0xf8] sm:$0xff] }
  0xdd   : > { %6944 = vmatmul.msk.bf16.gmra.mxu3 %vm526_vm2, %v8047_v21  ;;  %v8067_v13 = vpack.c.bf16 %v6919_v42, %v6918_v37 }
  0xde   : > { %6996 = vmatmul.msk.bf16.gmra.mxu0 %vm526_vm2, %v7765_v44 }
  0xdf   : > { %v929_v9 = vpop.f32.mrf.mxu2  ;;  %10335 = vst [vmem:[#allocation16_spill] sm:$0xff] %v8067_v13 }
  0xe0   : > { %v1009_v10 = vadd.f32 %v929_v9, %v737_v47  ;;  %v1155_v27 = vpop.f32.mrf.mxu3  ;;  %v836_v9 = vld [vmem:[%s7694_s15 + $0xf2] sm:$0xff] }
  0xe1   : > { %v738_v28 = vpop.f32.mrf.mxu1 }
  0xe2   : > { %v1235_v3 = vadd.f32 %v1155_v27, %v1009_v10  ;;  %v739_v46 = vadd.f32 %v738_v28, %v7939_v6  ;;  %v837_v10 = vld [vmem:[%s7694_s15 + $0xfa] sm:$0xff]  ;;  %v6920_v27 = vld [vmem:[%s7694_s15 + $0x108] sm:$0xff]  ;;  %v6921_v28 = vld [vmem:[%s7694_s15 + $0x110] sm:$0xff] }
  0xe3   : > { %v1382_v30 = vpop.f32.mrf.mxu0 }
  0xe4   : > { %v8059_v52 = vadd.f32 %v1380_v50, %v1235_v3 }
  0xe6   : > { %10334 = vst [vmem:[#allocation15_spill] sm:$0xff] %v8059_v52 }
  0xe7   : > { %v931_v60 = vpop.f32.mrf.mxu2 }
  0xe8   : > { %v1010_v18 = vadd.f32 %v931_v60, %v739_v46  ;;  %v1157_v23 = vpop.f32.mrf.mxu3 }
  0xe9   : > { %v741_v44 = vpop.f32.mrf.mxu1 }
  0xea   : > { %v1236_v47 = vadd.f32 %v1157_v23, %v1010_v18  ;;  %v742_v6 = vadd.f32 %v741_v44, %v7955_v16  ;;  %v8085_v44 = vpack.c.bf16 %v837_v10, %v836_v9 }
  0xeb   : > { %v1385_v50 = vpop.f32.mrf.mxu0 }
  0xec   : > { %6873 = vmatmul.msk.bf16.gmra.mxu1 %vm526_vm2, %v8047_v21  ;;  %6893 = vmatmul.msk.bf16.gmra.mxu2 %vm526_vm2, %v8065_v34  ;;  %v8074_v60 = vadd.f32 %v1382_v30, %v1236_v47  ;;  %10337 = vst [vmem:[#allocation18_spill] sm:$0xff] %v8085_v44 }
  0xed   : > { %6945 = vmatmul.msk.bf16.gmra.mxu3 %vm526_vm2, %v8067_v13 }
  0xee   : > { %10336 = vst [vmem:[#allocation17_spill] sm:$0xff] %v8074_v60  ;;  %6997 = vmatmul.msk.bf16.gmra.mxu0 %vm526_vm2, %v7789_v56  ;;  %v1084_v60 = vpack.c.bf16 %v6921_v28, %v6920_v27  ;;  %v838_v27 = vld [vmem:[%s7694_s15 + $0x10a] sm:$0xff]  ;;  %v839_v28 = vld [vmem:[%s7694_s15 + $0x112] sm:$0xff] }
  0xef   : > { %v934_v18 = vpop.f32.mrf.mxu2 }
  0xf0   : > { %v1011_v32 = vadd.f32 %v934_v18, %v742_v6  ;;  %v1160_v16 = vpop.f32.mrf.mxu3 }
  0xf1   : > { %v743_v37 = vpop.f32.mrf.mxu1 }
  0xf2   : > { %v1237_v23 = vadd.f32 %v1160_v16, %v1011_v32  ;;  %v744_v63 = vadd.f32 %v743_v37, %v7971_v26 }
  0xf3   : > { %v1387_v42 = vpop.f32.mrf.mxu0 }
  0xf4   : > { %v8095_v37 = vadd.f32 %v1385_v50, %v1237_v23 }
  0xf7   : > { %v936_v30 = vpop.f32.mrf.mxu2 }
  0xf8   : > { %v1012_v3 = vadd.f32 %v936_v30, %v744_v63  ;;  %v1162_v46 = vpop.f32.mrf.mxu3  ;;  %v6922_v30 = vld [vmem:[%s7694_s15 + $0x120] sm:$0xff] }
  0xf9   : > { %v746_v47 = vpop.f32.mrf.mxu1 }
  0xfa   : > { %v1238_v56 = vadd.f32 %v1162_v46, %v1012_v3  ;;  %v747_v6 = vadd.f32 %v746_v47, %v7987_v35  ;;  %v6923_v3 = vld [vmem:[%s7694_s15 + $0x128] sm:$0xff] }
  0xfb   : > { %v1390_v18 = vpop.f32.mrf.mxu0 }
  0xfc   : > { %6874 = vmatmul.msk.bf16.gmra.mxu1 %vm526_vm2, %v8067_v13  ;;  %6894 = vmatmul.msk.bf16.gmra.mxu2 %vm526_vm2, %v8085_v44  ;;  %v859_v44 = vpack.c.bf16 %v839_v28, %v838_v27  ;;  %v841_v27 = vld [vmem:[%s7694_s15 + $0x12a] sm:$0xff]  ;;  %v6925_v28 = vld [vmem:[%s7694_s15 + $0x140] sm:$0xff] }
  0xfd   : > { %6946 = vmatmul.msk.bf16.gmra.mxu3 %vm526_vm2, %v1084_v60 }
  0xfe   : > { %6998 = vmatmul.msk.bf16.gmra.mxu0 %vm526_vm2, %v7841_v11  ;;  %v1085_v11 = vpack.c.bf16 %v6923_v3, %v6922_v30 }
  0xff   : > { %v939_v26 = vpop.f32.mrf.mxu2 }
 0x100   : > { %v1013_v32 = vadd.f32 %v939_v26, %v747_v6  ;;  %v1165_v16 = vpop.f32.mrf.mxu3 }
 0x101   : > { %v748_v35 = vpop.f32.mrf.mxu1 }
 0x102   : > { %v1239_v63 = vadd.f32 %v1165_v16, %v1013_v32  ;;  %v749_v9 = vadd.f32 %v748_v35, %v8003_v41  ;;  %v8108_v16 = vadd.f32 %v1387_v42, %v1238_v56 }
 0x103   : > { %v1392_v10 = vpop.f32.mrf.mxu0 }
 0x107   : > { %v941_v46 = vpop.f32.mrf.mxu2 }
 0x108   : > { %v1014_v47 = vadd.f32 %v941_v46, %v749_v9  ;;  %v1167_v52 = vpop.f32.mrf.mxu3  ;;  %v840_v9 = vld [vmem:[%s7694_s15 + $0x122] sm:$0xff] }
 0x109   : > { %v751_v13 = vpop.f32.mrf.mxu1  ;;  %v860_v46 = vpack.c.bf16 %v841_v27, %v840_v9  ;;  %v842_v9 = vld [vmem:[%s7694_s15 + $0x13a] sm:$0xff] }
 0x10a   : > { %v1240_v6 = vadd.f32 %v1167_v52, %v1014_v47  ;;  %v752_v50 = vadd.f32 %v751_v13, %v8019_v61  ;;  %v8115_v47 = vadd.f32 %v1390_v18, %v1239_v63 }
 0x10b   : > { %v1395_v23 = vpop.f32.mrf.mxu0 }
 0x10c   : > { %6875 = vmatmul.msk.bf16.gmra.mxu1 %vm526_vm2, %v1084_v60  ;;  %6895 = vmatmul.msk.bf16.gmra.mxu2 %vm526_vm2, %v859_v44  ;;  %v6924_v60 = vld [vmem:[%s7694_s15 + $0x138] sm:$0xff] }
 0x10d   : > { %6947 = vmatmul.msk.bf16.gmra.mxu3 %vm526_vm2, %v1085_v11 }
 0x10e   : > { %6999 = vmatmul.msk.bf16.gmra.mxu0 %vm526_vm2, %v7730_v22 }
 0x10f   : > { %v944_v41 = vpop.f32.mrf.mxu2 }
 0x110   : > { %v1015_v26 = vadd.f32 %v944_v41, %v752_v50  ;;  %v1170_v32 = vpop.f32.mrf.mxu3  ;;  %v1086_v50 = vpack.c.bf16 %v6925_v28, %v6924_v60  ;;  %v6926_v60 = vld [vmem:[%s7694_s15 + $0x150] sm:$0xff]  ;;  %v6927_v28 = vld [vmem:[%s7694_s15 + $0x158] sm:$0xff] }
 0x111   : > { %v753_v52 = vpop.f32.mrf.mxu1 }
 0x112   : > { %v1241_v35 = vadd.f32 %v1170_v32, %v1015_v26  ;;  %v754_v13 = vadd.f32 %v753_v52, %v8035_v8  ;;  %v8123_v26 = vadd.f32 %v1392_v10, %v1240_v6 }
 0x113   : > { %v1397_v61 = vpop.f32.mrf.mxu0 }
 0x117   : > { %v946_v44 = vpop.f32.mrf.mxu2 }
 0x118   : > { %v1016_v30 = vadd.f32 %v946_v44, %v754_v13  ;;  %v1172_v3 = vpop.f32.mrf.mxu3 }
 0x119   : > { %v756_v22 = vpop.f32.mrf.mxu1 }
 0x11a   : > { %v1242_v42 = vadd.f32 %v1172_v3, %v1016_v30  ;;  %v757_v8 = vadd.f32 %v756_v22, %v7919_v1  ;;  %v1087_v22 = vpack.c.bf16 %v6927_v28, %v6926_v60  ;;  %v6929_v60 = vld [vmem:[%s7694_s15 + $0x170] sm:$0xff] }
 0x11b   : > { %v1400_v56 = vpop.f32.mrf.mxu0 }
 0x11c   : > { %6876 = vmatmul.msk.bf16.gmra.mxu1 %vm526_vm2, %v1085_v11  ;;  %6896 = vmatmul.msk.bf16.gmra.mxu2 %vm526_vm2, %v860_v46  ;;  %v843_v11 = vld [vmem:[%s7694_s15 + $0x142] sm:$0xff]  ;;  %v8130_v46 = vadd.f32 %v1395_v23, %v1241_v35 }
 0x11d   : > { %6948 = vmatmul.msk.bf16.gmra.mxu3 %vm526_vm2, %v1086_v50 }
 0x11e   : > { %7000 = vmatmul.msk.bf16.gmra.mxu0 %vm526_vm2, %v7767_v45  ;;  %v861_v45 = vpack.c.bf16 %v843_v11, %v842_v9  ;;  %v844_v9 = vld [vmem:[%s7694_s15 + $0x152] sm:$0xff] }
 0x11f   : > { %v949_v18 = vpop.f32.mrf.mxu2 }
 0x120   : > { %v1017_v63 = vadd.f32 %v949_v18, %v757_v8  ;;  %v1175_v41 = vpop.f32.mrf.mxu3  ;;  %v8138_v18 = vadd.f32 %v1397_v61, %v1242_v42 }
 0x121   : > { %v758_v32 = vpop.f32.mrf.mxu1 }
 0x122   : > { %v1243_v52 = vadd.f32 %v1175_v41, %v1017_v63  ;;  %v759_v27 = vadd.f32 %v758_v32, %v7937_v5 }
 0x123   : > { %v1402_v13 = vpop.f32.mrf.mxu0 }
 0x127   : > { %v951_v44 = vpop.f32.mrf.mxu2 }
 0x128   : > { %v1018_v30 = vadd.f32 %v951_v44, %v759_v27  ;;  %v1177_v3 = vpop.f32.mrf.mxu3  ;;  %v6928_v27 = vld [vmem:[%s7694_s15 + $0x168] sm:$0xff] }
 0x129   : > { %v761_v1 = vpop.f32.mrf.mxu1 }
 0x12a   : > { %v1244_v10 = vadd.f32 %v1177_v3, %v1018_v30  ;;  %v762_v5 = vadd.f32 %v761_v1, %v7951_v14  ;;  %v8145_v3 = vadd.f32 %v1400_v56, %v1243_v52 }
 0x12b   : > { %v1405_v6 = vpop.f32.mrf.mxu0 }
 0x12c   : > { %6877 = vmatmul.msk.bf16.gmra.mxu1 %vm526_vm2, %v1086_v50  ;;  %6897 = vmatmul.msk.bf16.gmra.mxu2 %vm526_vm2, %v861_v45  ;;  %v845_v50 = vld [vmem:[%s7694_s15 + $0x15a] sm:$0xff]  ;;  %v1088_v45 = vpack.c.bf16 %v6929_v60, %v6928_v27  ;;  %v6983_v60 = vld [vmem:[%s7694_s15 + $0x189] sm:$0xff] }
 0x12d   : > { %6949 = vmatmul.msk.bf16.gmra.mxu3 %vm526_vm2, %v1087_v22  ;;  %v6982_v27 = vld [vmem:[%s7694_s15 + $0x181] sm:$0xff] }
 0x12e   : > { %7001 = vmatmul.msk.bf16.gmra.mxu0 %vm526_vm2, %v7791_v57  ;;  %v862_v57 = vpack.c.bf16 %v845_v50, %v844_v9  ;;  %v6930_v9 = vld [vmem:[%s7694_s15 + $0x180] sm:$0xff] }
 0x12f   : > { %v954_v23 = vpop.f32.mrf.mxu2 }
 0x130   : > { %v1019_v35 = vadd.f32 %v954_v23, %v762_v5  ;;  %v1180_v8 = vpop.f32.mrf.mxu3  ;;  %v8153_v5 = vadd.f32 %v1402_v13, %v1244_v10  ;;  %v1314_v10 = vpack.c.bf16 %v6983_v60, %v6982_v27 }
 0x131   : > { %v763_v63 = vpop.f32.mrf.mxu1 }
 0x132   : > { %v1245_v41 = vadd.f32 %v1180_v8, %v1019_v35  ;;  %v764_v11 = vadd.f32 %v763_v63, %v7969_v19  ;;  %v846_v8 = vld [vmem:[%s7694_s15 + $0x16a] sm:$0xff]  ;;  %v847_v63 = vld [vmem:[%s7694_s15 + $0x172] sm:$0xff] }
 0x133   : > { %v1407_v32 = vpop.f32.mrf.mxu0 }
 0x137   : > { %v956_v28 = vpop.f32.mrf.mxu2 }
 0x138   : > { %v1020_v44 = vadd.f32 %v956_v28, %v764_v11  ;;  %v1182_v30 = vpop.f32.mrf.mxu3  ;;  %v6931_v11 = vld [vmem:[%s7694_s15 + $0x188] sm:$0xff] }
 0x139   : > { %v766_v14 = vpop.f32.mrf.mxu1  ;;  %v1089_v13 = vpack.c.bf16 %v6931_v11, %v6930_v9 }
 0x13a   : > { %v1246_v61 = vadd.f32 %v1182_v30, %v1020_v44  ;;  %v767_v19 = vadd.f32 %v766_v14, %v7983_v33  ;;  %v863_v33 = vpack.c.bf16 %v847_v63, %v846_v8  ;;  %v8162_v30 = vadd.f32 %v1405_v6, %v1245_v41 }
 0x13b   : > { %v1410_v42 = vpop.f32.mrf.mxu0 }
 0x13c   : > { %6878 = vmatmul.msk.bf16.gmra.mxu1 %vm526_vm2, %v1087_v22  ;;  %6898 = vmatmul.msk.bf16.gmra.mxu2 %vm526_vm2, %v862_v57  ;;  %v8169_v6 = vadd.f32 %v1407_v32, %v1246_v61 }
 0x13d   : > { %6950 = vmatmul.msk.bf16.gmra.mxu3 %vm526_vm2, %v1088_v45 }
 0x13e   : > { %7002 = vmatmul.msk.bf16.gmra.mxu0 %vm526_vm2, %v7843_v24 }
 0x13f   : > { %v959_v56 = vpop.f32.mrf.mxu2 }
 0x140   : > { %v1021_v52 = vadd.f32 %v959_v56, %v767_v19  ;;  %v1185_v1 = vpop.f32.mrf.mxu3 }
 0x141   : > { %v768_v23 = vpop.f32.mrf.mxu1 }
 0x142   : > { %v1247_v35 = vadd.f32 %v1185_v1, %v1021_v52  ;;  %v769_v50 = vadd.f32 %v768_v23, %v8001_v38 }
 0x143   : > { %v1412_v22 = vpop.f32.mrf.mxu0 }
 0x144   : > { %v8172_v11 = vadd.f32 %v1410_v42, %v1247_v35 }
 0x147   : > { %v961_v28 = vpop.f32.mrf.mxu2 }
 0x148   : > { %v1022_v24 = vadd.f32 %v961_v28, %v769_v50  ;;  %v1187_v44 = vpop.f32.mrf.mxu3 }
 0x149   : > { %v771_v57 = vpop.f32.mrf.mxu1 }
 0x14a   : > { %v1248_v14 = vadd.f32 %v1187_v44, %v1022_v24  ;;  %v772_v38 = vadd.f32 %v771_v57, %v8015_v53 }
 0x14b   : > { %v1415_v19 = vpop.f32.mrf.mxu0 }
 0x14c   : > { %6879 = vmatmul.msk.bf16.gmra.mxu1 %vm526_vm2, %v1088_v45  ;;  %6899 = vmatmul.msk.bf16.gmra.mxu2 %vm526_vm2, %v863_v33  ;;  %v8183_v42 = vadd.f32 %v1412_v22, %v1248_v14 }
 0x14d   : > { %6951 = vmatmul.msk.bf16.gmra.mxu3 %vm526_vm2, %v1089_v13 }
 0x14e   : > { %7003 = vmatmul.msk.bf16.gmra.mxu0 %vm526_vm2, %v1314_v10 }
 0x14f   : > { %v964_v56 = vpop.f32.mrf.mxu2 }
 0x150   : > { %v1023_v52 = vadd.f32 %v964_v56, %v772_v38  ;;  %v1190_v1 = vpop.f32.mrf.mxu3 }
 0x151   : > { %v773_v41 = vpop.f32.mrf.mxu1 }
 0x152   : > { %v1249_v23 = vadd.f32 %v1190_v1, %v1023_v52  ;;  %v774_v63 = vadd.f32 %v773_v41, %v8033_v7  ;;  %v7112_v41 = vld [vmem:[%s7694_s15 + $0x61] sm:$0xff] }
 0x153   : > { %v1417_v8 = vpop.f32.mrf.mxu0 }
 0x154   : > { %v8186_v13 = vadd.f32 %v1415_v19, %v1249_v23 }
 0x157   : > { %v966_v9 = vpop.f32.mrf.mxu2 }
 0x158   : > { %v1024_v45 = vadd.f32 %v966_v9, %v774_v63  ;;  %v1192_v50 = vpop.f32.mrf.mxu3 }
 0x159   : > { %v776_v27 = vpop.f32.mrf.mxu1 }
 0x15a   : > { %v1250_v60 = vadd.f32 %v1192_v50, %v1024_v45  ;;  %v777_v53 = vadd.f32 %v776_v27, %v7933_v20 }
 0x15b   : > { %v1420_v28 = vpop.f32.mrf.mxu0 }
 0x15c   : > { %7040 = vmatmul.msk.bf16.vlgmr.msra.gmra.mxu1 %vm526_vm2, %v7870_v39  ;;  %7092 = vmatmul.msk.bf16.vlgmr.msra.gmra.mxu2 %vm526_vm2, %v7872_v40  ;;  %v8197_v38 = vadd.f32 %v1417_v8, %v1250_v60 }
 0x15d   : > { %7144 = vmatmul.msk.bf16.vlgmr.msra.gmra.mxu3 %vm526_vm2, %v7793_v58 }
 0x15e   : > { %7196 = vmatmul.msk.bf16.vlgmr.msra.gmra.mxu0 %vm526_vm2, %v7885_v48 }
 0x15f   : > { %v969_v7 = vpop.f32.mrf.mxu2 }
 0x160   : > { %v1025_v32 = vadd.f32 %v969_v7, %v777_v53  ;;  %v1195_v61 = vpop.f32.mrf.mxu3 }
 0x161   : > { %v778_v35 = vpop.f32.mrf.mxu1 }
 0x162   : > { %v1251_v24 = vadd.f32 %v1195_v61, %v1025_v32  ;;  %v779_v39 = vadd.f32 %v778_v35, %v7945_v12  ;;  %v7114_v35 = vld [vmem:[%s7694_s15 + $0x79] sm:$0xff] }
 0x163   : > { %v1422_v44 = vpop.f32.mrf.mxu0 }
 0x164   : > { %v8202_v9 = vadd.f32 %v1420_v28, %v1251_v24  ;;  %v7115_v24 = vld [vmem:[%s7694_s15 + $0x81] sm:$0xff] }
 0x167   : > { %v971_v33 = vpop.f32.mrf.mxu2 }
 0x168   : > { %v1026_v40 = vadd.f32 %v971_v33, %v779_v39  ;;  %v1197_v57 = vpop.f32.mrf.mxu3 }
 0x169   : > { %v781_v58 = vpop.f32.mrf.mxu1 }
 0x16a   : > { %v1252_v10 = vadd.f32 %v1197_v57, %v1026_v40  ;;  %v782_v12 = vadd.f32 %v781_v58, %v7965_v17  ;;  %v1978_v58 = vpack.c.bf16 %v7115_v24, %v7114_v35 }
 0x16b   : > { %v1425_v20 = vpop.f32.mrf.mxu0 }
 0x16c   : > { %7041 = vmatmul.msk.bf16.gmra.mxu1 %vm526_vm2, %v7885_v48  ;;  %7093 = vmatmul.msk.bf16.gmra.mxu2 %vm526_vm2, %v7887_v49  ;;  %v7113_v49 = vld [vmem:[%s7694_s15 + $0x69] sm:$0xff]  ;;  %v8212_v53 = vadd.f32 %v1422_v44, %v1252_v10 }
 0x16d   : > { %7145 = vmatmul.msk.bf16.gmra.mxu3 %vm526_vm2, %v7845_v25  ;;  %v1977_v50 = vpack.c.bf16 %v7113_v49, %v7112_v41 }
 0x16e   : > { %7197 = vmatmul.msk.bf16.gmra.mxu0 %vm526_vm2, %v7901_v54 }
 0x16f   : > { %v974_v22 = vpop.f32.mrf.mxu2 }
 0x170   : > { %v1027_v14 = vadd.f32 %v974_v22, %v782_v12  ;;  %v1200_v19 = vpop.f32.mrf.mxu3 }
 0x171   : > { %v783_v56 = vpop.f32.mrf.mxu1 }
 0x172   : > { %v1253_v52 = vadd.f32 %v1200_v19, %v1027_v14  ;;  %v784_v48 = vadd.f32 %v783_v56, %v7977_v31 }
 0x173   : > { %v1427_v1 = vpop.f32.mrf.mxu0 }
 0x174   : > { %v8217_v40 = vadd.f32 %v1425_v20, %v1253_v52  ;;  %v7116_v52 = vld [vmem:[%s7694_s15 + $0x91] sm:$0xff] }
 0x177   : > { %v976_v23 = vpop.f32.mrf.mxu2 }
 0x178   : > { %v1028_v63 = vadd.f32 %v976_v23, %v784_v48  ;;  %v1202_v25 = vpop.f32.mrf.mxu3  ;;  %v7117_v48 = vld [vmem:[%s7694_s15 + $0x99] sm:$0xff] }
 0x179   : > { %v786_v45 = vpop.f32.mrf.mxu1 }
 0x17a   : > { %v1254_v17 = vadd.f32 %v1202_v25, %v1028_v63  ;;  %v787_v31 = vadd.f32 %v786_v45, %v7997_v36  ;;  %v1979_v25 = vpack.c.bf16 %v7117_v48, %v7116_v52 }
 0x17b   : > { %v1430_v27 = vpop.f32.mrf.mxu0 }
 0x17c   : > { %7042 = vmatmul.msk.bf16.gmra.mxu1 %vm526_vm2, %v7901_v54  ;;  %7094 = vmatmul.msk.bf16.gmra.mxu2 %vm526_vm2, %v7903_v59  ;;  %v8227_v22 = vadd.f32 %v1427_v1, %v1254_v17 }
 0x17d   : > { %7146 = vmatmul.msk.bf16.gmra.mxu3 %vm526_vm2, %v1977_v50 }
 0x17e   : > { %7198 = vmatmul.msk.bf16.gmra.mxu0 %vm526_vm2, %v7917_v0 }
 0x17f   : > { %v979_v8 = vpop.f32.mrf.mxu2 }
 0x180   : > { %v1029_v60 = vadd.f32 %v979_v8, %v787_v31  ;;  %v1205_v28 = vpop.f32.mrf.mxu3 }
 0x181   : > { %v788_v7 = vpop.f32.mrf.mxu1 }
 0x182   : > { %v1255_v32 = vadd.f32 %v1205_v28, %v1029_v60  ;;  %v789_v54 = vadd.f32 %v788_v7, %v8009_v51  ;;  %v10338_v28 = vld [vmem:[#allocation4_spill] sm:$0xff]  ;;  %v7118_v7 = vld [vmem:[%s7694_s15 + $0xa9] sm:$0xff] }
 0x183   : > { %v1432_v61 = vpop.f32.mrf.mxu0 }
 0x184   : > { %v8232_v23 = vadd.f32 %v1430_v27, %v1255_v32  ;;  %v7119_v32 = vld [vmem:[%s7694_s15 + $0xb1] sm:$0xff] }
 0x187   : > { %v981_v59 = vpop.f32.mrf.mxu2 }
 0x188   : > { %v1030_v39 = vadd.f32 %v981_v59, %v789_v54  ;;  %v1207_v33 = vpop.f32.mrf.mxu3 }
 0x189   : > { %v791_v57 = vpop.f32.mrf.mxu1 }
 0x18a   : > { %v1256_v36 = vadd.f32 %v1207_v33, %v1030_v39  ;;  %v792_v51 = vadd.f32 %v791_v57, %v8029_v62  ;;  %v10340_v57 = vld [vmem:[#allocation10_spill] sm:$0xff] }
 0x18b   : > { %v1435_v12 = vpop.f32.mrf.mxu0 }
 0x18c   : > { %7043 = vmatmul.msk.bf16.gmra.mxu1 %vm526_vm2, %v7917_v0  ;;  %7095 = vmatmul.msk.bf16.gmra.mxu2 %vm526_vm2, %v7921_v2  ;;  %v8242_v27 = vadd.f32 %v1432_v61, %v1256_v36  ;;  %v10339_v61 = vld [vmem:[#allocation7_spill] sm:$0xff] }
 0x18d   : > { %7147 = vmatmul.msk.bf16.gmra.mxu3 %vm526_vm2, %v1978_v58  ;;  %v10341_v58 = vld [vmem:[#allocation5_spill] sm:$0xff] }
 0x18e   : > { %7199 = vmatmul.msk.bf16.gmra.mxu0 %vm526_vm2, %v7949_v43 }
 0x18f   : > { %v984_v44 = vpop.f32.mrf.mxu2 }
 0x190   : > { %v1031_v10 = vadd.f32 %v984_v44, %v792_v51  ;;  %v1210_v20 = vpop.f32.mrf.mxu3 }
 0x191   : > { %v793_v14 = vpop.f32.mrf.mxu1 }
 0x192   : > { %v1257_v19 = vadd.f32 %v1210_v20, %v1031_v10  ;;  %v794_v0 = vadd.f32 %v793_v14, %v8041_v29 }
 0x193   : > { %v1437_v56 = vpop.f32.mrf.mxu0 }
 0x194   : > { %v8247_v24 = vadd.f32 %v1435_v12, %v1257_v19 }
 0x197   : > { %v986_v2 = vpop.f32.mrf.mxu2 }
 0x198   : > { %v1032_v41 = vadd.f32 %v986_v2, %v794_v0  ;;  %v1212_v49 = vpop.f32.mrf.mxu3  ;;  %v7120_v0 = vld [vmem:[%s7694_s15 + $0xc1] sm:$0xff] }
 0x199   : > { %v796_v63 = vpop.f32.mrf.mxu1 }
 0x19a   : > { %v1258_v62 = vadd.f32 %v1212_v49, %v1032_v41  ;;  %v797_v29 = vadd.f32 %v796_v63, %v7935_v4  ;;  %v1980_v4 = vpack.c.bf16 %v7119_v32, %v7118_v7  ;;  %v7122_v32 = vld [vmem:[%s7694_s15 + $0xd9] sm:$0xff] }
 0x19b   : > { %v1440_v45 = vpop.f32.mrf.mxu0 }
 0x19c   : > { %7044 = vmatmul.msk.bf16.gmra.mxu1 %vm526_vm2, %v7949_v43  ;;  %7096 = vmatmul.msk.bf16.gmra.mxu2 %vm526_vm2, %v7953_v15  ;;  %v8257_v10 = vadd.f32 %v1437_v56, %v1258_v62  ;;  %v10343_v56 = vld [vmem:[#allocation14_spill] sm:$0xff]  ;;  %v10344_v62 = vld [vmem:[#allocation8_spill] sm:$0xff] }
 0x19d   : > { %7148 = vmatmul.msk.bf16.gmra.mxu3 %vm526_vm2, %v1979_v25  ;;  %v10342_v25 = vld [vmem:[#allocation11_spill] sm:$0xff] }
 0x19e   : > { %7200 = vmatmul.msk.bf16.gmra.mxu0 %vm526_vm2, %v7981_v55 }
 0x19f   : > { %v989_v1 = vpop.f32.mrf.mxu2 }
 0x1a0   : > { %v1033_v50 = vadd.f32 %v989_v1, %v797_v29  ;;  %v1215_v17 = vpop.f32.mrf.mxu3 }
 0x1a1   : > { %v798_v31 = vpop.f32.mrf.mxu1 }
 0x1a2   : > { %v1259_v8 = vadd.f32 %v1215_v17, %v1033_v50  ;;  %v799_v43 = vadd.f32 %v798_v31, %v10338_v28 }
 0x1a3   : > { %v1442_v60 = vpop.f32.mrf.mxu0 }
 0x1a4   : > { %v8261_v2 = vadd.f32 %v1440_v45, %v1259_v8  ;;  %v7613_v8 = vmov 0.0  }
 0x1a5   : > { %301 = vst.msk [vmem:[#allocation2 + $0x18] sm:$0xff] %vm296_vm3, %v7613_v8 }
 0x1a6   : > { %302 = vst.msk [vmem:[#allocation2 + $0x20] sm:$0xff] %vm296_vm3, %v7613_v8 }
 0x1a7   : > { %v991_v15 = vpop.f32.mrf.mxu2  ;;  %297 = vst.msk [vmem:[#allocation2] sm:$0xff] %vm296_vm3, %v7613_v8 }
 0x1a8   : > { %v1034_v54 = vadd.f32 %v991_v15, %v799_v43  ;;  %v1217_v35 = vpop.f32.mrf.mxu3  ;;  %298 = vst.msk [vmem:[#allocation2 + $0x8] sm:$0xff] %vm296_vm3, %v7613_v8  ;;  %v7123_v15 = vld [vmem:[%s7694_s15 + $0xe1] sm:$0xff] }
 0x1a9   : > { %v801_v59 = vpop.f32.mrf.mxu1  ;;  %304 = vst.msk [vmem:[#allocation2 + $0x30] sm:$0xff] %vm296_vm3, %v7613_v8 }
 0x1aa   : > { %v1260_v39 = vadd.f32 %v1217_v35, %v1034_v54  ;;  %v802_v36 = vadd.f32 %v801_v59, %v10341_v58  ;;  %305 = vst.msk [vmem:[#allocation2 + $0x38] sm:$0xff] %vm296_vm3, %v7613_v8 }
 0x1ab   : > { %v1445_v33 = vpop.f32.mrf.mxu0  ;;  %307 = vst.msk [vmem:[#allocation2 + $0x48] sm:$0xff] %vm296_vm3, %v7613_v8 }
 0x1ac   : > { %7045 = vmatmul.msk.bf16.gmra.mxu1 %vm526_vm2, %v7981_v55  ;;  %7097 = vmatmul.msk.bf16.gmra.mxu2 %vm526_vm2, %v10339_v61  ;;  %v7121_v55 = vld [vmem:[%s7694_s15 + $0xc9] sm:$0xff]  ;;  %v8273_v17 = vadd.f32 %v1442_v60, %v1260_v39  ;;  %308 = vst.msk [vmem:[#allocation2 + $0x50] sm:$0xff] %vm296_vm3, %v7613_v8  ;;  %v1982_v61 = vpack.c.bf16 %v7123_v15, %v7122_v32 }
 0x1ad   : > { %7149 = vmatmul.msk.bf16.gmra.mxu3 %vm526_vm2, %v1980_v4  ;;  %v1981_v49 = vpack.c.bf16 %v7121_v55, %v7120_v0  ;;  %v10345_v60 = vld [vmem:[#allocation6_spill] sm:$0xff]  ;;  %310 = vst.msk [vmem:[#allocation2 + $0x60] sm:$0xff] %vm296_vm3, %v7613_v8  ;;  %v7125_v0 = vld [vmem:[%s7694_s15 + $0xf9] sm:$0xff] }
 0x1ae   : > { %7201 = vmatmul.msk.bf16.gmra.mxu0 %vm526_vm2, %v10340_v57  ;;  %311 = vst.msk [vmem:[#allocation2 + $0x68] sm:$0xff] %vm296_vm3, %v7613_v8 }
 0x1af   : > { %v994_v12 = vpop.f32.mrf.mxu2  ;;  %313 = vst.msk [vmem:[#allocation2 + $0x78] sm:$0xff] %vm296_vm3, %v7613_v8 }
 0x1b0   : > { %v1035_v51 = vadd.f32 %v994_v12, %v802_v36  ;;  %v1220_v44 = vpop.f32.mrf.mxu3  ;;  %314 = vst.msk [vmem:[#allocation2 + $0x80] sm:$0xff] %vm296_vm3, %v7613_v8 }
 0x1b1   : > { %v803_v20 = vpop.f32.mrf.mxu1  ;;  %316 = vst.msk [vmem:[#allocation2 + $0x90] sm:$0xff] %vm296_vm3, %v7613_v8 }
 0x1b2   : > { %v1261_v14 = vadd.f32 %v1220_v44, %v1035_v51  ;;  %v804_v7 = vadd.f32 %v803_v20, %v10345_v60  ;;  %317 = vst.msk [vmem:[#allocation2 + $0x98] sm:$0xff] %vm296_vm3, %v7613_v8 }
 0x1b3   : > { %v1447_v19 = vpop.f32.mrf.mxu0  ;;  %319 = vst.msk [vmem:[#allocation2 + $0xa8] sm:$0xff] %vm296_vm3, %v7613_v8 }
 0x1b4   : > { %v8302_v4 = vadd.f32 %v1445_v33, %v1261_v14  ;;  %v10346_v33 = vld [vmem:[#allocation12_spill] sm:$0xff]  ;;  %320 = vst.msk [vmem:[#allocation2 + $0xb0] sm:$0xff] %vm296_vm3, %v7613_v8 }
 0x1b5   : > { %322 = vst.msk [vmem:[#allocation2 + $0xc0] sm:$0xff] %vm296_vm3, %v7613_v8 }
 0x1b6   : > { %323 = vst.msk [vmem:[#allocation2 + $0xc8] sm:$0xff] %vm296_vm3, %v7613_v8 }
 0x1b7   : > { %v996_v52 = vpop.f32.mrf.mxu2  ;;  %325 = vst.msk [vmem:[#allocation2 + $0xd8] sm:$0xff] %vm296_vm3, %v7613_v8 }
 0x1b8   : > { %v1222_v48 = vpop.f32.mrf.mxu3  ;;  %v1036_v35 = vadd.f32 %v996_v52, %v804_v7  ;;  %326 = vst.msk [vmem:[#allocation2 + $0xe0] sm:$0xff] %vm296_vm3, %v7613_v8 }
 0x1b9   : > { %v806_v41 = vpop.f32.mrf.mxu1  ;;  %328 = vst.msk [vmem:[#allocation2 + $0xf0] sm:$0xff] %vm296_vm3, %v7613_v8 }
 0x1ba   : > { %v807_v29 = vadd.f32 %v806_v41, %v10344_v62  ;;  %329 = vst.msk [vmem:[#allocation2 + $0xf8] sm:$0xff] %vm296_vm3, %v7613_v8  ;;  %v10350_v62 = vld [vmem:[#allocation15_spill] sm:$0xff] }
 0x1bb   : > { %v8263_v63 = vpop.f32.mrf.mxu0  ;;  %331 = vst.msk [vmem:[#allocation2 + $0x108] sm:$0xff] %vm296_vm3, %v7613_v8 }
 0x1bc   : > { %7046 = vmatmul.msk.bf16.gmra.mxu1 %vm526_vm2, %v10340_v57  ;;  %7098 = vmatmul.msk.bf16.gmra.mxu2 %vm526_vm2, %v10342_v25  ;;  %v1262_v57 = vadd.f32 %v1222_v48, %v1036_v35  ;;  %332 = vst.msk [vmem:[#allocation2 + $0x110] sm:$0xff] %vm296_vm3, %v7613_v8 }
 0x1bd   : > { %7150 = vmatmul.msk.bf16.gmra.mxu3 %vm526_vm2, %v1981_v49  ;;  %334 = vst.msk [vmem:[#allocation2 + $0x120] sm:$0xff] %vm296_vm3, %v7613_v8 }
 0x1be   : > { %7202 = vmatmul.msk.bf16.gmra.mxu0 %vm526_vm2, %v10343_v56  ;;  %v8328_v44 = vadd.f32 %v1447_v19, %v1262_v57  ;;  %v7124_v19 = vld [vmem:[%s7694_s15 + $0xf1] sm:$0xff]  ;;  %335 = vst.msk [vmem:[#allocation2 + $0x128] sm:$0xff] %vm296_vm3, %v7613_v8 }
 0x1bf   : > { %v999_v45 = vpop.f32.mrf.mxu2  ;;  %v1983_v49 = vpack.c.bf16 %v7125_v0, %v7124_v19  ;;  %337 = vst.msk [vmem:[#allocation2 + $0x138] sm:$0xff] %vm296_vm3, %v7613_v8 }
 0x1c0   : > { %v1037_v1 = vadd.f32 %v999_v45, %v807_v29  ;;  %v1225_v50 = vpop.f32.mrf.mxu3  ;;  %338 = vst.msk [vmem:[#allocation2 + $0x140] sm:$0xff] %vm296_vm3, %v7613_v8 }
 0x1c1   : > { %v8275_v31 = vpop.f32.mrf.mxu1  ;;  %340 = vst.msk [vmem:[#allocation2 + $0x150] sm:$0xff] %vm296_vm3, %v7613_v8 }
 0x1c2   : > { %v1263_v28 = vadd.f32 %v1225_v50, %v1037_v1  ;;  %341 = vst.msk [vmem:[#allocation2 + $0x158] sm:$0xff] %vm296_vm3, %v7613_v8 }
 0x1c3   : > { %v8285_v43 = vpop.f32.mrf.mxu0  ;;  %343 = vst.msk [vmem:[#allocation2 + $0x168] sm:$0xff] %vm296_vm3, %v7613_v8 }
 0x1c4   : > { %v8355_v48 = vadd.f32 %v8263_v63, %v1263_v28  ;;  %v10349_v63 = vld [vmem:[#allocation18_spill] sm:$0xff]  ;;  %344 = vst.msk [vmem:[#allocation2 + $0x170] sm:$0xff] %vm296_vm3, %v7613_v8  ;;  %v8388_v28 = vld [vmem:[%s10289_s2] ss:$0 sm:$0xff] }
 0x1c5   : > { %346 = vst.msk [vmem:[#allocation2 + $0x180] sm:$0xff] %vm296_vm3, %v7613_v8 }
 0x1c6   : > { %347 = vst.msk [vmem:[#allocation2 + $0x188] sm:$0xff] %vm296_vm3, %v7613_v8 }
 0x1c7   : > { %v8294_v54 = vpop.f32.mrf.mxu2  ;;  %349 = vst.msk [vmem:[#allocation2 + $0x198] sm:$0xff] %vm296_vm3, %v7613_v8 }
 0x1c8   : > { %v8298_v59 = vpop.f32.mrf.mxu3  ;;  %350 = vst.msk [vmem:[#allocation2 + $0x1a0] sm:$0xff] %vm296_vm3, %v7613_v8 }
 0x1c9   : > { %v811_v39 = vpop.f32.mrf.mxu1  ;;  %352 = vst.msk [vmem:[#allocation3] sm:$0xff] %vm296_vm3, %v7613_v8 }
 0x1ca   : > { %v812_v58 = vadd.f32 %v811_v39, %v10346_v33  ;;  %353 = vst.msk [vmem:[#allocation3 + $0x8] sm:$0xff] %vm296_vm3, %v7613_v8  ;;  %v7022_v33 = vld [vmem:[%s7694_s15 + $0xf2] sm:$0xff] }
 0x1cb   : > { %v1455_v36 = vpop.f32.mrf.mxu0  ;;  %355 = vst.msk [vmem:[#allocation3 + $0x18] sm:$0xff] %vm296_vm3, %v7613_v8 }
 0x1cc   : > { %7047 = vmatmul.msk.bf16.gmra.mxu1 %vm526_vm2, %v10343_v56  ;;  %7099 = vmatmul.msk.bf16.gmra.mxu2 %vm526_vm2, %v8047_v21  ;;  %v10348_v56 = vld [vmem:[#allocation16_spill] sm:$0xff]  ;;  %356 = vst.msk [vmem:[#allocation3 + $0x20] sm:$0xff] %vm296_vm3, %v7613_v8 }
 0x1cd   : > { %7151 = vmatmul.msk.bf16.gmra.mxu3 %vm526_vm2, %v1982_v61  ;;  %358 = vst.msk [vmem:[#allocation3 + $0x30] sm:$0xff] %vm296_vm3, %v7613_v8 }
 0x1ce   : > { %7203 = vmatmul.msk.bf16.gmra.mxu0 %vm526_vm2, %v8065_v34  ;;  %359 = vst.msk [vmem:[#allocation3 + $0x38] sm:$0xff] %vm296_vm3, %v7613_v8 }
 0x1cf   : > { %v1004_v21 = vpop.f32.mrf.mxu2  ;;  %361 = vst.msk [vmem:[#allocation3 + $0x48] sm:$0xff] %vm296_vm3, %v7613_v8 }
 0x1d0   : > { %v1039_v12 = vadd.f32 %v1004_v21, %v812_v58  ;;  %v1230_v51 = vpop.f32.mrf.mxu3  ;;  %362 = vst.msk [vmem:[#allocation3 + $0x50] sm:$0xff] %vm296_vm3, %v7613_v8  ;;  %v7023_v58 = vld [vmem:[%s7694_s15 + $0xfa] sm:$0xff] }
 0x1d1   : > { %v8330_v20 = vpop.f32.mrf.mxu1  ;;  %364 = vst.msk [vmem:[#allocation3 + $0x60] sm:$0xff] %vm296_vm3, %v7613_v8  ;;  %v1533_v21 = vpack.c.bf16 %v7023_v58, %v7022_v33 }
 0x1d2   : > { %v1265_v14 = vadd.f32 %v1230_v51, %v1039_v12  ;;  %365 = vst.msk [vmem:[#allocation3 + $0x68] sm:$0xff] %vm296_vm3, %v7613_v8  ;;  %v7075_v12 = vld [vmem:[%s7694_s15 + $0x110] sm:$0xff] }
 0x1d3   : > { %v8357_v41 = vpop.f32.mrf.mxu0  ;;  %367 = vst.msk [vmem:[#allocation3 + $0x78] sm:$0xff] %vm296_vm3, %v7613_v8  ;;  %v7126_v51 = vld [vmem:[%s7694_s15 + $0x109] sm:$0xff] }
 0x1d4   : > { %10347 = vst [vmem:[#allocation4_spill] sm:$0xff] %v8357_v41  ;;  %v8405_v35 = vadd.f32 %v1455_v36, %v1265_v14  ;;  %v7074_v36 = vld [vmem:[%s7694_s15 + $0x108] sm:$0xff]  ;;  %v7127_v14 = vld [vmem:[%s7694_s15 + $0x111] sm:$0xff] }
 0x1d5   : > { %368 = vst.msk [vmem:[#allocation3 + $0x80] sm:$0xff] %vm296_vm3, %v7613_v8 }
 0x1d6   : > { %370 = vst.msk [vmem:[#allocation3 + $0x90] sm:$0xff] %vm296_vm3, %v7613_v8 }
 0x1d7   : > { %v8346_v55 = vpop.f32.mrf.mxu2  ;;  %371 = vst.msk [vmem:[#allocation3 + $0x98] sm:$0xff] %vm296_vm3, %v7613_v8 }
 0x1d8   : > { %v8350_v52 = vpop.f32.mrf.mxu3  ;;  %373 = vst.msk [vmem:[#allocation3 + $0xa8] sm:$0xff] %vm296_vm3, %v7613_v8 }
 0x1d9   : > { %v1605_v25 = vpop.f32.mrf.mxu1  ;;  %374 = vst.msk [vmem:[#allocation3 + $0xb0] sm:$0xff] %vm296_vm3, %v7613_v8 }
 0x1da   : > { %v1685_v29 = vadd.f32 %v1605_v25, %v10350_v62  ;;  %376 = vst.msk [vmem:[#allocation3 + $0xc0] sm:$0xff] %vm296_vm3, %v7613_v8  ;;  %v1984_v25 = vpack.c.bf16 %v7127_v14, %v7126_v51  ;;  %v7129_v14 = vld [vmem:[%s7694_s15 + $0x129] sm:$0xff] }
 0x1db   : > { %v2281_v60 = vpop.f32.mrf.mxu0  ;;  %377 = vst.msk [vmem:[#allocation3 + $0xc8] sm:$0xff] %vm296_vm3, %v7613_v8 }
 0x1dc   : > { %7048 = vmatmul.msk.bf16.gmra.mxu1 %vm526_vm2, %v8065_v34  ;;  %7100 = vmatmul.msk.bf16.gmra.mxu2 %vm526_vm2, %v10348_v56  ;;  %v7178_v56 = vld [vmem:[%s7694_s15 + $0x10a] sm:$0xff]  ;;  %379 = vst.msk [vmem:[#allocation3 + $0xd8] sm:$0xff] %vm296_vm3, %v7613_v8 }
 0x1dd   : > { %7152 = vmatmul.msk.bf16.gmra.mxu3 %vm526_vm2, %v1983_v49  ;;  %v1759_v49 = vpack.c.bf16 %v7075_v12, %v7074_v36  ;;  %380 = vst.msk [vmem:[#allocation3 + $0xe0] sm:$0xff] %vm296_vm3, %v7613_v8  ;;  %v7076_v36 = vld [vmem:[%s7694_s15 + $0x120] sm:$0xff] }
 0x1de   : > { %7204 = vmatmul.msk.bf16.gmra.mxu0 %vm526_vm2, %v10349_v63  ;;  %v7179_v63 = vld [vmem:[%s7694_s15 + $0x112] sm:$0xff]  ;;  %382 = vst.msk [vmem:[#allocation3 + $0xf0] sm:$0xff] %vm296_vm3, %v7613_v8  ;;  %v7128_v12 = vld [vmem:[%s7694_s15 + $0x121] sm:$0xff] }
 0x1df   : > { %v1831_v34 = vpop.f32.mrf.mxu2  ;;  %v2209_v62 = vpack.c.bf16 %v7179_v63, %v7178_v56  ;;  %383 = vst.msk [vmem:[#allocation3 + $0xf8] sm:$0xff] %vm296_vm3, %v7613_v8 }
 0x1e0   : > { %v1911_v45 = vadd.f32 %v1831_v34, %v1685_v29  ;;  %v2056_v1 = vpop.f32.mrf.mxu3  ;;  %385 = vst.msk [vmem:[#allocation3 + $0x108] sm:$0xff] %vm296_vm3, %v7613_v8 }
 0x1e1   : > { %v1607_v61 = vpop.f32.mrf.mxu1  ;;  %386 = vst.msk [vmem:[#allocation3 + $0x110] sm:$0xff] %vm296_vm3, %v7613_v8 }
 0x1e2   : > { %v2136_v50 = vadd.f32 %v2056_v1, %v1911_v45  ;;  %388 = vst.msk [vmem:[#allocation3 + $0x120] sm:$0xff] %vm296_vm3, %v7613_v8 }
 0x1e3   : > { %v8428_v57 = vpop.f32.mrf.mxu0  ;;  %389 = vst.msk [vmem:[#allocation3 + $0x128] sm:$0xff] %vm296_vm3, %v7613_v8 }
 0x1e4   : > { %v2361_v7 = vadd.f32 %v2281_v60, %v2136_v50  ;;  %391 = vst.msk [vmem:[#allocation3 + $0x138] sm:$0xff] %vm296_vm3, %v7613_v8  ;;  %v10351_v60 = vld [vmem:[#allocation17_spill] sm:$0xff] }
 0x1e5   : > { %392 = vst.msk [vmem:[#allocation3 + $0x140] sm:$0xff] %vm296_vm3, %v7613_v8 }
 0x1e6   : > { %v2396_v32 = vadd.f32 %v8388_v28, %v2361_v7  ;;  %394 = vst.msk [vmem:[#allocation3 + $0x150] sm:$0xff] %vm296_vm3, %v7613_v8  ;;  %v1686_v7 = vadd.f32 %v1607_v61, %v10351_v60 }
 0x1e7   : > { %v1833_v19 = vpop.f32.mrf.mxu2  ;;  %395 = vst.msk [vmem:[#allocation3 + $0x158] sm:$0xff] %vm296_vm3, %v7613_v8 }
 0x1e8   : > { %vm2428_vm4 = vcmp.gt.f32.partialorder %v2396_v32, 0.0  ;;  %v2460_v15 = vmul.f32 0.1, %v2396_v32  ;;  %v2058_v0 = vpop.f32.mrf.mxu3  ;;  %397 = vst.msk [vmem:[#allocation3 + $0x168] sm:$0xff] %vm296_vm3, %v7613_v8 }
 0x1e9   : > { %v1610_v29 = vpop.f32.mrf.mxu1  ;;  %398 = vst.msk [vmem:[#allocation3 + $0x170] sm:$0xff] %vm296_vm3, %v7613_v8 }
 0x1ea   : > { %v2492_v39 = vsel %vm2428_vm4, %v2396_v32, %v2460_v15  ;;  %400 = vst.msk [vmem:[#allocation3 + $0x180] sm:$0xff] %vm296_vm3, %v7613_v8  ;;  %v1912_v15 = vadd.f32 %v1833_v19, %v1686_v7  ;;  %v1687_v7 = vadd.f32 %v1610_v29, %v8095_v37  ;;  %v7079_v29 = vld [vmem:[%s7694_s15 + $0x140] sm:$0xff] }
 0x1eb   : > { %2525 = vst.msk [vmem:[#allocation2 + $0x19] sm:$0xff] %vm296_vm3, %v2492_v39  ;;  %v8462_v34 = vpop.f32.mrf.mxu0 }
 0x1ec   : > { %7049 = vmatmul.msk.bf16.gmra.mxu1 %vm526_vm2, %v1533_v21  ;;  %7101 = vmatmul.msk.bf16.gmra.mxu2 %vm526_vm2, %v1759_v49  ;;  %401 = vst.msk [vmem:[#allocation3 + $0x188] sm:$0xff] %vm296_vm3, %v7613_v8  ;;  %v2137_v33 = vadd.f32 %v2058_v0, %v1912_v15  ;;  %v7077_v21 = vld [vmem:[%s7694_s15 + $0x128] sm:$0xff]  ;;  %v1985_v49 = vpack.c.bf16 %v7129_v14, %v7128_v12  ;;  %v7130_v14 = vld [vmem:[%s7694_s15 + $0x139] sm:$0xff] }
 0x1ed   : > { %7153 = vmatmul.msk.bf16.gmra.mxu3 %vm526_vm2, %v1984_v25  ;;  %403 = vst.msk [vmem:[#allocation3 + $0x198] sm:$0xff] %vm296_vm3, %v7613_v8  ;;  %v1760_v51 = vpack.c.bf16 %v7077_v21, %v7076_v36  ;;  %v7180_v25 = vld [vmem:[%s7694_s15 + $0x122] sm:$0xff]  ;;  %v7181_v0 = vld [vmem:[%s7694_s15 + $0x12a] sm:$0xff] }
 0x1ee   : > { %7205 = vmatmul.msk.bf16.gmra.mxu0 %vm526_vm2, %v2209_v62  ;;  %404 = vst.msk [vmem:[#allocation3 + $0x1a0] sm:$0xff] %vm296_vm3, %v7613_v8  ;;  %v2362_v56 = vadd.f32 %v8428_v57, %v2137_v33  ;;  %v2210_v63 = vpack.c.bf16 %v7181_v0, %v7180_v25  ;;  %v7182_v25 = vld [vmem:[%s7694_s15 + $0x13a] sm:$0xff]  ;;  %v7183_v0 = vld [vmem:[%s7694_s15 + $0x142] sm:$0xff] }
 0x1ef   : > { %v1836_v45 = vpop.f32.mrf.mxu2  ;;  %300 = vst.msk [vmem:[#allocation2 + $0x10] sm:$0x3] %vm299_vm5, %v7613_v8 }
 0x1f0   : > { %v8472_v1 = vpop.f32.mrf.mxu3  ;;  %303 = vst.msk [vmem:[#allocation2 + $0x28] sm:$0x3] %vm299_vm5, %v7613_v8  ;;  %v2397_v57 = vadd.f32 %v8388_v28, %v2362_v56  ;;  %v1913_v36 = vadd.f32 %v1836_v45, %v1687_v7 }
 0x1f1   : > { %v1612_v50 = vpop.f32.mrf.mxu1  ;;  %351 = vst.msk [vmem:[#allocation2 + $0x1a8] sm:$0x3] %vm299_vm5, %v7613_v8 }
 0x1f2   : > { %354 = vst.msk [vmem:[#allocation3 + $0x10] sm:$0x3] %vm299_vm5, %v7613_v8  ;;  %v1688_v33 = vadd.f32 %v1612_v50, %v8108_v16  ;;  %v2461_v12 = vmul.f32 0.1, %v2397_v57  ;;  %vm2429_vm6 = vcmp.gt.f32.partialorder %v2397_v57, 0.0  ;;  %v7078_v16 = vld [vmem:[%s7694_s15 + $0x138] sm:$0xff] }
 0x1f3   : > { %v8487_v32 = vpop.f32.mrf.mxu0  ;;  %357 = vst.msk [vmem:[#allocation3 + $0x28] sm:$0x3] %vm299_vm5, %v7613_v8 }
 0x1f4   : > { %360 = vst.msk [vmem:[#allocation3 + $0x40] sm:$0x3] %vm299_vm5, %v7613_v8  ;;  %v2493_v56 = vsel %vm2429_vm6, %v2397_v57, %v2461_v12 }
 0x1f5   : > { %363 = vst.msk [vmem:[#allocation3 + $0x58] sm:$0x3] %vm299_vm5, %v7613_v8 }
 0x1f6   : > { %366 = vst.msk [vmem:[#allocation3 + $0x70] sm:$0x3] %vm299_vm5, %v7613_v8 }
 0x1f7   : > { %v1838_v39 = vpop.f32.mrf.mxu2  ;;  %369 = vst.msk [vmem:[#allocation3 + $0x88] sm:$0x3] %vm299_vm5, %v7613_v8 }
 0x1f8   : > { %v2063_v61 = vpop.f32.mrf.mxu3  ;;  %372 = vst.msk [vmem:[#allocation3 + $0xa0] sm:$0x3] %vm299_vm5, %v7613_v8 }
 0x1f9   : > { %v1615_v58 = vpop.f32.mrf.mxu1  ;;  %375 = vst.msk [vmem:[#allocation3 + $0xb8] sm:$0x3] %vm299_vm5, %v7613_v8 }
 0x1fa   : > { %378 = vst.msk [vmem:[#allocation3 + $0xd0] sm:$0x3] %vm299_vm5, %v7613_v8  ;;  %v1689_v37 = vadd.f32 %v1615_v58, %v8115_v47  ;;  %v2138_v47 = vadd.f32 %v8472_v1, %v1913_v36 }
 0x1fb   : > { %v8510_v19 = vpop.f32.mrf.mxu0  ;;  %381 = vst.msk [vmem:[#allocation3 + $0xe8] sm:$0x3] %vm299_vm5, %v7613_v8 }
 0x1fc   : > { %7050 = vmatmul.msk.bf16.gmra.mxu1 %vm526_vm2, %v2209_v62  ;;  %7102 = vmatmul.msk.bf16.gmra.mxu2 %vm526_vm2, %v1760_v51  ;;  %384 = vst.msk [vmem:[#allocation3 + $0x100] sm:$0x3] %vm299_vm5, %v7613_v8  ;;  %v1914_v51 = vadd.f32 %v1838_v39, %v1688_v33  ;;  %v7131_v39 = vld [vmem:[%s7694_s15 + $0x141] sm:$0xff]  ;;  %v2211_v33 = vpack.c.bf16 %v7183_v0, %v7182_v25  ;;  %v7132_v25 = vld [vmem:[%s7694_s15 + $0x151] sm:$0xff] }
 0x1fd   : > { %7154 = vmatmul.msk.bf16.gmra.mxu3 %vm526_vm2, %v1985_v49  ;;  %387 = vst.msk [vmem:[#allocation3 + $0x118] sm:$0x3] %vm299_vm5, %v7613_v8  ;;  %v2363_v36 = vadd.f32 %v8462_v34, %v2138_v47 }
 0x1fe   : > { %7206 = vmatmul.msk.bf16.gmra.mxu0 %vm526_vm2, %v2210_v63  ;;  %390 = vst.msk [vmem:[#allocation3 + $0x130] sm:$0x3] %vm299_vm5, %v7613_v8 }
 0x1ff   : > { %v1841_v62 = vpop.f32.mrf.mxu2  ;;  %393 = vst.msk [vmem:[#allocation3 + $0x148] sm:$0x3] %vm299_vm5, %v7613_v8 }
 0x200   : > { %v2066_v60 = vpop.f32.mrf.mxu3  ;;  %v1915_v45 = vadd.f32 %v1841_v62, %v1689_v37  ;;  %396 = vst.msk [vmem:[#allocation3 + $0x160] sm:$0x3] %vm299_vm5, %v7613_v8  ;;  %v1761_v62 = vpack.c.bf16 %v7079_v29, %v7078_v16 }
 0x201   : > { %v1617_v15 = vpop.f32.mrf.mxu1  ;;  %399 = vst.msk [vmem:[#allocation3 + $0x178] sm:$0x3] %vm299_vm5, %v7613_v8 }
 0x202   : > { %v1690_v50 = vadd.f32 %v1617_v15, %v8123_v26  ;;  %402 = vst.msk [vmem:[#allocation3 + $0x190] sm:$0x3] %vm299_vm5, %v7613_v8  ;;  %v1986_v15 = vpack.c.bf16 %v7131_v39, %v7130_v14  ;;  %v2140_v1 = vadd.f32 %v2066_v60, %v1915_v45 }
 0x203   : > { %v2293_v21 = vpop.f32.mrf.mxu0  ;;  %405 = vst.msk [vmem:[#allocation3 + $0x1a8] sm:$0x3] %vm299_vm5, %v7613_v8 }
 0x204   : > { %2526 = vst.msk [vmem:[#allocation2 + $0x21] sm:$0xff] %vm296_vm3, %v2493_v56  ;;  %v2365_v60 = vadd.f32 %v8510_v19, %v2140_v1 }
 0x205   : > { %306 = vst.msk [vmem:[#allocation2 + $0x40] sm:$0x3] %vm299_vm5, %v7613_v8 }
 0x206   : > { %309 = vst.msk [vmem:[#allocation2 + $0x58] sm:$0x3] %vm299_vm5, %v7613_v8  ;;  %v2400_v19 = vadd.f32 %v8388_v28, %v2365_v60 }
 0x207   : > { %v1843_v58 = vpop.f32.mrf.mxu2  ;;  %312 = vst.msk [vmem:[#allocation2 + $0x70] sm:$0x3] %vm299_vm5, %v7613_v8 }
 0x208   : > { %v2068_v49 = vpop.f32.mrf.mxu3  ;;  %v1916_v7 = vadd.f32 %v1843_v58, %v1690_v50  ;;  %315 = vst.msk [vmem:[#allocation2 + $0x88] sm:$0x3] %vm299_vm5, %v7613_v8  ;;  %v7080_v58 = vld [vmem:[%s7694_s15 + $0x150] sm:$0xff]  ;;  %v2464_v0 = vmul.f32 0.1, %v2400_v19  ;;  %vm2432_vm9 = vcmp.gt.f32.partialorder %v2400_v19, 0.0 }
 0x209   : > { %v1620_v26 = vpop.f32.mrf.mxu1  ;;  %318 = vst.msk [vmem:[#allocation2 + $0xa0] sm:$0x3] %vm299_vm5, %v7613_v8 }
 0x20a   : > { %v2141_v37 = vadd.f32 %v2068_v49, %v1916_v7  ;;  %v1691_v34 = vadd.f32 %v1620_v26, %v8130_v46  ;;  %321 = vst.msk [vmem:[#allocation2 + $0xb8] sm:$0x3] %vm299_vm5, %v7613_v8  ;;  %v7081_v49 = vld [vmem:[%s7694_s15 + $0x158] sm:$0xff] }
 0x20b   : > { %v2296_v41 = vpop.f32.mrf.mxu0  ;;  %324 = vst.msk [vmem:[#allocation2 + $0xd0] sm:$0x3] %vm299_vm5, %v7613_v8  ;;  %v7133_v7 = vld [vmem:[%s7694_s15 + $0x159] sm:$0xff] }
 0x20c   : > { %7051 = vmatmul.msk.bf16.gmra.mxu1 %vm526_vm2, %v2210_v63  ;;  %v2139_v63 = vadd.f32 %v2063_v61, %v1914_v51  ;;  %7103 = vmatmul.msk.bf16.gmra.mxu2 %vm526_vm2, %v1761_v62  ;;  %v2366_v57 = vadd.f32 %v2293_v21, %v2141_v37  ;;  %327 = vst.msk [vmem:[#allocation2 + $0xe8] sm:$0x3] %vm299_vm5, %v7613_v8 }
 0x20d   : > { %7155 = vmatmul.msk.bf16.gmra.mxu3 %vm526_vm2, %v1986_v15  ;;  %330 = vst.msk [vmem:[#allocation2 + $0x100] sm:$0x3] %vm299_vm5, %v7613_v8 }
 0x20e   : > { %v2364_v61 = vadd.f32 %v8487_v32, %v2139_v63  ;;  %7207 = vmatmul.msk.bf16.gmra.mxu0 %vm526_vm2, %v2211_v33  ;;  %v2398_v32 = vadd.f32 %v8388_v28, %v2363_v36  ;;  %v2401_v50 = vadd.f32 %v8388_v28, %v2366_v57  ;;  %333 = vst.msk [vmem:[#allocation2 + $0x118] sm:$0x3] %vm299_vm5, %v7613_v8 }
 0x20f   : > { %v1846_v12 = vpop.f32.mrf.mxu2  ;;  %336 = vst.msk [vmem:[#allocation2 + $0x130] sm:$0x3] %vm299_vm5, %v7613_v8 }
 0x210   : > { %v2071_v51 = vpop.f32.mrf.mxu3  ;;  %v2399_v16 = vadd.f32 %v8388_v28, %v2364_v61  ;;  %v1917_v29 = vadd.f32 %v1846_v12, %v1691_v34  ;;  %v2462_v45 = vmul.f32 0.1, %v2398_v32  ;;  %vm2430_vm7 = vcmp.gt.f32.partialorder %v2398_v32, 0.0  ;;  %339 = vst.msk [vmem:[#allocation2 + $0x148] sm:$0x3] %vm299_vm5, %v7613_v8 }
 0x211   : > { %v1622_v46 = vpop.f32.mrf.mxu1  ;;  %v2465_v26 = vmul.f32 0.1, %v2401_v50  ;;  %342 = vst.msk [vmem:[#allocation2 + $0x160] sm:$0x3] %vm299_vm5, %v7613_v8  ;;  %vm2433_vm10 = vcmp.gt.f32.partialorder %v2401_v50, 0.0  ;;  %v1762_v61 = vpack.c.bf16 %v7081_v49, %v7080_v58  ;;  %v1987_v34 = vpack.c.bf16 %v7133_v7, %v7132_v25  ;;  %v7082_v25 = vld [vmem:[%s7694_s15 + $0x168] sm:$0xff] }
 0x212   : > { %v2142_v21 = vadd.f32 %v2071_v51, %v1917_v29  ;;  %v2463_v39 = vmul.f32 0.1, %v2399_v16  ;;  %vm2431_vm8 = vcmp.gt.f32.partialorder %v2399_v16, 0.0  ;;  %v1692_v63 = vadd.f32 %v1622_v46, %v8138_v18  ;;  %345 = vst.msk [vmem:[#allocation2 + $0x178] sm:$0x3] %vm299_vm5, %v7613_v8  ;;  %v7134_v7 = vld [vmem:[%s7694_s15 + $0x169] sm:$0xff] }
 0x213   : > { %v2298_v14 = vpop.f32.mrf.mxu0  ;;  %v2494_v62 = vsel %vm2430_vm7, %v2398_v32, %v2462_v45  ;;  %348 = vst.msk [vmem:[#allocation2 + $0x190] sm:$0x3] %vm299_vm5, %v7613_v8  ;;  %v2496_v32 = vsel %vm2432_vm9, %v2400_v19, %v2464_v0  ;;  %v2497_v51 = vsel %vm2433_vm10, %v2401_v50, %v2465_v26  ;;  %v7083_v0 = vld [vmem:[%s7694_s15 + $0x170] sm:$0xff] }
 0x214   : > { %v2367_v47 = vadd.f32 %v2296_v41, %v2142_v21  ;;  %v7184_v41 = vld [vmem:[%s7694_s15 + $0x152] sm:$0xff]  ;;  %v2495_v18 = vsel %vm2431_vm8, %v2399_v16, %v2463_v39  ;;  %2527 = vst.msk [vmem:[#allocation2 + $0x31] sm:$0xff] %vm296_vm3, %v2494_v62 }
 0x215   : > { %2528 = vst.msk [vmem:[#allocation2 + $0x39] sm:$0xff] %vm296_vm3, %v2495_v18 }
 0x216   : > { %v2402_v56 = vadd.f32 %v8388_v28, %v2367_v47  ;;  %2529 = vst.msk [vmem:[#allocation2 + $0x49] sm:$0xff] %vm296_vm3, %v2496_v32 }
 0x217   : > { %v1848_v15 = vpop.f32.mrf.mxu2  ;;  %2530 = vst.msk [vmem:[#allocation2 + $0x51] sm:$0xff] %vm296_vm3, %v2497_v51 }
 0x218   : > { %v2073_v1 = vpop.f32.mrf.mxu3  ;;  %v2466_v36 = vmul.f32 0.1, %v2402_v56  ;;  %v1918_v37 = vadd.f32 %v1848_v15, %v1692_v63  ;;  %vm2434_vm11 = vcmp.gt.f32.partialorder %v2402_v56, 0.0  ;;  %v7186_v15 = vld [vmem:[%s7694_s15 + $0x16a] sm:$0xff] }
 0x219   : > { %v1625_v60 = vpop.f32.mrf.mxu1 }
 0x21a   : > { %v2143_v57 = vadd.f32 %v2073_v1, %v1918_v37  ;;  %v2498_v46 = vsel %vm2434_vm11, %v2402_v56, %v2466_v36  ;;  %v1693_v16 = vadd.f32 %v1625_v60, %v8145_v3  ;;  %v7187_v1 = vld [vmem:[%s7694_s15 + $0x172] sm:$0xff]  ;;  %v1763_v37 = vpack.c.bf16 %v7083_v0, %v7082_v25 }
 0x21b   : > { %v2301_v29 = vpop.f32.mrf.mxu0  ;;  %2531 = vst.msk [vmem:[#allocation2 + $0x61] sm:$0xff] %vm296_vm3, %v2498_v46  ;;  %v2213_v32 = vpack.c.bf16 %v7187_v1, %v7186_v15 }
 0x21c   : > { %7052 = vmatmul.msk.bf16.gmra.mxu1 %vm526_vm2, %v2211_v33  ;;  %v7185_v33 = vld [vmem:[%s7694_s15 + $0x15a] sm:$0xff]  ;;  %v2368_v21 = vadd.f32 %v2298_v14, %v2143_v57  ;;  %7104 = vmatmul.msk.bf16.gmra.mxu2 %vm526_vm2, %v1762_v61 }
 0x21d   : > { %v2212_v12 = vpack.c.bf16 %v7185_v33, %v7184_v41  ;;  %7156 = vmatmul.msk.bf16.gmra.mxu3 %vm526_vm2, %v1987_v34  ;;  %v7135_v41 = vld [vmem:[%s7694_s15 + $0x171] sm:$0xff] }
 0x21e   : > { %v2403_v8 = vadd.f32 %v8388_v28, %v2368_v21  ;;  %v1988_v18 = vpack.c.bf16 %v7135_v41, %v7134_v7 }
 0x21f   : > { %7208 = vmatmul.msk.bf16.gmra.mxu0 %vm526_vm2, %v2212_v12  ;;  %v1851_v19 = vpop.f32.mrf.mxu2 }
 0x220   : > { %v2076_v45 = vpop.f32.mrf.mxu3  ;;  %vm2435_vm12 = vcmp.gt.f32.partialorder %v2403_v8, 0.0  ;;  %v2467_v50 = vmul.f32 0.1, %v2403_v8  ;;  %v1919_v14 = vadd.f32 %v1851_v19, %v1693_v16 }
 0x221   : > { %v1627_v39 = vpop.f32.mrf.mxu1 }
 0x222   : > { %v2499_v47 = vsel %vm2435_vm12, %v2403_v8, %v2467_v50  ;;  %v2144_v58 = vadd.f32 %v2076_v45, %v1919_v14  ;;  %v1694_v63 = vadd.f32 %v1627_v39, %v8153_v5  ;;  %v7085_v39 = vld [vmem:[%s7694_s15 + $0x188] sm:$0xff] }
 0x223   : > { %2532 = vst.msk [vmem:[#allocation2 + $0x69] sm:$0xff] %vm296_vm3, %v2499_v47  ;;  %v2303_v3 = vpop.f32.mrf.mxu0 }
 0x224   : > { %v2369_v49 = vadd.f32 %v2301_v29, %v2144_v58 }
 0x226   : > { %v2404_v56 = vadd.f32 %v8388_v28, %v2369_v49  ;;  %v7137_v49 = vld [vmem:[%s7694_s15 + $0x189] sm:$0xff] }
 0x227   : > { %v1853_v62 = vpop.f32.mrf.mxu2 }
 0x228   : > { %v2078_v26 = vpop.f32.mrf.mxu3  ;;  %vm2436_vm13 = vcmp.gt.f32.partialorder %v2404_v56, 0.0  ;;  %v2468_v33 = vmul.f32 0.1, %v2404_v56  ;;  %v1920_v36 = vadd.f32 %v1853_v62, %v1694_v63  ;;  %v7189_v63 = vld [vmem:[%s7694_s15 + $0x18a] sm:$0xff] }
 0x229   : > { %v1630_v61 = vpop.f32.mrf.mxu1 }
 0x22a   : > { %v2500_v60 = vsel %vm2436_vm13, %v2404_v56, %v2468_v33  ;;  %v2145_v34 = vadd.f32 %v2078_v26, %v1920_v36  ;;  %v1695_v51 = vadd.f32 %v1630_v61, %v8162_v30  ;;  %v7084_v30 = vld [vmem:[%s7694_s15 + $0x180] sm:$0xff] }
 0x22b   : > { %2533 = vst.msk [vmem:[#allocation2 + $0x79] sm:$0xff] %vm296_vm3, %v2500_v60  ;;  %v2306_v57 = vpop.f32.mrf.mxu0  ;;  %v7188_v56 = vld [vmem:[%s7694_s15 + $0x182] sm:$0xff]  ;;  %v1764_v62 = vpack.c.bf16 %v7085_v39, %v7084_v30  ;;  %v7190_v30 = vld [vmem:[%s7694_s15 + $0x19a] sm:$0xff] }
 0x22c   : > { %7053 = vmatmul.msk.bf16.gmra.mxu1 %vm526_vm2, %v2212_v12  ;;  %v2370_v12 = vadd.f32 %v2303_v3, %v2145_v34  ;;  %7105 = vmatmul.msk.bf16.gmra.mxu2 %vm526_vm2, %v1763_v37  ;;  %v7136_v3 = vld [vmem:[%s7694_s15 + $0x181] sm:$0xff]  ;;  %v2214_v36 = vpack.c.bf16 %v7189_v63, %v7188_v56 }
 0x22d   : > { %7157 = vmatmul.msk.bf16.gmra.mxu3 %vm526_vm2, %v1988_v18  ;;  %v1989_v15 = vpack.c.bf16 %v7137_v49, %v7136_v3  ;;  %v7191_v39 = vld [vmem:[%s7694_s15 + $0x1a2] sm:$0xff] }
 0x22e   : > { %v2405_v5 = vadd.f32 %v8388_v28, %v2370_v12  ;;  %v2215_v63 = vpack.c.bf16 %v7191_v39, %v7190_v30 }
 0x22f   : > { %7209 = vmatmul.msk.bf16.gmra.mxu0 %vm526_vm2, %v2213_v32  ;;  %v1856_v29 = vpop.f32.mrf.mxu2 }
 0x230   : > { %v2081_v46 = vpop.f32.mrf.mxu3  ;;  %vm2437_vm14 = vcmp.gt.f32.partialorder %v2405_v5, 0.0  ;;  %v2469_v21 = vmul.f32 0.1, %v2405_v5  ;;  %v1921_v8 = vadd.f32 %v1856_v29, %v1695_v51 }
 0x231   : > { %v1632_v16 = vpop.f32.mrf.mxu1 }
 0x232   : > { %v2501_v19 = vsel %vm2437_vm14, %v2405_v5, %v2469_v21  ;;  %v2146_v45 = vadd.f32 %v2081_v46, %v1921_v8  ;;  %v1696_v58 = vadd.f32 %v1632_v16, %v8169_v6  ;;  %v7087_v21 = vld [vmem:[%s7694_s15 + $0x1a0] sm:$0xff] }
 0x233   : > { %2534 = vst.msk [vmem:[#allocation2 + $0x81] sm:$0xff] %vm296_vm3, %v2501_v19  ;;  %v2308_v50 = vpop.f32.mrf.mxu0  ;;  %v7138_v19 = vld [vmem:[%s7694_s15 + $0x199] sm:$0xff] }
 0x234   : > { %v2371_v14 = vadd.f32 %v2306_v57, %v2146_v45  ;;  %v7139_v45 = vld [vmem:[%s7694_s15 + $0x1a1] sm:$0xff] }
 0x236   : > { %v2406_v47 = vadd.f32 %v8388_v28, %v2371_v14 }
 0x237   : > { %v1858_v25 = vpop.f32.mrf.mxu2 }
 0x238   : > { %v2083_v0 = vpop.f32.mrf.mxu3  ;;  %vm2438_vm15 = vcmp.gt.f32.partialorder %v2406_v47, 0.0  ;;  %v2470_v7 = vmul.f32 0.1, %v2406_v47  ;;  %v1922_v41 = vadd.f32 %v1858_v25, %v1696_v58  ;;  %v1990_v25 = vpack.c.bf16 %v7139_v45, %v7138_v19 }
 0x239   : > { %v1635_v26 = vpop.f32.mrf.mxu1 }
 0x23a   : > { %v2502_v1 = vsel %vm2438_vm15, %v2406_v47, %v2470_v7  ;;  %v2147_v33 = vadd.f32 %v2083_v0, %v1922_v41  ;;  %v1697_v18 = vadd.f32 %v1635_v26, %v8172_v11  ;;  %v7086_v11 = vld [vmem:[%s7694_s15 + $0x198] sm:$0xff] }
 0x23b   : > { %2535 = vst.msk [vmem:[#allocation2 + $0x91] sm:$0xff] %vm296_vm3, %v2502_v1  ;;  %v2311_v37 = vpop.f32.mrf.mxu0  ;;  %v1765_v3 = vpack.c.bf16 %v7087_v21, %v7086_v11 }
 0x23c   : > { %7054 = vmatmul.msk.bf16.gmra.mxu1 %vm526_vm2, %v2213_v32  ;;  %v2372_v61 = vadd.f32 %v2308_v50, %v2147_v33  ;;  %7106 = vmatmul.msk.bf16.gmra.mxu2 %vm526_vm2, %v1764_v62 }
 0x23d   : > { %7158 = vmatmul.msk.bf16.gmra.mxu3 %vm526_vm2, %v1989_v15 }
 0x23e   : > { %v2407_v6 = vadd.f32 %v8388_v28, %v2372_v61 }
 0x23f   : > { %7210 = vmatmul.msk.bf16.gmra.mxu0 %vm526_vm2, %v2214_v36  ;;  %v1861_v60 = vpop.f32.mrf.mxu2 }
 0x240   : > { %v2086_v34 = vpop.f32.mrf.mxu3  ;;  %vm2439_vm0 = vcmp.gt.f32.partialorder %v2407_v6, 0.0  ;;  %v2471_v32 = vmul.f32 0.1, %v2407_v6  ;;  %v1923_v57 = vadd.f32 %v1861_v60, %v1697_v18 }
 0x241   : > { %v1637_v12 = vpop.f32.mrf.mxu1 }
 0x242   : > { %v2503_v5 = vsel %vm2439_vm0, %v2407_v6, %v2471_v32  ;;  %v2148_v51 = vadd.f32 %v2086_v34, %v1923_v57  ;;  %v1698_v16 = vadd.f32 %v1637_v12, %v8183_v42 }
 0x243   : > { %2536 = vst.msk [vmem:[#allocation2 + $0x99] sm:$0xff] %vm296_vm3, %v2503_v5  ;;  %v2313_v29 = vpop.f32.mrf.mxu0 }
 0x244   : > { %v2373_v46 = vadd.f32 %v2311_v37, %v2148_v51 }
 0x246   : > { %v2408_v8 = vadd.f32 %v8388_v28, %v2373_v46 }
 0x247   : > { %v1863_v50 = vpop.f32.mrf.mxu2 }
 0x248   : > { %v2088_v14 = vpop.f32.mrf.mxu3  ;;  %vm2440_vm1 = vcmp.gt.f32.partialorder %v2408_v8, 0.0  ;;  %v2472_v47 = vmul.f32 0.1, %v2408_v8  ;;  %v1924_v58 = vadd.f32 %v1863_v50, %v1698_v16 }
 0x249   : > { %v1640_v49 = vpop.f32.mrf.mxu1 }
 0x24a   : > { %v2504_v0 = vsel %vm2440_vm1, %v2408_v8, %v2472_v47  ;;  %v2149_v56 = vadd.f32 %v2088_v14, %v1924_v58  ;;  %v1699_v62 = vadd.f32 %v1640_v49, %v8186_v13 }
 0x24b   : > { %2537 = vst.msk [vmem:[#allocation2 + $0xa9] sm:$0xff] %vm296_vm3, %v2504_v0  ;;  %v2316_v7 = vpop.f32.mrf.mxu0 }
 0x24c   : > { %7055 = vmatmul.msk.bf16.gmra.mxu1 %vm526_vm2, %v2214_v36  ;;  %v2374_v41 = vadd.f32 %v2313_v29, %v2149_v56  ;;  %7107 = vmatmul.msk.bf16.gmra.mxu2 %vm526_vm2, %v1765_v3 }
 0x24d   : > { %7159 = vmatmul.msk.bf16.gmra.mxu3 %vm526_vm2, %v1990_v25 }
 0x24e   : > { %v2409_v42 = vadd.f32 %v8388_v28, %v2374_v41 }
 0x24f   : > { %7211 = vmatmul.msk.bf16.gmra.mxu0 %vm526_vm2, %v2215_v63  ;;  %v1866_v26 = vpop.f32.mrf.mxu2 }
 0x250   : > { %v2091_v15 = vpop.f32.mrf.mxu3  ;;  %vm2441_vm4 = vcmp.gt.f32.partialorder %v2409_v42, 0.0  ;;  %v2473_v1 = vmul.f32 0.1, %v2409_v42  ;;  %v1925_v33 = vadd.f32 %v1866_v26, %v1699_v62 }
 0x251   : > { %v1642_v36 = vpop.f32.mrf.mxu1 }
 0x252   : > { %v2505_v37 = vsel %vm2441_vm4, %v2409_v42, %v2473_v1  ;;  %v2150_v61 = vadd.f32 %v2091_v15, %v1925_v33  ;;  %v1700_v34 = vadd.f32 %v1642_v36, %v8197_v38 }
 0x253   : > { %2538 = vst.msk [vmem:[#allocation2 + $0xb1] sm:$0xff] %vm296_vm3, %v2505_v37  ;;  %v2318_v6 = vpop.f32.mrf.mxu0 }
 0x254   : > { %v2375_v18 = vadd.f32 %v2316_v7, %v2150_v61 }
 0x256   : > { %v2410_v60 = vadd.f32 %v8388_v28, %v2375_v18 }
 0x257   : > { %v1868_v32 = vpop.f32.mrf.mxu2 }
 0x258   : > { %v2093_v13 = vpop.f32.mrf.mxu3  ;;  %vm2442_vm5 = vcmp.gt.f32.partialorder %v2410_v60, 0.0  ;;  %v2474_v57 = vmul.f32 0.1, %v2410_v60  ;;  %v1926_v12 = vadd.f32 %v1868_v32, %v1700_v34 }
 0x259   : > { %v1645_v5 = vpop.f32.mrf.mxu1 }
 0x25a   : > { %v2506_v51 = vsel %vm2442_vm5, %v2410_v60, %v2474_v57  ;;  %v2151_v29 = vadd.f32 %v2093_v13, %v1926_v12  ;;  %v1701_v8 = vadd.f32 %v1645_v5, %v8202_v9 }
 0x25b   : > { %2539 = vst.msk [vmem:[#allocation2 + $0xc1] sm:$0xff] %vm296_vm3, %v2506_v51  ;;  %v2321_v46 = vpop.f32.mrf.mxu0 }
 0x25c   : > { %v2376_v11 = vadd.f32 %v2318_v6, %v2151_v29 }
 0x25e   : > { %v2411_v21 = vadd.f32 %v8388_v28, %v2376_v11 }
 0x25f   : > { %v1871_v16 = vpop.f32.mrf.mxu2 }
 0x260   : > { %v2096_v19 = vpop.f32.mrf.mxu3  ;;  %vm2443_vm2 = vcmp.gt.f32.partialorder %v2411_v21, 0.0  ;;  %v2475_v38 = vmul.f32 0.1, %v2411_v21  ;;  %v1927_v45 = vadd.f32 %v1871_v16, %v1701_v8 }
 0x261   : > { %v1647_v50 = vpop.f32.mrf.mxu1 }
 0x262   : > { %v2507_v14 = vsel %vm2443_vm2, %v2411_v21, %v2475_v38  ;;  %v2152_v30 = vadd.f32 %v2096_v19, %v1927_v45  ;;  %v1702_v3 = vadd.f32 %v1647_v50, %v8212_v53 }
 0x263   : > { %2540 = vst.msk [vmem:[#allocation2 + $0xc9] sm:$0xff] %vm296_vm3, %v2507_v14  ;;  %v2323_v39 = vpop.f32.mrf.mxu0 }
 0x264   : > { %v2377_v47 = vadd.f32 %v2321_v46, %v2152_v30 }
 0x266   : > { %v2412_v58 = vadd.f32 %v8388_v28, %v2377_v47 }
 0x267   : > { %v1873_v49 = vpop.f32.mrf.mxu2 }
 0x268   : > { %v2098_v25 = vpop.f32.mrf.mxu3  ;;  %vm2444_vm6 = vcmp.gt.f32.partialorder %v2412_v58, 0.0  ;;  %v2476_v9 = vmul.f32 0.1, %v2412_v58  ;;  %v1928_v0 = vadd.f32 %v1873_v49, %v1702_v3 }
 0x269   : > { %v1650_v56 = vpop.f32.mrf.mxu1 }
 0x26a   : > { %v2508_v63 = vsel %vm2444_vm6, %v2412_v58, %v2476_v9  ;;  %v2153_v7 = vadd.f32 %v2098_v25, %v1928_v0  ;;  %v1703_v26 = vadd.f32 %v1650_v56, %v8217_v40 }
 0x26b   : > { %2541 = vst.msk [vmem:[#allocation2 + $0xd9] sm:$0xff] %vm296_vm3, %v2508_v63  ;;  %v2326_v41 = vpop.f32.mrf.mxu0 }
 0x26c   : > { %v2378_v42 = vadd.f32 %v2323_v39, %v2153_v7 }
 0x26e   : > { %v2413_v62 = vadd.f32 %v8388_v28, %v2378_v42 }
 0x26f   : > { %v1876_v15 = vpop.f32.mrf.mxu2 }
 0x270   : > { %v2101_v1 = vpop.f32.mrf.mxu3  ;;  %vm2445_vm7 = vcmp.gt.f32.partialorder %v2413_v62, 0.0  ;;  %v2477_v53 = vmul.f32 0.1, %v2413_v62  ;;  %v1929_v33 = vadd.f32 %v1876_v15, %v1703_v26 }
 0x271   : > { %v1652_v36 = vpop.f32.mrf.mxu1 }
 0x272   : > { %v2509_v37 = vsel %vm2445_vm7, %v2413_v62, %v2477_v53  ;;  %v2154_v61 = vadd.f32 %v2101_v1, %v1929_v33  ;;  %v1704_v34 = vadd.f32 %v1652_v36, %v8227_v22 }
 0x273   : > { %2542 = vst.msk [vmem:[#allocation2 + $0xe1] sm:$0xff] %vm296_vm3, %v2509_v37  ;;  %v2328_v6 = vpop.f32.mrf.mxu0 }
 0x274   : > { %v2379_v18 = vadd.f32 %v2326_v41, %v2154_v61 }
 0x276   : > { %v2414_v60 = vadd.f32 %v8388_v28, %v2379_v18 }
 0x277   : > { %v1878_v32 = vpop.f32.mrf.mxu2 }
 0x278   : > { %v2103_v13 = vpop.f32.mrf.mxu3  ;;  %vm2446_vm8 = vcmp.gt.f32.partialorder %v2414_v60, 0.0  ;;  %v2478_v40 = vmul.f32 0.1, %v2414_v60  ;;  %v1930_v57 = vadd.f32 %v1878_v32, %v1704_v34 }
 0x279   : > { %v1655_v12 = vpop.f32.mrf.mxu1 }
 0x27a   : > { %v2510_v5 = vsel %vm2446_vm8, %v2414_v60, %v2478_v40  ;;  %v2155_v51 = vadd.f32 %v2103_v13, %v1930_v57  ;;  %v1705_v21 = vadd.f32 %v1655_v12, %v8232_v23 }
 0x27b   : > { %2543 = vst.msk [vmem:[#allocation2 + $0xf1] sm:$0xff] %vm296_vm3, %v2510_v5  ;;  %v2331_v29 = vpop.f32.mrf.mxu0 }
 0x27c   : > { %v2380_v46 = vadd.f32 %v2328_v6, %v2155_v51 }
 0x27e   : > { %v2415_v11 = vadd.f32 %v8388_v28, %v2380_v46 }
 0x27f   : > { %v1881_v8 = vpop.f32.mrf.mxu2 }
 0x280   : > { %vm2447_vm9 = vcmp.gt.f32.partialorder %v2415_v11, 0.0  ;;  %v2479_v16 = vmul.f32 0.1, %v2415_v11  ;;  %v1931_v22 = vadd.f32 %v1881_v8, %v1705_v21  ;;  %v2106_v19 = vpop.f32.mrf.mxu3 }
 0x281   : > { %v1657_v38 = vpop.f32.mrf.mxu1 }
 0x282   : > { %v2511_v45 = vsel %vm2447_vm9, %v2415_v11, %v2479_v16  ;;  %v2156_v50 = vadd.f32 %v2106_v19, %v1931_v22  ;;  %v1706_v47 = vadd.f32 %v1657_v38, %v8242_v27 }
 0x283   : > { %2544 = vst.msk [vmem:[#allocation2 + $0xf9] sm:$0xff] %vm296_vm3, %v2511_v45  ;;  %v2333_v14 = vpop.f32.mrf.mxu0 }
 0x284   : > { %v2381_v30 = vadd.f32 %v2331_v29, %v2156_v50 }
 0x286   : > { %v2416_v39 = vadd.f32 %v8388_v28, %v2381_v30 }
 0x287   : > { %v1883_v58 = vpop.f32.mrf.mxu2 }
 0x288   : > { %vm2448_vm10 = vcmp.gt.f32.partialorder %v2416_v39, 0.0  ;;  %v2480_v3 = vmul.f32 0.1, %v2416_v39  ;;  %v1932_v23 = vadd.f32 %v1883_v58, %v1706_v47  ;;  %v2108_v49 = vpop.f32.mrf.mxu3 }
 0x289   : > { %v1660_v25 = vpop.f32.mrf.mxu1 }
 0x28a   : > { %v2512_v9 = vsel %vm2448_vm10, %v2416_v39, %v2480_v3  ;;  %v2157_v0 = vadd.f32 %v2108_v49, %v1932_v23  ;;  %v1707_v41 = vadd.f32 %v1660_v25, %v8247_v24 }
 0x28b   : > { %2545 = vst.msk [vmem:[#allocation2 + $0x109] sm:$0xff] %vm296_vm3, %v2512_v9  ;;  %v2336_v56 = vpop.f32.mrf.mxu0 }
 0x28c   : > { %v2382_v63 = vadd.f32 %v2333_v14, %v2157_v0 }
 0x28e   : > { %v2417_v7 = vadd.f32 %v8388_v28, %v2382_v63 }
 0x28f   : > { %v1886_v42 = vpop.f32.mrf.mxu2 }
 0x290   : > { %vm2449_vm11 = vcmp.gt.f32.partialorder %v2417_v7, 0.0  ;;  %v2481_v62 = vmul.f32 0.1, %v2417_v7  ;;  %v1933_v27 = vadd.f32 %v1886_v42, %v1707_v41  ;;  %v2111_v26 = vpop.f32.mrf.mxu3 }
 0x291   : > { %v1662_v15 = vpop.f32.mrf.mxu1 }
 0x292   : > { %v2513_v1 = vsel %vm2449_vm11, %v2417_v7, %v2481_v62  ;;  %v2158_v53 = vadd.f32 %v2111_v26, %v1933_v27  ;;  %v1708_v61 = vadd.f32 %v1662_v15, %v8257_v10  ;;  %v8713_v62 = vld [vmem:[%s10289_s2] ss:$0 sm:$0xff] }
 0x293   : > { %2546 = vst.msk [vmem:[#allocation2 + $0x111] sm:$0xff] %vm296_vm3, %v2513_v1  ;;  %v2338_v33 = vpop.f32.mrf.mxu0 }
 0x294   : > { %v2383_v36 = vadd.f32 %v2336_v56, %v2158_v53 }
 0x296   : > { %v2418_v37 = vadd.f32 %v8388_v28, %v2383_v36 }
 0x297   : > { %v1888_v6 = vpop.f32.mrf.mxu2 }
 0x298   : > { %vm2450_vm12 = vcmp.gt.f32.partialorder %v2418_v37, 0.0  ;;  %v2482_v18 = vmul.f32 0.1, %v2418_v37  ;;  %v1934_v24 = vadd.f32 %v1888_v6, %v1708_v61  ;;  %v2113_v60 = vpop.f32.mrf.mxu3 }
 0x299   : > { %v1665_v34 = vpop.f32.mrf.mxu1 }
 0x29a   : > { %v2514_v32 = vsel %vm2450_vm12, %v2418_v37, %v2482_v18  ;;  %v2159_v13 = vadd.f32 %v2113_v60, %v1934_v24  ;;  %v1709_v5 = vadd.f32 %v1665_v34, %v8261_v2 }
 0x29b   : > { %2547 = vst.msk [vmem:[#allocation2 + $0x121] sm:$0xff] %vm296_vm3, %v2514_v32 }
 0x29c   : > { %v2341_v40 = vpop.f32.mrf.mxu0  ;;  %v2384_v57 = vadd.f32 %v2338_v33, %v2159_v13  ;;  %v10352_v33 = vld [vmem:[#allocation9_spill] sm:$0xff] }
 0x29d   : > { %v809_v36 = vadd.f32 %v8275_v31, %v10352_v33 }
 0x29e   : > { %v2419_v12 = vadd.f32 %v8388_v28, %v2384_v57 }
 0x29f   : > { %v1891_v51 = vpop.f32.mrf.mxu2  ;;  %v1038_v6 = vadd.f32 %v8294_v54, %v809_v36 }
 0x2a0   : > { %vm2451_vm13 = vcmp.gt.f32.partialorder %v2419_v12, 0.0  ;;  %v2483_v29 = vmul.f32 0.1, %v2419_v12  ;;  %v1935_v10 = vadd.f32 %v1891_v51, %v1709_v5  ;;  %v2116_v46 = vpop.f32.mrf.mxu3 }
 0x2a1   : > { %v1667_v11 = vpop.f32.mrf.mxu1  ;;  %v1264_v32 = vadd.f32 %v8298_v59, %v1038_v6 }
 0x2a2   : > { %v2515_v21 = vsel %vm2451_vm13, %v2419_v12, %v2483_v29  ;;  %v2160_v8 = vadd.f32 %v2116_v46, %v1935_v10  ;;  %v1710_v38 = vadd.f32 %v1667_v11, %v8273_v17 }
 0x2a3   : > { %2548 = vst.msk [vmem:[#allocation2 + $0x129] sm:$0xff] %vm296_vm3, %v2515_v21  ;;  %v1489_v54 = vadd.f32 %v8285_v43, %v1264_v32 }
 0x2a4   : > { %v2343_v16 = vpop.f32.mrf.mxu0  ;;  %v2385_v22 = vadd.f32 %v2341_v40, %v2160_v8 }
 0x2a6   : > { %v2420_v19 = vadd.f32 %v8388_v28, %v2385_v22 }
 0x2a7   : > { %v1893_v45 = vpop.f32.mrf.mxu2 }
 0x2a8   : > { %vm2452_vm14 = vcmp.gt.f32.partialorder %v2420_v19, 0.0  ;;  %v2484_v50 = vmul.f32 0.1, %v2420_v19  ;;  %v1936_v2 = vadd.f32 %v1893_v45, %v1710_v38  ;;  %v2118_v14 = vpop.f32.mrf.mxu3 }
 0x2a9   : > { %v1670_v30 = vpop.f32.mrf.mxu1 }
 0x2aa   : > { %v2516_v39 = vsel %vm2452_vm14, %v2420_v19, %v2484_v50  ;;  %v2161_v47 = vadd.f32 %v2118_v14, %v1936_v2  ;;  %v1711_v49 = vadd.f32 %v1670_v30, %v8302_v4 }
 0x2ab   : > { %2549 = vst.msk [vmem:[#allocation2 + $0x139] sm:$0xff] %vm296_vm3, %v2516_v39 }
 0x2ac   : > { %v2346_v58 = vpop.f32.mrf.mxu0  ;;  %v2386_v3 = vadd.f32 %v2343_v16, %v2161_v47  ;;  %v10353_v16 = vld [vmem:[#allocation13_spill] sm:$0xff] }
 0x2ad   : > { %v814_v22 = vadd.f32 %v8330_v20, %v10353_v16 }
 0x2ae   : > { %v2421_v23 = vadd.f32 %v8388_v28, %v2386_v3 }
 0x2af   : > { %v1896_v25 = vpop.f32.mrf.mxu2  ;;  %v1040_v45 = vadd.f32 %v8346_v55, %v814_v22  ;;  %v10354_v55 = vld [vmem:[#allocation4_spill] sm:$0xff] }
 0x2b0   : > { %vm2453_vm15 = vcmp.gt.f32.partialorder %v2421_v23, 0.0  ;;  %v2485_v9 = vmul.f32 0.1, %v2421_v23  ;;  %v1937_v17 = vadd.f32 %v1896_v25, %v1711_v49  ;;  %v2121_v0 = vpop.f32.mrf.mxu3 }
 0x2b1   : > { %v1672_v56 = vpop.f32.mrf.mxu1  ;;  %v1266_v30 = vadd.f32 %v8350_v52, %v1040_v45 }
 0x2b2   : > { %v2517_v63 = vsel %vm2453_vm15, %v2421_v23, %v2485_v9  ;;  %v2162_v7 = vadd.f32 %v2121_v0, %v1937_v17  ;;  %v1712_v4 = vadd.f32 %v1672_v56, %v8328_v44 }
 0x2b3   : > { %2550 = vst.msk [vmem:[#allocation2 + $0x141] sm:$0xff] %vm296_vm3, %v2517_v63  ;;  %v1491_v9 = vadd.f32 %v10354_v55, %v1266_v30 }
 0x2b4   : > { %v2348_v41 = vpop.f32.mrf.mxu0  ;;  %v2387_v42 = vadd.f32 %v2346_v58, %v2162_v7 }
 0x2b6   : > { %v2422_v28 = vadd.f32 %v8713_v62, %v2387_v42 }
 0x2b7   : > { %v1898_v27 = vpop.f32.mrf.mxu2 }
 0x2b8   : > { %vm2454_vm0 = vcmp.gt.f32.partialorder %v2422_v28, 0.0  ;;  %v2486_v26 = vmul.f32 0.1, %v2422_v28  ;;  %v1938_v15 = vadd.f32 %v1898_v27, %v1712_v4  ;;  %v2123_v1 = vpop.f32.mrf.mxu3 }
 0x2b9   : > { %v1675_v53 = vpop.f32.mrf.mxu1 }
 0x2ba   : > { %v2518_v37 = vsel %vm2454_vm0, %v2422_v28, %v2486_v26  ;;  %v2163_v61 = vadd.f32 %v2123_v1, %v1938_v15  ;;  %v1713_v44 = vadd.f32 %v1675_v53, %v8355_v48 }
 0x2bb   : > { %2551 = vst.msk [vmem:[#allocation2 + $0x151] sm:$0xff] %vm296_vm3, %v2518_v37 }
 0x2bc   : > { %v2388_v18 = vadd.f32 %v2348_v41, %v2163_v61  ;;  %v2351_v24 = vpop.f32.mrf.mxu0 }
 0x2be   : > { %v2423_v60 = vadd.f32 %v8713_v62, %v2388_v18 }
 0x2bf   : > { %v1901_v34 = vpop.f32.mrf.mxu2 }
 0x2c0   : > { %vm2455_vm1 = vcmp.gt.f32.partialorder %v2423_v60, 0.0  ;;  %v2487_v13 = vmul.f32 0.1, %v2423_v60  ;;  %v1939_v40 = vadd.f32 %v1901_v34, %v1713_v44  ;;  %v2126_v57 = vpop.f32.mrf.mxu3 }
 0x2c1   : > { %v1677_v31 = vpop.f32.mrf.mxu1 }
 0x2c2   : > { %v2519_v12 = vsel %vm2455_vm1, %v2423_v60, %v2487_v13  ;;  %v2164_v5 = vadd.f32 %v2126_v57, %v1939_v40  ;;  %v1714_v10 = vadd.f32 %v1677_v31, %v1489_v54 }
 0x2c3   : > { %2552 = vst.msk [vmem:[#allocation2 + $0x159] sm:$0xff] %vm296_vm3, %v2519_v12 }
 0x2c4   : > { %v2389_v51 = vadd.f32 %v2351_v24, %v2164_v5  ;;  %v2353_v46 = vpop.f32.mrf.mxu0 }
 0x2c6   : > { %v2424_v29 = vadd.f32 %v8713_v62, %v2389_v51 }
 0x2c7   : > { %v1903_v48 = vpop.f32.mrf.mxu2 }
 0x2c8   : > { %vm2456_vm4 = vcmp.gt.f32.partialorder %v2424_v29, 0.0  ;;  %v2488_v11 = vmul.f32 0.1, %v2424_v29  ;;  %v1940_v59 = vadd.f32 %v1903_v48, %v1714_v10  ;;  %v2128_v21 = vpop.f32.mrf.mxu3 }
 0x2c9   : > { %v1680_v8 = vpop.f32.mrf.mxu1 }
 0x2ca   : > { %v2520_v19 = vsel %vm2456_vm4, %v2424_v29, %v2488_v11  ;;  %v2165_v38 = vadd.f32 %v2128_v21, %v1940_v59  ;;  %v1715_v2 = vadd.f32 %v1680_v8, %v8405_v35 }
 0x2cb   : > { %2553 = vst.msk [vmem:[#allocation2 + $0x169] sm:$0xff] %vm296_vm3, %v2520_v19 }
 0x2cc   : > { %v2390_v43 = vadd.f32 %v2353_v46, %v2165_v38  ;;  %v2356_v3 = vpop.f32.mrf.mxu0 }
 0x2ce   : > { %v2425_v50 = vadd.f32 %v8713_v62, %v2390_v43 }
 0x2cf   : > { %v1906_v14 = vpop.f32.mrf.mxu2 }
 0x2d0   : > { %vm2457_vm5 = vcmp.gt.f32.partialorder %v2425_v50, 0.0  ;;  %v2489_v39 = vmul.f32 0.1, %v2425_v50  ;;  %v1941_v47 = vadd.f32 %v1906_v14, %v1715_v2  ;;  %v2131_v58 = vpop.f32.mrf.mxu3 }
 0x2d1   : > { %v1682_v49 = vpop.f32.mrf.mxu1 }
 0x2d2   : > { %v2521_v20 = vsel %vm2457_vm5, %v2425_v50, %v2489_v39  ;;  %v2166_v23 = vadd.f32 %v2131_v58, %v1941_v47  ;;  %v1716_v0 = vadd.f32 %v1682_v49, %v1491_v9 }
 0x2d3   : > { %2554 = vst.msk [vmem:[#allocation2 + $0x171] sm:$0xff] %vm296_vm3, %v2521_v20 }
 0x2d4   : > { %v2391_v25 = vadd.f32 %v2356_v3, %v2166_v23  ;;  %v2358_v42 = vpop.f32.mrf.mxu0 }
 0x2d6   : > { %v2426_v17 = vadd.f32 %v8713_v62, %v2391_v25 }
 0x2d7   : > { %v1908_v35 = vpop.f32.mrf.mxu2 }
 0x2d8   : > { %vm2458_vm2 = vcmp.gt.f32.partialorder %v2426_v17, 0.0  ;;  %v2490_v56 = vmul.f32 0.1, %v2426_v17  ;;  %v1942_v52 = vadd.f32 %v1908_v35, %v1716_v0  ;;  %v2133_v63 = vpop.f32.mrf.mxu3 }
 0x2da   : > { %v2522_v7 = vsel %vm2458_vm2, %v2426_v17, %v2490_v56  ;;  %v2167_v41 = vadd.f32 %v2133_v63, %v1942_v52 }
 0x2db   : > { %2555 = vst.msk [vmem:[#allocation2 + $0x181] sm:$0xff] %vm296_vm3, %v2522_v7 }
 0x2dc   : > { %v2392_v28 = vadd.f32 %v2358_v42, %v2167_v41 }
 0x2de   : > { %v2427_v4 = vadd.f32 %v8713_v62, %v2392_v28 }
 0x2e0   : > { %vm2459_vm6 = vcmp.gt.f32.partialorder %v2427_v4, 0.0  ;;  %v2491_v27 = vmul.f32 0.1, %v2427_v4 }
 0x2e2   : > { %v2523_v26 = vsel %vm2459_vm6, %v2427_v4, %v2491_v27 }
 0x2e3   : > { %2556 = vst.msk [vmem:[#allocation2 + $0x189] sm:$0xff] %vm296_vm3, %v2523_v26 }
 0x2e4 PF: > { %p7212_p7 = scmp.le.s32.totalorder %s7594_s24, 0 }
 0x2e6   : > { %2560 = sbr.rel (%p7212_p7) target bundleno = 2178 (0x882), region = 56 }
 0x2eb   : > { %s8742_s8 = sadd.s32 4294967295, %s7594_s24  ;;  %v2624_v15 = vld [vmem:[#allocation2 + $0x1] sm:$0xff]  ;;  %v2625_v62 = vld [vmem:[#allocation2 + $0x9] sm:$0xff]  ;;  %vm2721_vm3 = vcmask 1043456   ;;  %vm2672_vm7 = vcmask 64512   ;;  %v2626_v54 = vld [vmem:[#allocation2 + $0x19] sm:$0xff] }
 0x2ec   : > { %s7517_s9 = smul.u32 36, %s8742_s8  ;;  %s8749_s13 = scalar_lea.vmem %s10291_s4, %s8742_s8  ;;  %v2640_v1 = vld [vmem:[#allocation2 + $0xc1] sm:$0xff]  ;;  %v2641_v53 = vld [vmem:[#allocation2 + $0xc9] sm:$0xff]  ;;  %v2656_v24 = vpack.c.bf16 %v2625_v62, %v2624_v15  ;;  %v2642_v10 = vld [vmem:[#allocation2 + $0xd9] sm:$0xff] }
 0x2ed   : > { %s4607_s17 = scalar_lea.vmem %s10293_s6, %s8742_s8  ;;  %v2592_v33 = vld [vmem:[#allocation2 + $0xc0] sm:$0xff]  ;;  %v2593_v36 = vld [vmem:[#allocation2 + $0xc8] sm:$0xff]  ;;  %v8767_v32 = vpack.c.bf16 %v2641_v53, %v2640_v1  ;;  %v2594_v48 = vld [vmem:[#allocation2 + $0xd8] sm:$0xff] }
 0x2ee   : > { %s8760_s20 = scalar_lea.vmem %s10290_s3, %s7517_s9  ;;  %v2576_v37 = vld [vmem:[#allocation2] sm:$0xff]  ;;  %v2577_v61 = vld [vmem:[#allocation2 + $0x8] sm:$0xff]  ;;  %v8771_v57 = vpack.c.bf16 %v2593_v36, %v2592_v33  ;;  %v2578_v59 = vld [vmem:[#allocation2 + $0x18] sm:$0xff]  ;;  %s9030_s23 = scalar_lea.vmem %s10292_s5, %s7517_s9 }
 0x2ef   : > { %v2566_v6 = vld [vmem:[%s8760_s20 + $0x4] sm:$0xf]  ;;  %v2565_v18 = vld [vmem:[%s8760_s20] sm:$0xf]  ;;  %v2567_v60 = vld [vmem:[%s8760_s20 + $0x8] sm:$0xf]  ;;  %v2608_v31 = vpack.c.bf16 %v2577_v61, %v2576_v37 }
 0x2f0   : > { %v2723_v44 = vsel %vm2721_vm3, %v2566_v6, 0  ;;  %v2863_v34 = vsel %vm2721_vm3, %v2565_v18, 0  ;;  %v3051_v13 = vsel %vm2721_vm3, %v2567_v60, 0  ;;  %v2568_v40 = vld [vmem:[%s8760_s20 + $0xc] sm:$0xf]  ;;  %v2627_v29 = vld [vmem:[#allocation2 + $0x21] sm:$0xff] }
 0x2f1   : > { %2732 = vmatpush.bf16.msra.mxu0 %v2723_v44  ;;  %7522 = vmatpush.bf16.msra.mxu2 %v2723_v44  ;;  %v3272_v12 = vsel %vm2721_vm3, %v2568_v40, 0  ;;  %v2569_v5 = vld [vmem:[%s8760_s20 + $0x10] sm:$0xf]  ;;  %v2643_v46 = vld [vmem:[#allocation2 + $0xe1] sm:$0xff]  ;;  %v8782_v8 = vpack.c.bf16 %v2627_v29, %v2626_v54  ;;  %v2629_v45 = vld [vmem:[#allocation2 + $0x39] sm:$0xff] }
 0x2f2   : > { %7523 = vmatpush.bf16.msra.mxu3 %v2863_v34  ;;  %2872 = vmatpush.bf16.msra.mxu1 %v2863_v34  ;;  %v3492_v51 = vsel %vm2721_vm3, %v2569_v5, 0  ;;  %v2595_v11 = vld [vmem:[#allocation2 + $0xe0] sm:$0xff]  ;;  %v8784_v16 = vpack.c.bf16 %v2643_v46, %v2642_v10  ;;  %v2628_v38 = vld [vmem:[#allocation2 + $0x31] sm:$0xff]  ;;  %v2630_v23 = vld [vmem:[#allocation2 + $0x49] sm:$0xff] }
 0x2f3   : > { %v2579_v21 = vld [vmem:[#allocation2 + $0x20] sm:$0xff]  ;;  %v8786_v22 = vpack.c.bf16 %v2595_v11, %v2594_v48  ;;  %v2644_v43 = vld [vmem:[#allocation2 + $0xf1] sm:$0xff]  ;;  %v8798_v47 = vpack.c.bf16 %v2629_v45, %v2628_v38  ;;  %v2646_v25 = vld [vmem:[#allocation2 + $0x109] sm:$0xff] }
 0x2f4   : > { %7215 = vmatmul.msk.bf16.vlgmr.msra.gmra.mxu0 %vm2672_vm7, %v2656_v24  ;;  %7223 = vmatmul.msk.bf16.vlgmr.msra.gmra.mxu2 %vm2672_vm7, %v8767_v32  ;;  %v8788_v19 = vpack.c.bf16 %v2579_v21, %v2578_v59  ;;  %v2645_v50 = vld [vmem:[#allocation2 + $0xf9] sm:$0xff]  ;;  %v2596_v2 = vld [vmem:[#allocation2 + $0xf0] sm:$0xff]  ;;  %v2598_v9 = vld [vmem:[#allocation2 + $0x108] sm:$0xff] }
 0x2f5   : > { %3060 = vmatpush.bf16.msrb.mxu2 %v3051_v13  ;;  %7239 = vmatmul.msk.bf16.vlgmr.msra.gmra.mxu3 %vm2672_vm7, %v8771_v57  ;;  %v2597_v14 = vld [vmem:[#allocation2 + $0xf8] sm:$0xff]  ;;  %v2580_v30 = vld [vmem:[#allocation2 + $0x30] sm:$0xff]  ;;  %v8800_v58 = vpack.c.bf16 %v2645_v50, %v2644_v43  ;;  %v2582_v0 = vld [vmem:[#allocation2 + $0x48] sm:$0xff] }
 0x2f6   : > { %3281 = vmatpush.bf16.msrb.mxu3 %v3272_v12  ;;  %7231 = vmatmul.msk.bf16.vlgmr.msra.gmra.mxu1 %vm2672_vm7, %v2608_v31  ;;  %v2581_v39 = vld [vmem:[#allocation2 + $0x38] sm:$0xff]  ;;  %v8802_v3 = vpack.c.bf16 %v2597_v14, %v2596_v2  ;;  %v2599_v17 = vld [vmem:[#allocation2 + $0x110] sm:$0xff]  ;;  %v2632_v41 = vld [vmem:[#allocation2 + $0x61] sm:$0xff] }
 0x2f7   : > { %3501 = vmatpush.bf16.msrb.mxu0 %v3492_v51  ;;  %v8804_v20 = vpack.c.bf16 %v2581_v39, %v2580_v30  ;;  %v2631_v49 = vld [vmem:[#allocation2 + $0x51] sm:$0xff]  ;;  %v8818_v63 = vpack.c.bf16 %v2599_v17, %v2598_v9  ;;  %v2633_v42 = vld [vmem:[#allocation2 + $0x69] sm:$0xff]  ;;  %v2648_v28 = vld [vmem:[#allocation2 + $0x121] sm:$0xff] }
 0x2f8   : > { %v2647_v55 = vld [vmem:[#allocation2 + $0x111] sm:$0xff]  ;;  %v8814_v56 = vpack.c.bf16 %v2631_v49, %v2630_v23  ;;  %v2649_v4 = vld [vmem:[#allocation2 + $0x129] sm:$0xff]  ;;  %v2600_v27 = vld [vmem:[#allocation2 + $0x120] sm:$0xff]  ;;  %v8830_v1 = vpack.c.bf16 %v2633_v42, %v2632_v41 }
 0x2f9   : > { %v2583_v35 = vld [vmem:[#allocation2 + $0x50] sm:$0xff]  ;;  %v8816_v52 = vpack.c.bf16 %v2647_v55, %v2646_v25  ;;  %v2601_v26 = vld [vmem:[#allocation2 + $0x128] sm:$0xff]  ;;  %v2584_v15 = vld [vmem:[#allocation2 + $0x60] sm:$0xff]  ;;  %v8832_v53 = vpack.c.bf16 %v2649_v4, %v2648_v28 }
 0x2fa   : > { %v8820_v7 = vpack.c.bf16 %v2583_v35, %v2582_v0  ;;  %v2585_v62 = vld [vmem:[#allocation2 + $0x68] sm:$0xff]  ;;  %v8834_v33 = vpack.c.bf16 %v2601_v26, %v2600_v27  ;;  %v2634_v37 = vld [vmem:[#allocation2 + $0x79] sm:$0xff]  ;;  %v2636_v5 = vld [vmem:[#allocation2 + $0x91] sm:$0xff] }
 0x2fb   : > { %v8836_v36 = vpack.c.bf16 %v2585_v62, %v2584_v15  ;;  %v2635_v61 = vld [vmem:[#allocation2 + $0x81] sm:$0xff]  ;;  %v2650_v6 = vld [vmem:[#allocation2 + $0x139] sm:$0xff]  ;;  %v2652_v54 = vld [vmem:[#allocation2 + $0x151] sm:$0xff] }
 0x2fc   : > { %v2651_v18 = vld [vmem:[#allocation2 + $0x141] sm:$0xff]  ;;  %v2602_v24 = vld [vmem:[#allocation2 + $0x138] sm:$0xff]  ;;  %v8846_v13 = vpack.c.bf16 %v2635_v61, %v2634_v37  ;;  %v2604_v10 = vld [vmem:[#allocation2 + $0x150] sm:$0xff] }
 0x2fd   : > { %v2603_v60 = vld [vmem:[#allocation2 + $0x140] sm:$0xff]  ;;  %v2586_v44 = vld [vmem:[#allocation2 + $0x78] sm:$0xff]  ;;  %v8848_v40 = vpack.c.bf16 %v2651_v18, %v2650_v6  ;;  %v2588_v48 = vld [vmem:[#allocation2 + $0x90] sm:$0xff] }
 0x2fe   : > { %v2587_v34 = vld [vmem:[#allocation2 + $0x80] sm:$0xff]  ;;  %v8850_v31 = vpack.c.bf16 %v2603_v60, %v2602_v24  ;;  %v2605_v46 = vld [vmem:[#allocation2 + $0x158] sm:$0xff]  ;;  %v2570_v30 = vld [vmem:[%s8760_s20 + $0x14] sm:$0xf] }
 0x2ff   : > { %v8852_v12 = vpack.c.bf16 %v2587_v34, %v2586_v44  ;;  %v2637_v51 = vld [vmem:[#allocation2 + $0x99] sm:$0xff]  ;;  %v8866_v38 = vpack.c.bf16 %v2605_v46, %v2604_v10  ;;  %v2638_v23 = vld [vmem:[#allocation2 + $0xa9] sm:$0xff]  ;;  %v2639_v49 = vld [vmem:[#allocation2 + $0xb1] sm:$0xff]  ;;  %v3712_v25 = vsel %vm2721_vm3, %v2570_v30, 0 }
 0x300   : > { %v2653_v29 = vld [vmem:[#allocation2 + $0x159] sm:$0xff]  ;;  %v8862_v59 = vpack.c.bf16 %v2637_v51, %v2636_v5  ;;  %v2654_v9 = vld [vmem:[#allocation2 + $0x169] sm:$0xff]  ;;  %v2655_v17 = vld [vmem:[#allocation2 + $0x171] sm:$0xff]  ;;  %3721 = vmatpush.bf16.msrb.mxu1 %v3712_v25  ;;  %v8886_v28 = vpack.c.bf16 %v2639_v49, %v2638_v23 }
 0x301   : > { %v2589_v11 = vld [vmem:[#allocation2 + $0x98] sm:$0xff]  ;;  %v8864_v21 = vpack.c.bf16 %v2653_v29, %v2652_v54  ;;  %v2573_v39 = vld [vmem:[%s8760_s20 + $0x20] sm:$0xf]  ;;  %v2606_v0 = vld [vmem:[#allocation2 + $0x168] sm:$0xff]  ;;  %v8888_v4 = vpack.c.bf16 %v2655_v17, %v2654_v9 }
 0x302   : > { %v8868_v45 = vpack.c.bf16 %v2589_v11, %v2588_v48  ;;  %v2571_v43 = vld [vmem:[%s8760_s20 + $0x18] sm:$0xf]  ;;  %v2572_v50 = vld [vmem:[%s8760_s20 + $0x1c] sm:$0xf]  ;;  %v4373_v55 = vsel %vm2721_vm3, %v2573_v39, 0  ;;  %v2607_v35 = vld [vmem:[#allocation2 + $0x170] sm:$0xff] }
 0x303   : > { %v3933_v2 = vsel %vm2721_vm3, %v2571_v43, 0  ;;  %v4153_v14 = vsel %vm2721_vm3, %v2572_v50, 0  ;;  %4382 = vmatpush.bf16.msra.mxu0 %v4373_v55  ;;  %v2590_v41 = vld [vmem:[#allocation2 + $0xa8] sm:$0xff]  ;;  %v2591_v42 = vld [vmem:[#allocation2 + $0xb0] sm:$0xff]  ;;  %v8890_v27 = vpack.c.bf16 %v2607_v35, %v2606_v0  ;;  %v3615_v37 = vld [vmem:[#allocation2 + $0x1a] sm:$0xff] }
 0x304   : > { %7216 = vmatmul.msk.bf16.gmra.mxu0 %vm2672_vm7, %v8782_v8  ;;  %7224 = vmatmul.msk.bf16.gmra.mxu2 %vm2672_vm7, %v8784_v16  ;;  %v8892_v26 = vpack.c.bf16 %v2591_v42, %v2590_v41  ;;  %v2954_v15 = vld [vmem:[#allocation2 + $0x2] sm:$0xff]  ;;  %v2955_v62 = vld [vmem:[#allocation2 + $0xa] sm:$0xff]  ;;  %v3617_v46 = vld [vmem:[#allocation2 + $0x32] sm:$0xff] }
 0x305   : > { %7240 = vmatmul.msk.bf16.gmra.mxu3 %vm2672_vm7, %v8786_v22  ;;  %3942 = vmatpush.bf16.msra.mxu2 %v3933_v2  ;;  %v3616_v61 = vld [vmem:[#allocation2 + $0x22] sm:$0xff]  ;;  %v2986_v6 = vpack.c.bf16 %v2955_v62, %v2954_v15  ;;  %v3618_v48 = vld [vmem:[#allocation2 + $0x3a] sm:$0xff]  ;;  %v3619_v9 = vld [vmem:[#allocation2 + $0x4a] sm:$0xff] }
 0x306   : > { %7232 = vmatmul.msk.bf16.gmra.mxu1 %vm2672_vm7, %v8788_v19  ;;  %4162 = vmatpush.bf16.msra.mxu3 %v4153_v14  ;;  %v3647_v24 = vpack.c.bf16 %v3616_v61, %v3615_v37  ;;  %v8916_v2 = vpack.c.bf16 %v3618_v48, %v3617_v46  ;;  %v3620_v17 = vld [vmem:[#allocation2 + $0x52] sm:$0xff] }
 0x307   : > { %v8933_v42 = vpack.c.bf16 %v3620_v17, %v3619_v9 }
 0x314   : > { %7217 = vmatmul.msk.bf16.gmra.mxu0 %vm2672_vm7, %v8798_v47  ;;  %7225 = vmatmul.msk.bf16.gmra.mxu2 %vm2672_vm7, %v8800_v58 }
 0x315   : > { %7241 = vmatmul.msk.bf16.gmra.mxu3 %vm2672_vm7, %v8802_v3 }
 0x316   : > { %7233 = vmatmul.msk.bf16.gmra.mxu1 %vm2672_vm7, %v8804_v20 }
 0x324   : > { %7218 = vmatmul.msk.bf16.gmra.mxu0 %vm2672_vm7, %v8814_v56  ;;  %7226 = vmatmul.msk.bf16.gmra.mxu2 %vm2672_vm7, %v8816_v52 }
 0x325   : > { %7242 = vmatmul.msk.bf16.gmra.mxu3 %vm2672_vm7, %v8818_v63 }
 0x326   : > { %7234 = vmatmul.msk.bf16.gmra.mxu1 %vm2672_vm7, %v8820_v7 }
 0x334   : > { %7219 = vmatmul.msk.bf16.gmra.mxu0 %vm2672_vm7, %v8830_v1  ;;  %7227 = vmatmul.msk.bf16.gmra.mxu2 %vm2672_vm7, %v8832_v53 }
 0x335   : > { %7243 = vmatmul.msk.bf16.gmra.mxu3 %vm2672_vm7, %v8834_v33 }
 0x336   : > { %7235 = vmatmul.msk.bf16.gmra.mxu1 %vm2672_vm7, %v8836_v36 }
 0x344   : > { %7220 = vmatmul.msk.bf16.gmra.mxu0 %vm2672_vm7, %v8846_v13  ;;  %7228 = vmatmul.msk.bf16.gmra.mxu2 %vm2672_vm7, %v8848_v40 }
 0x345   : > { %7244 = vmatmul.msk.bf16.gmra.mxu3 %vm2672_vm7, %v8850_v31 }
 0x346   : > { %7236 = vmatmul.msk.bf16.gmra.mxu1 %vm2672_vm7, %v8852_v12 }
 0x354   : > { %7221 = vmatmul.msk.bf16.gmra.mxu0 %vm2672_vm7, %v8862_v59  ;;  %7229 = vmatmul.msk.bf16.gmra.mxu2 %vm2672_vm7, %v8864_v21 }
 0x355   : > { %7245 = vmatmul.msk.bf16.gmra.mxu3 %vm2672_vm7, %v8866_v38 }
 0x356   : > { %7237 = vmatmul.msk.bf16.gmra.mxu1 %vm2672_vm7, %v8868_v45 }
 0x364   : > { %7222 = vmatmul.msk.bf16.gmra.mxu0 %vm2672_vm7, %v8886_v28  ;;  %7230 = vmatmul.msk.bf16.gmra.mxu2 %vm2672_vm7, %v8888_v4 }
 0x365   : > { %7246 = vmatmul.msk.bf16.gmra.mxu3 %vm2672_vm7, %v8890_v27 }
 0x366   : > { %7238 = vmatmul.msk.bf16.gmra.mxu1 %vm2672_vm7, %v8892_v26 }
 0x371   : > { %v2734_v18 = vpop.f32.mrf.mxu0 }
 0x373   : > { %v2874_v60 = vpop.f32.mrf.mxu1 }
 0x374   : > { %v8902_v44 = vadd.f32 %v2874_v60, %v2734_v18  ;;  %7247 = vmatmul.msk.bf16.vlgmr.msrb.gmra.mxu2 %vm2672_vm7, %v2986_v6  ;;  %7279 = vmatmul.msk.bf16.vlgmr.msrb.gmra.mxu0 %vm2672_vm7, %v8782_v8  ;;  %v3621_v60 = vld [vmem:[#allocation2 + $0x62] sm:$0xff] }
 0x375   : > { %7263 = vmatmul.msk.bf16.vlgmr.msrb.gmra.mxu3 %vm2672_vm7, %v8788_v19 }
 0x376   : > { %7295 = vmatmul.msk.bf16.vlgmr.msrb.gmra.mxu1 %vm2672_vm7, %v3647_v24 }
 0x377   : > { %v2774_v34 = vpop.f32.mrf.mxu2 }
 0x378   : > { %v2914_v5 = vpop.f32.mrf.mxu3 }
 0x379   : > { %v8910_v51 = vadd.f32 %v2914_v5, %v2774_v34  ;;  %v2736_v54 = vpop.f32.mrf.mxu0  ;;  %v3622_v34 = vld [vmem:[#allocation2 + $0x6a] sm:$0xff] }
 0x37a   : > { %v8951_v46 = vpack.c.bf16 %v3622_v34, %v3621_v60  ;;  %v3625_v34 = vld [vmem:[#allocation2 + $0x92] sm:$0xff] }
 0x37b   : > { %v2876_v29 = vpop.f32.mrf.mxu1 }
 0x37c   : > { %v8912_v10 = vadd.f32 %v2876_v29, %v2736_v54 }
 0x37f   : > { %v2776_v11 = vpop.f32.mrf.mxu2 }
 0x380   : > { %v2916_v43 = vpop.f32.mrf.mxu3 }
 0x381   : > { %v8914_v50 = vadd.f32 %v2916_v43, %v2776_v11  ;;  %v2739_v8 = vpop.f32.mrf.mxu0 }
 0x383   : > { %v2879_v19 = vpop.f32.mrf.mxu1 }
 0x384   : > { %v8918_v14 = vadd.f32 %v2879_v19, %v2739_v8  ;;  %7248 = vmatmul.msk.bf16.gmra.mxu2 %vm2672_vm7, %v3647_v24  ;;  %7280 = vmatmul.msk.bf16.gmra.mxu0 %vm2672_vm7, %v8798_v47 }
 0x385   : > { %7264 = vmatmul.msk.bf16.gmra.mxu3 %vm2672_vm7, %v8804_v20 }
 0x386   : > { %7296 = vmatmul.msk.bf16.gmra.mxu1 %vm2672_vm7, %v8916_v2 }
 0x387   : > { %v2779_v30 = vpop.f32.mrf.mxu2 }
 0x388   : > { %v2919_v39 = vpop.f32.mrf.mxu3 }
 0x389   : > { %v8927_v23 = vadd.f32 %v2919_v39, %v2779_v30  ;;  %v2741_v49 = vpop.f32.mrf.mxu0 }
 0x38b   : > { %v2881_v25 = vpop.f32.mrf.mxu1 }
 0x38c   : > { %v8929_v55 = vadd.f32 %v2881_v25, %v2741_v49  ;;  %v3623_v49 = vld [vmem:[#allocation2 + $0x7a] sm:$0xff]  ;;  %v3624_v25 = vld [vmem:[#allocation2 + $0x82] sm:$0xff] }
 0x38f   : > { %v2781_v0 = vpop.f32.mrf.mxu2 }
 0x390   : > { %v2921_v35 = vpop.f32.mrf.mxu3 }
 0x391   : > { %v8931_v41 = vadd.f32 %v2921_v35, %v2781_v0  ;;  %v2744_v47 = vpop.f32.mrf.mxu0  ;;  %v8969_v35 = vpack.c.bf16 %v3624_v25, %v3623_v49 }
 0x393   : > { %v2884_v20 = vpop.f32.mrf.mxu1 }
 0x394   : > { %v8935_v15 = vadd.f32 %v2884_v20, %v2744_v47  ;;  %7249 = vmatmul.msk.bf16.gmra.mxu2 %vm2672_vm7, %v8916_v2  ;;  %7281 = vmatmul.msk.bf16.gmra.mxu0 %vm2672_vm7, %v8814_v56 }
 0x395   : > { %7265 = vmatmul.msk.bf16.gmra.mxu3 %vm2672_vm7, %v8820_v7 }
 0x396   : > { %7297 = vmatmul.msk.bf16.gmra.mxu1 %vm2672_vm7, %v8933_v42 }
 0x397   : > { %v2784_v62 = vpop.f32.mrf.mxu2 }
 0x398   : > { %v2924_v37 = vpop.f32.mrf.mxu3 }
 0x399   : > { %v8945_v61 = vadd.f32 %v2924_v37, %v2784_v62  ;;  %v2746_v6 = vpop.f32.mrf.mxu0 }
 0x39b   : > { %v2886_v18 = vpop.f32.mrf.mxu1 }
 0x39c   : > { %v8947_v24 = vadd.f32 %v2886_v18, %v2746_v6 }
 0x39f   : > { %v2786_v5 = vpop.f32.mrf.mxu2 }
 0x3a0   : > { %v2926_v54 = vpop.f32.mrf.mxu3 }
 0x3a1   : > { %v8949_v29 = vadd.f32 %v2926_v54, %v2786_v5  ;;  %v2749_v56 = vpop.f32.mrf.mxu0  ;;  %v3626_v5 = vld [vmem:[#allocation2 + $0x9a] sm:$0xff] }
 0x3a3   : > { %v2889_v7 = vpop.f32.mrf.mxu1 }
 0x3a4   : > { %v8953_v48 = vadd.f32 %v2889_v7, %v2749_v56  ;;  %7250 = vmatmul.msk.bf16.gmra.mxu2 %vm2672_vm7, %v8933_v42  ;;  %7282 = vmatmul.msk.bf16.gmra.mxu0 %vm2672_vm7, %v8830_v1 }
 0x3a5   : > { %7266 = vmatmul.msk.bf16.gmra.mxu3 %vm2672_vm7, %v8836_v36 }
 0x3a6   : > { %7298 = vmatmul.msk.bf16.gmra.mxu1 %vm2672_vm7, %v8951_v46 }
 0x3a7   : > { %v2789_v11 = vpop.f32.mrf.mxu2 }
 0x3a8   : > { %v2929_v43 = vpop.f32.mrf.mxu3 }
 0x3a9   : > { %v8963_v8 = vadd.f32 %v2929_v43, %v2789_v11  ;;  %v2751_v19 = vpop.f32.mrf.mxu0  ;;  %v8987_v11 = vpack.c.bf16 %v3626_v5, %v3625_v34 }
 0x3ab   : > { %v2891_v30 = vpop.f32.mrf.mxu1 }
 0x3ac   : > { %v8965_v39 = vadd.f32 %v2891_v30, %v2751_v19 }
 0x3af   : > { %v2791_v9 = vpop.f32.mrf.mxu2 }
 0x3b0   : > { %v2931_v17 = vpop.f32.mrf.mxu3 }
 0x3b1   : > { %v8967_v0 = vadd.f32 %v2931_v17, %v2791_v9  ;;  %v2754_v1 = vpop.f32.mrf.mxu0 }
 0x3b3   : > { %v2894_v36 = vpop.f32.mrf.mxu1 }
 0x3b4   : > { %v8971_v47 = vadd.f32 %v2894_v36, %v2754_v1  ;;  %7251 = vmatmul.msk.bf16.gmra.mxu2 %vm2672_vm7, %v8951_v46  ;;  %7283 = vmatmul.msk.bf16.gmra.mxu0 %vm2672_vm7, %v8846_v13  ;;  %v3627_v1 = vld [vmem:[#allocation2 + $0xaa] sm:$0xff]  ;;  %v3628_v36 = vld [vmem:[#allocation2 + $0xb2] sm:$0xff] }
 0x3b5   : > { %7267 = vmatmul.msk.bf16.gmra.mxu3 %vm2672_vm7, %v8852_v12 }
 0x3b6   : > { %7299 = vmatmul.msk.bf16.gmra.mxu1 %vm2672_vm7, %v8969_v35 }
 0x3b7   : > { %v2794_v20 = vpop.f32.mrf.mxu2 }
 0x3b8   : > { %v2934_v62 = vpop.f32.mrf.mxu3 }
 0x3b9   : > { %v8981_v37 = vadd.f32 %v2934_v62, %v2794_v20  ;;  %v2756_v6 = vpop.f32.mrf.mxu0 }
 0x3bb   : > { %v2896_v18 = vpop.f32.mrf.mxu1 }
 0x3bc   : > { %v8983_v60 = vadd.f32 %v2896_v18, %v2756_v6  ;;  %v9005_v18 = vpack.c.bf16 %v3628_v36, %v3627_v1 }
 0x3bf   : > { %v2796_v54 = vpop.f32.mrf.mxu2 }
 0x3c0   : > { %v2936_v56 = vpop.f32.mrf.mxu3 }
 0x3c1   : > { %v8985_v7 = vadd.f32 %v2936_v56, %v2796_v54  ;;  %v2759_v13 = vpop.f32.mrf.mxu0 }
 0x3c3   : > { %v2899_v12 = vpop.f32.mrf.mxu1 }
 0x3c4   : > { %v8989_v43 = vadd.f32 %v2899_v12, %v2759_v13  ;;  %7252 = vmatmul.msk.bf16.gmra.mxu2 %vm2672_vm7, %v8969_v35  ;;  %7284 = vmatmul.msk.bf16.gmra.mxu0 %vm2672_vm7, %v8862_v59 }
 0x3c5   : > { %7268 = vmatmul.msk.bf16.gmra.mxu3 %vm2672_vm7, %v8868_v45 }
 0x3c6   : > { %7300 = vmatmul.msk.bf16.gmra.mxu1 %vm2672_vm7, %v8987_v11 }
 0x3c7   : > { %v2799_v19 = vpop.f32.mrf.mxu2 }
 0x3c8   : > { %v2939_v30 = vpop.f32.mrf.mxu3 }
 0x3c9   : > { %v8999_v49 = vadd.f32 %v2939_v30, %v2799_v19  ;;  %v2761_v25 = vpop.f32.mrf.mxu0  ;;  %v3629_v30 = vld [vmem:[#allocation2 + $0xc2] sm:$0xff] }
 0x3cb   : > { %10355 = vst [vmem:[#allocation19_spill] sm:$0xff] %v8999_v49  ;;  %v2901_v9 = vpop.f32.mrf.mxu1 }
 0x3cc   : > { %v9001_v17 = vadd.f32 %v2901_v9, %v2761_v25  ;;  %v3630_v25 = vld [vmem:[#allocation2 + $0xca] sm:$0xff] }
 0x3cf   : > { %v2801_v20 = vpop.f32.mrf.mxu2 }
 0x3d0   : > { %v2941_v62 = vpop.f32.mrf.mxu3 }
 0x3d1   : > { %v9003_v6 = vadd.f32 %v2941_v62, %v2801_v20  ;;  %v2764_v59 = vpop.f32.mrf.mxu0 }
 0x3d3   : > { %10356 = vst [vmem:[#allocation20_spill] sm:$0xff] %v9003_v6  ;;  %v2904_v45 = vpop.f32.mrf.mxu1 }
 0x3d4   : > { %v9007_v34 = vadd.f32 %v2904_v45, %v2764_v59  ;;  %7253 = vmatmul.msk.bf16.gmra.mxu2 %vm2672_vm7, %v8987_v11  ;;  %7285 = vmatmul.msk.bf16.gmra.mxu0 %vm2672_vm7, %v8886_v28  ;;  %v4599_v59 = vld [vmem:[%s9030_s23 + $0x4] sm:$0xf] }
 0x3d5   : > { %7269 = vmatmul.msk.bf16.gmra.mxu3 %vm2672_vm7, %v8892_v26  ;;  %v9023_v26 = vpack.c.bf16 %v3630_v25, %v3629_v30  ;;  %v4754_v45 = vsel %vm2721_vm3, %v4599_v59, 0 }
 0x3d6   : > { %7301 = vmatmul.msk.bf16.gmra.mxu1 %vm2672_vm7, %v9005_v18 }
 0x3d7   : > { %v2804_v5 = vpop.f32.mrf.mxu2  ;;  %10359 = vst [vmem:[#allocation23_spill] sm:$0xff] %v9023_v26  ;;  %4763 = vmatpush.bf16.msra.mxu1 %v4754_v45 }
 0x3d8   : > { %v2944_v54 = vpop.f32.mrf.mxu3 }
 0x3d9   : > { %v9017_v56 = vadd.f32 %v2944_v54, %v2804_v5  ;;  %v2766_v13 = vpop.f32.mrf.mxu0 }
 0x3db   : > { %10357 = vst [vmem:[#allocation21_spill] sm:$0xff] %v9017_v56  ;;  %v2906_v12 = vpop.f32.mrf.mxu1 }
 0x3dc   : > { %v9019_v19 = vadd.f32 %v2906_v12, %v2766_v13 }
 0x3df   : > { %v2806_v9 = vpop.f32.mrf.mxu2 }
 0x3e0   : > { %v2946_v1 = vpop.f32.mrf.mxu3 }
 0x3e1   : > { %v9021_v28 = vadd.f32 %v2946_v1, %v2806_v9  ;;  %v2769_v36 = vpop.f32.mrf.mxu0  ;;  %v3631_v9 = vld [vmem:[#allocation2 + $0xda] sm:$0xff] }
 0x3e3   : > { %10358 = vst [vmem:[#allocation22_spill] sm:$0xff] %v9021_v28  ;;  %v2909_v20 = vpop.f32.mrf.mxu1 }
 0x3e4   : > { %v9032_v62 = vadd.f32 %v2909_v20, %v2769_v36  ;;  %7254 = vmatmul.msk.bf16.gmra.mxu2 %vm2672_vm7, %v9005_v18  ;;  %7286 = vmatmul.msk.bf16.gmra.mxu0 %vm2672_vm7, %v8767_v32  ;;  %v3632_v32 = vld [vmem:[#allocation2 + $0xe2] sm:$0xff] }
 0x3e5   : > { %7270 = vmatmul.msk.bf16.gmra.mxu3 %vm2672_vm7, %v8771_v57  ;;  %v9050_v28 = vpack.c.bf16 %v3632_v32, %v3631_v9 }
 0x3e6   : > { %7302 = vmatmul.msk.bf16.gmra.mxu1 %vm2672_vm7, %v9023_v26 }
 0x3e7   : > { %v2809_v5 = vpop.f32.mrf.mxu2 }
 0x3e8   : > { %v2949_v54 = vpop.f32.mrf.mxu3 }
 0x3e9   : > { %v9044_v13 = vadd.f32 %v2949_v54, %v2809_v5  ;;  %v2771_v12 = vpop.f32.mrf.mxu0 }
 0x3eb   : > { %10360 = vst [vmem:[#allocation24_spill] sm:$0xff] %v9044_v13  ;;  %v2911_v30 = vpop.f32.mrf.mxu1 }
 0x3ec   : > { %v9046_v25 = vadd.f32 %v2911_v30, %v2771_v12 }
 0x3ef   : > { %v2811_v1 = vpop.f32.mrf.mxu2 }
 0x3f0   : > { %v2951_v36 = vpop.f32.mrf.mxu3 }
 0x3f1   : > { %v9048_v57 = vadd.f32 %v2951_v36, %v2811_v1  ;;  %v3503_v20 = vpop.f32.mrf.mxu0  ;;  %v3633_v1 = vld [vmem:[#allocation2 + $0xf2] sm:$0xff]  ;;  %v3634_v36 = vld [vmem:[#allocation2 + $0xfa] sm:$0xff] }
 0x3f3   : > { %10361 = vst [vmem:[#allocation25_spill] sm:$0xff] %v9048_v57  ;;  %v3723_v56 = vpop.f32.mrf.mxu1 }
 0x3f4   : > { %7255 = vmatmul.msk.bf16.gmra.mxu2 %vm2672_vm7, %v9023_v26  ;;  %7287 = vmatmul.msk.bf16.gmra.mxu0 %vm2672_vm7, %v8784_v16  ;;  %v9064_v26 = vpack.c.bf16 %v3634_v36, %v3633_v1 }
 0x3f5   : > { %7271 = vmatmul.msk.bf16.gmra.mxu3 %vm2672_vm7, %v8786_v22 }
 0x3f6   : > { %7303 = vmatmul.msk.bf16.gmra.mxu1 %vm2672_vm7, %v9050_v28 }
 0x3f7   : > { %v3062_v59 = vpop.f32.mrf.mxu2 }
 0x3f8   : > { %v3142_v45 = vadd.f32 %v3062_v59, %v8902_v44  ;;  %v3283_v5 = vpop.f32.mrf.mxu3 }
 0x3f9   : > { %v3505_v54 = vpop.f32.mrf.mxu0 }
 0x3fa   : > { %v3363_v12 = vadd.f32 %v3283_v5, %v3142_v45 }
 0x3fb   : > { %v3725_v30 = vpop.f32.mrf.mxu1 }
 0x3fc   : > { %v3583_v9 = vadd.f32 %v3503_v20, %v3363_v12 }
 0x3fe   : > { %v9061_v32 = vadd.f32 %v3723_v56, %v3583_v9 }
 0x3ff   : > { %v3064_v57 = vpop.f32.mrf.mxu2 }
 0x400   : > { %v3143_v16 = vadd.f32 %v3064_v57, %v8912_v10  ;;  %v3285_v13 = vpop.f32.mrf.mxu3 }
 0x401   : > { %v3508_v22 = vpop.f32.mrf.mxu0 }
 0x402   : > { %v3364_v6 = vadd.f32 %v3285_v13, %v3143_v16 }
 0x403   : > { %v3728_v49 = vpop.f32.mrf.mxu1 }
 0x404   : > { %7256 = vmatmul.msk.bf16.gmra.mxu2 %vm2672_vm7, %v9050_v28  ;;  %7288 = vmatmul.msk.bf16.gmra.mxu0 %vm2672_vm7, %v8800_v58  ;;  %v3584_v44 = vadd.f32 %v3505_v54, %v3364_v6  ;;  %v3635_v58 = vld [vmem:[#allocation2 + $0x10a] sm:$0xff]  ;;  %v3636_v6 = vld [vmem:[#allocation2 + $0x112] sm:$0xff] }
 0x405   : > { %7272 = vmatmul.msk.bf16.gmra.mxu3 %vm2672_vm7, %v8802_v3  ;;  %v9080_v36 = vpack.c.bf16 %v3636_v6, %v3635_v58 }
 0x406   : > { %7304 = vmatmul.msk.bf16.gmra.mxu1 %vm2672_vm7, %v9064_v26  ;;  %v9074_v10 = vadd.f32 %v3725_v30, %v3584_v44 }
 0x407   : > { %v3067_v56 = vpop.f32.mrf.mxu2 }
 0x408   : > { %v3144_v57 = vadd.f32 %v3067_v56, %v8918_v14  ;;  %v3288_v13 = vpop.f32.mrf.mxu3 }
 0x409   : > { %v3510_v20 = vpop.f32.mrf.mxu0 }
 0x40a   : > { %v3365_v59 = vadd.f32 %v3288_v13, %v3144_v57 }
 0x40b   : > { %v3730_v45 = vpop.f32.mrf.mxu1 }
 0x40c   : > { %v3585_v5 = vadd.f32 %v3508_v22, %v3365_v59 }
 0x40e   : > { %v9077_v12 = vadd.f32 %v3728_v49, %v3585_v5 }
 0x40f   : > { %v3069_v54 = vpop.f32.mrf.mxu2 }
 0x410   : > { %v3145_v3 = vadd.f32 %v3069_v54, %v8929_v55  ;;  %v3290_v9 = vpop.f32.mrf.mxu3 }
 0x411   : > { %v3513_v1 = vpop.f32.mrf.mxu0 }
 0x412   : > { %v3366_v30 = vadd.f32 %v3290_v9, %v3145_v3 }
 0x413   : > { %v3733_v16 = vpop.f32.mrf.mxu1 }
 0x414   : > { %7257 = vmatmul.msk.bf16.gmra.mxu2 %vm2672_vm7, %v9064_v26  ;;  %7289 = vmatmul.msk.bf16.gmra.mxu0 %vm2672_vm7, %v8816_v52  ;;  %v3586_v14 = vadd.f32 %v3510_v20, %v3366_v30  ;;  %v3637_v52 = vld [vmem:[#allocation2 + $0x122] sm:$0xff]  ;;  %v3638_v20 = vld [vmem:[#allocation2 + $0x12a] sm:$0xff] }
 0x415   : > { %7273 = vmatmul.msk.bf16.gmra.mxu3 %vm2672_vm7, %v8818_v63  ;;  %v9096_v3 = vpack.c.bf16 %v3638_v20, %v3637_v52 }
 0x416   : > { %7305 = vmatmul.msk.bf16.gmra.mxu1 %vm2672_vm7, %v9080_v36  ;;  %v9090_v55 = vadd.f32 %v3730_v45, %v3586_v14 }
 0x417   : > { %v3072_v49 = vpop.f32.mrf.mxu2 }
 0x418   : > { %v3146_v22 = vadd.f32 %v3072_v49, %v8935_v15  ;;  %v3293_v44 = vpop.f32.mrf.mxu3 }
 0x419   : > { %v3515_v56 = vpop.f32.mrf.mxu0 }
 0x41a   : > { %v3367_v57 = vadd.f32 %v3293_v44, %v3146_v22 }
 0x41b   : > { %v3735_v13 = vpop.f32.mrf.mxu1 }
 0x41c   : > { %v3587_v59 = vadd.f32 %v3513_v1, %v3367_v57 }
 0x41e   : > { %v9093_v5 = vadd.f32 %v3733_v16, %v3587_v59 }
 0x41f   : > { %v3074_v58 = vpop.f32.mrf.mxu2 }
 0x420   : > { %v3147_v63 = vadd.f32 %v3074_v58, %v8947_v24  ;;  %v3295_v6 = vpop.f32.mrf.mxu3 }
 0x421   : > { %v3518_v54 = vpop.f32.mrf.mxu0 }
 0x422   : > { %v3368_v45 = vadd.f32 %v3295_v6, %v3147_v63 }
 0x423   : > { %v3738_v9 = vpop.f32.mrf.mxu1 }
 0x424   : > { %7258 = vmatmul.msk.bf16.gmra.mxu2 %vm2672_vm7, %v9080_v36  ;;  %7290 = vmatmul.msk.bf16.gmra.mxu0 %vm2672_vm7, %v8832_v53  ;;  %v3588_v15 = vadd.f32 %v3515_v56, %v3368_v45  ;;  %v3639_v53 = vld [vmem:[#allocation2 + $0x13a] sm:$0xff]  ;;  %v3640_v56 = vld [vmem:[#allocation2 + $0x142] sm:$0xff] }
 0x425   : > { %7274 = vmatmul.msk.bf16.gmra.mxu3 %vm2672_vm7, %v8834_v33  ;;  %v9112_v58 = vpack.c.bf16 %v3640_v56, %v3639_v53 }
 0x426   : > { %7306 = vmatmul.msk.bf16.gmra.mxu1 %vm2672_vm7, %v9096_v3  ;;  %v9106_v24 = vadd.f32 %v3735_v13, %v3588_v15 }
 0x427   : > { %v3077_v1 = vpop.f32.mrf.mxu2 }
 0x428   : > { %v3148_v30 = vadd.f32 %v3077_v1, %v8953_v48  ;;  %v3298_v16 = vpop.f32.mrf.mxu3 }
 0x429   : > { %v3520_v14 = vpop.f32.mrf.mxu0 }
 0x42a   : > { %v3369_v49 = vadd.f32 %v3298_v16, %v3148_v30 }
 0x42b   : > { %v3740_v22 = vpop.f32.mrf.mxu1 }
 0x42c   : > { %v3589_v44 = vadd.f32 %v3518_v54, %v3369_v49 }
 0x42e   : > { %v9109_v57 = vadd.f32 %v3738_v9, %v3589_v44 }
 0x42f   : > { %v3079_v59 = vpop.f32.mrf.mxu2 }
 0x430   : > { %v3149_v33 = vadd.f32 %v3079_v59, %v8965_v39  ;;  %v3300_v52 = vpop.f32.mrf.mxu3 }
 0x431   : > { %v3523_v20 = vpop.f32.mrf.mxu0 }
 0x432   : > { %v3370_v13 = vadd.f32 %v3300_v52, %v3149_v33 }
 0x433   : > { %v3743_v63 = vpop.f32.mrf.mxu1 }
 0x434   : > { %7259 = vmatmul.msk.bf16.gmra.mxu2 %vm2672_vm7, %v9096_v3  ;;  %7291 = vmatmul.msk.bf16.gmra.mxu0 %vm2672_vm7, %v8848_v40  ;;  %v3590_v48 = vadd.f32 %v3520_v14, %v3370_v13  ;;  %v3641_v40 = vld [vmem:[#allocation2 + $0x152] sm:$0xff]  ;;  %v3642_v14 = vld [vmem:[#allocation2 + $0x15a] sm:$0xff] }
 0x435   : > { %7275 = vmatmul.msk.bf16.gmra.mxu3 %vm2672_vm7, %v8850_v31 }
 0x436   : > { %7307 = vmatmul.msk.bf16.gmra.mxu1 %vm2672_vm7, %v9112_v58  ;;  %v9122_v39 = vadd.f32 %v3740_v22, %v3590_v48  ;;  %v9130_v22 = vpack.c.bf16 %v3642_v14, %v3641_v40 }
 0x437   : > { %v3082_v6 = vpop.f32.mrf.mxu2 }
 0x438   : > { %v3150_v54 = vadd.f32 %v3082_v6, %v8971_v47  ;;  %v3303_v45 = vpop.f32.mrf.mxu3 }
 0x439   : > { %v3525_v9 = vpop.f32.mrf.mxu0 }
 0x43a   : > { %v3371_v15 = vadd.f32 %v3303_v45, %v3150_v54  ;;  %v3644_v54 = vld [vmem:[#allocation2 + $0x172] sm:$0xff] }
 0x43b   : > { %v9125_v1 = vpop.f32.mrf.mxu1 }
 0x43c   : > { %v3591_v30 = vadd.f32 %v3523_v20, %v3371_v15 }
 0x43e   : > { %v9127_v16 = vadd.f32 %v3743_v63, %v3591_v30 }
 0x43f   : > { %v3084_v49 = vpop.f32.mrf.mxu2 }
 0x440   : > { %v3151_v31 = vadd.f32 %v3084_v49, %v8983_v60  ;;  %v3305_v44 = vpop.f32.mrf.mxu3 }
 0x441   : > { %v3528_v53 = vpop.f32.mrf.mxu0 }
 0x442   : > { %v3372_v56 = vadd.f32 %v3305_v44, %v3151_v31 }
 0x443   : > { %v3748_v59 = vpop.f32.mrf.mxu1 }
 0x444   : > { %7260 = vmatmul.msk.bf16.gmra.mxu2 %vm2672_vm7, %v9112_v58  ;;  %7292 = vmatmul.msk.bf16.gmra.mxu0 %vm2672_vm7, %v8864_v21  ;;  %v9136_v47 = vadd.f32 %v3525_v9, %v3372_v56  ;;  %v3643_v21 = vld [vmem:[#allocation2 + $0x16a] sm:$0xff] }
 0x445   : > { %7276 = vmatmul.msk.bf16.gmra.mxu3 %vm2672_vm7, %v8866_v38  ;;  %v9148_v30 = vpack.c.bf16 %v3644_v54, %v3643_v21 }
 0x446   : > { %7308 = vmatmul.msk.bf16.gmra.mxu1 %vm2672_vm7, %v9130_v22 }
 0x447   : > { %v3087_v60 = vpop.f32.mrf.mxu2 }
 0x448   : > { %v3152_v33 = vadd.f32 %v3087_v60, %v8989_v43  ;;  %v3308_v52 = vpop.f32.mrf.mxu3  ;;  %v3205_v60 = vld [vmem:[#allocation2 + $0x180] sm:$0xff] }
 0x449   : > { %v3530_v20 = vpop.f32.mrf.mxu0 }
 0x44a   : > { %v3373_v13 = vadd.f32 %v3308_v52, %v3152_v33  ;;  %v3425_v33 = vld [vmem:[#allocation2 + $0x181] sm:$0xff] }
 0x44b   : > { %v9143_v63 = vpop.f32.mrf.mxu1 }
 0x44c   : > { %v3593_v48 = vadd.f32 %v3528_v53, %v3373_v13  ;;  %v3645_v13 = vld [vmem:[#allocation2 + $0x182] sm:$0xff] }
 0x44e   : > { %v9145_v6 = vadd.f32 %v3748_v59, %v3593_v48 }
 0x44f   : > { %v3089_v45 = vpop.f32.mrf.mxu2 }
 0x450   : > { %v3153_v9 = vadd.f32 %v3089_v45, %v9001_v17  ;;  %v3310_v38 = vpop.f32.mrf.mxu3 }
 0x451   : > { %v3533_v15 = vpop.f32.mrf.mxu0 }
 0x452   : > { %v3374_v40 = vadd.f32 %v3310_v38, %v3153_v9 }
 0x453   : > { %v3753_v14 = vpop.f32.mrf.mxu1 }
 0x454   : > { %7261 = vmatmul.msk.bf16.gmra.mxu2 %vm2672_vm7, %v9130_v22  ;;  %7293 = vmatmul.msk.bf16.gmra.mxu0 %vm2672_vm7, %v8888_v4  ;;  %v9154_v43 = vadd.f32 %v3530_v20, %v3374_v40  ;;  %v3426_v4 = vld [vmem:[#allocation2 + $0x189] sm:$0xff] }
 0x455   : > { %7277 = vmatmul.msk.bf16.gmra.mxu3 %vm2672_vm7, %v8890_v27  ;;  %v3206_v20 = vld [vmem:[#allocation2 + $0x188] sm:$0xff]  ;;  %v9166_v45 = vpack.c.bf16 %v3426_v4, %v3425_v33  ;;  %v3836_v33 = vld [vmem:[#allocation2 + $0x30] sm:$0xff]  ;;  %v3837_v4 = vld [vmem:[#allocation2 + $0x38] sm:$0xff] }
 0x456   : > { %7309 = vmatmul.msk.bf16.gmra.mxu1 %vm2672_vm7, %v9148_v30  ;;  %v3646_v27 = vld [vmem:[#allocation2 + $0x18a] sm:$0xff]  ;;  %v9168_v9 = vpack.c.bf16 %v3206_v20, %v3205_v60 }
 0x457   : > { %v3092_v17 = vpop.f32.mrf.mxu2  ;;  %v9170_v38 = vpack.c.bf16 %v3646_v27, %v3645_v13  ;;  %v4057_v13 = vld [vmem:[#allocation2 + $0x39] sm:$0xff] }
 0x458   : > { %v3154_v49 = vadd.f32 %v3092_v17, %v9007_v34  ;;  %v3313_v31 = vpop.f32.mrf.mxu3 }
 0x459   : > { %v3535_v44 = vpop.f32.mrf.mxu0 }
 0x45a   : > { %v3375_v53 = vadd.f32 %v3313_v31, %v3154_v49 }
 0x45b   : > { %v9161_v56 = vpop.f32.mrf.mxu1 }
 0x45c   : > { %10362 = vst [vmem:[#allocation26_spill] sm:$0xff] %v9161_v56  ;;  %v3595_v59 = vadd.f32 %v3533_v15, %v3375_v53 }
 0x45e   : > { %v9163_v52 = vadd.f32 %v3753_v14, %v3595_v59 }
 0x45f   : > { %v3094_v48 = vpop.f32.mrf.mxu2 }
 0x460   : > { %v3155_v21 = vadd.f32 %v3094_v48, %v9019_v19  ;;  %v3315_v54 = vpop.f32.mrf.mxu3 }
 0x461   : > { %v3538_v34 = vpop.f32.mrf.mxu0 }
 0x462   : > { %v3376_v15 = vadd.f32 %v3315_v54, %v3155_v21  ;;  %v3868_v54 = vpack.c.bf16 %v3837_v4, %v3836_v33  ;;  %v3838_v4 = vld [vmem:[#allocation2 + $0x48] sm:$0xff] }
 0x463   : > { %v3758_v40 = vpop.f32.mrf.mxu1 }
 0x464   : > { %7262 = vmatmul.msk.bf16.gmra.mxu2 %vm2672_vm7, %v9148_v30  ;;  %7294 = vmatmul.msk.bf16.gmra.mxu0 %vm2672_vm7, %v9166_v45  ;;  %v9176_v14 = vadd.f32 %v3535_v44, %v3376_v15  ;;  %v4056_v44 = vld [vmem:[#allocation2 + $0x31] sm:$0xff] }
 0x465   : > { %7278 = vmatmul.msk.bf16.gmra.mxu3 %vm2672_vm7, %v9168_v9  ;;  %v4088_v56 = vpack.c.bf16 %v4057_v13, %v4056_v44  ;;  %v3839_v44 = vld [vmem:[#allocation2 + $0x50] sm:$0xff] }
 0x466   : > { %7310 = vmatmul.msk.bf16.gmra.mxu1 %vm2672_vm7, %v9170_v38 }
 0x467   : > { %v3097_v19 = vpop.f32.mrf.mxu2 }
 0x468   : > { %v3156_v17 = vadd.f32 %v3097_v19, %v9032_v62  ;;  %v3318_v49 = vpop.f32.mrf.mxu3 }
 0x469   : > { %v3540_v31 = vpop.f32.mrf.mxu0 }
 0x46a   : > { %v3377_v53 = vadd.f32 %v3318_v49, %v3156_v17 }
 0x46b   : > { %v9183_v59 = vpop.f32.mrf.mxu1 }
 0x46c   : > { %v3597_v60 = vadd.f32 %v3538_v34, %v3377_v53 }
 0x46e   : > { %v9185_v20 = vadd.f32 %v3758_v40, %v3597_v60 }
 0x46f   : > { %v3099_v27 = vpop.f32.mrf.mxu2 }
 0x470   : > { %v3157_v48 = vadd.f32 %v3099_v27, %v9046_v25  ;;  %v3320_v21 = vpop.f32.mrf.mxu3  ;;  %v4058_v27 = vld [vmem:[#allocation2 + $0x49] sm:$0xff] }
 0x471   : > { %v3543_v15 = vpop.f32.mrf.mxu0 }
 0x472   : > { %v3378_v62 = vadd.f32 %v3320_v21, %v3157_v48  ;;  %v4059_v48 = vld [vmem:[#allocation2 + $0x51] sm:$0xff] }
 0x473   : > { %v3763_v19 = vpop.f32.mrf.mxu1 }
 0x474   : > { %7311 = vmatmul.msk.bf16.vlgmr.msra.gmra.mxu2 %vm2672_vm7, %v3868_v54  ;;  %7343 = vmatmul.msk.bf16.vlgmr.msra.gmra.mxu0 %vm2672_vm7, %v8916_v2  ;;  %v9191_v34 = vadd.f32 %v3540_v31, %v3378_v62  ;;  %v4089_v62 = vpack.c.bf16 %v4059_v48, %v4058_v27  ;;  %v3841_v27 = vld [vmem:[#allocation2 + $0x68] sm:$0xff] }
 0x475   : > { %7327 = vmatmul.msk.bf16.vlgmr.msra.gmra.mxu3 %vm2672_vm7, %v4088_v56  ;;  %v3869_v56 = vpack.c.bf16 %v3839_v44, %v3838_v4  ;;  %v3840_v44 = vld [vmem:[#allocation2 + $0x60] sm:$0xff] }
 0x477   : > { %v3102_v40 = vpop.f32.mrf.mxu2 }
 0x478   : > { %v3158_v17 = vadd.f32 %v3102_v40, %v8910_v51  ;;  %v3323_v49 = vpop.f32.mrf.mxu3 }
 0x479   : > { %v3545_v25 = vpop.f32.mrf.mxu0 }
 0x47a   : > { %v3379_v53 = vadd.f32 %v3323_v49, %v3158_v17 }
 0x47b   : > { %v9195_v60 = vpop.f32.mrf.mxu1 }
 0x47c   : > { %v3599_v33 = vadd.f32 %v3543_v15, %v3379_v53 }
 0x47e   : > { %v9197_v13 = vadd.f32 %v3763_v19, %v3599_v33 }
 0x47f   : > { %v3104_v2 = vpop.f32.mrf.mxu2 }
 0x480   : > { %v3159_v31 = vadd.f32 %v3104_v2, %v8914_v50  ;;  %v3325_v21 = vpop.f32.mrf.mxu3  ;;  %v4060_v2 = vld [vmem:[#allocation2 + $0x61] sm:$0xff] }
 0x481   : > { %v3548_v54 = vpop.f32.mrf.mxu0 }
 0x482   : > { %v3380_v51 = vadd.f32 %v3325_v21, %v3159_v31  ;;  %v4061_v31 = vld [vmem:[#allocation2 + $0x69] sm:$0xff] }
 0x483   : > { %v3768_v40 = vpop.f32.mrf.mxu1 }
 0x484   : > { %7312 = vmatmul.msk.bf16.gmra.mxu2 %vm2672_vm7, %v3869_v56  ;;  %7344 = vmatmul.msk.bf16.gmra.mxu0 %vm2672_vm7, %v8933_v42  ;;  %v9203_v15 = vadd.f32 %v3545_v25, %v3380_v51  ;;  %v3870_v56 = vpack.c.bf16 %v3841_v27, %v3840_v44  ;;  %v4090_v51 = vpack.c.bf16 %v4061_v31, %v4060_v2  ;;  %v3842_v27 = vld [vmem:[#allocation2 + $0x78] sm:$0xff]  ;;  %v3843_v2 = vld [vmem:[#allocation2 + $0x80] sm:$0xff] }
 0x485   : > { %7328 = vmatmul.msk.bf16.gmra.mxu3 %vm2672_vm7, %v4089_v62 }
 0x487   : > { %v3107_v19 = vpop.f32.mrf.mxu2 }
 0x488   : > { %v3160_v17 = vadd.f32 %v3107_v19, %v8927_v23  ;;  %v3328_v49 = vpop.f32.mrf.mxu3 }
 0x489   : > { %v3550_v50 = vpop.f32.mrf.mxu0 }
 0x48a   : > { %v3381_v53 = vadd.f32 %v3328_v49, %v3160_v17 }
 0x48b   : > { %v9207_v33 = vpop.f32.mrf.mxu1 }
 0x48c   : > { %v3601_v4 = vadd.f32 %v3548_v54, %v3381_v53 }
 0x48e   : > { %v9209_v48 = vadd.f32 %v3768_v40, %v3601_v4 }
 0x48f   : > { %v3109_v42 = vpop.f32.mrf.mxu2 }
 0x490   : > { %v3161_v25 = vadd.f32 %v3109_v42, %v8931_v41  ;;  %v3330_v21 = vpop.f32.mrf.mxu3  ;;  %v4062_v42 = vld [vmem:[#allocation2 + $0x79] sm:$0xff] }
 0x491   : > { %v3553_v62 = vpop.f32.mrf.mxu0 }
 0x492   : > { %v3382_v23 = vadd.f32 %v3330_v21, %v3161_v25  ;;  %v4063_v25 = vld [vmem:[#allocation2 + $0x81] sm:$0xff] }
 0x493   : > { %v3773_v19 = vpop.f32.mrf.mxu1 }
 0x494   : > { %7313 = vmatmul.msk.bf16.gmra.mxu2 %vm2672_vm7, %v3870_v56  ;;  %7345 = vmatmul.msk.bf16.gmra.mxu0 %vm2672_vm7, %v8951_v46  ;;  %v9215_v54 = vadd.f32 %v3550_v50, %v3382_v23  ;;  %v3871_v56 = vpack.c.bf16 %v3843_v2, %v3842_v27  ;;  %v4091_v23 = vpack.c.bf16 %v4063_v25, %v4062_v42  ;;  %v3844_v2 = vld [vmem:[#allocation2 + $0x90] sm:$0xff]  ;;  %v3845_v42 = vld [vmem:[#allocation2 + $0x98] sm:$0xff] }
 0x495   : > { %7329 = vmatmul.msk.bf16.gmra.mxu3 %vm2672_vm7, %v4090_v51 }
 0x497   : > { %v3112_v40 = vpop.f32.mrf.mxu2 }
 0x498   : > { %v3162_v17 = vadd.f32 %v3112_v40, %v8945_v61  ;;  %v3333_v49 = vpop.f32.mrf.mxu3 }
 0x499   : > { %v3555_v41 = vpop.f32.mrf.mxu0 }
 0x49a   : > { %v3383_v53 = vadd.f32 %v3333_v49, %v3162_v17 }
 0x49b   : > { %v9219_v4 = vpop.f32.mrf.mxu1 }
 0x49c   : > { %v3603_v44 = vadd.f32 %v3553_v62, %v3383_v53 }
 0x49e   : > { %v9221_v31 = vadd.f32 %v3773_v19, %v3603_v44 }
 0x49f   : > { %v3114_v46 = vpop.f32.mrf.mxu2 }
 0x4a0   : > { %v3163_v50 = vadd.f32 %v3114_v46, %v8949_v29  ;;  %v3335_v21 = vpop.f32.mrf.mxu3  ;;  %v4064_v46 = vld [vmem:[#allocation2 + $0x91] sm:$0xff] }
 0x4a1   : > { %v3558_v51 = vpop.f32.mrf.mxu0 }
 0x4a2   : > { %v3384_v61 = vadd.f32 %v3335_v21, %v3163_v50  ;;  %v4065_v50 = vld [vmem:[#allocation2 + $0x99] sm:$0xff] }
 0x4a3   : > { %v3778_v40 = vpop.f32.mrf.mxu1 }
 0x4a4   : > { %7314 = vmatmul.msk.bf16.gmra.mxu2 %vm2672_vm7, %v3871_v56  ;;  %7346 = vmatmul.msk.bf16.gmra.mxu0 %vm2672_vm7, %v8969_v35  ;;  %v9227_v62 = vadd.f32 %v3555_v41, %v3384_v61  ;;  %v3872_v56 = vpack.c.bf16 %v3845_v42, %v3844_v2  ;;  %v4092_v61 = vpack.c.bf16 %v4065_v50, %v4064_v46  ;;  %v3846_v42 = vld [vmem:[#allocation2 + $0xa8] sm:$0xff]  ;;  %v3847_v46 = vld [vmem:[#allocation2 + $0xb0] sm:$0xff] }
 0x4a5   : > { %7330 = vmatmul.msk.bf16.gmra.mxu3 %vm2672_vm7, %v4091_v23 }
 0x4a7   : > { %v3117_v19 = vpop.f32.mrf.mxu2 }
 0x4a8   : > { %v3164_v17 = vadd.f32 %v3117_v19, %v8963_v8  ;;  %v3338_v49 = vpop.f32.mrf.mxu3 }
 0x4a9   : > { %v3560_v29 = vpop.f32.mrf.mxu0 }
 0x4aa   : > { %v3385_v53 = vadd.f32 %v3338_v49, %v3164_v17 }
 0x4ab   : > { %v9231_v44 = vpop.f32.mrf.mxu1 }
 0x4ac   : > { %v3605_v27 = vadd.f32 %v3558_v51, %v3385_v53 }
 0x4ae   : > { %v9233_v25 = vadd.f32 %v3778_v40, %v3605_v27 }
 0x4af   : > { %v3119_v35 = vpop.f32.mrf.mxu2 }
 0x4b0   : > { %v3165_v41 = vadd.f32 %v3119_v35, %v8967_v0  ;;  %v3340_v21 = vpop.f32.mrf.mxu3  ;;  %v4066_v35 = vld [vmem:[#allocation2 + $0xa9] sm:$0xff] }
 0x4b1   : > { %v3563_v23 = vpop.f32.mrf.mxu0 }
 0x4b2   : > { %v3386_v8 = vadd.f32 %v3340_v21, %v3165_v41  ;;  %v4067_v41 = vld [vmem:[#allocation2 + $0xb1] sm:$0xff] }
 0x4b3   : > { %v3783_v19 = vpop.f32.mrf.mxu1 }
 0x4b4   : > { %7315 = vmatmul.msk.bf16.gmra.mxu2 %vm2672_vm7, %v3872_v56  ;;  %7347 = vmatmul.msk.bf16.gmra.mxu0 %vm2672_vm7, %v8987_v11  ;;  %v9239_v51 = vadd.f32 %v3560_v29, %v3386_v8  ;;  %v3873_v56 = vpack.c.bf16 %v3847_v46, %v3846_v42  ;;  %v4093_v8 = vpack.c.bf16 %v4067_v41, %v4066_v35  ;;  %v3848_v46 = vld [vmem:[#allocation2 + $0xc0] sm:$0xff]  ;;  %v3849_v35 = vld [vmem:[#allocation2 + $0xc8] sm:$0xff] }
 0x4b5   : > { %7331 = vmatmul.msk.bf16.gmra.mxu3 %vm2672_vm7, %v4092_v61 }
 0x4b7   : > { %v3122_v40 = vpop.f32.mrf.mxu2 }
 0x4b8   : > { %v3166_v17 = vadd.f32 %v3122_v40, %v8981_v37  ;;  %v3343_v49 = vpop.f32.mrf.mxu3 }
 0x4b9   : > { %v3565_v0 = vpop.f32.mrf.mxu0 }
 0x4ba   : > { %v3387_v53 = vadd.f32 %v3343_v49, %v3166_v17  ;;  %v10365_v17 = vld [vmem:[#allocation19_spill] sm:$0xff] }
 0x4bb   : > { %v9243_v27 = vpop.f32.mrf.mxu1 }
 0x4bc   : > { %10363 = vst [vmem:[#allocation27_spill] sm:$0xff] %v9243_v27  ;;  %v3607_v2 = vadd.f32 %v3563_v23, %v3387_v53 }
 0x4be   : > { %v9245_v50 = vadd.f32 %v3783_v19, %v3607_v2 }
 0x4bf   : > { %v3124_v11 = vpop.f32.mrf.mxu2 }
 0x4c0   : > { %v3167_v29 = vadd.f32 %v3124_v11, %v8985_v7  ;;  %v3345_v21 = vpop.f32.mrf.mxu3 }
 0x4c1   : > { %v3568_v61 = vpop.f32.mrf.mxu0 }
 0x4c2   : > { %v3388_v37 = vadd.f32 %v3345_v21, %v3167_v29  ;;  %v4068_v29 = vld [vmem:[#allocation2 + $0xc1] sm:$0xff]  ;;  %v4069_v21 = vld [vmem:[#allocation2 + $0xc9] sm:$0xff] }
 0x4c3   : > { %v3788_v40 = vpop.f32.mrf.mxu1 }
 0x4c4   : > { %7316 = vmatmul.msk.bf16.gmra.mxu2 %vm2672_vm7, %v3873_v56  ;;  %7348 = vmatmul.msk.bf16.gmra.mxu0 %vm2672_vm7, %v9005_v18  ;;  %v9251_v23 = vadd.f32 %v3565_v0, %v3388_v37  ;;  %v10367_v0 = vld [vmem:[#allocation20_spill] sm:$0xff] }
 0x4c5   : > { %7332 = vmatmul.msk.bf16.gmra.mxu3 %vm2672_vm7, %v4093_v8  ;;  %v3874_v8 = vpack.c.bf16 %v3849_v35, %v3848_v46  ;;  %v4657_v46 = vld [vmem:[#allocation3 + $0x1] sm:$0xff]  ;;  %v4658_v35 = vld [vmem:[#allocation3 + $0x9] sm:$0xff] }
 0x4c6   : > { %10364 = vst [vmem:[#allocation28_spill] sm:$0xff] %v9251_v23  ;;  %v4094_v23 = vpack.c.bf16 %v4069_v21, %v4068_v29  ;;  %v4689_v29 = vpack.c.bf16 %v4658_v35, %v4657_v46 }
 0x4c7   : > { %v3127_v19 = vpop.f32.mrf.mxu2 }
 0x4c8   : > { %v3168_v49 = vadd.f32 %v3127_v19, %v10365_v17  ;;  %v3348_v53 = vpop.f32.mrf.mxu3  ;;  %v10368_v17 = vld [vmem:[#allocation23_spill] sm:$0xff]  ;;  %7360 = vmatmul.msk.bf16.vlgmr.msra.gmra.mxu1 %vm2672_vm7, %v4689_v29 }
 0x4c9   : > { %v3570_v7 = vpop.f32.mrf.mxu0 }
 0x4ca   : > { %v3389_v2 = vadd.f32 %v3348_v53, %v3168_v49  ;;  %v10370_v53 = vld [vmem:[#allocation21_spill] sm:$0xff] }
 0x4cb   : > { %v9255_v41 = vpop.f32.mrf.mxu1 }
 0x4cc   : > { %v3609_v42 = vadd.f32 %v3568_v61, %v3389_v2  ;;  %10366 = vst [vmem:[#allocation19_spill] sm:$0xff] %v9255_v41 }
 0x4ce   : > { %v9257_v11 = vadd.f32 %v3788_v40, %v3609_v42 }
 0x4cf   : > { %v3129_v18 = vpop.f32.mrf.mxu2 }
 0x4d0   : > { %v3169_v56 = vadd.f32 %v3129_v18, %v10367_v0  ;;  %v3350_v37 = vpop.f32.mrf.mxu3 }
 0x4d1   : > { %v3573_v27 = vpop.f32.mrf.mxu0 }
 0x4d2   : > { %v3390_v19 = vadd.f32 %v3350_v37, %v3169_v56  ;;  %v3850_v56 = vld [vmem:[#allocation2 + $0xd8] sm:$0xff]  ;;  %v3851_v37 = vld [vmem:[#allocation2 + $0xe0] sm:$0xff] }
 0x4d3   : > { %v3793_v49 = vpop.f32.mrf.mxu1  ;;  %v3875_v41 = vpack.c.bf16 %v3851_v37, %v3850_v56  ;;  %v10374_v56 = vld [vmem:[#allocation24_spill] sm:$0xff] }
 0x4d4   : > { %7317 = vmatmul.msk.bf16.gmra.mxu2 %vm2672_vm7, %v3874_v8  ;;  %7349 = vmatmul.msk.bf16.gmra.mxu0 %vm2672_vm7, %v10368_v17  ;;  %v9263_v61 = vadd.f32 %v3570_v7, %v3390_v19  ;;  %v4071_v8 = vld [vmem:[#allocation2 + $0xe1] sm:$0xff]  ;;  %v10371_v17 = vld [vmem:[#allocation22_spill] sm:$0xff] }
 0x4d5   : > { %7333 = vmatmul.msk.bf16.gmra.mxu3 %vm2672_vm7, %v4094_v23  ;;  %v4070_v23 = vld [vmem:[#allocation2 + $0xd9] sm:$0xff] }
 0x4d6   : > { %10369 = vst [vmem:[#allocation20_spill] sm:$0xff] %v9263_v61 }
 0x4d7   : > { %v3132_v40 = vpop.f32.mrf.mxu2 }
 0x4d8   : > { %v3170_v2 = vadd.f32 %v3132_v40, %v10370_v53  ;;  %v3353_v42 = vpop.f32.mrf.mxu3 }
 0x4d9   : > { %v3575_v18 = vpop.f32.mrf.mxu0 }
 0x4da   : > { %v3391_v0 = vadd.f32 %v3353_v42, %v3170_v2  ;;  %v4095_v42 = vpack.c.bf16 %v4071_v8, %v4070_v23 }
 0x4db   : > { %v9271_v61 = vpop.f32.mrf.mxu1 }
 0x4dc   : > { %v3611_v21 = vadd.f32 %v3573_v27, %v3391_v0  ;;  %10372 = vst [vmem:[#allocation23_spill] sm:$0xff] %v9271_v61  ;;  %v4598_v27 = vld [vmem:[%s9030_s23] sm:$0xf]  ;;  %v4600_v0 = vld [vmem:[%s9030_s23 + $0x8] sm:$0xf] }
 0x4dd   : > { %v4894_v35 = vsel %vm2721_vm3, %v4598_v27, 0 }
 0x4de   : > { %v9268_v7 = vadd.f32 %v3793_v49, %v3611_v21  ;;  %v5082_v49 = vsel %vm2721_vm3, %v4600_v0, 0  ;;  %4903 = vmatpush.bf16.msrb.mxu2 %v4894_v35  ;;  %v4072_v0 = vld [vmem:[#allocation2 + $0xf1] sm:$0xff]  ;;  %v4073_v35 = vld [vmem:[#allocation2 + $0xf9] sm:$0xff] }
 0x4df   : > { %v3134_v19 = vpop.f32.mrf.mxu2  ;;  %5091 = vmatpush.bf16.msrb.mxu3 %v5082_v49 }
 0x4e0   : > { %v3171_v40 = vadd.f32 %v3134_v19, %v10371_v17  ;;  %v3355_v53 = vpop.f32.mrf.mxu3  ;;  %v4601_v17 = vld [vmem:[%s9030_s23 + $0xc] sm:$0xf] }
 0x4e1   : > { %v3578_v2 = vpop.f32.mrf.mxu0 }
 0x4e2   : > { %v3392_v46 = vadd.f32 %v3355_v53, %v3171_v40  ;;  %v4602_v40 = vld [vmem:[%s9030_s23 + $0x10] sm:$0xf] }
 0x4e3   : > { %v3798_v53 = vpop.f32.mrf.mxu1  ;;  %v5522_v27 = vsel %vm2721_vm3, %v4602_v40, 0 }
 0x4e4   : > { %7318 = vmatmul.msk.bf16.gmra.mxu2 %vm2672_vm7, %v3875_v41  ;;  %7350 = vmatmul.msk.bf16.gmra.mxu0 %vm2672_vm7, %v9050_v28  ;;  %v9280_v29 = vadd.f32 %v3575_v18, %v3392_v46  ;;  %v5302_v41 = vsel %vm2721_vm3, %v4601_v17, 0  ;;  %v3852_v18 = vld [vmem:[#allocation2 + $0xf0] sm:$0xff] }
 0x4e5   : > { %7334 = vmatmul.msk.bf16.gmra.mxu3 %vm2672_vm7, %v4095_v42  ;;  %5311 = vmatpush.bf16.msrb.mxu0 %v5302_v41  ;;  %v3853_v42 = vld [vmem:[#allocation2 + $0xf8] sm:$0xff] }
 0x4e6   : > { %10373 = vst [vmem:[#allocation21_spill] sm:$0xff] %v9280_v29  ;;  %5531 = vmatpush.bf16.msrb.mxu1 %v5522_v27  ;;  %v4096_v29 = vpack.c.bf16 %v4073_v35, %v4072_v0  ;;  %v9299_v27 = vld [vmem:[%s8749_s13] ss:$0 sm:$0xff]  ;;  %v3855_v0 = vld [vmem:[#allocation2 + $0x110] sm:$0xff] }
 0x4e7   : > { %v3137_v21 = vpop.f32.mrf.mxu2 }
 0x4e8   : > { %v3172_v37 = vadd.f32 %v3137_v21, %v10374_v56  ;;  %v3358_v23 = vpop.f32.mrf.mxu3  ;;  %v10375_v21 = vld [vmem:[#allocation25_spill] sm:$0xff] }
 0x4e9   : > { %v3580_v8 = vpop.f32.mrf.mxu0 }
 0x4ea   : > { %v3393_v19 = vadd.f32 %v3358_v23, %v3172_v37  ;;  %v3876_v23 = vpack.c.bf16 %v3853_v42, %v3852_v18  ;;  %v3854_v42 = vld [vmem:[#allocation2 + $0x108] sm:$0xff] }
 0x4ec   : > { %v3613_v28 = vadd.f32 %v3578_v2, %v3393_v19 }
 0x4ee   : > { %v9288_v46 = vadd.f32 %v3798_v53, %v3613_v28 }
 0x4ef   : > { %v3139_v49 = vpop.f32.mrf.mxu2 }
 0x4f0   : > { %v3173_v56 = vadd.f32 %v3139_v49, %v10375_v21  ;;  %v3360_v37 = vpop.f32.mrf.mxu3  ;;  %v4074_v49 = vld [vmem:[#allocation2 + $0x109] sm:$0xff]  ;;  %v4075_v21 = vld [vmem:[#allocation2 + $0x111] sm:$0xff] }
 0x4f1   : > { %v4384_v61 = vpop.f32.mrf.mxu0 }
 0x4f2   : > { %v3394_v17 = vadd.f32 %v3360_v37, %v3173_v56  ;;  %v3877_v37 = vpack.c.bf16 %v3855_v0, %v3854_v42 }
 0x4f4   : > { %7319 = vmatmul.msk.bf16.gmra.mxu2 %vm2672_vm7, %v3876_v23  ;;  %7351 = vmatmul.msk.bf16.gmra.mxu0 %vm2672_vm7, %v9064_v26  ;;  %v9294_v2 = vadd.f32 %v3580_v8, %v3394_v17 }
 0x4f5   : > { %7335 = vmatmul.msk.bf16.gmra.mxu3 %vm2672_vm7, %v4096_v29 }
 0x4f7   : > { %v3944_v19 = vpop.f32.mrf.mxu2 }
 0x4f8   : > { %v4024_v40 = vadd.f32 %v3944_v19, %v9061_v32  ;;  %v4164_v53 = vpop.f32.mrf.mxu3  ;;  %v4097_v32 = vpack.c.bf16 %v4075_v21, %v4074_v49  ;;  %v4076_v21 = vld [vmem:[#allocation2 + $0x121] sm:$0xff] }
 0x4f9   : > { %v4386_v41 = vpop.f32.mrf.mxu0 }
 0x4fa   : > { %v4244_v28 = vadd.f32 %v4164_v53, %v4024_v40 }
 0x4fc   : > { %v4464_v18 = vadd.f32 %v4384_v61, %v4244_v28 }
 0x4fe   : > { %v4499_v35 = vadd.f32 %v9299_v27, %v4464_v18 }
 0x4ff   : > { %v3946_v26 = vpop.f32.mrf.mxu2 }
 0x500   : > { %v4531_v8 = vmax.f32 %v4499_v35, 0.0  ;;  %v4025_v56 = vadd.f32 %v3946_v26, %v9074_v10  ;;  %v4166_v29 = vpop.f32.mrf.mxu3  ;;  %v3857_v35 = vld [vmem:[#allocation2 + $0x128] sm:$0xff] }
 0x501   : > { %v4389_v23 = vpop.f32.mrf.mxu0 }
 0x502   : > { %4564 = vst.msk [vmem:[#allocation3 + $0x19] sm:$0xff] %vm2672_vm7, %v4531_v8  ;;  %v4245_v17 = vadd.f32 %v4166_v29, %v4025_v56 }
 0x504   : > { %v4465_v19 = vadd.f32 %v4386_v41, %v4245_v17  ;;  %7320 = vmatmul.msk.bf16.gmra.mxu2 %vm2672_vm7, %v3877_v37  ;;  %7352 = vmatmul.msk.bf16.gmra.mxu0 %vm2672_vm7, %v9080_v36  ;;  %v3856_v41 = vld [vmem:[#allocation2 + $0x120] sm:$0xff]  ;;  %v4077_v36 = vld [vmem:[#allocation2 + $0x129] sm:$0xff] }
 0x505   : > { %7336 = vmatmul.msk.bf16.gmra.mxu3 %vm2672_vm7, %v4097_v32  ;;  %v3878_v37 = vpack.c.bf16 %v3857_v35, %v3856_v41  ;;  %v3858_v35 = vld [vmem:[#allocation2 + $0x138] sm:$0xff] }
 0x506   : > { %v4500_v61 = vadd.f32 %v9299_v27, %v4465_v19 }
 0x507   : > { %v3949_v40 = vpop.f32.mrf.mxu2 }
 0x508   : > { %v4532_v53 = vmax.f32 %v4500_v61, 0.0  ;;  %v4026_v10 = vadd.f32 %v3949_v40, %v9077_v12  ;;  %v4169_v28 = vpop.f32.mrf.mxu3  ;;  %v4098_v12 = vpack.c.bf16 %v4077_v36, %v4076_v21  ;;  %v4078_v21 = vld [vmem:[#allocation2 + $0x139] sm:$0xff]  ;;  %v4079_v36 = vld [vmem:[#allocation2 + $0x141] sm:$0xff] }
 0x509   : > { %v4391_v18 = vpop.f32.mrf.mxu0  ;;  %v4659_v17 = vld [vmem:[#allocation3 + $0x19] sm:$0xff] }
 0x50a   : > { %4565 = vst.msk [vmem:[#allocation3 + $0x21] sm:$0xff] %vm2672_vm7, %v4532_v53  ;;  %v4246_v42 = vadd.f32 %v4169_v28, %v4026_v10 }
 0x50c   : > { %v4466_v0 = vadd.f32 %v4389_v23, %v4246_v42 }
 0x50e   : > { %v4501_v49 = vadd.f32 %v9299_v27, %v4466_v0 }
 0x50f   : > { %v3951_v26 = vpop.f32.mrf.mxu2 }
 0x510   : > { %v4533_v8 = vmax.f32 %v4501_v49, 0.0  ;;  %v4027_v56 = vadd.f32 %v3951_v26, %v9090_v55  ;;  %v4171_v29 = vpop.f32.mrf.mxu3  ;;  %v3859_v49 = vld [vmem:[#allocation2 + $0x140] sm:$0xff] }
 0x511   : > { %v4394_v32 = vpop.f32.mrf.mxu0  ;;  %v4660_v19 = vld [vmem:[#allocation3 + $0x21] sm:$0xff] }
 0x512   : > { %4566 = vst.msk [vmem:[#allocation3 + $0x31] sm:$0xff] %vm2672_vm7, %v4533_v8  ;;  %v4247_v61 = vadd.f32 %v4171_v29, %v4027_v56  ;;  %v4690_v23 = vpack.c.bf16 %v4660_v19, %v4659_v17 }
 0x514   : > { %v4467_v40 = vadd.f32 %v4391_v18, %v4247_v61  ;;  %7321 = vmatmul.msk.bf16.gmra.mxu2 %vm2672_vm7, %v3878_v37  ;;  %7353 = vmatmul.msk.bf16.gmra.mxu0 %vm2672_vm7, %v9096_v3  ;;  %v3879_v37 = vpack.c.bf16 %v3859_v49, %v3858_v35  ;;  %v4080_v35 = vld [vmem:[#allocation2 + $0x151] sm:$0xff]  ;;  %v4081_v49 = vld [vmem:[#allocation2 + $0x159] sm:$0xff] }
 0x515   : > { %7337 = vmatmul.msk.bf16.gmra.mxu3 %vm2672_vm7, %v4098_v12  ;;  %7361 = vmatmul.msk.bf16.gmra.mxu1 %vm2672_vm7, %v4690_v23 }
 0x516   : > { %v4502_v55 = vadd.f32 %v9299_v27, %v4467_v40 }
 0x517   : > { %v3954_v53 = vpop.f32.mrf.mxu2 }
 0x518   : > { %v4534_v10 = vmax.f32 %v4502_v55, 0.0  ;;  %v4028_v28 = vadd.f32 %v3954_v53, %v9093_v5  ;;  %v4174_v42 = vpop.f32.mrf.mxu3  ;;  %v4099_v5 = vpack.c.bf16 %v4079_v36, %v4078_v21 }
 0x519   : > { %v4396_v0 = vpop.f32.mrf.mxu0  ;;  %v4661_v17 = vld [vmem:[#allocation3 + $0x31] sm:$0xff] }
 0x51a   : > { %4567 = vst.msk [vmem:[#allocation3 + $0x39] sm:$0xff] %vm2672_vm7, %v4534_v10  ;;  %v4248_v18 = vadd.f32 %v4174_v42, %v4028_v28 }
 0x51c   : > { %v4468_v41 = vadd.f32 %v4394_v32, %v4248_v18  ;;  %v3860_v18 = vld [vmem:[#allocation2 + $0x150] sm:$0xff] }
 0x51e   : > { %v4503_v3 = vadd.f32 %v9299_v27, %v4468_v41  ;;  %v3861_v41 = vld [vmem:[#allocation2 + $0x158] sm:$0xff] }
 0x51f   : > { %v3956_v26 = vpop.f32.mrf.mxu2 }
 0x520   : > { %v4535_v8 = vmax.f32 %v4503_v3, 0.0  ;;  %v4029_v56 = vadd.f32 %v3956_v26, %v9106_v24  ;;  %v4176_v29 = vpop.f32.mrf.mxu3 }
 0x521   : > { %v4399_v12 = vpop.f32.mrf.mxu0  ;;  %v4662_v19 = vld [vmem:[#allocation3 + $0x39] sm:$0xff] }
 0x522   : > { %4568 = vst.msk [vmem:[#allocation3 + $0x49] sm:$0xff] %vm2672_vm7, %v4535_v8  ;;  %v4249_v61 = vadd.f32 %v4176_v29, %v4029_v56  ;;  %v4691_v32 = vpack.c.bf16 %v4662_v19, %v4661_v17  ;;  %v3880_v8 = vpack.c.bf16 %v3861_v41, %v3860_v18 }
 0x524   : > { %v4469_v23 = vadd.f32 %v4396_v0, %v4249_v61  ;;  %7322 = vmatmul.msk.bf16.gmra.mxu2 %vm2672_vm7, %v3879_v37  ;;  %7354 = vmatmul.msk.bf16.gmra.mxu0 %vm2672_vm7, %v9112_v58 }
 0x525   : > { %7338 = vmatmul.msk.bf16.gmra.mxu3 %vm2672_vm7, %v4099_v5  ;;  %7362 = vmatmul.msk.bf16.gmra.mxu1 %vm2672_vm7, %v4691_v32 }
 0x526   : > { %v4504_v24 = vadd.f32 %v9299_v27, %v4469_v23 }
 0x527   : > { %v3959_v40 = vpop.f32.mrf.mxu2 }
 0x528   : > { %v4536_v55 = vmax.f32 %v4504_v24, 0.0  ;;  %v4030_v53 = vadd.f32 %v3959_v40, %v9109_v57  ;;  %v4179_v10 = vpop.f32.mrf.mxu3  ;;  %v4100_v57 = vpack.c.bf16 %v4081_v49, %v4080_v35 }
 0x529   : > { %v4401_v28 = vpop.f32.mrf.mxu0  ;;  %v4663_v29 = vld [vmem:[#allocation3 + $0x49] sm:$0xff] }
 0x52a   : > { %4569 = vst.msk [vmem:[#allocation3 + $0x51] sm:$0xff] %vm2672_vm7, %v4536_v55  ;;  %v4250_v42 = vadd.f32 %v4179_v10, %v4030_v53  ;;  %v3862_v53 = vld [vmem:[#allocation2 + $0x168] sm:$0xff]  ;;  %v3863_v10 = vld [vmem:[#allocation2 + $0x170] sm:$0xff] }
 0x52c   : > { %v4470_v0 = vadd.f32 %v4399_v12, %v4250_v42  ;;  %v4082_v42 = vld [vmem:[#allocation2 + $0x169] sm:$0xff] }
 0x52e   : > { %v4505_v58 = vadd.f32 %v9299_v27, %v4470_v0  ;;  %v4083_v0 = vld [vmem:[#allocation2 + $0x171] sm:$0xff] }
 0x52f   : > { %v3961_v3 = vpop.f32.mrf.mxu2 }
 0x530   : > { %v4537_v21 = vmax.f32 %v4505_v58, 0.0  ;;  %v4031_v36 = vadd.f32 %v3961_v3, %v9122_v39  ;;  %v4181_v26 = vpop.f32.mrf.mxu3  ;;  %v4101_v3 = vpack.c.bf16 %v4083_v0, %v4082_v42 }
 0x531   : > { %v4404_v56 = vpop.f32.mrf.mxu0  ;;  %v4664_v37 = vld [vmem:[#allocation3 + $0x51] sm:$0xff] }
 0x532   : > { %4570 = vst.msk [vmem:[#allocation3 + $0x61] sm:$0xff] %vm2672_vm7, %v4537_v21  ;;  %v4251_v5 = vadd.f32 %v4181_v26, %v4031_v36  ;;  %v4692_v12 = vpack.c.bf16 %v4664_v37, %v4663_v29 }
 0x534   : > { %v4471_v17 = vadd.f32 %v4401_v28, %v4251_v5  ;;  %7323 = vmatmul.msk.bf16.gmra.mxu2 %vm2672_vm7, %v3880_v8  ;;  %7355 = vmatmul.msk.bf16.gmra.mxu0 %vm2672_vm7, %v9130_v22  ;;  %v3812_v22 = vadd.f32 %v9125_v1, %v9136_v47 }
 0x535   : > { %7339 = vmatmul.msk.bf16.gmra.mxu3 %vm2672_vm7, %v4100_v57  ;;  %7363 = vmatmul.msk.bf16.gmra.mxu1 %vm2672_vm7, %v4692_v12 }
 0x536   : > { %v4506_v39 = vadd.f32 %v9299_v27, %v4471_v17 }
 0x537   : > { %v3964_v19 = vpop.f32.mrf.mxu2 }
 0x538   : > { %v4538_v61 = vmax.f32 %v4506_v39, 0.0  ;;  %v4032_v32 = vadd.f32 %v3964_v19, %v9127_v16  ;;  %v4184_v23 = vpop.f32.mrf.mxu3  ;;  %v3881_v16 = vpack.c.bf16 %v3863_v10, %v3862_v53  ;;  %v3814_v39 = vadd.f32 %v9143_v63, %v9154_v43 }
 0x539   : > { %v4406_v24 = vpop.f32.mrf.mxu0  ;;  %v4665_v21 = vld [vmem:[#allocation3 + $0x61] sm:$0xff] }
 0x53a   : > { %4571 = vst.msk [vmem:[#allocation3 + $0x69] sm:$0xff] %vm2672_vm7, %v4538_v61  ;;  %v4252_v40 = vadd.f32 %v4184_v23, %v4032_v32 }
 0x53c   : > { %v4472_v55 = vadd.f32 %v4404_v56, %v4252_v40 }
 0x53e   : > { %v4507_v28 = vadd.f32 %v9299_v27, %v4472_v55 }
 0x53f   : > { %v3966_v18 = vpop.f32.mrf.mxu2 }
 0x540   : > { %v4539_v41 = vmax.f32 %v4507_v28, 0.0  ;;  %v4033_v58 = vadd.f32 %v3966_v18, %v3812_v22  ;;  %v4186_v35 = vpop.f32.mrf.mxu3 }
 0x541   : > { %v4409_v49 = vpop.f32.mrf.mxu0  ;;  %v4666_v36 = vld [vmem:[#allocation3 + $0x69] sm:$0xff] }
 0x542   : > { %4572 = vst.msk [vmem:[#allocation3 + $0x79] sm:$0xff] %vm2672_vm7, %v4539_v41  ;;  %v4253_v26 = vadd.f32 %v4186_v35, %v4033_v58  ;;  %v4693_v8 = vpack.c.bf16 %v4666_v36, %v4665_v21  ;;  %v3866_v41 = vld [vmem:[#allocation2 + $0x198] sm:$0xff]  ;;  %v4307_v35 = vld [vmem:[#allocation2 + $0x1a2] sm:$0xff] }
 0x543   : > { %v4306_v58 = vld [vmem:[#allocation2 + $0x19a] sm:$0xff] }
 0x544   : > { %v4473_v56 = vadd.f32 %v4406_v24, %v4253_v26  ;;  %7324 = vmatmul.msk.bf16.gmra.mxu2 %vm2672_vm7, %v3881_v16  ;;  %7356 = vmatmul.msk.bf16.gmra.mxu0 %vm2672_vm7, %v9148_v30  ;;  %v4087_v21 = vld [vmem:[#allocation2 + $0x1a1] sm:$0xff] }
 0x545   : > { %7340 = vmatmul.msk.bf16.gmra.mxu3 %vm2672_vm7, %v4101_v3  ;;  %7364 = vmatmul.msk.bf16.gmra.mxu1 %vm2672_vm7, %v4693_v8  ;;  %v4086_v3 = vld [vmem:[#allocation2 + $0x199] sm:$0xff] }
 0x546   : > { %v4508_v1 = vadd.f32 %v9299_v27, %v4473_v56 }
 0x547   : > { %v3969_v47 = vpop.f32.mrf.mxu2 }
 0x548   : > { %v4540_v57 = vmax.f32 %v4508_v1, 0.0  ;;  %v4034_v29 = vadd.f32 %v3969_v47, %v9145_v6  ;;  %v4189_v37 = vpop.f32.mrf.mxu3  ;;  %v4323_v1 = vpack.c.bf16 %v4307_v35, %v4306_v58  ;;  %v5205_v35 = vld [vmem:[#allocation3 + $0x18] sm:$0xff] }
 0x549   : > { %v4411_v5 = vpop.f32.mrf.mxu0  ;;  %v4667_v40 = vld [vmem:[#allocation3 + $0x79] sm:$0xff] }
 0x54a   : > { %4573 = vst.msk [vmem:[#allocation3 + $0x81] sm:$0xff] %vm2672_vm7, %v4540_v57  ;;  %v4254_v12 = vadd.f32 %v4189_v37, %v4034_v29  ;;  %v4103_v57 = vpack.c.bf16 %v4087_v21, %v4086_v3  ;;  %v9399_v21 = vpop.f32.mrf.mxu1 }
 0x54c   : > { %v4474_v17 = vadd.f32 %v4409_v49, %v4254_v12 }
 0x54e   : > { %v4509_v30 = vadd.f32 %v9299_v27, %v4474_v17 }
 0x54f   : > { %v3971_v19 = vpop.f32.mrf.mxu2 }
 0x550   : > { %v4541_v61 = vmax.f32 %v4509_v30, 0.0  ;;  %v4035_v32 = vadd.f32 %v3971_v19, %v3814_v39  ;;  %v4191_v23 = vpop.f32.mrf.mxu3 }
 0x551   : > { %v4414_v24 = vpop.f32.mrf.mxu0  ;;  %v4668_v55 = vld [vmem:[#allocation3 + $0x81] sm:$0xff] }
 0x552   : > { %4574 = vst.msk [vmem:[#allocation3 + $0x91] sm:$0xff] %vm2672_vm7, %v4541_v61  ;;  %v4255_v6 = vadd.f32 %v4191_v23, %v4035_v32  ;;  %v9360_v53 = vpack.c.bf16 %v4668_v55, %v4667_v40  ;;  %v4609_v40 = vld [vmem:[#allocation3] sm:$0xff]  ;;  %v4610_v55 = vld [vmem:[#allocation3 + $0x8] sm:$0xff] }
 0x554   : > { %v4475_v10 = vadd.f32 %v4411_v5, %v4255_v6  ;;  %7325 = vmatmul.msk.bf16.gmra.mxu2 %vm2672_vm7, %v9168_v9  ;;  %7357 = vmatmul.msk.bf16.gmra.mxu0 %vm2672_vm7, %v9170_v38  ;;  %v3867_v38 = vld [vmem:[#allocation2 + $0x1a0] sm:$0xff]  ;;  %v3818_v6 = vadd.f32 %v9183_v59, %v9191_v34 }
 0x555   : > { %7341 = vmatmul.msk.bf16.gmra.mxu3 %vm2672_vm7, %v9166_v45  ;;  %7365 = vmatmul.msk.bf16.gmra.mxu1 %vm2672_vm7, %v9360_v53  ;;  %v10376_v45 = vld [vmem:[#allocation26_spill] sm:$0xff]  ;;  %v3883_v56 = vpack.c.bf16 %v3867_v38, %v3866_v41 }
 0x556   : > { %v4510_v63 = vadd.f32 %v9299_v27, %v4475_v10  ;;  %v3816_v16 = vadd.f32 %v10376_v45, %v9176_v14 }
 0x557   : > { %v3974_v43 = vpop.f32.mrf.mxu2 }
 0x558   : > { %v4542_v22 = vmax.f32 %v4510_v63, 0.0  ;;  %v4036_v28 = vadd.f32 %v3974_v43, %v9163_v52  ;;  %v4194_v42 = vpop.f32.mrf.mxu3  ;;  %v4985_v63 = vld [vmem:[#allocation3 + $0x2] sm:$0xff]  ;;  %v4986_v43 = vld [vmem:[#allocation3 + $0xa] sm:$0xff] }
 0x559   : > { %v4416_v0 = vpop.f32.mrf.mxu0  ;;  %v4669_v29 = vld [vmem:[#allocation3 + $0x91] sm:$0xff]  ;;  %v5017_v58 = vpack.c.bf16 %v4986_v43, %v4985_v63 }
 0x55a   : > { %4575 = vst.msk [vmem:[#allocation3 + $0x99] sm:$0xff] %vm2672_vm7, %v4542_v22  ;;  %v4256_v9 = vadd.f32 %v4194_v42, %v4036_v28  ;;  %v5206_v28 = vld [vmem:[#allocation3 + $0x20] sm:$0xff] }
 0x55b   : > { %v5237_v59 = vpack.c.bf16 %v5206_v28, %v5205_v35 }
 0x55c   : > { %v4476_v18 = vadd.f32 %v4414_v24, %v4256_v9  ;;  %v4641_v9 = vpack.c.bf16 %v4610_v55, %v4609_v40 }
 0x55e   : > { %v4511_v49 = vadd.f32 %v9299_v27, %v4476_v18 }
 0x55f   : > { %v3976_v36 = vpop.f32.mrf.mxu2 }
 0x560   : > { %v4543_v26 = vmax.f32 %v4511_v49, 0.0  ;;  %v4037_v52 = vadd.f32 %v3976_v36, %v3816_v16  ;;  %v4196_v8 = vpop.f32.mrf.mxu3 }
 0x561   : > { %v4419_v47 = vpop.f32.mrf.mxu0  ;;  %v4670_v37 = vld [vmem:[#allocation3 + $0x99] sm:$0xff] }
 0x562   : > { %4576 = vst.msk [vmem:[#allocation3 + $0xa9] sm:$0xff] %vm2672_vm7, %v4543_v26  ;;  %v4257_v5 = vadd.f32 %v4196_v8, %v4037_v52  ;;  %v9377_v12 = vpack.c.bf16 %v4670_v37, %v4669_v29  ;;  %v5208_v37 = vld [vmem:[#allocation3 + $0x38] sm:$0xff] }
 0x564   : > { %v4477_v14 = vadd.f32 %v4416_v0, %v4257_v5  ;;  %7326 = vmatmul.msk.bf16.gmra.mxu2 %vm2672_vm7, %v3883_v56  ;;  %7358 = vmatmul.msk.bf16.gmra.mxu0 %vm2672_vm7, %v4323_v1 }
 0x565   : > { %7342 = vmatmul.msk.bf16.gmra.mxu3 %vm2672_vm7, %v4103_v57  ;;  %7366 = vmatmul.msk.bf16.gmra.mxu1 %vm2672_vm7, %v9377_v12 }
 0x566   : > { %v4512_v17 = vadd.f32 %v9299_v27, %v4477_v14  ;;  %v9406_v14 = vpop.f32.mrf.mxu1 }
 0x567   : > { %v3979_v39 = vpop.f32.mrf.mxu2 }
 0x568   : > { %v4544_v30 = vmax.f32 %v4512_v17, 0.0  ;;  %v4038_v19 = vadd.f32 %v3979_v39, %v9185_v20  ;;  %v4199_v61 = vpop.f32.mrf.mxu3 }
 0x569   : > { %v4421_v32 = vpop.f32.mrf.mxu0  ;;  %v4671_v41 = vld [vmem:[#allocation3 + $0xa9] sm:$0xff] }
 0x56a   : > { %4577 = vst.msk [vmem:[#allocation3 + $0xb1] sm:$0xff] %vm2672_vm7, %v4544_v30  ;;  %v4258_v23 = vadd.f32 %v4199_v61, %v4038_v19  ;;  %v4987_v30 = vld [vmem:[#allocation3 + $0x1a] sm:$0xff] }
 0x56c   : > { %v4478_v24 = vadd.f32 %v4419_v47, %v4258_v23  ;;  %v3820_v47 = vadd.f32 %v9195_v60, %v9203_v15  ;;  %v5207_v23 = vld [vmem:[#allocation3 + $0x30] sm:$0xff] }
 0x56d   : > { %v9411_v60 = vpack.c.bf16 %v5208_v37, %v5207_v23 }
 0x56e   : > { %v4513_v10 = vadd.f32 %v9299_v27, %v4478_v24 }
 0x56f   : > { %v3981_v22 = vpop.f32.mrf.mxu2 }
 0x570   : > { %v4545_v42 = vmax.f32 %v4513_v10, 0.0  ;;  %v4039_v0 = vadd.f32 %v3981_v22, %v3818_v6  ;;  %v4201_v20 = vpop.f32.mrf.mxu3 }
 0x571   : > { %v4424_v18 = vpop.f32.mrf.mxu0  ;;  %v4672_v38 = vld [vmem:[#allocation3 + $0xb1] sm:$0xff] }
 0x572   : > { %4578 = vst.msk [vmem:[#allocation3 + $0xc1] sm:$0xff] %vm2672_vm7, %v4545_v42  ;;  %v4259_v45 = vadd.f32 %v4201_v20, %v4039_v0  ;;  %v9391_v16 = vpack.c.bf16 %v4672_v38, %v4671_v41  ;;  %v9425_v42 = vpop.f32.mrf.mxu1  ;;  %v5210_v38 = vld [vmem:[#allocation3 + $0x50] sm:$0xff] }
 0x574   : > { %v4479_v34 = vadd.f32 %v4421_v32, %v4259_v45  ;;  %7376 = vmatmul.msk.bf16.vlgmr.msrb.gmra.mxu2 %vm2672_vm7, %v4641_v9  ;;  %7408 = vmatmul.msk.bf16.vlgmr.msrb.gmra.mxu0 %vm2672_vm7, %v5237_v59  ;;  %v3822_v9 = vadd.f32 %v9207_v33, %v9215_v54 }
 0x575   : > { %7367 = vmatmul.msk.bf16.gmra.mxu1 %vm2672_vm7, %v9391_v16  ;;  %7392 = vmatmul.msk.bf16.vlgmr.msrb.gmra.mxu3 %vm2672_vm7, %v5017_v58 }
 0x576   : > { %v4514_v49 = vadd.f32 %v9299_v27, %v4479_v34 }
 0x577   : > { %v3984_v3 = vpop.f32.mrf.mxu2 }
 0x578   : > { %v4546_v36 = vmax.f32 %v4514_v49, 0.0  ;;  %v4040_v26 = vadd.f32 %v3984_v3, %v9197_v13  ;;  %v4204_v52 = vpop.f32.mrf.mxu3  ;;  %v4988_v13 = vld [vmem:[#allocation3 + $0x22] sm:$0xff] }
 0x579   : > { %v4426_v8 = vpop.f32.mrf.mxu0  ;;  %v4673_v61 = vld [vmem:[#allocation3 + $0xc1] sm:$0xff]  ;;  %v9413_v15 = vpack.c.bf16 %v4988_v13, %v4987_v30  ;;  %v3824_v13 = vadd.f32 %v9219_v4, %v9227_v62 }
 0x57a   : > { %4579 = vst.msk [vmem:[#allocation3 + $0xc9] sm:$0xff] %vm2672_vm7, %v4546_v36  ;;  %v4260_v56 = vadd.f32 %v4204_v52, %v4040_v26  ;;  %v5209_v36 = vld [vmem:[#allocation3 + $0x48] sm:$0xff] }
 0x57b   : > { %v9435_v33 = vpack.c.bf16 %v5210_v38, %v5209_v36 }
 0x57c   : > { %v4480_v1 = vadd.f32 %v4424_v18, %v4260_v56 }
 0x57e   : > { %v4515_v57 = vadd.f32 %v9299_v27, %v4480_v1 }
 0x57f   : > { %v3986_v29 = vpop.f32.mrf.mxu2 }
 0x580   : > { %v4547_v5 = vmax.f32 %v4515_v57, 0.0  ;;  %v4041_v17 = vadd.f32 %v3986_v29, %v3820_v47  ;;  %v4206_v39 = vpop.f32.mrf.mxu3 }
 0x581   : > { %v4429_v19 = vpop.f32.mrf.mxu0  ;;  %v4674_v32 = vld [vmem:[#allocation3 + $0xc9] sm:$0xff] }
 0x582   : > { %4580 = vst.msk [vmem:[#allocation3 + $0xd9] sm:$0xff] %vm2672_vm7, %v4547_v5  ;;  %v4261_v24 = vadd.f32 %v4206_v39, %v4041_v17  ;;  %v9409_v40 = vpack.c.bf16 %v4674_v32, %v4673_v61  ;;  %v5212_v32 = vld [vmem:[#allocation3 + $0x68] sm:$0xff] }
 0x584   : > { %v4481_v55 = vadd.f32 %v4426_v8, %v4261_v24  ;;  %7377 = vmatmul.msk.bf16.gmra.mxu2 %vm2672_vm7, %v5237_v59  ;;  %7409 = vmatmul.msk.bf16.gmra.mxu0 %vm2672_vm7, %v9411_v60  ;;  %v4989_v59 = vld [vmem:[#allocation3 + $0x32] sm:$0xff] }
 0x585   : > { %7368 = vmatmul.msk.bf16.gmra.mxu1 %vm2672_vm7, %v9409_v40  ;;  %7393 = vmatmul.msk.bf16.gmra.mxu3 %vm2672_vm7, %v9413_v15 }
 0x586   : > { %v4516_v6 = vadd.f32 %v9299_v27, %v4481_v55 }
 0x587   : > { %v3989_v10 = vpop.f32.mrf.mxu2 }
 0x588   : > { %v4548_v63 = vmax.f32 %v4516_v6, 0.0  ;;  %v4042_v43 = vadd.f32 %v3989_v10, %v9209_v48  ;;  %v4209_v22 = vpop.f32.mrf.mxu3  ;;  %v4990_v48 = vld [vmem:[#allocation3 + $0x3a] sm:$0xff]  ;;  %v4991_v6 = vld [vmem:[#allocation3 + $0x4a] sm:$0xff] }
 0x589   : > { %v4431_v28 = vpop.f32.mrf.mxu0  ;;  %v4675_v49 = vld [vmem:[#allocation3 + $0xd9] sm:$0xff]  ;;  %v9437_v54 = vpack.c.bf16 %v4990_v48, %v4989_v59 }
 0x58a   : > { %4581 = vst.msk [vmem:[#allocation3 + $0xe1] sm:$0xff] %vm2672_vm7, %v4548_v63  ;;  %v4262_v0 = vadd.f32 %v4209_v22, %v4042_v43  ;;  %v5211_v22 = vld [vmem:[#allocation3 + $0x60] sm:$0xff] }
 0x58b   : > { %v9460_v4 = vpack.c.bf16 %v5212_v32, %v5211_v22  ;;  %v10377_v22 = vld [vmem:[#allocation28_spill] sm:$0xff] }
 0x58c   : > { %v4482_v20 = vadd.f32 %v4429_v19, %v4262_v0 }
 0x58e   : > { %v4517_v18 = vadd.f32 %v9299_v27, %v4482_v20 }
 0x58f   : > { %v3991_v41 = vpop.f32.mrf.mxu2 }
 0x590   : > { %v4549_v58 = vmax.f32 %v4517_v18, 0.0  ;;  %v4043_v35 = vadd.f32 %v3991_v41, %v3822_v9  ;;  %v4211_v45 = vpop.f32.mrf.mxu3 }
 0x591   : > { %v4434_v34 = vpop.f32.mrf.mxu0  ;;  %v4676_v3 = vld [vmem:[#allocation3 + $0xe1] sm:$0xff] }
 0x592   : > { %4582 = vst.msk [vmem:[#allocation3 + $0xf1] sm:$0xff] %vm2672_vm7, %v4549_v58  ;;  %v4263_v26 = vadd.f32 %v4211_v45, %v4043_v35  ;;  %v9431_v52 = vpop.f32.mrf.mxu1  ;;  %v9433_v8 = vpack.c.bf16 %v4676_v3, %v4675_v49  ;;  %v3826_v49 = vadd.f32 %v9231_v44, %v9239_v51 }
 0x594   : > { %v4483_v56 = vadd.f32 %v4431_v28, %v4263_v26  ;;  %7378 = vmatmul.msk.bf16.gmra.mxu2 %vm2672_vm7, %v9411_v60  ;;  %7410 = vmatmul.msk.bf16.gmra.mxu0 %vm2672_vm7, %v9435_v33  ;;  %v5214_v26 = vld [vmem:[#allocation3 + $0x80] sm:$0xff] }
 0x595   : > { %7369 = vmatmul.msk.bf16.gmra.mxu1 %vm2672_vm7, %v9433_v8  ;;  %7394 = vmatmul.msk.bf16.gmra.mxu3 %vm2672_vm7, %v9437_v54 }
 0x596   : > { %v4518_v1 = vadd.f32 %v9299_v27, %v4483_v56 }
 0x597   : > { %v3994_v47 = vpop.f32.mrf.mxu2 }
 0x598   : > { %v4550_v57 = vmax.f32 %v4518_v1, 0.0  ;;  %v4044_v29 = vadd.f32 %v3994_v47, %v9221_v31  ;;  %v4214_v37 = vpop.f32.mrf.mxu3  ;;  %v4992_v31 = vld [vmem:[#allocation3 + $0x52] sm:$0xff] }
 0x599   : > { %v4436_v5 = vpop.f32.mrf.mxu0  ;;  %v4677_v63 = vld [vmem:[#allocation3 + $0xf1] sm:$0xff]  ;;  %v9462_v62 = vpack.c.bf16 %v4992_v31, %v4991_v6 }
 0x59a   : > { %4583 = vst.msk [vmem:[#allocation3 + $0xf9] sm:$0xff] %vm2672_vm7, %v4550_v57  ;;  %v4264_v17 = vadd.f32 %v4214_v37, %v4044_v29  ;;  %v9450_v39 = vpop.f32.mrf.mxu1  ;;  %v4993_v57 = vld [vmem:[#allocation3 + $0x62] sm:$0xff] }
 0x59c   : > { %v4484_v30 = vadd.f32 %v4434_v34, %v4264_v17  ;;  %v5213_v17 = vld [vmem:[#allocation3 + $0x78] sm:$0xff] }
 0x59d   : > { %v9485_v44 = vpack.c.bf16 %v5214_v26, %v5213_v17 }
 0x59e   : > { %v4519_v19 = vadd.f32 %v9299_v27, %v4484_v30 }
 0x59f   : > { %v3996_v61 = vpop.f32.mrf.mxu2 }
 0x5a0   : > { %v4551_v23 = vmax.f32 %v4519_v19, 0.0  ;;  %v4045_v24 = vadd.f32 %v3996_v61, %v3824_v13  ;;  %v4216_v55 = vpop.f32.mrf.mxu3 }
 0x5a1   : > { %v4439_v10 = vpop.f32.mrf.mxu0  ;;  %v4678_v43 = vld [vmem:[#allocation3 + $0xf9] sm:$0xff] }
 0x5a2   : > { %4584 = vst.msk [vmem:[#allocation3 + $0x109] sm:$0xff] %vm2672_vm7, %v4551_v23  ;;  %v4265_v28 = vadd.f32 %v4216_v55, %v4045_v24  ;;  %v9456_v0 = vpop.f32.mrf.mxu1  ;;  %v9458_v20 = vpack.c.bf16 %v4678_v43, %v4677_v63 }
 0x5a4   : > { %v4485_v9 = vadd.f32 %v4436_v5, %v4265_v28  ;;  %7379 = vmatmul.msk.bf16.gmra.mxu2 %vm2672_vm7, %v9435_v33  ;;  %7411 = vmatmul.msk.bf16.gmra.mxu0 %vm2672_vm7, %v9460_v4  ;;  %v10378_v28 = vld [vmem:[#allocation27_spill] sm:$0xff] }
 0x5a5   : > { %7370 = vmatmul.msk.bf16.gmra.mxu1 %vm2672_vm7, %v9458_v20  ;;  %7395 = vmatmul.msk.bf16.gmra.mxu3 %vm2672_vm7, %v9462_v62 }
 0x5a6   : > { %v4520_v18 = vadd.f32 %v9299_v27, %v4485_v9  ;;  %v3828_v9 = vadd.f32 %v10378_v28, %v10377_v22  ;;  %v5218_v22 = vld [vmem:[#allocation3 + $0xb0] sm:$0xff] }
 0x5a7   : > { %v3999_v41 = vpop.f32.mrf.mxu2 }
 0x5a8   : > { %v4552_v38 = vmax.f32 %v4520_v18, 0.0  ;;  %v4046_v58 = vadd.f32 %v3999_v41, %v9233_v25  ;;  %v4219_v35 = vpop.f32.mrf.mxu3  ;;  %v4994_v25 = vld [vmem:[#allocation3 + $0x6a] sm:$0xff] }
 0x5a9   : > { %v4441_v45 = vpop.f32.mrf.mxu0  ;;  %v4679_v37 = vld [vmem:[#allocation3 + $0x109] sm:$0xff]  ;;  %v9487_v51 = vpack.c.bf16 %v4994_v25, %v4993_v57 }
 0x5aa   : > { %4585 = vst.msk [vmem:[#allocation3 + $0x111] sm:$0xff] %vm2672_vm7, %v4552_v38  ;;  %v4266_v59 = vadd.f32 %v4219_v35, %v4046_v58  ;;  %v9475_v48 = vpop.f32.mrf.mxu1  ;;  %v5216_v38 = vld [vmem:[#allocation3 + $0x98] sm:$0xff] }
 0x5ac   : > { %v4486_v34 = vadd.f32 %v4439_v10, %v4266_v59  ;;  %v4995_v59 = vld [vmem:[#allocation3 + $0x7a] sm:$0xff] }
 0x5ae   : > { %v4521_v3 = vadd.f32 %v9299_v27, %v4486_v34 }
 0x5af   : > { %v4001_v36 = vpop.f32.mrf.mxu2 }
 0x5b0   : > { %v4553_v56 = vmax.f32 %v4521_v3, 0.0  ;;  %v4047_v1 = vadd.f32 %v4001_v36, %v3826_v49  ;;  %v4221_v47 = vpop.f32.mrf.mxu3  ;;  %v5215_v36 = vld [vmem:[#allocation3 + $0x90] sm:$0xff] }
 0x5b1   : > { %v4444_v29 = vpop.f32.mrf.mxu0  ;;  %v4680_v5 = vld [vmem:[#allocation3 + $0x111] sm:$0xff] }
 0x5b2   : > { %4586 = vst.msk [vmem:[#allocation3 + $0x121] sm:$0xff] %vm2672_vm7, %v4553_v56  ;;  %v4267_v30 = vadd.f32 %v4221_v47, %v4047_v1  ;;  %v9481_v13 = vpop.f32.mrf.mxu1  ;;  %v9483_v19 = vpack.c.bf16 %v4680_v5, %v4679_v37  ;;  %v9510_v47 = vpack.c.bf16 %v5216_v38, %v5215_v36 }
 0x5b4   : > { %v4487_v61 = vadd.f32 %v4441_v45, %v4267_v30  ;;  %7380 = vmatmul.msk.bf16.gmra.mxu2 %vm2672_vm7, %v9460_v4  ;;  %7412 = vmatmul.msk.bf16.gmra.mxu0 %vm2672_vm7, %v9485_v44 }
 0x5b5   : > { %7371 = vmatmul.msk.bf16.gmra.mxu1 %vm2672_vm7, %v9483_v19  ;;  %7396 = vmatmul.msk.bf16.gmra.mxu3 %vm2672_vm7, %v9487_v51 }
 0x5b6   : > { %v4522_v32 = vadd.f32 %v9299_v27, %v4487_v61 }
 0x5b7   : > { %v4004_v23 = vpop.f32.mrf.mxu2 }
 0x5b8   : > { %v4554_v24 = vmax.f32 %v4522_v32, 0.0  ;;  %v4048_v55 = vadd.f32 %v4004_v23, %v9245_v50  ;;  %v4224_v6 = vpop.f32.mrf.mxu3  ;;  %v4996_v50 = vld [vmem:[#allocation3 + $0x82] sm:$0xff] }
 0x5b9   : > { %v4446_v31 = vpop.f32.mrf.mxu0  ;;  %v4681_v49 = vld [vmem:[#allocation3 + $0x121] sm:$0xff]  ;;  %v9512_v57 = vpack.c.bf16 %v4996_v50, %v4995_v59 }
 0x5ba   : > { %4587 = vst.msk [vmem:[#allocation3 + $0x129] sm:$0xff] %vm2672_vm7, %v4554_v24  ;;  %v4268_v10 = vadd.f32 %v4224_v6, %v4048_v55  ;;  %v9500_v63 = vpop.f32.mrf.mxu1  ;;  %v10379_v55 = vld [vmem:[#allocation20_spill] sm:$0xff]  ;;  %v10380_v6 = vld [vmem:[#allocation19_spill] sm:$0xff] }
 0x5bc   : > { %v4488_v43 = vadd.f32 %v4444_v29, %v4268_v10 }
 0x5be   : > { %v4523_v18 = vadd.f32 %v9299_v27, %v4488_v43 }
 0x5bf   : > { %v4006_v41 = vpop.f32.mrf.mxu2 }
 0x5c0   : > { %v4555_v58 = vmax.f32 %v4523_v18, 0.0  ;;  %v4049_v35 = vadd.f32 %v4006_v41, %v3828_v9  ;;  %v4226_v45 = vpop.f32.mrf.mxu3  ;;  %v4997_v41 = vld [vmem:[#allocation3 + $0x92] sm:$0xff] }
 0x5c1   : > { %v4449_v34 = vpop.f32.mrf.mxu0  ;;  %v4682_v3 = vld [vmem:[#allocation3 + $0x129] sm:$0xff] }
 0x5c2   : > { %4588 = vst.msk [vmem:[#allocation3 + $0x139] sm:$0xff] %vm2672_vm7, %v4555_v58  ;;  %v4269_v26 = vadd.f32 %v4226_v45, %v4049_v35  ;;  %v9506_v56 = vpop.f32.mrf.mxu1  ;;  %v9508_v1 = vpack.c.bf16 %v4682_v3, %v4681_v49  ;;  %v5217_v45 = vld [vmem:[#allocation3 + $0xa8] sm:$0xff] }
 0x5c3   : > { %v9535_v49 = vpack.c.bf16 %v5218_v22, %v5217_v45 }
 0x5c4   : > { %v4489_v25 = vadd.f32 %v4446_v31, %v4269_v26  ;;  %7381 = vmatmul.msk.bf16.gmra.mxu2 %vm2672_vm7, %v9485_v44  ;;  %7413 = vmatmul.msk.bf16.gmra.mxu0 %vm2672_vm7, %v9510_v47  ;;  %v3830_v31 = vadd.f32 %v10380_v6, %v10379_v55 }
 0x5c5   : > { %7372 = vmatmul.msk.bf16.gmra.mxu1 %vm2672_vm7, %v9508_v1  ;;  %7397 = vmatmul.msk.bf16.gmra.mxu3 %vm2672_vm7, %v9512_v57  ;;  %10382 = vst [vmem:[#allocation24_spill] sm:$0xff] %v9535_v49 }
 0x5c6   : > { %v4524_v29 = vadd.f32 %v9299_v27, %v4489_v25 }
 0x5c7   : > { %v4009_v37 = vpop.f32.mrf.mxu2 }
 0x5c8   : > { %v4556_v5 = vmax.f32 %v4524_v29, 0.0  ;;  %v4050_v17 = vadd.f32 %v4009_v37, %v9257_v11  ;;  %v4229_v30 = vpop.f32.mrf.mxu3  ;;  %v4998_v11 = vld [vmem:[#allocation3 + $0x9a] sm:$0xff] }
 0x5c9   : > { %v4451_v61 = vpop.f32.mrf.mxu0  ;;  %v4683_v58 = vld [vmem:[#allocation3 + $0x139] sm:$0xff]  ;;  %v9537_v3 = vpack.c.bf16 %v4998_v11, %v4997_v41 }
 0x5ca   : > { %4589 = vst.msk [vmem:[#allocation3 + $0x141] sm:$0xff] %vm2672_vm7, %v4556_v5  ;;  %v4270_v32 = vadd.f32 %v4229_v30, %v4050_v17  ;;  %v9525_v23 = vpop.f32.mrf.mxu1 }
 0x5cc   : > { %v4490_v24 = vadd.f32 %v4449_v34, %v4270_v32  ;;  %v4603_v32 = vld [vmem:[%s9030_s23 + $0x14] sm:$0xf] }
 0x5cd   : > { %v5742_v55 = vsel %vm2721_vm3, %v4603_v32, 0 }
 0x5ce   : > { %v4525_v10 = vadd.f32 %v9299_v27, %v4490_v24  ;;  %v4604_v24 = vld [vmem:[%s9030_s23 + $0x18] sm:$0xf]  ;;  %5751 = vmatpush.bf16.msra.mxu2 %v5742_v55  ;;  %v4606_v55 = vld [vmem:[%s9030_s23 + $0x20] sm:$0xf] }
 0x5cf   : > { %v4011_v43 = vpop.f32.mrf.mxu2  ;;  %v5963_v6 = vsel %vm2721_vm3, %v4604_v24, 0 }
 0x5d0   : > { %v4557_v28 = vmax.f32 %v4525_v10, 0.0  ;;  %v4051_v9 = vadd.f32 %v4011_v43, %v3830_v31  ;;  %v4231_v18 = vpop.f32.mrf.mxu3  ;;  %5972 = vmatpush.bf16.msra.mxu3 %v5963_v6  ;;  %v10383_v10 = vld [vmem:[#allocation21_spill] sm:$0xff]  ;;  %v10384_v43 = vld [vmem:[#allocation23_spill] sm:$0xff] }
 0x5d1   : > { %v4454_v38 = vpop.f32.mrf.mxu0  ;;  %v4684_v35 = vld [vmem:[#allocation3 + $0x141] sm:$0xff]  ;;  %v3832_v22 = vadd.f32 %v10384_v43, %v10383_v10 }
 0x5d2   : > { %4590 = vst.msk [vmem:[#allocation3 + $0x151] sm:$0xff] %vm2672_vm7, %v4557_v28  ;;  %v4271_v59 = vadd.f32 %v4231_v18, %v4051_v9  ;;  %v9531_v50 = vpop.f32.mrf.mxu1  ;;  %v9533_v34 = vpack.c.bf16 %v4684_v35, %v4683_v58  ;;  %v5220_v9 = vld [vmem:[#allocation3 + $0xc8] sm:$0xff]  ;;  %v5000_v35 = vld [vmem:[#allocation3 + $0xb2] sm:$0xff] }
 0x5d3   : > { %v4999_v58 = vld [vmem:[#allocation3 + $0xaa] sm:$0xff] }
 0x5d4   : > { %10381 = vst [vmem:[#allocation22_spill] sm:$0xff] %v9533_v34  ;;  %v4491_v36 = vadd.f32 %v4451_v61, %v4271_v59  ;;  %7382 = vmatmul.msk.bf16.gmra.mxu2 %vm2672_vm7, %v9510_v47  ;;  %7414 = vmatmul.msk.bf16.gmra.mxu0 %vm2672_vm7, %v9535_v49 }
 0x5d5   : > { %7373 = vmatmul.msk.bf16.gmra.mxu1 %vm2672_vm7, %v9533_v34  ;;  %7398 = vmatmul.msk.bf16.gmra.mxu3 %vm2672_vm7, %v9537_v3 }
 0x5d6   : > { %v4526_v26 = vadd.f32 %v9299_v27, %v4491_v36 }
 0x5d7   : > { %v4014_v25 = vpop.f32.mrf.mxu2 }
 0x5d8   : > { %v4558_v29 = vmax.f32 %v4526_v26, 0.0  ;;  %v4052_v37 = vadd.f32 %v4014_v25, %v9268_v7  ;;  %v4234_v5 = vpop.f32.mrf.mxu3 }
 0x5d9   : > { %v4456_v17 = vpop.f32.mrf.mxu0  ;;  %v4685_v59 = vld [vmem:[#allocation3 + $0x151] sm:$0xff] }
 0x5da   : > { %4591 = vst.msk [vmem:[#allocation3 + $0x159] sm:$0xff] %vm2672_vm7, %v4558_v29  ;;  %v4272_v30 = vadd.f32 %v4234_v5, %v4052_v37  ;;  %v9550_v61 = vpop.f32.mrf.mxu1  ;;  %v4605_v5 = vld [vmem:[%s9030_s23 + $0x1c] sm:$0xf] }
 0x5db   : > { %v6183_v32 = vsel %vm2721_vm3, %v4605_v5, 0 }
 0x5dc   : > { %v4492_v31 = vadd.f32 %v4454_v38, %v4272_v30  ;;  %v5219_v38 = vld [vmem:[#allocation3 + $0xc0] sm:$0xff]  ;;  %v9567_v30 = vpack.c.bf16 %v5000_v35, %v4999_v58  ;;  %6192 = vmatpush.bf16.msra.mxu0 %v6183_v32 }
 0x5dd   : > { %v9564_v37 = vpack.c.bf16 %v5220_v9, %v5219_v38  ;;  %v5222_v35 = vld [vmem:[#allocation3 + $0xe0] sm:$0xff] }
 0x5de   : > { %v4527_v7 = vadd.f32 %v9299_v27, %v4492_v31  ;;  %10387 = vst [vmem:[#allocation28_spill] sm:$0xff] %v9567_v30  ;;  %v6403_v31 = vsel %vm2721_vm3, %v4606_v55, 0  ;;  %v5221_v55 = vld [vmem:[#allocation3 + $0xd8] sm:$0xff] }
 0x5df   : > { %v4016_v28 = vpop.f32.mrf.mxu2  ;;  %10386 = vst [vmem:[#allocation26_spill] sm:$0xff] %v9564_v37  ;;  %6412 = vmatpush.bf16.msra.mxu1 %v6403_v31 }
 0x5e0   : > { %v4559_v18 = vmax.f32 %v4527_v7, 0.0  ;;  %v4053_v41 = vadd.f32 %v4016_v28, %v3832_v22  ;;  %v4236_v11 = vpop.f32.mrf.mxu3 }
 0x5e1   : > { %v4459_v45 = vpop.f32.mrf.mxu0  ;;  %v4686_v36 = vld [vmem:[#allocation3 + $0x159] sm:$0xff] }
 0x5e2   : > { %4592 = vst.msk [vmem:[#allocation3 + $0x169] sm:$0xff] %vm2672_vm7, %v4559_v18  ;;  %v4273_v26 = vadd.f32 %v4236_v11, %v4053_v41  ;;  %v9560_v25 = vpop.f32.mrf.mxu1  ;;  %v9562_v29 = vpack.c.bf16 %v4686_v36, %v4685_v59  ;;  %v3834_v41 = vadd.f32 %v9399_v21, %v9294_v2 }
 0x5e4   : > { %10385 = vst [vmem:[#allocation25_spill] sm:$0xff] %v9562_v29  ;;  %v4493_v24 = vadd.f32 %v4456_v17, %v4273_v26  ;;  %7383 = vmatmul.msk.bf16.gmra.mxu2 %vm2672_vm7, %v9535_v49  ;;  %7415 = vmatmul.msk.bf16.gmra.mxu0 %vm2672_vm7, %v9564_v37  ;;  %v5001_v26 = vld [vmem:[#allocation3 + $0xc2] sm:$0xff] }
 0x5e5   : > { %7374 = vmatmul.msk.bf16.gmra.mxu1 %vm2672_vm7, %v9562_v29  ;;  %7399 = vmatmul.msk.bf16.gmra.mxu3 %vm2672_vm7, %v9567_v30 }
 0x5e6   : > { %v4528_v6 = vadd.f32 %v9299_v27, %v4493_v24 }
 0x5e7   : > { %v4019_v10 = vpop.f32.mrf.mxu2 }
 0x5e8   : > { %v4560_v17 = vmax.f32 %v4528_v6, 0.0  ;;  %v4054_v43 = vadd.f32 %v4019_v10, %v9288_v46  ;;  %v4239_v22 = vpop.f32.mrf.mxu3  ;;  %v5002_v46 = vld [vmem:[#allocation3 + $0xca] sm:$0xff] }
 0x5e9   : > { %v4461_v7 = vpop.f32.mrf.mxu0  ;;  %v4687_v32 = vld [vmem:[#allocation3 + $0x169] sm:$0xff]  ;;  %v9595_v21 = vpack.c.bf16 %v5002_v46, %v5001_v26  ;;  %v5003_v26 = vld [vmem:[#allocation3 + $0xda] sm:$0xff] }
 0x5ea   : > { %4593 = vst.msk [vmem:[#allocation3 + $0x171] sm:$0xff] %vm2672_vm7, %v4560_v17  ;;  %v4274_v28 = vadd.f32 %v4239_v22, %v4054_v43  ;;  %v9583_v9 = vpop.f32.mrf.mxu1  ;;  %v7571_v10 = vld [vmem:[%s8749_s13] ss:$0 sm:$0xff]  ;;  %v5004_v46 = vld [vmem:[#allocation3 + $0xe2] sm:$0xff] }
 0x5eb   : > { %10390 = vst [vmem:[#allocation19_spill] sm:$0xff] %v9595_v21 }
 0x5ec   : > { %v4494_v18 = vadd.f32 %v4459_v45, %v4274_v28 }
 0x5ee   : > { %v4529_v11 = vadd.f32 %v9299_v27, %v4494_v18  ;;  %v9593_v27 = vpack.c.bf16 %v5222_v35, %v5221_v55  ;;  %v5223_v55 = vld [vmem:[#allocation3 + $0xf0] sm:$0xff] }
 0x5ef   : > { %v4021_v58 = vpop.f32.mrf.mxu2 }
 0x5f0   : > { %v4561_v59 = vmax.f32 %v4529_v11, 0.0  ;;  %v4055_v36 = vadd.f32 %v4021_v58, %v3834_v41  ;;  %v4241_v38 = vpop.f32.mrf.mxu3  ;;  %10389 = vst [vmem:[#allocation20_spill] sm:$0xff] %v9593_v27 }
 0x5f1   : > { %v5313_v5 = vpop.f32.mrf.mxu0  ;;  %v4688_v24 = vld [vmem:[#allocation3 + $0x171] sm:$0xff] }
 0x5f2   : > { %4594 = vst.msk [vmem:[#allocation3 + $0x181] sm:$0xff] %vm2672_vm7, %v4561_v59  ;;  %v4275_v45 = vadd.f32 %v4241_v38, %v4055_v36  ;;  %v9589_v6 = vpop.f32.mrf.mxu1  ;;  %v9591_v2 = vpack.c.bf16 %v4688_v24, %v4687_v32  ;;  %v5224_v59 = vld [vmem:[#allocation3 + $0xf8] sm:$0xff]  ;;  %v5426_v32 = vld [vmem:[#allocation3 + $0x21] sm:$0xff] }
 0x5f4   : > { %10388 = vst [vmem:[#allocation27_spill] sm:$0xff] %v9591_v2  ;;  %v4495_v31 = vadd.f32 %v4461_v7, %v4275_v45  ;;  %7384 = vmatmul.msk.bf16.gmra.mxu2 %vm2672_vm7, %v9564_v37  ;;  %7416 = vmatmul.msk.bf16.gmra.mxu0 %vm2672_vm7, %v9593_v27  ;;  %v5229_v37 = vld [vmem:[#allocation3 + $0x138] sm:$0xff] }
 0x5f5   : > { %7375 = vmatmul.msk.bf16.gmra.mxu1 %vm2672_vm7, %v9591_v2  ;;  %7400 = vmatmul.msk.bf16.gmra.mxu3 %vm2672_vm7, %v9595_v21 }
 0x5f6   : > { %v4530_v17 = vadd.f32 %v7571_v10, %v4495_v31  ;;  %v9615_v31 = vpack.c.bf16 %v5224_v59, %v5223_v55  ;;  %v5425_v10 = vld [vmem:[#allocation3 + $0x19] sm:$0xff] }
 0x5f7   : > { %v4905_v43 = vpop.f32.mrf.mxu2  ;;  %v5428_v55 = vld [vmem:[#allocation3 + $0x39] sm:$0xff] }
 0x5f8   : > { %v4562_v22 = vmax.f32 %v4530_v17, 0.0  ;;  %v4906_v28 = vadd.f32 %v4905_v43, %v9406_v14  ;;  %v5093_v18 = vpop.f32.mrf.mxu3  ;;  %10391 = vst [vmem:[#allocation21_spill] sm:$0xff] %v9615_v31  ;;  %v9617_v17 = vpack.c.bf16 %v5004_v46, %v5003_v26  ;;  %v5005_v46 = vld [vmem:[#allocation3 + $0xf2] sm:$0xff] }
 0x5f9   : > { %v5315_v7 = vpop.f32.mrf.mxu0 }
 0x5fa   : > { %4595 = vst.msk [vmem:[#allocation3 + $0x189] sm:$0xff] %vm2672_vm7, %v4562_v22  ;;  %v5173_v41 = vadd.f32 %v5093_v18, %v4906_v28  ;;  %v9608_v11 = vpop.f32.mrf.mxu1 }
 0x5fb   : > { %10392 = vst [vmem:[#allocation23_spill] sm:$0xff] %v9617_v17 }
 0x5fc   : > { %v9610_v58 = vadd.f32 %v5313_v5, %v5173_v41  ;;  %v5457_v5 = vpack.c.bf16 %v5426_v32, %v5425_v10  ;;  %v5006_v32 = vld [vmem:[#allocation3 + $0xfa] sm:$0xff]  ;;  %v5225_v10 = vld [vmem:[#allocation3 + $0x108] sm:$0xff] }
 0x5ff   : > { %v4907_v35 = vpop.f32.mrf.mxu2 }
 0x600   : > { %v4908_v36 = vadd.f32 %v4907_v35, %v9425_v42  ;;  %v5095_v38 = vpop.f32.mrf.mxu3 }
 0x601   : > { %v5318_v24 = vpop.f32.mrf.mxu0 }
 0x602   : > { %v5174_v14 = vadd.f32 %v5095_v38, %v4908_v36  ;;  %v9613_v45 = vpop.f32.mrf.mxu1  ;;  %v5226_v38 = vld [vmem:[#allocation3 + $0x110] sm:$0xff] }
 0x604   : > { %7385 = vmatmul.msk.bf16.gmra.mxu2 %vm2672_vm7, %v9593_v27  ;;  %7417 = vmatmul.msk.bf16.gmra.mxu0 %vm2672_vm7, %v9615_v31  ;;  %v9623_v42 = vadd.f32 %v5315_v7, %v5174_v14  ;;  %v5227_v27 = vld [vmem:[#allocation3 + $0x120] sm:$0xff] }
 0x605   : > { %7401 = vmatmul.msk.bf16.gmra.mxu3 %vm2672_vm7, %v9617_v17  ;;  %7424 = vmatmul.msk.bf16.vlgmr.msrb.gmra.mxu1 %vm2672_vm7, %v5457_v5 }
 0x607   : > { %v4910_v43 = vpop.f32.mrf.mxu2 }
 0x608   : > { %v4911_v22 = vadd.f32 %v4910_v43, %v9431_v52  ;;  %v5098_v28 = vpop.f32.mrf.mxu3  ;;  %v9636_v52 = vpack.c.bf16 %v5226_v38, %v5225_v10  ;;  %v5427_v43 = vld [vmem:[#allocation3 + $0x31] sm:$0xff] }
 0x609   : > { %v5320_v18 = vpop.f32.mrf.mxu0 }
 0x60a   : > { %v5175_v41 = vadd.f32 %v5098_v28, %v4911_v22  ;;  %v9629_v35 = vpop.f32.mrf.mxu1  ;;  %10393 = vst [vmem:[#allocation29_spill] sm:$0xff] %v9636_v52  ;;  %v9638_v22 = vpack.c.bf16 %v5006_v32, %v5005_v46 }
 0x60c   : > { %v9631_v59 = vadd.f32 %v5318_v24, %v5175_v41  ;;  %10394 = vst [vmem:[#allocation30_spill] sm:$0xff] %v9638_v22  ;;  %v9640_v24 = vpack.c.bf16 %v5428_v55, %v5427_v43  ;;  %v5228_v55 = vld [vmem:[#allocation3 + $0x128] sm:$0xff]  ;;  %v5008_v43 = vld [vmem:[#allocation3 + $0x112] sm:$0xff] }
 0x60f   : > { %v4912_v36 = vpop.f32.mrf.mxu2 }
 0x610   : > { %v4913_v7 = vadd.f32 %v4912_v36, %v9450_v39  ;;  %v5100_v26 = vpop.f32.mrf.mxu3 }
 0x611   : > { %v5323_v14 = vpop.f32.mrf.mxu0 }
 0x612   : > { %v5176_v5 = vadd.f32 %v5100_v26, %v4913_v7  ;;  %v9634_v17 = vpop.f32.mrf.mxu1 }
 0x614   : > { %7386 = vmatmul.msk.bf16.gmra.mxu2 %vm2672_vm7, %v9615_v31  ;;  %7418 = vmatmul.msk.bf16.gmra.mxu0 %vm2672_vm7, %v9636_v52  ;;  %v9646_v39 = vadd.f32 %v5320_v18, %v5176_v5  ;;  %v5007_v5 = vld [vmem:[#allocation3 + $0x10a] sm:$0xff] }
 0x615   : > { %7402 = vmatmul.msk.bf16.gmra.mxu3 %vm2672_vm7, %v9638_v22  ;;  %7425 = vmatmul.msk.bf16.gmra.mxu1 %vm2672_vm7, %v9640_v24  ;;  %v5430_v22 = vld [vmem:[#allocation3 + $0x51] sm:$0xff] }
 0x617   : > { %v4915_v28 = vpop.f32.mrf.mxu2 }
 0x618   : > { %v4916_v41 = vadd.f32 %v4915_v28, %v9456_v0  ;;  %v5103_v36 = vpop.f32.mrf.mxu3  ;;  %v9660_v0 = vpack.c.bf16 %v5228_v55, %v5227_v27  ;;  %v5429_v28 = vld [vmem:[#allocation3 + $0x49] sm:$0xff] }
 0x619   : > { %v5325_v38 = vpop.f32.mrf.mxu0 }
 0x61a   : > { %v5177_v7 = vadd.f32 %v5103_v36, %v4916_v41  ;;  %v9653_v26 = vpop.f32.mrf.mxu1  ;;  %10395 = vst [vmem:[#allocation31_spill] sm:$0xff] %v9660_v0  ;;  %v9662_v41 = vpack.c.bf16 %v5008_v43, %v5007_v5  ;;  %v5230_v5 = vld [vmem:[#allocation3 + $0x140] sm:$0xff] }
 0x61b   : > { %v5009_v43 = vld [vmem:[#allocation3 + $0x122] sm:$0xff] }
 0x61c   : > { %v9655_v46 = vadd.f32 %v5323_v14, %v5177_v7  ;;  %10396 = vst [vmem:[#allocation32_spill] sm:$0xff] %v9662_v41  ;;  %v9664_v14 = vpack.c.bf16 %v5430_v22, %v5429_v28  ;;  %v5010_v28 = vld [vmem:[#allocation3 + $0x12a] sm:$0xff] }
 0x61f   : > { %v4917_v32 = vpop.f32.mrf.mxu2 }
 0x620   : > { %v4918_v18 = vadd.f32 %v4917_v32, %v9475_v48  ;;  %v5105_v10 = vpop.f32.mrf.mxu3 }
 0x621   : > { %v5328_v31 = vpop.f32.mrf.mxu0 }
 0x622   : > { %v5178_v2 = vadd.f32 %v5105_v10, %v4918_v18  ;;  %v9658_v21 = vpop.f32.mrf.mxu1 }
 0x624   : > { %7387 = vmatmul.msk.bf16.gmra.mxu2 %vm2672_vm7, %v9636_v52  ;;  %7419 = vmatmul.msk.bf16.gmra.mxu0 %vm2672_vm7, %v9660_v0  ;;  %v9670_v48 = vadd.f32 %v5325_v38, %v5178_v2 }
 0x625   : > { %7403 = vmatmul.msk.bf16.gmra.mxu3 %vm2672_vm7, %v9662_v41  ;;  %7426 = vmatmul.msk.bf16.gmra.mxu1 %vm2672_vm7, %v9664_v14  ;;  %v5432_v41 = vld [vmem:[#allocation3 + $0x69] sm:$0xff] }
 0x627   : > { %v4920_v27 = vpop.f32.mrf.mxu2 }
 0x628   : > { %v4921_v36 = vadd.f32 %v4920_v27, %v9481_v13  ;;  %v5108_v7 = vpop.f32.mrf.mxu3  ;;  %v9684_v13 = vpack.c.bf16 %v5230_v5, %v5229_v37  ;;  %v5431_v27 = vld [vmem:[#allocation3 + $0x61] sm:$0xff] }
 0x629   : > { %v5330_v22 = vpop.f32.mrf.mxu0 }
 0x62a   : > { %v5179_v32 = vadd.f32 %v5108_v7, %v4921_v36  ;;  %v9677_v55 = vpop.f32.mrf.mxu1  ;;  %10397 = vst [vmem:[#allocation33_spill] sm:$0xff] %v9684_v13  ;;  %v9686_v36 = vpack.c.bf16 %v5010_v28, %v5009_v43  ;;  %v5232_v43 = vld [vmem:[#allocation3 + $0x158] sm:$0xff] }
 0x62b   : > { %v5011_v28 = vld [vmem:[#allocation3 + $0x13a] sm:$0xff] }
 0x62c   : > { %v9679_v18 = vadd.f32 %v5328_v31, %v5179_v32  ;;  %10398 = vst [vmem:[#allocation34_spill] sm:$0xff] %v9686_v36  ;;  %v9688_v31 = vpack.c.bf16 %v5432_v41, %v5431_v27  ;;  %v5012_v27 = vld [vmem:[#allocation3 + $0x142] sm:$0xff] }
 0x62f   : > { %v4922_v10 = vpop.f32.mrf.mxu2 }
 0x630   : > { %v4923_v2 = vadd.f32 %v4922_v10, %v9500_v63  ;;  %v5110_v38 = vpop.f32.mrf.mxu3 }
 0x631   : > { %v5333_v52 = vpop.f32.mrf.mxu0 }
 0x632   : > { %v5180_v29 = vadd.f32 %v5110_v38, %v4923_v2  ;;  %v9682_v30 = vpop.f32.mrf.mxu1 }
 0x634   : > { %7388 = vmatmul.msk.bf16.gmra.mxu2 %vm2672_vm7, %v9660_v0  ;;  %7420 = vmatmul.msk.bf16.gmra.mxu0 %vm2672_vm7, %v9684_v13  ;;  %v9694_v63 = vadd.f32 %v5330_v22, %v5180_v29  ;;  %v5231_v0 = vld [vmem:[#allocation3 + $0x150] sm:$0xff] }
 0x635   : > { %7404 = vmatmul.msk.bf16.gmra.mxu3 %vm2672_vm7, %v9686_v36  ;;  %7427 = vmatmul.msk.bf16.gmra.mxu1 %vm2672_vm7, %v9688_v31 }
 0x637   : > { %v4925_v37 = vpop.f32.mrf.mxu2 }
 0x638   : > { %v4926_v7 = vadd.f32 %v4925_v37, %v9506_v56  ;;  %v5113_v32 = vpop.f32.mrf.mxu3  ;;  %v9708_v56 = vpack.c.bf16 %v5232_v43, %v5231_v0  ;;  %v9710_v37 = vpack.c.bf16 %v5012_v27, %v5011_v28  ;;  %v5013_v28 = vld [vmem:[#allocation3 + $0x152] sm:$0xff]  ;;  %v5014_v27 = vld [vmem:[#allocation3 + $0x15a] sm:$0xff] }
 0x639   : > { %v5335_v41 = vpop.f32.mrf.mxu0 }
 0x63a   : > { %v5181_v10 = vadd.f32 %v5113_v32, %v4926_v7  ;;  %v9701_v5 = vpop.f32.mrf.mxu1  ;;  %10399 = vst [vmem:[#allocation35_spill] sm:$0xff] %v9708_v56 }
 0x63b   : > { %10400 = vst [vmem:[#allocation36_spill] sm:$0xff] %v9710_v37 }
 0x63c   : > { %v9703_v2 = vadd.f32 %v5333_v52, %v5181_v10 }
 0x63f   : > { %v4927_v38 = vpop.f32.mrf.mxu2 }
 0x640   : > { %v4928_v29 = vadd.f32 %v4927_v38, %v9525_v23  ;;  %v5115_v22 = vpop.f32.mrf.mxu3 }
 0x641   : > { %v5338_v36 = vpop.f32.mrf.mxu0 }
 0x642   : > { %v5182_v49 = vadd.f32 %v5115_v22, %v4928_v29  ;;  %v9706_v34 = vpop.f32.mrf.mxu1  ;;  %v5234_v22 = vld [vmem:[#allocation3 + $0x170] sm:$0xff] }
 0x644   : > { %7389 = vmatmul.msk.bf16.gmra.mxu2 %vm2672_vm7, %v9684_v13  ;;  %7421 = vmatmul.msk.bf16.gmra.mxu0 %vm2672_vm7, %v9708_v56  ;;  %v9716_v52 = vadd.f32 %v5335_v41, %v5182_v49  ;;  %v5233_v13 = vld [vmem:[#allocation3 + $0x168] sm:$0xff] }
 0x645   : > { %7405 = vmatmul.msk.bf16.gmra.mxu3 %vm2672_vm7, %v9710_v37  ;;  %7428 = vmatmul.msk.bf16.gmra.mxu1 %vm2672_vm7, %v9360_v53 }
 0x646   : > { %10401 = vst [vmem:[#allocation37_spill] sm:$0xff] %v9716_v52 }
 0x647   : > { %v4930_v23 = vpop.f32.mrf.mxu2 }
 0x648   : > { %v4931_v0 = vadd.f32 %v4930_v23, %v9531_v50  ;;  %v5118_v7 = vpop.f32.mrf.mxu3  ;;  %v9730_v50 = vpack.c.bf16 %v5234_v22, %v5233_v13  ;;  %v9732_v23 = vpack.c.bf16 %v5014_v27, %v5013_v28  ;;  %v5015_v27 = vld [vmem:[#allocation3 + $0x16a] sm:$0xff] }
 0x649   : > { %v5340_v32 = vpop.f32.mrf.mxu0 }
 0x64a   : > { %v5183_v10 = vadd.f32 %v5118_v7, %v4931_v0  ;;  %v9723_v38 = vpop.f32.mrf.mxu1  ;;  %10402 = vst [vmem:[#allocation38_spill] sm:$0xff] %v9732_v23 }
 0x64c   : > { %v9725_v43 = vadd.f32 %v5338_v36, %v5183_v10 }
 0x64f   : > { %v4932_v29 = vpop.f32.mrf.mxu2 }
 0x650   : > { %v4933_v49 = vadd.f32 %v4932_v29, %v9550_v61  ;;  %v5120_v41 = vpop.f32.mrf.mxu3 }
 0x651   : > { %v5343_v37 = vpop.f32.mrf.mxu0 }
 0x652   : > { %v5184_v53 = vadd.f32 %v5120_v41, %v4933_v49  ;;  %v9728_v52 = vpop.f32.mrf.mxu1  ;;  %v5236_v41 = vld [vmem:[#allocation3 + $0x188] sm:$0xff] }
 0x654   : > { %7390 = vmatmul.msk.bf16.gmra.mxu2 %vm2672_vm7, %v9708_v56  ;;  %7422 = vmatmul.msk.bf16.gmra.mxu0 %vm2672_vm7, %v9730_v50  ;;  %v9738_v36 = vadd.f32 %v5340_v32, %v5184_v53  ;;  %v5016_v53 = vld [vmem:[#allocation3 + $0x172] sm:$0xff]  ;;  %v5235_v56 = vld [vmem:[#allocation3 + $0x180] sm:$0xff] }
 0x655   : > { %7406 = vmatmul.msk.bf16.gmra.mxu3 %vm2672_vm7, %v9732_v23  ;;  %7429 = vmatmul.msk.bf16.gmra.mxu1 %vm2672_vm7, %v9377_v12 }
 0x656   : > { %10403 = vst [vmem:[#allocation39_spill] sm:$0xff] %v9738_v36 }
 0x657   : > { %v4935_v61 = vpop.f32.mrf.mxu2 }
 0x658   : > { %v4936_v13 = vadd.f32 %v4935_v61, %v9560_v25  ;;  %v5123_v0 = vpop.f32.mrf.mxu3  ;;  %v9752_v25 = vpack.c.bf16 %v5236_v41, %v5235_v56  ;;  %v9754_v61 = vpack.c.bf16 %v5016_v53, %v5015_v27 }
 0x659   : > { %v5345_v7 = vpop.f32.mrf.mxu0 }
 0x65a   : > { %v5185_v10 = vadd.f32 %v5123_v0, %v4936_v13  ;;  %v9745_v29 = vpop.f32.mrf.mxu1 }
 0x65c   : > { %v9747_v22 = vadd.f32 %v5343_v37, %v5185_v10 }
 0x65f   : > { %v4937_v49 = vpop.f32.mrf.mxu2 }
 0x660   : > { %v4938_v32 = vadd.f32 %v4937_v49, %v9583_v9  ;;  %v5125_v28 = vpop.f32.mrf.mxu3 }
 0x661   : > { %v5348_v23 = vpop.f32.mrf.mxu0 }
 0x662   : > { %v5186_v12 = vadd.f32 %v5125_v28, %v4938_v32  ;;  %v9750_v36 = vpop.f32.mrf.mxu1 }
 0x664   : > { %7391 = vmatmul.msk.bf16.gmra.mxu2 %vm2672_vm7, %v9730_v50  ;;  %7423 = vmatmul.msk.bf16.gmra.mxu0 %vm2672_vm7, %v9752_v25  ;;  %v9760_v37 = vadd.f32 %v5345_v7, %v5186_v12 }
 0x665   : > { %7407 = vmatmul.msk.bf16.gmra.mxu3 %vm2672_vm7, %v9754_v61  ;;  %7430 = vmatmul.msk.bf16.gmra.mxu1 %vm2672_vm7, %v9391_v16 }
 0x667   : > { %v4940_v9 = vpop.f32.mrf.mxu2 }
 0x668   : > { %v4941_v56 = vadd.f32 %v4940_v9, %v9589_v6  ;;  %v5128_v13 = vpop.f32.mrf.mxu3 }
 0x669   : > { %v5350_v0 = vpop.f32.mrf.mxu0 }
 0x66a   : > { %v5187_v10 = vadd.f32 %v5128_v13, %v4941_v56  ;;  %v9767_v49 = vpop.f32.mrf.mxu1 }
 0x66c   : > { %v9769_v41 = vadd.f32 %v5348_v23, %v5187_v10 }
 0x66f   : > { %v4942_v32 = vpop.f32.mrf.mxu2 }
 0x670   : > { %v4943_v7 = vadd.f32 %v4942_v32, %v9608_v11  ;;  %v5130_v28 = vpop.f32.mrf.mxu3 }
 0x671   : > { %v5353_v27 = vpop.f32.mrf.mxu0 }
 0x672   : > { %v5188_v53 = vadd.f32 %v5130_v28, %v4943_v7  ;;  %v9772_v12 = vpop.f32.mrf.mxu1 }
 0x674   : > { %7440 = vmatmul.msk.bf16.vlgmr.msra.gmra.mxu2 %vm2672_vm7, %v9413_v15  ;;  %7472 = vmatmul.msk.bf16.vlgmr.msra.gmra.mxu0 %vm2672_vm7, %v9640_v24  ;;  %v9778_v16 = vadd.f32 %v5350_v0, %v5188_v53 }
 0x675   : > { %7431 = vmatmul.msk.bf16.gmra.mxu1 %vm2672_vm7, %v9409_v40  ;;  %7456 = vmatmul.msk.bf16.vlgmr.msra.gmra.mxu3 %vm2672_vm7, %v9411_v60 }
 0x677   : > { %v4945_v6 = vpop.f32.mrf.mxu2 }
 0x678   : > { %v4946_v11 = vadd.f32 %v4945_v6, %v9613_v45  ;;  %v5133_v23 = vpop.f32.mrf.mxu3 }
 0x679   : > { %v5355_v9 = vpop.f32.mrf.mxu0 }
 0x67a   : > { %v5189_v56 = vadd.f32 %v5133_v23, %v4946_v11  ;;  %v9785_v13 = vpop.f32.mrf.mxu1 }
 0x67c   : > { %v9787_v15 = vadd.f32 %v5353_v27, %v5189_v56 }
 0x67f   : > { %v4947_v10 = vpop.f32.mrf.mxu2 }
 0x680   : > { %v4948_v24 = vadd.f32 %v4947_v10, %v9629_v35  ;;  %v5135_v0 = vpop.f32.mrf.mxu3 }
 0x681   : > { %v5358_v32 = vpop.f32.mrf.mxu0 }
 0x682   : > { %v5190_v7 = vadd.f32 %v5135_v0, %v4948_v24  ;;  %v5533_v40 = vpop.f32.mrf.mxu1 }
 0x683   : > { %v9791_v28 = vadd.f32 %v5533_v40, %v9610_v58  ;;  %v6093_v40 = vld [vmem:[#allocation3 + $0x81] sm:$0xff] }
 0x684   : > { %7441 = vmatmul.msk.bf16.gmra.mxu2 %vm2672_vm7, %v9437_v54  ;;  %7473 = vmatmul.msk.bf16.gmra.mxu0 %vm2672_vm7, %v9664_v14  ;;  %v9797_v60 = vadd.f32 %v5355_v9, %v5190_v7 }
 0x685   : > { %7432 = vmatmul.msk.bf16.gmra.mxu1 %vm2672_vm7, %v9433_v8  ;;  %7457 = vmatmul.msk.bf16.gmra.mxu3 %vm2672_vm7, %v9435_v33 }
 0x687   : > { %v4950_v45 = vpop.f32.mrf.mxu2 }
 0x688   : > { %v4951_v35 = vadd.f32 %v4950_v45, %v9634_v17  ;;  %v5138_v27 = vpop.f32.mrf.mxu3 }
 0x689   : > { %v5360_v58 = vpop.f32.mrf.mxu0 }
 0x68a   : > { %v5191_v53 = vadd.f32 %v5138_v27, %v4951_v35  ;;  %v5535_v6 = vpop.f32.mrf.mxu1  ;;  %v6092_v27 = vld [vmem:[#allocation3 + $0x79] sm:$0xff] }
 0x68b   : > { %v9805_v54 = vadd.f32 %v5535_v6, %v9623_v42 }
 0x68c   : > { %v9807_v11 = vadd.f32 %v5358_v32, %v5191_v53  ;;  %v6121_v53 = vpack.c.bf16 %v6093_v40, %v6092_v27  ;;  %v6097_v27 = vld [vmem:[#allocation3 + $0xb1] sm:$0xff] }
 0x68f   : > { %v4952_v14 = vpop.f32.mrf.mxu2 }
 0x690   : > { %v4953_v23 = vadd.f32 %v4952_v14, %v9653_v26  ;;  %v5140_v9 = vpop.f32.mrf.mxu3 }
 0x691   : > { %v5363_v8 = vpop.f32.mrf.mxu0 }
 0x692   : > { %v5192_v56 = vadd.f32 %v5140_v9, %v4953_v23  ;;  %v5538_v10 = vpop.f32.mrf.mxu1 }
 0x693   : > { %v9811_v33 = vadd.f32 %v5538_v10, %v9631_v59  ;;  %v6095_v10 = vld [vmem:[#allocation3 + $0x99] sm:$0xff] }
 0x694   : > { %7442 = vmatmul.msk.bf16.gmra.mxu2 %vm2672_vm7, %v9462_v62  ;;  %7474 = vmatmul.msk.bf16.gmra.mxu0 %vm2672_vm7, %v9688_v31  ;;  %v9817_v17 = vadd.f32 %v5360_v58, %v5192_v56 }
 0x695   : > { %7433 = vmatmul.msk.bf16.gmra.mxu1 %vm2672_vm7, %v9458_v20  ;;  %7458 = vmatmul.msk.bf16.gmra.mxu3 %vm2672_vm7, %v9460_v4 }
 0x697   : > { %v4955_v42 = vpop.f32.mrf.mxu2 }
 0x698   : > { %v4956_v26 = vadd.f32 %v4955_v42, %v9658_v21  ;;  %v5143_v24 = vpop.f32.mrf.mxu3 }
 0x699   : > { %v5365_v59 = vpop.f32.mrf.mxu0 }
 0x69a   : > { %v5193_v0 = vadd.f32 %v5143_v24, %v4956_v26  ;;  %v5540_v32 = vpop.f32.mrf.mxu1  ;;  %v6094_v24 = vld [vmem:[#allocation3 + $0x91] sm:$0xff] }
 0x69b   : > { %v9825_v62 = vadd.f32 %v5540_v32, %v9646_v39 }
 0x69c   : > { %v9827_v7 = vadd.f32 %v5363_v8, %v5193_v0  ;;  %v6122_v0 = vpack.c.bf16 %v6095_v10, %v6094_v24  ;;  %v6099_v24 = vld [vmem:[#allocation3 + $0xc9] sm:$0xff] }
 0x69f   : > { %v4957_v31 = vpop.f32.mrf.mxu2 }
 0x6a0   : > { %v4958_v45 = vadd.f32 %v4957_v31, %v9677_v55  ;;  %v5145_v20 = vpop.f32.mrf.mxu3 }
 0x6a1   : > { %v5368_v35 = vpop.f32.mrf.mxu0 }
 0x6a2   : > { %v5194_v4 = vadd.f32 %v5145_v20, %v4958_v45  ;;  %v5543_v58 = vpop.f32.mrf.mxu1 }
 0x6a3   : > { %v9831_v21 = vadd.f32 %v5543_v58, %v9655_v46 }
 0x6a4   : > { %7443 = vmatmul.msk.bf16.gmra.mxu2 %vm2672_vm7, %v9487_v51  ;;  %7475 = vmatmul.msk.bf16.gmra.mxu0 %vm2672_vm7, %v6121_v53  ;;  %v9836_v39 = vadd.f32 %v5365_v59, %v5194_v4  ;;  %v6096_v53 = vld [vmem:[#allocation3 + $0xa9] sm:$0xff] }
 0x6a5   : > { %7434 = vmatmul.msk.bf16.gmra.mxu1 %vm2672_vm7, %v9483_v19  ;;  %7459 = vmatmul.msk.bf16.gmra.mxu3 %vm2672_vm7, %v9485_v44 }
 0x6a7   : > { %v4960_v55 = vpop.f32.mrf.mxu2 }
 0x6a8   : > { %v4961_v6 = vadd.f32 %v4960_v55, %v9682_v30  ;;  %v5148_v14 = vpop.f32.mrf.mxu3 }
 0x6a9   : > { %v5370_v23 = vpop.f32.mrf.mxu0 }
 0x6aa   : > { %v5195_v46 = vadd.f32 %v5148_v14, %v4961_v6  ;;  %v5545_v9 = vpop.f32.mrf.mxu1  ;;  %v6123_v6 = vpack.c.bf16 %v6097_v27, %v6096_v53  ;;  %v10404_v14 = vld [vmem:[#allocation22_spill] sm:$0xff] }
 0x6ab   : > { %v9844_v8 = vadd.f32 %v5545_v9, %v9670_v48 }
 0x6ac   : > { %v9846_v51 = vadd.f32 %v5368_v35, %v5195_v46 }
 0x6af   : > { %v4962_v56 = vpop.f32.mrf.mxu2 }
 0x6b0   : > { %v4963_v42 = vadd.f32 %v4962_v56, %v9701_v5  ;;  %v5150_v19 = vpop.f32.mrf.mxu3 }
 0x6b1   : > { %v5373_v26 = vpop.f32.mrf.mxu0 }
 0x6b2   : > { %v5196_v44 = vadd.f32 %v5150_v19, %v4963_v42  ;;  %v5548_v59 = vpop.f32.mrf.mxu1  ;;  %v10406_v42 = vld [vmem:[#allocation37_spill] sm:$0xff] }
 0x6b3   : > { %v9850_v30 = vadd.f32 %v5548_v59, %v9679_v18 }
 0x6b4   : > { %7444 = vmatmul.msk.bf16.gmra.mxu2 %vm2672_vm7, %v9512_v57  ;;  %7476 = vmatmul.msk.bf16.gmra.mxu0 %vm2672_vm7, %v6122_v0  ;;  %v9855_v48 = vadd.f32 %v5370_v23, %v5196_v44 }
 0x6b5   : > { %7435 = vmatmul.msk.bf16.gmra.mxu1 %vm2672_vm7, %v9508_v1  ;;  %7460 = vmatmul.msk.bf16.gmra.mxu3 %vm2672_vm7, %v9510_v47 }
 0x6b7   : > { %v4965_v5 = vpop.f32.mrf.mxu2 }
 0x6b8   : > { %v4966_v32 = vadd.f32 %v4965_v5, %v9706_v34  ;;  %v5153_v31 = vpop.f32.mrf.mxu3  ;;  %v6098_v5 = vld [vmem:[#allocation3 + $0xc1] sm:$0xff] }
 0x6b9   : > { %v5375_v40 = vpop.f32.mrf.mxu0 }
 0x6ba   : > { %v5197_v18 = vadd.f32 %v5153_v31, %v4966_v32  ;;  %v5550_v45 = vpop.f32.mrf.mxu1 }
 0x6bb   : > { %v9863_v20 = vadd.f32 %v5550_v45, %v9694_v63 }
 0x6bc   : > { %v9865_v57 = vadd.f32 %v5373_v26, %v5197_v18  ;;  %v10407_v18 = vld [vmem:[#allocation28_spill] sm:$0xff] }
 0x6bf   : > { %v4967_v35 = vpop.f32.mrf.mxu2 }
 0x6c0   : > { %v4968_v4 = vadd.f32 %v4967_v35, %v9723_v38  ;;  %v5155_v1 = vpop.f32.mrf.mxu3  ;;  %v10405_v38 = vld [vmem:[#allocation24_spill] sm:$0xff]  ;;  %v10408_v35 = vld [vmem:[#allocation25_spill] sm:$0xff] }
 0x6c1   : > { %v5378_v58 = vpop.f32.mrf.mxu0 }
 0x6c2   : > { %v5198_v47 = vadd.f32 %v5155_v1, %v4968_v4  ;;  %v5553_v55 = vpop.f32.mrf.mxu1 }
 0x6c3   : > { %v9869_v34 = vadd.f32 %v5553_v55, %v9703_v2 }
 0x6c4   : > { %7445 = vmatmul.msk.bf16.gmra.mxu2 %vm2672_vm7, %v9537_v3  ;;  %7477 = vmatmul.msk.bf16.gmra.mxu0 %vm2672_vm7, %v6123_v6  ;;  %v9874_v63 = vadd.f32 %v5375_v40, %v5198_v47  ;;  %v6124_v40 = vpack.c.bf16 %v6099_v24, %v6098_v5  ;;  %v10410_v47 = vld [vmem:[#allocation39_spill] sm:$0xff] }
 0x6c5   : > { %7436 = vmatmul.msk.bf16.gmra.mxu1 %vm2672_vm7, %v10404_v14  ;;  %7461 = vmatmul.msk.bf16.gmra.mxu3 %vm2672_vm7, %v10405_v38  ;;  %v6101_v38 = vld [vmem:[#allocation3 + $0xe1] sm:$0xff] }
 0x6c7   : > { %v4970_v23 = vpop.f32.mrf.mxu2 }
 0x6c8   : > { %v4971_v46 = vadd.f32 %v4970_v23, %v9728_v52  ;;  %v5158_v9 = vpop.f32.mrf.mxu3 }
 0x6c9   : > { %v5380_v56 = vpop.f32.mrf.mxu0 }
 0x6ca   : > { %v5199_v2 = vadd.f32 %v5158_v9, %v4971_v46  ;;  %v5555_v10 = vpop.f32.mrf.mxu1 }
 0x6cb   : > { %v9882_v19 = vadd.f32 %v5555_v10, %v10406_v42 }
 0x6cc   : > { %v9884_v3 = vadd.f32 %v5378_v58, %v5199_v2 }
 0x6cf   : > { %v4972_v26 = vpop.f32.mrf.mxu2 }
 0x6d0   : > { %v4973_v44 = vadd.f32 %v4972_v26, %v9745_v29  ;;  %v5160_v59 = vpop.f32.mrf.mxu3  ;;  %v10409_v29 = vld [vmem:[#allocation26_spill] sm:$0xff]  ;;  %v10411_v26 = vld [vmem:[#allocation19_spill] sm:$0xff] }
 0x6d1   : > { %v5383_v0 = vpop.f32.mrf.mxu0 }
 0x6d2   : > { %v5200_v32 = vadd.f32 %v5160_v59, %v4973_v44  ;;  %v5558_v31 = vpop.f32.mrf.mxu1  ;;  %v10412_v44 = vld [vmem:[#allocation27_spill] sm:$0xff] }
 0x6d3   : > { %v9888_v52 = vadd.f32 %v5558_v31, %v9725_v43 }
 0x6d4   : > { %7446 = vmatmul.msk.bf16.gmra.mxu2 %vm2672_vm7, %v10407_v18  ;;  %7478 = vmatmul.msk.bf16.gmra.mxu0 %vm2672_vm7, %v6124_v40  ;;  %v9893_v45 = vadd.f32 %v5380_v56, %v5200_v32  ;;  %v6100_v56 = vld [vmem:[#allocation3 + $0xd9] sm:$0xff] }
 0x6d5   : > { %7437 = vmatmul.msk.bf16.gmra.mxu1 %vm2672_vm7, %v10408_v35  ;;  %7462 = vmatmul.msk.bf16.gmra.mxu3 %vm2672_vm7, %v10409_v29  ;;  %v6125_v42 = vpack.c.bf16 %v6101_v38, %v6100_v56  ;;  %v6103_v29 = vld [vmem:[#allocation3 + $0xf9] sm:$0xff] }
 0x6d7   : > { %v4975_v27 = vpop.f32.mrf.mxu2 }
 0x6d8   : > { %v4976_v4 = vadd.f32 %v4975_v27, %v9750_v36  ;;  %v5163_v1 = vpop.f32.mrf.mxu3 }
 0x6d9   : > { %v5385_v58 = vpop.f32.mrf.mxu0 }
 0x6da   : > { %v5201_v43 = vadd.f32 %v5163_v1, %v4976_v4  ;;  %v5560_v53 = vpop.f32.mrf.mxu1  ;;  %v5456_v1 = vld [vmem:[#allocation3 + $0x189] sm:$0xff] }
 0x6db   : > { %v9901_v55 = vadd.f32 %v5560_v53, %v10410_v47 }
 0x6dc   : > { %v9903_v6 = vadd.f32 %v5383_v0, %v5201_v43  ;;  %v6102_v43 = vld [vmem:[#allocation3 + $0xf1] sm:$0xff] }
 0x6df   : > { %v4977_v14 = vpop.f32.mrf.mxu2 }
 0x6e0   : > { %v4978_v23 = vadd.f32 %v4977_v14, %v9767_v49  ;;  %v5165_v46 = vpop.f32.mrf.mxu3  ;;  %v10413_v49 = vld [vmem:[#allocation20_spill] sm:$0xff]  ;;  %v6126_v14 = vpack.c.bf16 %v6103_v29, %v6102_v43 }
 0x6e1   : > { %v5388_v9 = vpop.f32.mrf.mxu0 }
 0x6e2   : > { %v5202_v2 = vadd.f32 %v5165_v46, %v4978_v23  ;;  %v5563_v10 = vpop.f32.mrf.mxu1 }
 0x6e3   : > { %v9907_v36 = vadd.f32 %v5563_v10, %v9747_v22 }
 0x6e4   : > { %7447 = vmatmul.msk.bf16.gmra.mxu2 %vm2672_vm7, %v10411_v26  ;;  %7479 = vmatmul.msk.bf16.gmra.mxu0 %vm2672_vm7, %v6125_v42  ;;  %v9912_v24 = vadd.f32 %v5385_v58, %v5202_v2 }
 0x6e5   : > { %7438 = vmatmul.msk.bf16.gmra.mxu1 %vm2672_vm7, %v10412_v44  ;;  %7463 = vmatmul.msk.bf16.gmra.mxu3 %vm2672_vm7, %v10413_v49 }
 0x6e7   : > { %v4980_v59 = vpop.f32.mrf.mxu2 }
 0x6e8   : > { %v4981_v0 = vadd.f32 %v4980_v59, %v9772_v12  ;;  %v5168_v5 = vpop.f32.mrf.mxu3  ;;  %v5455_v12 = vld [vmem:[#allocation3 + $0x181] sm:$0xff]  ;;  %v6105_v59 = vld [vmem:[#allocation3 + $0x111] sm:$0xff] }
 0x6e9   : > { %v5390_v32 = vpop.f32.mrf.mxu0  ;;  %v9928_v23 = vpack.c.bf16 %v5456_v1, %v5455_v12 }
 0x6ea   : > { %v5203_v22 = vadd.f32 %v5168_v5, %v4981_v0  ;;  %v5565_v31 = vpop.f32.mrf.mxu1 }
 0x6eb   : > { %v9920_v40 = vadd.f32 %v5565_v31, %v9760_v37  ;;  %v10414_v37 = vld [vmem:[#allocation23_spill] sm:$0xff] }
 0x6ec   : > { %v9922_v18 = vadd.f32 %v5388_v9, %v5203_v22  ;;  %v6307_v22 = vld [vmem:[#allocation3 + $0x3a] sm:$0xff] }
 0x6ef   : > { %v4982_v35 = vpop.f32.mrf.mxu2 }
 0x6f0   : > { %v4983_v27 = vadd.f32 %v4982_v35, %v9785_v13  ;;  %v5170_v4 = vpop.f32.mrf.mxu3  ;;  %v10415_v13 = vld [vmem:[#allocation21_spill] sm:$0xff]  ;;  %v6104_v35 = vld [vmem:[#allocation3 + $0x109] sm:$0xff] }
 0x6f1   : > { %v6194_v58 = vpop.f32.mrf.mxu0 }
 0x6f2   : > { %v5204_v53 = vadd.f32 %v5170_v4, %v4983_v27  ;;  %v5568_v47 = vpop.f32.mrf.mxu1  ;;  %v6127_v27 = vpack.c.bf16 %v6105_v59, %v6104_v35 }
 0x6f3   : > { %v9926_v38 = vadd.f32 %v5568_v47, %v9769_v41 }
 0x6f4   : > { %7448 = vmatmul.msk.bf16.gmra.mxu2 %vm2672_vm7, %v10414_v37  ;;  %7480 = vmatmul.msk.bf16.gmra.mxu0 %vm2672_vm7, %v6126_v14  ;;  %v9933_v46 = vadd.f32 %v5390_v32, %v5204_v53  ;;  %v6306_v32 = vld [vmem:[#allocation3 + $0x32] sm:$0xff] }
 0x6f5   : > { %7439 = vmatmul.msk.bf16.gmra.mxu1 %vm2672_vm7, %v9928_v23  ;;  %7464 = vmatmul.msk.bf16.gmra.mxu3 %vm2672_vm7, %v10415_v13  ;;  %v6338_v1 = vpack.c.bf16 %v6307_v22, %v6306_v32 }
 0x6f7   : > { %v5753_v9 = vpop.f32.mrf.mxu2 }
 0x6f8   : > { %v5833_v56 = vadd.f32 %v5753_v9, %v9791_v28  ;;  %v5974_v41 = vpop.f32.mrf.mxu3 }
 0x6f9   : > { %v6196_v2 = vpop.f32.mrf.mxu0 }
 0x6fa   : > { %v6054_v10 = vadd.f32 %v5974_v41, %v5833_v56  ;;  %v5570_v42 = vpop.f32.mrf.mxu1  ;;  %v6107_v56 = vld [vmem:[#allocation3 + $0x129] sm:$0xff] }
 0x6fb   : > { %v9941_v26 = vadd.f32 %v5570_v42, %v9778_v16  ;;  %v10416_v16 = vld [vmem:[#allocation30_spill] sm:$0xff]  ;;  %v6309_v42 = vld [vmem:[#allocation3 + $0x52] sm:$0xff] }
 0x6fc   : > { %v9943_v44 = vadd.f32 %v6194_v58, %v6054_v10  ;;  %v6308_v10 = vld [vmem:[#allocation3 + $0x4a] sm:$0xff] }
 0x6fd   : > { %v6339_v32 = vpack.c.bf16 %v6309_v42, %v6308_v10 }
 0x6ff   : > { %v5755_v49 = vpop.f32.mrf.mxu2 }
 0x700   : > { %v5834_v0 = vadd.f32 %v5755_v49, %v9805_v54  ;;  %v5976_v5 = vpop.f32.mrf.mxu3  ;;  %v10417_v54 = vld [vmem:[#allocation29_spill] sm:$0xff] }
 0x701   : > { %v6199_v31 = vpop.f32.mrf.mxu0  ;;  %v6106_v49 = vld [vmem:[#allocation3 + $0x121] sm:$0xff] }
 0x702   : > { %v6055_v29 = vadd.f32 %v5976_v5, %v5834_v0  ;;  %v5573_v28 = vpop.f32.mrf.mxu1 }
 0x703   : > { %v9947_v4 = vadd.f32 %v5573_v28, %v9787_v15 }
 0x704   : > { %7449 = vmatmul.msk.bf16.gmra.mxu2 %vm2672_vm7, %v10416_v16  ;;  %7481 = vmatmul.msk.bf16.gmra.mxu0 %vm2672_vm7, %v6127_v27  ;;  %v9952_v58 = vadd.f32 %v6196_v2, %v6055_v29 }
 0x705   : > { %7465 = vmatmul.msk.bf16.gmra.mxu3 %vm2672_vm7, %v10417_v54  ;;  %7488 = vmatmul.msk.bf16.vlgmr.msra.gmra.mxu1 %vm2672_vm7, %v6338_v1 }
 0x707   : > { %v5758_v43 = vpop.f32.mrf.mxu2 }
 0x708   : > { %v5835_v53 = vadd.f32 %v5758_v43, %v9811_v33  ;;  %v5979_v47 = vpop.f32.mrf.mxu3  ;;  %v6128_v33 = vpack.c.bf16 %v6107_v56, %v6106_v49  ;;  %v10421_v49 = vld [vmem:[#allocation33_spill] sm:$0xff] }
 0x709   : > { %v6201_v37 = vpop.f32.mrf.mxu0 }
 0x70a   : > { %v6056_v12 = vadd.f32 %v5979_v47, %v5835_v53  ;;  %v5575_v15 = vpop.f32.mrf.mxu1  ;;  %v6109_v53 = vld [vmem:[#allocation3 + $0x141] sm:$0xff] }
 0x70b   : > { %v9959_v14 = vadd.f32 %v5575_v15, %v9797_v60  ;;  %v10418_v60 = vld [vmem:[#allocation32_spill] sm:$0xff]  ;;  %v6310_v15 = vld [vmem:[#allocation3 + $0x62] sm:$0xff] }
 0x70c   : > { %v9961_v13 = vadd.f32 %v6199_v31, %v6056_v12 }
 0x70f   : > { %v5760_v9 = vpop.f32.mrf.mxu2 }
 0x710   : > { %v5836_v41 = vadd.f32 %v5760_v9, %v9825_v62  ;;  %v5981_v2 = vpop.f32.mrf.mxu3  ;;  %v10419_v62 = vld [vmem:[#allocation31_spill] sm:$0xff]  ;;  %v6108_v9 = vld [vmem:[#allocation3 + $0x139] sm:$0xff] }
 0x711   : > { %v6204_v31 = vpop.f32.mrf.mxu0 }
 0x712   : > { %v6057_v59 = vadd.f32 %v5981_v2, %v5836_v41  ;;  %v5578_v0 = vpop.f32.mrf.mxu1 }
 0x713   : > { %v9965_v5 = vadd.f32 %v5578_v0, %v9807_v11 }
 0x714   : > { %7450 = vmatmul.msk.bf16.gmra.mxu2 %vm2672_vm7, %v10418_v60  ;;  %7482 = vmatmul.msk.bf16.gmra.mxu0 %vm2672_vm7, %v6128_v33  ;;  %v9970_v22 = vadd.f32 %v6201_v37, %v6057_v59  ;;  %v6311_v37 = vld [vmem:[#allocation3 + $0x6a] sm:$0xff] }
 0x715   : > { %7466 = vmatmul.msk.bf16.gmra.mxu3 %vm2672_vm7, %v10419_v62  ;;  %7489 = vmatmul.msk.bf16.gmra.mxu1 %vm2672_vm7, %v6339_v32  ;;  %v6340_v10 = vpack.c.bf16 %v6311_v37, %v6310_v15 }
 0x717   : > { %v5763_v35 = vpop.f32.mrf.mxu2 }
 0x718   : > { %v5837_v29 = vadd.f32 %v5763_v35, %v9831_v21  ;;  %v5984_v28 = vpop.f32.mrf.mxu3  ;;  %v6129_v21 = vpack.c.bf16 %v6109_v53, %v6108_v9  ;;  %v6111_v35 = vld [vmem:[#allocation3 + $0x159] sm:$0xff] }
 0x719   : > { %v6206_v54 = vpop.f32.mrf.mxu0 }
 0x71a   : > { %v6058_v11 = vadd.f32 %v5984_v28, %v5837_v29  ;;  %v5580_v27 = vpop.f32.mrf.mxu1  ;;  %v6312_v28 = vld [vmem:[#allocation3 + $0x7a] sm:$0xff] }
 0x71b   : > { %v9977_v1 = vadd.f32 %v5580_v27, %v9817_v17  ;;  %v10420_v17 = vld [vmem:[#allocation34_spill] sm:$0xff] }
 0x71c   : > { %v9979_v16 = vadd.f32 %v6204_v31, %v6058_v11  ;;  %v6313_v11 = vld [vmem:[#allocation3 + $0x82] sm:$0xff] }
 0x71d   : > { %v6341_v15 = vpack.c.bf16 %v6313_v11, %v6312_v28  ;;  %v6117_v28 = vld [vmem:[#allocation3 + $0x1a1] sm:$0xff] }
 0x71e   : > { %v5897_v11 = vld [vmem:[#allocation3 + $0x1a0] sm:$0xff] }
 0x71f   : > { %v5765_v43 = vpop.f32.mrf.mxu2 }
 0x720   : > { %v5838_v47 = vadd.f32 %v5765_v43, %v9844_v8  ;;  %v5986_v12 = vpop.f32.mrf.mxu3 }
 0x721   : > { %v6209_v33 = vpop.f32.mrf.mxu0 }
 0x722   : > { %v6059_v56 = vadd.f32 %v5986_v12, %v5838_v47  ;;  %v5583_v41 = vpop.f32.mrf.mxu1 }
 0x723   : > { %v9983_v2 = vadd.f32 %v5583_v41, %v9827_v7  ;;  %v6113_v41 = vld [vmem:[#allocation3 + $0x171] sm:$0xff] }
 0x724   : > { %7451 = vmatmul.msk.bf16.gmra.mxu2 %vm2672_vm7, %v10420_v17  ;;  %7483 = vmatmul.msk.bf16.gmra.mxu0 %vm2672_vm7, %v6129_v21  ;;  %v9988_v42 = vadd.f32 %v6206_v54, %v6059_v56  ;;  %v6110_v54 = vld [vmem:[#allocation3 + $0x151] sm:$0xff]  ;;  %v6315_v21 = vld [vmem:[#allocation3 + $0x9a] sm:$0xff] }
 0x725   : > { %7467 = vmatmul.msk.bf16.gmra.mxu3 %vm2672_vm7, %v10421_v49  ;;  %7490 = vmatmul.msk.bf16.gmra.mxu1 %vm2672_vm7, %v6340_v10  ;;  %v6112_v10 = vld [vmem:[#allocation3 + $0x169] sm:$0xff] }
 0x726   : > { %v6131_v49 = vpack.c.bf16 %v6113_v41, %v6112_v10 }
 0x727   : > { %v5768_v8 = vpop.f32.mrf.mxu2 }
 0x728   : > { %v5839_v59 = vadd.f32 %v5768_v8, %v9850_v30  ;;  %v5989_v0 = vpop.f32.mrf.mxu3  ;;  %v6130_v30 = vpack.c.bf16 %v6111_v35, %v6110_v54  ;;  %v5676_v54 = vld [vmem:[#allocation3 + $0x18a] sm:$0xff] }
 0x729   : > { %v6211_v47 = vpop.f32.mrf.mxu0 }
 0x72a   : > { %v6060_v7 = vadd.f32 %v5989_v0, %v5839_v59  ;;  %v5585_v32 = vpop.f32.mrf.mxu1  ;;  %v10424_v0 = vld [vmem:[#allocation38_spill] sm:$0xff] }
 0x72b   : > { %v9995_v60 = vadd.f32 %v5585_v32, %v9836_v39  ;;  %v10422_v39 = vld [vmem:[#allocation36_spill] sm:$0xff] }
 0x72c   : > { %v9997_v31 = vadd.f32 %v6209_v33, %v6060_v7  ;;  %v6316_v7 = vld [vmem:[#allocation3 + $0xaa] sm:$0xff]  ;;  %v6317_v32 = vld [vmem:[#allocation3 + $0xb2] sm:$0xff] }
 0x72d   : > { %v6343_v35 = vpack.c.bf16 %v6317_v32, %v6316_v7 }
 0x72f   : > { %v5770_v62 = vpop.f32.mrf.mxu2 }
 0x730   : > { %v5840_v29 = vadd.f32 %v5770_v62, %v9863_v20  ;;  %v5991_v27 = vpop.f32.mrf.mxu3  ;;  %v10423_v20 = vld [vmem:[#allocation35_spill] sm:$0xff] }
 0x732   : > { %v6061_v43 = vadd.f32 %v5991_v27, %v5840_v29  ;;  %v5588_v53 = vpop.f32.mrf.mxu1  ;;  %v6116_v29 = vld [vmem:[#allocation3 + $0x199] sm:$0xff]  ;;  %v5675_v27 = vld [vmem:[#allocation3 + $0x182] sm:$0xff] }
 0x733   : > { %v10001_v12 = vadd.f32 %v5588_v53, %v9846_v51  ;;  %v6314_v51 = vld [vmem:[#allocation3 + $0x92] sm:$0xff]  ;;  %v6133_v53 = vpack.c.bf16 %v6117_v28, %v6116_v29 }
 0x734   : > { %7452 = vmatmul.msk.bf16.gmra.mxu2 %vm2672_vm7, %v10422_v39  ;;  %7484 = vmatmul.msk.bf16.gmra.mxu0 %vm2672_vm7, %v6130_v30  ;;  %v10006_v37 = vadd.f32 %v6211_v47, %v6061_v43  ;;  %v6342_v59 = vpack.c.bf16 %v6315_v21, %v6314_v51  ;;  %v6318_v43 = vld [vmem:[#allocation3 + $0xc2] sm:$0xff]  ;;  %v10039_v47 = vpack.c.bf16 %v5676_v54, %v5675_v27  ;;  %v10074_v27 = vpop.f32.mrf.mxu0 }
 0x735   : > { %7468 = vmatmul.msk.bf16.gmra.mxu3 %vm2672_vm7, %v10423_v20  ;;  %7491 = vmatmul.msk.bf16.gmra.mxu1 %vm2672_vm7, %v6341_v15  ;;  %v6320_v20 = vld [vmem:[#allocation3 + $0xda] sm:$0xff] }
 0x738   : > { %v10072_v28 = vpop.f32.mrf.mxu3 }
 0x73a   : > { %v5590_v9 = vpop.f32.mrf.mxu1 }
 0x73b   : > { %v10012_v56 = vadd.f32 %v5590_v9, %v9855_v48  ;;  %v6321_v9 = vld [vmem:[#allocation3 + $0xe2] sm:$0xff] }
 0x73c   : > { %v6345_v51 = vpack.c.bf16 %v6321_v9, %v6320_v20  ;;  %v10085_v20 = vpop.f32.mrf.mxu0 }
 0x742   : > { %v5593_v17 = vpop.f32.mrf.mxu1 }
 0x743   : > { %v10015_v8 = vadd.f32 %v5593_v17, %v9865_v57  ;;  %v6322_v17 = vld [vmem:[#allocation3 + $0xf2] sm:$0xff] }
 0x744   : > { %7453 = vmatmul.msk.bf16.gmra.mxu2 %vm2672_vm7, %v10424_v0  ;;  %7485 = vmatmul.msk.bf16.gmra.mxu0 %vm2672_vm7, %v6131_v49  ;;  %v6323_v49 = vld [vmem:[#allocation3 + $0xfa] sm:$0xff] }
 0x745   : > { %7469 = vmatmul.msk.bf16.gmra.mxu3 %vm2672_vm7, %v9730_v50  ;;  %7492 = vmatmul.msk.bf16.gmra.mxu1 %vm2672_vm7, %v6342_v59 }
 0x74a   : > { %v5595_v48 = vpop.f32.mrf.mxu1 }
 0x74b   : > { %v10024_v33 = vadd.f32 %v5595_v48, %v9874_v63  ;;  %v6561_v48 = vld [vmem:[#allocation2 + $0x19] sm:$0xff] }
 0x752   : > { %v5598_v62 = vpop.f32.mrf.mxu1 }
 0x753   : > { %v10027_v57 = vadd.f32 %v5598_v62, %v9884_v3  ;;  %v5896_v3 = vld [vmem:[#allocation3 + $0x198] sm:$0xff] }
 0x754   : > { %7454 = vmatmul.msk.bf16.gmra.mxu2 %vm2672_vm7, %v9754_v61  ;;  %7486 = vmatmul.msk.bf16.gmra.mxu0 %vm2672_vm7, %v9928_v23  ;;  %v6319_v61 = vld [vmem:[#allocation3 + $0xca] sm:$0xff]  ;;  %v5913_v30 = vpack.c.bf16 %v5897_v11, %v5896_v3  ;;  %v6325_v11 = vld [vmem:[#allocation3 + $0x112] sm:$0xff] }
 0x755   : > { %7470 = vmatmul.msk.bf16.gmra.mxu3 %vm2672_vm7, %v9752_v25  ;;  %7493 = vmatmul.msk.bf16.gmra.mxu1 %vm2672_vm7, %v6343_v35  ;;  %v6344_v15 = vpack.c.bf16 %v6319_v61, %v6318_v43 }
 0x75a   : > { %v5600_v50 = vpop.f32.mrf.mxu1 }
 0x75b   : > { %v10037_v63 = vadd.f32 %v5600_v50, %v9893_v45  ;;  %v6562_v50 = vld [vmem:[#allocation2 + $0x21] sm:$0xff] }
 0x762   : > { %v5603_v23 = vpop.f32.mrf.mxu1 }
 0x763   : > { %v10042_v25 = vadd.f32 %v5603_v23, %v9903_v6 }
 0x764   : > { %7455 = vmatmul.msk.bf16.gmra.mxu2 %vm2672_vm7, %v10039_v47  ;;  %7487 = vmatmul.msk.bf16.gmra.mxu0 %vm2672_vm7, %v6133_v53 }
 0x765   : > { %7494 = vmatmul.msk.bf16.gmra.mxu1 %vm2672_vm7, %v6344_v15  ;;  %7471 = vmatmul.msk.bf16.gmra.mxu3 %vm2672_vm7, %v5913_v30  ;;  %v6563_v30 = vld [vmem:[#allocation2 + $0x31] sm:$0xff]  ;;  %v10082_v15 = vpop.f32.mrf.mxu3 }
 0x76a   : > { %v5605_v45 = vpop.f32.mrf.mxu1 }
 0x76b   : > { %v10050_v39 = vadd.f32 %v5605_v45, %v9912_v24  ;;  %v10064_v24 = vld [vmem:[%s4607_s17] ss:$0 sm:$0xff] }
 0x772   : > { %v5608_v41 = vpop.f32.mrf.mxu1 }
 0x773   : > { %v10053_v6 = vadd.f32 %v5608_v41, %v9922_v18  ;;  %v6346_v18 = vpack.c.bf16 %v6323_v49, %v6322_v17  ;;  %v6326_v17 = vld [vmem:[#allocation3 + $0x122] sm:$0xff]  ;;  %v6327_v49 = vld [vmem:[#allocation3 + $0x12a] sm:$0xff] }
 0x775   : > { %7495 = vmatmul.msk.bf16.gmra.mxu1 %vm2672_vm7, %v6345_v51  ;;  %v6564_v51 = vld [vmem:[#allocation2 + $0x39] sm:$0xff] }
 0x77a   : > { %v5610_v21 = vpop.f32.mrf.mxu1 }
 0x77b   : > { %v10057_v10 = vadd.f32 %v5610_v21, %v9933_v46  ;;  %v5773_v46 = vpop.f32.mrf.mxu2 }
 0x782   : > { %v6414_v59 = vpop.f32.mrf.mxu1 }
 0x783   : > { %v6494_v0 = vadd.f32 %v6414_v59, %v9943_v44  ;;  %v6324_v44 = vld [vmem:[#allocation3 + $0x10a] sm:$0xff]  ;;  %v10077_v54 = vpop.f32.mrf.mxu2  ;;  %v10092_v59 = vpop.f32.mrf.mxu3 }
 0x784   : > { %v6347_v53 = vpack.c.bf16 %v6325_v11, %v6324_v44  ;;  %v6566_v44 = vld [vmem:[#allocation2 + $0x51] sm:$0xff] }
 0x785   : > { %v6529_v7 = vadd.f32 %v10064_v24, %v6494_v0  ;;  %7496 = vmatmul.msk.bf16.gmra.mxu1 %vm2672_vm7, %v6346_v18 }
 0x787   : > { %v6593_v32 = vadd.f32 %v6561_v48, %v6529_v7  ;;  %v6348_v48 = vpack.c.bf16 %v6327_v49, %v6326_v17  ;;  %v6565_v7 = vld [vmem:[#allocation2 + $0x49] sm:$0xff] }
 0x789   : > { %6625 = vst.msk [vmem:[#allocation2 + $0x19] sm:$0xff] %vm2672_vm7, %v6593_v32  ;;  %v10095_v32 = vpop.f32.mrf.mxu0 }
 0x78a   : > { %v6416_v62 = vpop.f32.mrf.mxu1 }
 0x78b   : > { %v6495_v35 = vadd.f32 %v6416_v62, %v9952_v58  ;;  %v10088_v41 = vpop.f32.mrf.mxu2 }
 0x78d   : > { %v6530_v29 = vadd.f32 %v10064_v24, %v6495_v35 }
 0x78f   : > { %v6594_v3 = vadd.f32 %v6562_v50, %v6530_v29 }
 0x791   : > { %6626 = vst.msk [vmem:[#allocation2 + $0x21] sm:$0xff] %vm2672_vm7, %v6594_v3  ;;  %v10101_v3 = vpop.f32.mrf.mxu3  ;;  %v10104_v11 = vpop.f32.mrf.mxu0 }
 0x792   : > { %v6419_v43 = vpop.f32.mrf.mxu1 }
 0x793   : > { %v6496_v61 = vadd.f32 %v6419_v43, %v9961_v13  ;;  %v5780_v62 = vpop.f32.mrf.mxu2 }
 0x795   : > { %v6531_v58 = vadd.f32 %v10064_v24, %v6496_v61  ;;  %7497 = vmatmul.msk.bf16.gmra.mxu1 %vm2672_vm7, %v6347_v53  ;;  %v6328_v53 = vld [vmem:[#allocation3 + $0x13a] sm:$0xff] }
 0x797   : > { %v6595_v23 = vadd.f32 %v6563_v30, %v6531_v58  ;;  %v6329_v30 = vld [vmem:[#allocation3 + $0x142] sm:$0xff] }
 0x799   : > { %6627 = vst.msk [vmem:[#allocation2 + $0x31] sm:$0xff] %vm2672_vm7, %v6595_v23  ;;  %v10113_v17 = vpop.f32.mrf.mxu0 }
 0x79a   : > { %v6421_v45 = vpop.f32.mrf.mxu1 }
 0x79b   : > { %v6497_v9 = vadd.f32 %v6421_v45, %v9970_v22  ;;  %v10106_v61 = vpop.f32.mrf.mxu2  ;;  %v6349_v45 = vpack.c.bf16 %v6329_v30, %v6328_v53  ;;  %v6569_v30 = vld [vmem:[#allocation2 + $0x79] sm:$0xff] }
 0x79d   : > { %v6532_v13 = vadd.f32 %v10064_v24, %v6497_v9  ;;  %v6567_v9 = vld [vmem:[#allocation2 + $0x61] sm:$0xff] }
 0x79f   : > { %v6596_v21 = vadd.f32 %v6564_v51, %v6532_v13  ;;  %v6004_v51 = vpop.f32.mrf.mxu3 }
 0x7a1   : > { %6628 = vst.msk [vmem:[#allocation2 + $0x39] sm:$0xff] %vm2672_vm7, %v6596_v21  ;;  %v5841_v21 = vadd.f32 %v5773_v46, %v9869_v34  ;;  %v5842_v34 = vadd.f32 %v10077_v54, %v9882_v19  ;;  %v5843_v19 = vadd.f32 %v10088_v41, %v9888_v52 }
 0x7a2   : > { %v6424_v0 = vpop.f32.mrf.mxu1 }
 0x7a3   : > { %v6498_v18 = vadd.f32 %v6424_v0, %v9979_v16  ;;  %v5785_v49 = vpop.f32.mrf.mxu2 }
 0x7a5   : > { %v6533_v22 = vadd.f32 %v10064_v24, %v6498_v18  ;;  %7498 = vmatmul.msk.bf16.gmra.mxu1 %vm2672_vm7, %v6348_v48  ;;  %v6568_v48 = vld [vmem:[#allocation2 + $0x69] sm:$0xff] }
 0x7a7   : > { %v6597_v35 = vadd.f32 %v6565_v7, %v6533_v22 }
 0x7a9   : > { %6629 = vst.msk [vmem:[#allocation2 + $0x49] sm:$0xff] %vm2672_vm7, %v6597_v35  ;;  %v6006_v35 = vpop.f32.mrf.mxu3 }
 0x7aa   : > { %v6426_v50 = vpop.f32.mrf.mxu1 }
 0x7ab   : > { %v6499_v29 = vadd.f32 %v6426_v50, %v9988_v42  ;;  %v6330_v50 = vld [vmem:[#allocation3 + $0x152] sm:$0xff]  ;;  %v5788_v53 = vpop.f32.mrf.mxu2 }
 0x7ad   : > { %v6534_v16 = vadd.f32 %v10064_v24, %v6499_v29  ;;  %v6331_v29 = vld [vmem:[#allocation3 + $0x15a] sm:$0xff] }
 0x7af   : > { %v6598_v43 = vadd.f32 %v6566_v44, %v6534_v16  ;;  %v6226_v16 = vpop.f32.mrf.mxu0 }
 0x7b1   : > { %6630 = vst.msk [vmem:[#allocation2 + $0x51] sm:$0xff] %vm2672_vm7, %v6598_v43  ;;  %v6009_v54 = vpop.f32.mrf.mxu3 }
 0x7b2   : > { %v6429_v58 = vpop.f32.mrf.mxu1 }
 0x7b3   : > { %v6500_v23 = vadd.f32 %v6429_v58, %v9997_v31  ;;  %v6062_v31 = vadd.f32 %v10072_v28, %v5841_v21  ;;  %v6063_v28 = vadd.f32 %v10082_v15, %v5842_v34 }
 0x7b5   : > { %v6535_v42 = vadd.f32 %v10064_v24, %v6500_v23  ;;  %7499 = vmatmul.msk.bf16.gmra.mxu1 %vm2672_vm7, %v6349_v45  ;;  %v6282_v46 = vadd.f32 %v10074_v27, %v6062_v31  ;;  %v6283_v27 = vadd.f32 %v10085_v20, %v6063_v28  ;;  %v6333_v31 = vld [vmem:[#allocation3 + $0x172] sm:$0xff] }
 0x7b7   : > { %v6599_v13 = vadd.f32 %v6567_v9, %v6535_v42  ;;  %v6570_v42 = vld [vmem:[#allocation2 + $0x81] sm:$0xff]  ;;  %v6229_v21 = vpop.f32.mrf.mxu0 }
 0x7b9   : > { %6631 = vst.msk [vmem:[#allocation2 + $0x61] sm:$0xff] %vm2672_vm7, %v6599_v13  ;;  %v6064_v13 = vadd.f32 %v10092_v59, %v5843_v19  ;;  %v5846_v19 = vadd.f32 %v5785_v49, %v9920_v40 }
 0x7ba   : > { %v6431_v0 = vpop.f32.mrf.mxu1 }
 0x7bb   : > { %v6501_v18 = vadd.f32 %v6431_v0, %v10006_v37  ;;  %v6350_v37 = vpack.c.bf16 %v6331_v29, %v6330_v50  ;;  %v5790_v0 = vpop.f32.mrf.mxu2  ;;  %v6284_v52 = vadd.f32 %v10095_v32, %v6064_v13  ;;  %v6011_v50 = vpop.f32.mrf.mxu3  ;;  %v6571_v29 = vld [vmem:[#allocation2 + $0x91] sm:$0xff] }
 0x7bd   : > { %v6536_v7 = vadd.f32 %v10064_v24, %v6501_v18 }
 0x7bf   : > { %v6600_v22 = vadd.f32 %v6568_v48, %v6536_v7  ;;  %v6332_v48 = vld [vmem:[#allocation3 + $0x16a] sm:$0xff]  ;;  %v5844_v7 = vadd.f32 %v5780_v62, %v9901_v55  ;;  %v5845_v55 = vadd.f32 %v10106_v61, %v9907_v36 }
 0x7c1   : > { %6632 = vst.msk [vmem:[#allocation2 + $0x69] sm:$0xff] %vm2672_vm7, %v6600_v22  ;;  %v6351_v22 = vpack.c.bf16 %v6333_v31, %v6332_v48  ;;  %v6065_v59 = vadd.f32 %v10101_v3, %v5844_v7  ;;  %v6066_v28 = vadd.f32 %v6004_v51, %v5845_v55  ;;  %v6574_v7 = vld [vmem:[#allocation2 + $0xb1] sm:$0xff] }
 0x7c2   : > { %v6434_v44 = vpop.f32.mrf.mxu1 }
 0x7c3   : > { %v6502_v43 = vadd.f32 %v6434_v44, %v6282_v46  ;;  %v6231_v46 = vpop.f32.mrf.mxu0  ;;  %v6285_v32 = vadd.f32 %v10104_v11, %v6065_v59  ;;  %v6067_v11 = vadd.f32 %v6006_v35, %v5846_v19 }
 0x7c5   : > { %v6537_v58 = vadd.f32 %v10064_v24, %v6502_v43  ;;  %7500 = vmatmul.msk.bf16.gmra.mxu1 %vm2672_vm7, %v6350_v37  ;;  %v5793_v43 = vpop.f32.mrf.mxu2  ;;  %v6287_v40 = vadd.f32 %v6226_v16, %v6067_v11 }
 0x7c7   : > { %v6601_v23 = vadd.f32 %v6569_v30, %v6537_v58  ;;  %v6572_v30 = vld [vmem:[#allocation2 + $0x99] sm:$0xff]  ;;  %v6014_v58 = vpop.f32.mrf.mxu3 }
 0x7c9   : > { %6633 = vst.msk [vmem:[#allocation2 + $0x79] sm:$0xff] %vm2672_vm7, %v6601_v23 }
 0x7ca   : > { %v6436_v45 = vpop.f32.mrf.mxu1 }
 0x7cb   : > { %v6503_v9 = vadd.f32 %v6436_v45, %v6283_v27  ;;  %v6234_v27 = vpop.f32.mrf.mxu0  ;;  %v6286_v45 = vadd.f32 %v10113_v17, %v6066_v28  ;;  %v6576_v28 = vld [vmem:[#allocation2 + $0xc9] sm:$0xff] }
 0x7cd   : > { %v6538_v15 = vadd.f32 %v10064_v24, %v6503_v9  ;;  %v5795_v36 = vpop.f32.mrf.mxu2 }
 0x7cf   : > { %v6602_v18 = vadd.f32 %v6570_v42, %v6538_v15  ;;  %v6573_v42 = vld [vmem:[#allocation2 + $0xa9] sm:$0xff]  ;;  %v6016_v15 = vpop.f32.mrf.mxu3 }
 0x7d1   : > { %6634 = vst.msk [vmem:[#allocation2 + $0x81] sm:$0xff] %vm2672_vm7, %v6602_v18  ;;  %v5847_v18 = vadd.f32 %v5788_v53, %v9926_v38 }
 0x7d2   : > { %v6439_v20 = vpop.f32.mrf.mxu1 }
 0x7d3   : > { %v6504_v41 = vadd.f32 %v6439_v20, %v6284_v52  ;;  %v6236_v48 = vpop.f32.mrf.mxu0  ;;  %v6068_v52 = vadd.f32 %v6009_v54, %v5847_v18  ;;  %v6336_v20 = vld [vmem:[#allocation3 + $0x19a] sm:$0xff] }
 0x7d5   : > { %v6539_v34 = vadd.f32 %v10064_v24, %v6504_v41  ;;  %7501 = vmatmul.msk.bf16.gmra.mxu1 %vm2672_vm7, %v6351_v22  ;;  %v5798_v31 = vpop.f32.mrf.mxu2  ;;  %v6337_v41 = vld [vmem:[#allocation3 + $0x1a2] sm:$0xff] }
 0x7d6   : > { %v6353_v38 = vpack.c.bf16 %v6337_v41, %v6336_v20 }
 0x7d7   : > { %v6603_v44 = vadd.f32 %v6571_v29, %v6539_v34  ;;  %v6288_v29 = vadd.f32 %v6229_v21, %v6068_v52  ;;  %v6019_v53 = vpop.f32.mrf.mxu3  ;;  %v6575_v34 = vld [vmem:[#allocation2 + $0xc1] sm:$0xff] }
 0x7d9   : > { %6635 = vst.msk [vmem:[#allocation2 + $0x91] sm:$0xff] %vm2672_vm7, %v6603_v44 }
 0x7da   : > { %v6441_v62 = vpop.f32.mrf.mxu1 }
 0x7db   : > { %v6505_v37 = vadd.f32 %v6441_v62, %v6285_v32  ;;  %v6239_v55 = vpop.f32.mrf.mxu0 }
 0x7dd   : > { %v6540_v3 = vadd.f32 %v10064_v24, %v6505_v37  ;;  %v5800_v54 = vpop.f32.mrf.mxu2  ;;  %v5849_v37 = vadd.f32 %v5793_v43, %v9947_v4  ;;  %v6577_v43 = vld [vmem:[#allocation2 + $0xd9] sm:$0xff] }
 0x7df   : > { %v6604_v23 = vadd.f32 %v6572_v30, %v6540_v3  ;;  %v6021_v30 = vpop.f32.mrf.mxu3  ;;  %v6070_v3 = vadd.f32 %v6014_v58, %v5849_v37  ;;  %v5851_v58 = vadd.f32 %v5798_v31, %v9965_v5 }
 0x7e1   : > { %6636 = vst.msk [vmem:[#allocation2 + $0x99] sm:$0xff] %vm2672_vm7, %v6604_v23 }
 0x7e2   : > { %v6444_v61 = vpop.f32.mrf.mxu1 }
 0x7e3   : > { %v6506_v9 = vadd.f32 %v6444_v61, %v6286_v45  ;;  %v5850_v61 = vadd.f32 %v5795_v36, %v9959_v14  ;;  %v6578_v36 = vld [vmem:[#allocation2 + $0xe1] sm:$0xff] }
 0x7e5   : > { %v6541_v13 = vadd.f32 %v10064_v24, %v6506_v9  ;;  %7502 = vmatmul.msk.bf16.gmra.mxu1 %vm2672_vm7, %v10039_v47  ;;  %v5848_v47 = vadd.f32 %v5790_v0, %v9941_v26  ;;  %v5803_v45 = vpop.f32.mrf.mxu2  ;;  %v6290_v9 = vadd.f32 %v6234_v27, %v6070_v3  ;;  %v6071_v11 = vadd.f32 %v6016_v15, %v5850_v61 }
 0x7e6   : > { %v5852_v15 = vadd.f32 %v5800_v54, %v9977_v1 }
 0x7e7   : > { %v6605_v51 = vadd.f32 %v6573_v42, %v6541_v13  ;;  %v6069_v44 = vadd.f32 %v6011_v50, %v5848_v47  ;;  %v6241_v50 = vpop.f32.mrf.mxu0  ;;  %v6024_v13 = vpop.f32.mrf.mxu3  ;;  %v6579_v47 = vld [vmem:[#allocation2 + $0xf1] sm:$0xff] }
 0x7e9   : > { %6637 = vst.msk [vmem:[#allocation2 + $0xa9] sm:$0xff] %vm2672_vm7, %v6605_v51  ;;  %v6289_v26 = vadd.f32 %v6231_v46, %v6069_v44  ;;  %v6580_v44 = vld [vmem:[#allocation2 + $0xf9] sm:$0xff] }
 0x7ea   : > { %v6446_v49 = vpop.f32.mrf.mxu1 }
 0x7eb   : > { %v6507_v17 = vadd.f32 %v6446_v49, %v6287_v40  ;;  %v6291_v40 = vadd.f32 %v6236_v48, %v6071_v11  ;;  %v6073_v48 = vadd.f32 %v6021_v30, %v5852_v15 }
 0x7ed   : > { %v6542_v35 = vadd.f32 %v10064_v24, %v6507_v17  ;;  %v5805_v49 = vpop.f32.mrf.mxu2 }
 0x7ef   : > { %v6606_v22 = vadd.f32 %v6574_v7, %v6542_v35  ;;  %v6244_v18 = vpop.f32.mrf.mxu0  ;;  %v6072_v7 = vadd.f32 %v6019_v53, %v5851_v58  ;;  %v6026_v35 = vpop.f32.mrf.mxu3  ;;  %v5853_v53 = vadd.f32 %v5803_v45, %v9983_v2 }
 0x7f1   : > { %6638 = vst.msk [vmem:[#allocation2 + $0xb1] sm:$0xff] %vm2672_vm7, %v6606_v22  ;;  %v6292_v20 = vadd.f32 %v6239_v55, %v6072_v7 }
 0x7f2   : > { %v6449_v59 = vpop.f32.mrf.mxu1 }
 0x7f3   : > { %v6508_v16 = vadd.f32 %v6449_v59, %v6288_v29  ;;  %v6293_v59 = vadd.f32 %v6241_v50, %v6073_v48 }
 0x7f5   : > { %v6543_v32 = vadd.f32 %v10064_v24, %v6508_v16  ;;  %7503 = vmatmul.msk.bf16.gmra.mxu1 %vm2672_vm7, %v6353_v38  ;;  %v5808_v22 = vpop.f32.mrf.mxu2 }
 0x7f6   : > { %v5855_v61 = vadd.f32 %v5808_v22, %v10001_v12 }
 0x7f7   : > { %v6607_v62 = vadd.f32 %v6575_v34, %v6543_v32  ;;  %v6246_v5 = vpop.f32.mrf.mxu0  ;;  %v6029_v16 = vpop.f32.mrf.mxu3  ;;  %v6074_v32 = vadd.f32 %v6024_v13, %v5853_v53 }
 0x7f9   : > { %6639 = vst.msk [vmem:[#allocation2 + $0xc1] sm:$0xff] %vm2672_vm7, %v6607_v62 }
 0x7fa   : > { %v6451_v0 = vpop.f32.mrf.mxu1 }
 0x7fb   : > { %v6509_v21 = vadd.f32 %v6451_v0, %v6289_v26  ;;  %v5854_v26 = vadd.f32 %v5805_v49, %v9995_v60  ;;  %v6294_v0 = vadd.f32 %v6244_v18, %v6074_v32 }
 0x7fd   : > { %v6544_v23 = vadd.f32 %v10064_v24, %v6509_v21  ;;  %v5810_v62 = vpop.f32.mrf.mxu2  ;;  %v6075_v3 = vadd.f32 %v6026_v35, %v5854_v26  ;;  %v6586_v26 = vld [vmem:[#allocation2 + $0x141] sm:$0xff] }
 0x7ff   : > { %v6608_v19 = vadd.f32 %v6576_v28, %v6544_v23  ;;  %v6249_v55 = vpop.f32.mrf.mxu0  ;;  %v6031_v30 = vpop.f32.mrf.mxu3  ;;  %v6581_v28 = vld [vmem:[#allocation2 + $0x109] sm:$0xff] }
 0x801   : > { %6640 = vst.msk [vmem:[#allocation2 + $0xc9] sm:$0xff] %vm2672_vm7, %v6608_v19 }
 0x802   : > { %v6454_v42 = vpop.f32.mrf.mxu1 }
 0x803   : > { %v6510_v4 = vadd.f32 %v6454_v42, %v6290_v9  ;;  %v6295_v9 = vadd.f32 %v6246_v5, %v6075_v3  ;;  %v6584_v5 = vld [vmem:[#allocation2 + $0x129] sm:$0xff] }
 0x805   : > { %v6545_v46 = vadd.f32 %v10064_v24, %v6510_v4  ;;  %v5813_v45 = vpop.f32.mrf.mxu2  ;;  %v6582_v4 = vld [vmem:[#allocation2 + $0x111] sm:$0xff] }
 0x807   : > { %v6609_v51 = vadd.f32 %v6577_v43, %v6545_v46  ;;  %v6251_v50 = vpop.f32.mrf.mxu0  ;;  %v6076_v43 = vadd.f32 %v6029_v16, %v5855_v61  ;;  %v6034_v46 = vpop.f32.mrf.mxu3 }
 0x809   : > { %6641 = vst.msk [vmem:[#allocation2 + $0xd9] sm:$0xff] %vm2672_vm7, %v6609_v51  ;;  %v5856_v51 = vadd.f32 %v5810_v62, %v10012_v56  ;;  %v6296_v18 = vadd.f32 %v6249_v55, %v6076_v43 }
 0x80a   : > { %v6456_v17 = vpop.f32.mrf.mxu1 }
 0x80b   : > { %v6511_v14 = vadd.f32 %v6456_v17, %v6291_v40  ;;  %v6583_v17 = vld [vmem:[#allocation2 + $0x121] sm:$0xff] }
 0x80d   : > { %v6546_v27 = vadd.f32 %v10064_v24, %v6511_v14  ;;  %v5815_v40 = vpop.f32.mrf.mxu2  ;;  %v6077_v14 = vadd.f32 %v6031_v30, %v5856_v51 }
 0x80e   : > { %v5858_v48 = vadd.f32 %v5815_v40, %v10024_v33 }
 0x80f   : > { %v6610_v52 = vadd.f32 %v6578_v36, %v6546_v27  ;;  %v6254_v58 = vpop.f32.mrf.mxu0  ;;  %v6036_v27 = vpop.f32.mrf.mxu3  ;;  %v6297_v35 = vadd.f32 %v6251_v50, %v6077_v14 }
 0x810   : > { %v6079_v16 = vadd.f32 %v6036_v27, %v5858_v48 }
 0x811   : > { %6642 = vst.msk [vmem:[#allocation2 + $0xe1] sm:$0xff] %vm2672_vm7, %v6610_v52  ;;  %v5857_v52 = vadd.f32 %v5813_v45, %v10015_v8 }
 0x812   : > { %v6459_v41 = vpop.f32.mrf.mxu1 }
 0x813   : > { %v6512_v31 = vadd.f32 %v6459_v41, %v6292_v20 }
 0x815   : > { %v6547_v29 = vadd.f32 %v10064_v24, %v6512_v31  ;;  %v5818_v41 = vpop.f32.mrf.mxu2  ;;  %v6078_v31 = vadd.f32 %v6034_v46, %v5857_v52 }
 0x816   : > { %v5859_v55 = vadd.f32 %v5818_v41, %v10027_v57 }
 0x817   : > { %v6611_v38 = vadd.f32 %v6579_v47, %v6547_v29  ;;  %v6256_v56 = vpop.f32.mrf.mxu0  ;;  %v6298_v29 = vadd.f32 %v6254_v58, %v6078_v31  ;;  %v6590_v31 = vld [vmem:[#allocation2 + $0x171] sm:$0xff] }
 0x819   : > { %6643 = vst.msk [vmem:[#allocation2 + $0xf1] sm:$0xff] %vm2672_vm7, %v6611_v38  ;;  %v6039_v38 = vpop.f32.mrf.mxu3 }
 0x81a   : > { %v6461_v34 = vpop.f32.mrf.mxu1 }
 0x81b   : > { %v6513_v1 = vadd.f32 %v6461_v34, %v6293_v59  ;;  %v6585_v59 = vld [vmem:[#allocation2 + $0x139] sm:$0xff] }
 0x81d   : > { %v6548_v54 = vadd.f32 %v10064_v24, %v6513_v1 }
 0x81f   : > { %v6612_v37 = vadd.f32 %v6580_v44, %v6548_v54  ;;  %v6259_v34 = vpop.f32.mrf.mxu0  ;;  %v5820_v44 = vpop.f32.mrf.mxu2  ;;  %v6299_v54 = vadd.f32 %v6256_v56, %v6079_v16  ;;  %v6591_v16 = vld [vmem:[#allocation2 + $0x181] sm:$0xff] }
 0x820   : > { %v5860_v3 = vadd.f32 %v5820_v44, %v10037_v63 }
 0x821   : > { %6644 = vst.msk [vmem:[#allocation2 + $0xf9] sm:$0xff] %vm2672_vm7, %v6612_v37  ;;  %v6041_v37 = vpop.f32.mrf.mxu3 }
 0x822   : > { %v6464_v21 = vpop.f32.mrf.mxu1  ;;  %v6081_v45 = vadd.f32 %v6041_v37, %v5860_v3 }
 0x823   : > { %v6514_v2 = vadd.f32 %v6464_v21, %v6294_v0  ;;  %v6080_v0 = vadd.f32 %v6039_v38, %v5859_v55 }
 0x825   : > { %v6549_v23 = vadd.f32 %v10064_v24, %v6514_v2 }
 0x827   : > { %v6613_v19 = vadd.f32 %v6581_v28, %v6549_v23  ;;  %v6261_v2 = vpop.f32.mrf.mxu0  ;;  %v5823_v28 = vpop.f32.mrf.mxu2  ;;  %v6300_v23 = vadd.f32 %v6259_v34, %v6080_v0 }
 0x828   : > { %v6301_v43 = vadd.f32 %v6261_v2, %v6081_v45 }
 0x829   : > { %6645 = vst.msk [vmem:[#allocation2 + $0x109] sm:$0xff] %vm2672_vm7, %v6613_v19  ;;  %v6587_v19 = vld [vmem:[#allocation2 + $0x151] sm:$0xff] }
 0x82a   : > { %v6466_v42 = vpop.f32.mrf.mxu1 }
 0x82b   : > { %v6515_v60 = vadd.f32 %v6466_v42, %v6295_v9  ;;  %v6044_v9 = vpop.f32.mrf.mxu3 }
 0x82d   : > { %v6550_v11 = vadd.f32 %v10064_v24, %v6515_v60 }
 0x82f   : > { %v6614_v13 = vadd.f32 %v6582_v4, %v6550_v11  ;;  %v6264_v60 = vpop.f32.mrf.mxu0  ;;  %v5861_v4 = vadd.f32 %v5823_v28, %v10042_v25  ;;  %v5825_v11 = vpop.f32.mrf.mxu2 }
 0x831   : > { %6646 = vst.msk [vmem:[#allocation2 + $0x111] sm:$0xff] %vm2672_vm7, %v6614_v13  ;;  %v6588_v13 = vld [vmem:[#allocation2 + $0x159] sm:$0xff]  ;;  %v6082_v51 = vadd.f32 %v6044_v9, %v5861_v4 }
 0x832   : > { %v6469_v49 = vpop.f32.mrf.mxu1 }
 0x833   : > { %v6516_v12 = vadd.f32 %v6469_v49, %v6296_v18  ;;  %v6046_v40 = vpop.f32.mrf.mxu3  ;;  %v5862_v49 = vadd.f32 %v5825_v11, %v10050_v39 }
 0x835   : > { %v6551_v36 = vadd.f32 %v10064_v24, %v6516_v12  ;;  %v6302_v12 = vadd.f32 %v6264_v60, %v6082_v51  ;;  %v6083_v27 = vadd.f32 %v6046_v40, %v5862_v49 }
 0x837   : > { %v6615_v7 = vadd.f32 %v6583_v17, %v6551_v36  ;;  %v6266_v25 = vpop.f32.mrf.mxu0  ;;  %v5828_v36 = vpop.f32.mrf.mxu2 }
 0x838   : > { %v5863_v56 = vadd.f32 %v5828_v36, %v10053_v6 }
 0x839   : > { %6647 = vst.msk [vmem:[#allocation2 + $0x121] sm:$0xff] %vm2672_vm7, %v6615_v7  ;;  %v6589_v7 = vld [vmem:[#allocation2 + $0x169] sm:$0xff] }
 0x83a   : > { %v6471_v15 = vpop.f32.mrf.mxu1 }
 0x83b   : > { %v6517_v20 = vadd.f32 %v6471_v15, %v6297_v35  ;;  %v6049_v15 = vpop.f32.mrf.mxu3 }
 0x83d   : > { %v6552_v22 = vadd.f32 %v10064_v24, %v6517_v20  ;;  %v6303_v20 = vadd.f32 %v6266_v25, %v6083_v27 }
 0x83f   : > { %v6616_v47 = vadd.f32 %v6584_v5, %v6552_v22  ;;  %v6269_v5 = vpop.f32.mrf.mxu0  ;;  %v6084_v22 = vadd.f32 %v6049_v15, %v5863_v56  ;;  %v5830_v48 = vpop.f32.mrf.mxu2 }
 0x841   : > { %6648 = vst.msk [vmem:[#allocation2 + $0x129] sm:$0xff] %vm2672_vm7, %v6616_v47  ;;  %v6304_v38 = vadd.f32 %v6269_v5, %v6084_v22 }
 0x842   : > { %v6474_v53 = vpop.f32.mrf.mxu1 }
 0x843   : > { %v6518_v8 = vadd.f32 %v6474_v53, %v6298_v29  ;;  %v5864_v53 = vadd.f32 %v5830_v48, %v10057_v10 }
 0x845   : > { %v6553_v1 = vadd.f32 %v10064_v24, %v6518_v8  ;;  %v6051_v8 = vpop.f32.mrf.mxu3 }
 0x846   : > { %v6085_v34 = vadd.f32 %v6051_v8, %v5864_v53 }
 0x847   : > { %v6617_v32 = vadd.f32 %v6585_v59, %v6553_v1  ;;  %v6271_v44 = vpop.f32.mrf.mxu0 }
 0x848   : > { %v6305_v55 = vadd.f32 %v6271_v44, %v6085_v34 }
 0x849   : > { %6649 = vst.msk [vmem:[#allocation2 + $0x139] sm:$0xff] %vm2672_vm7, %v6617_v32 }
 0x84a   : > { %v6476_v62 = vpop.f32.mrf.mxu1 }
 0x84b   : > { %v6519_v33 = vadd.f32 %v6476_v62, %v6299_v54 }
 0x84d   : > { %v6554_v21 = vadd.f32 %v10064_v24, %v6519_v33  ;;  %v6592_v33 = vld [vmem:[#allocation2 + $0x189] sm:$0xff] }
 0x84f   : > { %v6618_v30 = vadd.f32 %v6586_v26, %v6554_v21 }
 0x851   : > { %6650 = vst.msk [vmem:[#allocation2 + $0x141] sm:$0xff] %vm2672_vm7, %v6618_v30 }
 0x852   : > { %v6479_v50 = vpop.f32.mrf.mxu1 }
 0x853   : > { %v6520_v57 = vadd.f32 %v6479_v50, %v6300_v23 }
 0x855   : > { %v6555_v61 = vadd.f32 %v10064_v24, %v6520_v57 }
 0x857   : > { %v6619_v42 = vadd.f32 %v6587_v19, %v6555_v61 }
 0x859   : > { %6651 = vst.msk [vmem:[#allocation2 + $0x151] sm:$0xff] %vm2672_vm7, %v6619_v42 }
 0x85a   : > { %v6481_v46 = vpop.f32.mrf.mxu1 }
 0x85b   : > { %v6521_v63 = vadd.f32 %v6481_v46, %v6301_v43 }
 0x85d   : > { %v6556_v58 = vadd.f32 %v10064_v24, %v6521_v63 }
 0x85f   : > { %v6620_v18 = vadd.f32 %v6588_v13, %v6556_v58 }
 0x861   : > { %6652 = vst.msk [vmem:[#allocation2 + $0x159] sm:$0xff] %vm2672_vm7, %v6620_v18 }
 0x862   : > { %v6484_v17 = vpop.f32.mrf.mxu1 }
 0x863   : > { %v6522_v14 = vadd.f32 %v6484_v17, %v6302_v12 }
 0x865   : > { %v6557_v52 = vadd.f32 %v10064_v24, %v6522_v14 }
 0x867   : > { %v6621_v35 = vadd.f32 %v6589_v7, %v6557_v52 }
 0x869   : > { %6653 = vst.msk [vmem:[#allocation2 + $0x169] sm:$0xff] %vm2672_vm7, %v6621_v35 }
 0x86a   : > { %v6486_v41 = vpop.f32.mrf.mxu1 }
 0x86b   : > { %v6523_v39 = vadd.f32 %v6486_v41, %v6303_v20 }
 0x86d   : > { %v6558_v47 = vadd.f32 %v10064_v24, %v6523_v39 }
 0x86f   : > { %v6622_v29 = vadd.f32 %v6590_v31, %v6558_v47 }
 0x871   : > { %6654 = vst.msk [vmem:[#allocation2 + $0x171] sm:$0xff] %vm2672_vm7, %v6622_v29 }
 0x872   : > { %v6489_v59 = vpop.f32.mrf.mxu1 }
 0x873   : > { %v6524_v6 = vadd.f32 %v6489_v59, %v6304_v38 }
 0x875   : > { %v6559_v1 = vadd.f32 %v10064_v24, %v6524_v6 }
 0x877   : > { %v6623_v32 = vadd.f32 %v6591_v16, %v6559_v1 }
 0x879   : > { %6655 = vst.msk [vmem:[#allocation2 + $0x181] sm:$0xff] %vm2672_vm7, %v6623_v32 }
 0x87a   : > { %v6491_v54 = vpop.f32.mrf.mxu1 }
 0x87b   : > { %v6525_v62 = vadd.f32 %v6491_v54, %v6305_v55 }
 0x87d   : > { %v6560_v37 = vadd.f32 %v10064_v24, %v6525_v62 }
 0x87f   : > { %v6624_v10 = vadd.f32 %v6592_v33, %v6560_v37 }
 0x881   : > { %6656 = vst.msk [vmem:[#allocation2 + $0x189] sm:$0xff] %vm2672_vm7, %v6624_v10 }
 0x882 PF: > { %p7504_p8 = scmp.ne.s32.totalorder %s7594_s24, 30 }
 0x884   : > { %6660 = sbr.rel (%p7504_p8) target bundleno = 2220 (0x8ac), region = 60 }
 0x889   : > { %v6662_v26 = vld [vmem:[#allocation2 + $0x19] sm:$0xff]  ;;  %vm6726_vm8 = vcmask 60416   ;;  %v6663_v0 = vld [vmem:[#allocation2 + $0x21] sm:$0xff]  ;;  %v6664_v21 = vld [vmem:[#allocation2 + $0x31] sm:$0xff] }
 0x88a   : > { %v6694_v2 = vpack.c.bf16 %v6662_v26, %v6662_v26  ;;  %v6695_v30 = vpack.c.bf16 %v6663_v0, %v6663_v0  ;;  %v6696_v28 = vpack.c.bf16 %v6664_v21, %v6664_v21  ;;  %v6665_v3 = vld [vmem:[#allocation2 + $0x39] sm:$0xff]  ;;  %v6666_v24 = vld [vmem:[#allocation2 + $0x49] sm:$0xff]  ;;  %v6667_v23 = vld [vmem:[#allocation2 + $0x51] sm:$0xff] }
 0x88b   : > { %v6697_v50 = vpack.c.bf16 %v6665_v3, %v6665_v3  ;;  %v6668_v57 = vld [vmem:[#allocation2 + $0x61] sm:$0xff]  ;;  %v6698_v19 = vpack.c.bf16 %v6666_v24, %v6666_v24  ;;  %v6669_v45 = vld [vmem:[#allocation2 + $0x69] sm:$0xff]  ;;  %v6699_v61 = vpack.c.bf16 %v6667_v23, %v6667_v23  ;;  %v6670_v9 = vld [vmem:[#allocation2 + $0x79] sm:$0xff] }
 0x88c   : > { %6727 = vst.msk [vmem:[%s7689_s12] sm:$0xf] %vm6726_vm8, %v6694_v2  ;;  %v6700_v42 = vpack.c.bf16 %v6668_v57, %v6668_v57  ;;  %v6671_v60 = vld [vmem:[#allocation2 + $0x81] sm:$0xff]  ;;  %v6701_v4 = vpack.c.bf16 %v6669_v45, %v6669_v45  ;;  %v6672_v43 = vld [vmem:[#allocation2 + $0x91] sm:$0xff]  ;;  %v6702_v11 = vpack.c.bf16 %v6670_v9, %v6670_v9  ;;  %v6673_v46 = vld [vmem:[#allocation2 + $0x99] sm:$0xff] }
 0x88d   : > { %6728 = vst.msk [vmem:[%s7689_s12 + $0x4] sm:$0xf] %vm6726_vm8, %v6695_v30  ;;  %v6703_v63 = vpack.c.bf16 %v6671_v60, %v6671_v60  ;;  %v6674_v13 = vld [vmem:[#allocation2 + $0xa9] sm:$0xff]  ;;  %v6704_v51 = vpack.c.bf16 %v6672_v43, %v6672_v43  ;;  %v6675_v58 = vld [vmem:[#allocation2 + $0xb1] sm:$0xff]  ;;  %v6705_v18 = vpack.c.bf16 %v6673_v46, %v6673_v46  ;;  %v6676_v40 = vld [vmem:[#allocation2 + $0xc1] sm:$0xff] }
 0x88e   : > { %6729 = vst.msk [vmem:[%s7689_s12 + $0x8] sm:$0xf] %vm6726_vm8, %v6696_v28  ;;  %v6706_v49 = vpack.c.bf16 %v6674_v13, %v6674_v13  ;;  %v6677_v12 = vld [vmem:[#allocation2 + $0xc9] sm:$0xff]  ;;  %v6707_v17 = vpack.c.bf16 %v6675_v58, %v6675_v58  ;;  %v6678_v14 = vld [vmem:[#allocation2 + $0xd9] sm:$0xff]  ;;  %v6708_v25 = vpack.c.bf16 %v6676_v40, %v6676_v40  ;;  %v6679_v36 = vld [vmem:[#allocation2 + $0xe1] sm:$0xff] }
 0x88f   : > { %6730 = vst.msk [vmem:[%s7689_s12 + $0xc] sm:$0xf] %vm6726_vm8, %v6697_v50  ;;  %v6709_v7 = vpack.c.bf16 %v6677_v12, %v6677_v12  ;;  %v6680_v27 = vld [vmem:[#allocation2 + $0xf1] sm:$0xff]  ;;  %v6710_v52 = vpack.c.bf16 %v6678_v14, %v6678_v14  ;;  %v6681_v35 = vld [vmem:[#allocation2 + $0xf9] sm:$0xff]  ;;  %v6711_v15 = vpack.c.bf16 %v6679_v36, %v6679_v36  ;;  %v6682_v56 = vld [vmem:[#allocation2 + $0x109] sm:$0xff] }
 0x890   : > { %6731 = vst.msk [vmem:[%s7689_s12 + $0x10] sm:$0xf] %vm6726_vm8, %v6698_v19  ;;  %v6712_v20 = vpack.c.bf16 %v6680_v27, %v6680_v27  ;;  %v6683_v41 = vld [vmem:[#allocation2 + $0x111] sm:$0xff]  ;;  %v6713_v39 = vpack.c.bf16 %v6681_v35, %v6681_v35  ;;  %v6684_v5 = vld [vmem:[#allocation2 + $0x121] sm:$0xff]  ;;  %v6714_v31 = vpack.c.bf16 %v6682_v56, %v6682_v56  ;;  %v6685_v22 = vld [vmem:[#allocation2 + $0x129] sm:$0xff] }
 0x891   : > { %6732 = vst.msk [vmem:[%s7689_s12 + $0x14] sm:$0xf] %vm6726_vm8, %v6699_v61  ;;  %v6715_v47 = vpack.c.bf16 %v6683_v41, %v6683_v41  ;;  %v6686_v48 = vld [vmem:[#allocation2 + $0x139] sm:$0xff]  ;;  %v6716_v29 = vpack.c.bf16 %v6684_v5, %v6684_v5  ;;  %v6687_v38 = vld [vmem:[#allocation2 + $0x141] sm:$0xff]  ;;  %v6717_v53 = vpack.c.bf16 %v6685_v22, %v6685_v22  ;;  %v6688_v8 = vld [vmem:[#allocation2 + $0x151] sm:$0xff] }
 0x892   : > { %6733 = vst.msk [vmem:[%s7689_s12 + $0x18] sm:$0xf] %vm6726_vm8, %v6700_v42  ;;  %v6718_v59 = vpack.c.bf16 %v6686_v48, %v6686_v48  ;;  %v6689_v6 = vld [vmem:[#allocation2 + $0x159] sm:$0xff]  ;;  %v6719_v16 = vpack.c.bf16 %v6687_v38, %v6687_v38  ;;  %v6690_v34 = vld [vmem:[#allocation2 + $0x169] sm:$0xff]  ;;  %v6720_v1 = vpack.c.bf16 %v6688_v8, %v6688_v8  ;;  %v6691_v44 = vld [vmem:[#allocation2 + $0x171] sm:$0xff] }
 0x893   : > { %6734 = vst.msk [vmem:[%s7689_s12 + $0x1c] sm:$0xf] %vm6726_vm8, %v6701_v4  ;;  %v6721_v32 = vpack.c.bf16 %v6689_v6, %v6689_v6  ;;  %v6692_v55 = vld [vmem:[#allocation2 + $0x181] sm:$0xff]  ;;  %v6722_v54 = vpack.c.bf16 %v6690_v34, %v6690_v34  ;;  %v6693_v62 = vld [vmem:[#allocation2 + $0x189] sm:$0xff]  ;;  %v6723_v33 = vpack.c.bf16 %v6691_v44, %v6691_v44 }
 0x894   : > { %6735 = vst.msk [vmem:[%s7689_s12 + $0x20] sm:$0xf] %vm6726_vm8, %v6702_v11  ;;  %v6724_v37 = vpack.c.bf16 %v6692_v55, %v6692_v55  ;;  %v6725_v10 = vpack.c.bf16 %v6693_v62, %v6693_v62 }
 0x895   : > { %6736 = vst.msk [vmem:[%s7689_s12 + $0x24] sm:$0xf] %vm6726_vm8, %v6703_v63 }
 0x896   : > { %6737 = vst.msk [vmem:[%s7689_s12 + $0x28] sm:$0xf] %vm6726_vm8, %v6704_v51 }
 0x897   : > { %6738 = vst.msk [vmem:[%s7689_s12 + $0x2c] sm:$0xf] %vm6726_vm8, %v6705_v18 }
 0x898   : > { %6739 = vst.msk [vmem:[%s7689_s12 + $0x30] sm:$0xf] %vm6726_vm8, %v6706_v49 }
 0x899   : > { %6740 = vst.msk [vmem:[%s7689_s12 + $0x34] sm:$0xf] %vm6726_vm8, %v6707_v17 }
 0x89a   : > { %6741 = vst.msk [vmem:[%s7689_s12 + $0x38] sm:$0xf] %vm6726_vm8, %v6708_v25 }
 0x89b   : > { %6742 = vst.msk [vmem:[%s7689_s12 + $0x3c] sm:$0xf] %vm6726_vm8, %v6709_v7 }
 0x89c   : > { %6743 = vst.msk [vmem:[%s7689_s12 + $0x40] sm:$0xf] %vm6726_vm8, %v6710_v52 }
 0x89d   : > { %6744 = vst.msk [vmem:[%s7689_s12 + $0x44] sm:$0xf] %vm6726_vm8, %v6711_v15 }
 0x89e   : > { %6745 = vst.msk [vmem:[%s7689_s12 + $0x48] sm:$0xf] %vm6726_vm8, %v6712_v20 }
 0x89f   : > { %6746 = vst.msk [vmem:[%s7689_s12 + $0x4c] sm:$0xf] %vm6726_vm8, %v6713_v39 }
 0x8a0   : > { %6747 = vst.msk [vmem:[%s7689_s12 + $0x50] sm:$0xf] %vm6726_vm8, %v6714_v31 }
 0x8a1   : > { %6748 = vst.msk [vmem:[%s7689_s12 + $0x54] sm:$0xf] %vm6726_vm8, %v6715_v47 }
 0x8a2   : > { %6749 = vst.msk [vmem:[%s7689_s12 + $0x58] sm:$0xf] %vm6726_vm8, %v6716_v29 }
 0x8a3   : > { %6750 = vst.msk [vmem:[%s7689_s12 + $0x5c] sm:$0xf] %vm6726_vm8, %v6717_v53 }
 0x8a4   : > { %6751 = vst.msk [vmem:[%s7689_s12 + $0x60] sm:$0xf] %vm6726_vm8, %v6718_v59 }
 0x8a5   : > { %6752 = vst.msk [vmem:[%s7689_s12 + $0x64] sm:$0xf] %vm6726_vm8, %v6719_v16 }
 0x8a6   : > { %6753 = vst.msk [vmem:[%s7689_s12 + $0x68] sm:$0xf] %vm6726_vm8, %v6720_v1 }
 0x8a7   : > { %6754 = vst.msk [vmem:[%s7689_s12 + $0x6c] sm:$0xf] %vm6726_vm8, %v6721_v32 }
 0x8a8   : > { %6755 = vst.msk [vmem:[%s7689_s12 + $0x70] sm:$0xf] %vm6726_vm8, %v6722_v54 }
 0x8a9   : > { %6756 = vst.msk [vmem:[%s7689_s12 + $0x74] sm:$0xf] %vm6726_vm8, %v6723_v33 }
 0x8aa   : > { %6757 = vst.msk [vmem:[%s7689_s12 + $0x78] sm:$0xf] %vm6726_vm8, %v6724_v37 }
 0x8ab   : > { %6758 = vst.msk [vmem:[%s7689_s12 + $0x7c] sm:$0xf] %vm6726_vm8, %v6725_v10 }
 0x8ac PF: > { %s17_s28 = sadd.s32 1, %s7610_s28   ;;  %s10425_s24 = smov %s7602_s26 }
 0x8ad   : > { %p14_p9 = scmp.ge.s32.totalorder %s17_s28, 188   ;;  %s10426_s25 = smov %s7606_s27 }
 0x8ae   : > { %s10427_s26 = smov %s10430_s29  ;;  %s10428_s27 = smov %s10434_s30 }
 0x8af   :  { %16 = sbr.rel (!%p14_p9) target bundleno = 3 (0x3), region = 102 }

</bundles_post_ra>
